<compile_context>
chip_gen: v5e
topology: v5e:2x2
jax: 0.10.0
libtpu: 0.0.40
codegen_flags: <defaults>
</compile_context>

<pallas_src>
import functools

import jax
import jax.numpy as jnp
from jax import lax
from jax.experimental import pallas as pl
from jax.experimental.pallas import tpu as pltpu

GP = 128  # lane pitch for gate-aligned GRU weight blocks


# --------------------------------------------------------------------------- #
# Kernel
# --------------------------------------------------------------------------- #
def omni_anomaly_kernel(
    # inputs
    x_ref, h0_ref, eps_ref,
    wih0_ref, bih0_ref,                          # layer-0 input projection (gate-padded, biases folded)
    wrec_ref, brec_ref,                          # fused recurrent weight (bf16) + small per-gate biases
    we1_ref, be1_ref, ae1_ref,
    we2_ref, be2_ref, ae2_ref,
    we3_ref, be3_ref,
    wd1_ref, bd1_ref, ad1_ref,
    wd2_ref, bd2_ref, ad2_ref,
    wd3_ref, bd3_ref,
    # outputs
    recon_ref, mulogvar_ref,
    # scratch
    gi0_ref, h2seq_ref, h12_ref,
):
    bb = h0_ref.shape[1]
    H = h0_ref.shape[2]
    L = eps_ref.shape[1]
    TB = x_ref.shape[0]
    T = TB // bb
    f32 = jnp.float32
    bf16 = jnp.bfloat16

    # ---- phase 0: hoisted layer-0 input projection for all timesteps -------
    # (layer-0 r/z hidden biases are pre-folded into bih0)
    gi0_ref[...] = (
        jnp.dot(x_ref[...], wih0_ref[...], preferred_element_type=f32)
        + bih0_ref[...]
    )

    # ---- phase 1: recurrent 2-layer GRU, one fused MXU dot per step --------
    wrec = wrec_ref[...]                                   # (2H, 7*GP) bf16
    brec = brec_ref[...]                                   # (8, H) f32
    bhh0n = jnp.broadcast_to(brec[0:1, :], (bb, H))        # hoisted broadcasts
    b1r = jnp.broadcast_to(brec[1:2, :], (bb, H))
    b1z = jnp.broadcast_to(brec[2:3, :], (bb, H))
    b1gin = jnp.broadcast_to(brec[3:4, :], (bb, H))
    b1ghn = jnp.broadcast_to(brec[4:5, :], (bb, H))

    h1 = h0_ref[0]                                         # (bb, H) f32
    h2 = h0_ref[1]                                         # (bb, H) f32

    # persistent fused-dot LHS: lanes [0:H]=h1, [H:2H]=h2 (no per-step concat)
    h12_ref[:, 0:H] = h1
    h12_ref[:, H:2 * H] = h2

    # prologue: gh0 for t=0 (only the first 3*GP fused columns are meaningful)
    gh0 = jnp.dot(h12_ref[...].astype(bf16), wrec,
                  preferred_element_type=f32)[:, 0:3 * GP]

    for t in range(T):  # T is compile-time static -> fully unrolled
        gi0 = gi0_ref[t * bb:(t + 1) * bb, :]              # (bb, 3*GP)

        # GRU layer 0 (r/z hidden biases already folded into gi0)
        r0 = jax.nn.sigmoid(gi0[:, 0:H] + gh0[:, 0:H])
        z0 = jax.nn.sigmoid(gi0[:, GP:GP + H] + gh0[:, GP:GP + H])
        n0 = jnp.tanh(gi0[:, 2 * GP:2 * GP + H]
                      + r0 * (gh0[:, 2 * GP:2 * GP + H] + bhh0n))
        h1 = (1.0 - z0) * n0 + z0 * h1

        # single skewed dot: [gh0(t+1) | g1(t)] from [h1_t ; h2_{t-1}]
        h12_ref[:, 0:H] = h1
        d = jnp.dot(h12_ref[...].astype(bf16), wrec,
                    preferred_element_type=f32)            # (bb, 7*GP)
        gh0 = d[:, 0:3 * GP]

        # GRU layer 1
        r1 = jax.nn.sigmoid(d[:, 3 * GP:3 * GP + H] + b1r)
        z1 = jax.nn.sigmoid(d[:, 4 * GP:4 * GP + H] + b1z)
        n1 = jnp.tanh(d[:, 5 * GP:5 * GP + H] + b1gin
                      + r1 * (d[:, 6 * GP:6 * GP + H] + b1ghn))
        h2 = (1.0 - z1) * n1 + z1 * h2

        h2seq_ref[t * bb:(t + 1) * bb, :] = h2
        if t + 1 < T:
            h12_ref[:, H:2 * H] = h2

    # ---- phase 2: batched encoder / reparam / decoder over all T*bb rows ---
    def prelu(v, a_ref):
        a = a_ref[...]
        return jnp.where(v > 0, v, a * v)

    h = h2seq_ref[...]                                     # (T*bb, H)
    e = prelu(jnp.dot(h, we1_ref[...], preferred_element_type=f32)
              + be1_ref[...], ae1_ref)
    e = prelu(jnp.dot(e, we2_ref[...], preferred_element_type=f32)
              + be2_ref[...], ae2_ref)
    ml = jnp.dot(e, we3_ref[...], preferred_element_type=f32) + be3_ref[...]

    mu = ml[:, 0:L]
    logvar = ml[:, L:2 * L]
    zlat = mu + eps_ref[...] * jnp.exp(0.5 * logvar)

    dd = prelu(jnp.dot(zlat, wd1_ref[...], preferred_element_type=f32)
               + bd1_ref[...], ad1_ref)
    dd = prelu(jnp.dot(dd, wd2_ref[...], preferred_element_type=f32)
               + bd2_ref[...], ad2_ref)
    recon = jax.nn.sigmoid(jnp.dot(dd, wd3_ref[...], preferred_element_type=f32)
                           + bd3_ref[...])

    # single-shot, whole-block output stores (compute layout, no relayout)
    recon_ref[...] = recon
    mulogvar_ref[...] = ml


# --------------------------------------------------------------------------- #
# Parameter construction / packing
# --------------------------------------------------------------------------- #
def init_params(key, feats, hidden=64, latent=16):
    """Deterministic synthetic parameters, PyTorch layouts pre-transposed to
    (in, out) so the kernel computes x @ W.  GRU gate order is r|z|n."""
    ks = jax.random.split(key, 16)
    scale = 0.1

    def w(k, shape):
        return (scale * jax.random.normal(k, shape)).astype(jnp.float32)

    H, L, F = hidden, latent, feats
    return dict(
        wih0=w(ks[0], (F, 3 * H)), whh0=w(ks[1], (H, 3 * H)),
        bih0=w(ks[2], (1, 3 * H)), bhh0=w(ks[3], (1, 3 * H)),
        wih1=w(ks[4], (H, 3 * H)), whh1=w(ks[5], (H, 3 * H)),
        bih1=w(ks[6], (1, 3 * H)), bhh1=w(ks[7], (1, 3 * H)),
        we1=w(ks[8], (H, H)), be1=w(ks[9], (1, H)),
        ae1=jnp.full((1, 1), 0.25, jnp.float32),
        we2=w(ks[10], (H, H)), be2=w(ks[11], (1, H)),
        ae2=jnp.full((1, 1), 0.25, jnp.float32),
        we3=w(ks[12], (H, 2 * L)), be3=w(ks[13], (1, 2 * L)),
        wd1=w(ks[14], (L, H)), bd1=w(ks[15], (1, H)),
        ad1=jnp.full((1, 1), 0.25, jnp.float32),
        wd2=w(jax.random.fold_in(key, 100), (H, H)),
        bd2=w(jax.random.fold_in(key, 101), (1, H)),
        ad2=jnp.full((1, 1), 0.25, jnp.float32),
        wd3=w(jax.random.fold_in(key, 102), (H, F)),
        bd3=w(jax.random.fold_in(key, 103), (1, F)),
    )


def pack_params(p, *, hidden=64):
    """Pad GRU gates to 128-lane blocks, fold layer-0 r/z hidden biases into
    the input bias, and build the skew-fused recurrent RHS:
        wrec = [[whh0_r|whh0_z|whh0_n | wih1_r|wih1_z|wih1_n|   0   ],
                [   0  |   0  |   0   | whh1_r|whh1_z|   0  | whh1_n]]  (bf16)
    """
    H = hidden
    assert H <= GP

    def gate(w, g):                 # (in, 3H) -> (in, H) gate block g (r|z|n)
        return w[:, g * H:(g + 1) * H]

    def pad_lanes(w):               # (in, H) -> (in, GP)
        return jnp.pad(w, ((0, 0), (0, GP - H)))

    wih0_p = jnp.concatenate([pad_lanes(gate(p["wih0"], g)) for g in range(3)],
                             axis=1)

    bih0_f = jnp.concatenate([
        pad_lanes(gate(p["bih0"], 0) + gate(p["bhh0"], 0)),   # r: fold bhh
        pad_lanes(gate(p["bih0"], 1) + gate(p["bhh0"], 1)),   # z: fold bhh
        pad_lanes(gate(p["bih0"], 2)),                        # n: bih only
    ], axis=1)

    zH = jnp.zeros((H, H), jnp.float32)

    def col_block(top, bot):        # (H,H),(H,H) -> (2H, GP)
        return pad_lanes(jnp.concatenate([top, bot], axis=0))

    wrec = jnp.concatenate([
        col_block(gate(p["whh0"], 0), zH),                    # gh0 r  (t+1)
        col_block(gate(p["whh0"], 1), zH),                    # gh0 z
        col_block(gate(p["whh0"], 2), zH),                    # gh0 n
        col_block(gate(p["wih1"], 0), gate(p["whh1"], 0)),    # g1 r
        col_block(gate(p["wih1"], 1), gate(p["whh1"], 1)),    # g1 z
        col_block(gate(p["wih1"], 2), zH),                    # g1 gi_n
        col_block(zH, gate(p["whh1"], 2)),                    # g1 gh_n
    ], axis=1).astype(jnp.bfloat16)                           # (2H, 7*GP)

    brec = jnp.zeros((8, H), jnp.float32)
    brec = brec.at[0].set(gate(p["bhh0"], 2)[0])                          # bhh0_n
    brec = brec.at[1].set((gate(p["bih1"], 0) + gate(p["bhh1"], 0))[0])   # b1 r
    brec = brec.at[2].set((gate(p["bih1"], 1) + gate(p["bhh1"], 1))[0])   # b1 z
    brec = brec.at[3].set(gate(p["bih1"], 2)[0])                          # b1 gi_n
    brec = brec.at[4].set(gate(p["bhh1"], 2)[0])                          # b1 gh_n

    out = dict(p)
    out.update(wih0_p=wih0_p, bih0_f=bih0_f, wrec=wrec, brec=brec)
    return out


def _pick_num_blocks(B):
    """Split the batch into 2 'parallel' grid blocks only on multi-TensorCore
    (v7x-class) chips; on single-TC v5e/v6e a split is pure serialization."""
    try:
        kind = jax.devices()[0].device_kind.lower()
    except Exception:
        return 1
    if "v7" in kind and B % 2 == 0 and (B // 2) % 8 == 0:
        return 2
    return 1


# --------------------------------------------------------------------------- #
# Wrapper
# --------------------------------------------------------------------------- #
@functools.partial(jax.jit, static_argnames=("hidden", "latent"))
def omni_anomaly_forward(x, h0, eps, params, *, hidden=64, latent=16):
    """x: (B, T, F) batch-first.  Returns (recon, mu, logvar), batch-first."""
    B, T, F = x.shape
    H, L = hidden, latent
    p = pack_params(params, hidden=H)

    nb = _pick_num_blocks(B)
    bb = B // nb
    TB = T * bb

    # flat row layout: row r (within batch-block i) = t*bb + b
    def to_rows(a, feat):           # (B, T, feat) -> (nb*T*bb, feat)
        a = a.astype(jnp.float32).reshape(nb, bb, T, feat).transpose(0, 2, 1, 3)
        return a.reshape(nb * TB, feat)

    def from_rows(a, feat):         # (nb*T*bb, feat) -> (B, T, feat)
        return a.reshape(nb, T, bb, feat).transpose(0, 2, 1, 3).reshape(B, T, feat)

    x_r = to_rows(x, F)
    eps_r = to_rows(eps, L)
    h0_f = h0.astype(jnp.float32)                           # (2, B, H)

    inputs = (
        x_r, h0_f, eps_r,
        p["wih0_p"], p["bih0_f"],
        p["wrec"], p["brec"],
        p["we1"], p["be1"], p["ae1"],
        p["we2"], p["be2"], p["ae2"],
        p["we3"], p["be3"],
        p["wd1"], p["bd1"], p["ad1"],
        p["wd2"], p["bd2"], p["ad2"],
        p["wd3"], p["bd3"],
    )

    def row_spec(feat):             # block along the flat-row axis
        return pl.BlockSpec((TB, feat), lambda i: (i, 0))

    def full_spec(a):               # whole-array resident (weights)
        nd = a.ndim
        return pl.BlockSpec(a.shape, lambda i, nd=nd: (0,) * nd)

    in_specs = [row_spec(F),
                pl.BlockSpec((2, bb, H), lambda i: (0, i, 0)),
                row_spec(L)]
    in_specs += [full_spec(a) for a in inputs[3:]]

    out_shape = (jax.ShapeDtypeStruct((nb * TB, F), jnp.float32),
                 jax.ShapeDtypeStruct((nb * TB, 2 * L), jnp.float32))
    out_specs = (row_spec(F), row_spec(2 * L))

    recon_r, ml_r = pl.pallas_call(
        omni_anomaly_kernel,
        out_shape=out_shape,
        grid=(nb,),
        in_specs=in_specs,
        out_specs=out_specs,
        scratch_shapes=[
            pltpu.VMEM((TB, 3 * GP), jnp.float32),   # hoisted layer-0 gi
            pltpu.VMEM((TB, H), jnp.float32),        # per-step top hidden
            pltpu.VMEM((bb, 2 * H), jnp.float32),    # fused-dot LHS [h1 | h2]
        ],
        compiler_params=pltpu.CompilerParams(
            dimension_semantics=("parallel",)),
    )(*inputs)

    recon = from_rows(recon_r, F)
    ml = from_rows(ml_r, 2 * L)
    return recon, ml[..., :L], ml[..., L:]


# --------------------------------------------------------------------------- #
# Pure-JAX reference (mirrors the PyTorch module; bf16 casts mirrored on the
# recurrent matmuls so the comparison to the kernel stays tight).
# --------------------------------------------------------------------------- #
def reference_forward(x, h0, eps, p, *, hidden=64, latent=16):
    H, L = hidden, latent
    bf16 = jnp.bfloat16
    f32 = jnp.float32

    def gru_layer(xs, h, wih, whh, bih, bhh, *, input_bf16):
        wih_b = wih.astype(bf16)
        whh_b = whh.astype(bf16)

        def cell(h, xt):
            if input_bf16:
                gi = jnp.dot(xt.astype(bf16), wih_b,
                             preferred_element_type=f32) + bih
            else:
                gi = xt @ wih + bih
            gh = jnp.dot(h.astype(bf16), whh_b,
                         preferred_element_type=f32) + bhh
            r = jax.nn.sigmoid(gi[:, :H] + gh[:, :H])
            z = jax.nn.sigmoid(gi[:, H:2 * H] + gh[:, H:2 * H])
            n = jnp.tanh(gi[:, 2 * H:] + r * gh[:, 2 * H:])
            h_new = (1.0 - z) * n + z * h
            return h_new, h_new

        _, ys = lax.scan(cell, h, xs)
        return ys

    xs = jnp.transpose(x, (1, 0, 2)).astype(f32)
    y = gru_layer(xs, h0[0].astype(f32), p["wih0"], p["whh0"],
                  p["bih0"][0], p["bhh0"][0], input_bf16=False)
    y = gru_layer(y, h0[1].astype(f32), p["wih1"], p["whh1"],
                  p["bih1"][0], p["bhh1"][0], input_bf16=True)
    out = jnp.transpose(y, (1, 0, 2))                       # (B, T, H)

    def prelu(v, a):
        return jnp.where(v > 0, v, a * v)

    e = prelu(out @ p["we1"] + p["be1"][0], p["ae1"][0, 0])
    e = prelu(e @ p["we2"] + p["be2"][0], p["ae2"][0, 0])
    ml = e @ p["we3"] + p["be3"][0]
    mu, logvar = ml[..., :L], ml[..., L:]
    z = mu + eps * jnp.exp(0.5 * logvar)
    d = prelu(z @ p["wd1"] + p["bd1"][0], p["ad1"][0, 0])
    d = prelu(d @ p["wd2"] + p["bd2"][0], p["ad2"][0, 0])
    recon = jax.nn.sigmoid(d @ p["wd3"] + p["bd3"][0])
    return recon, mu, logvar


# --------------------------------------------------------------------------- #
if __name__ == "__main__":
    # Small shapes consistent with the module: feats=16, n_window=8.
    B, T, F = 16, 8, 16
    HIDDEN, LATENT = 64, 16

    key = jax.random.PRNGKey(0)
    kx, kh, keps, kp = jax.random.split(key, 4)

    x = jax.random.normal(kx, (B, T, F), dtype=jnp.float32)
    # TODO(synk): PyTorch draws xavier_normal_ hidden and randn eps inside
    # forward(); here they are deterministic explicit inputs.
    h0 = (jax.random.normal(kh, (2, B, HIDDEN), dtype=jnp.float32)
          * (2.0 / (B + HIDDEN)) ** 0.5)
    eps = jax.random.normal(keps, (B, T, LATENT), dtype=jnp.float32)

    params = init_params(kp, F, HIDDEN, LATENT)

    recon, mu, logvar = omni_anomaly_forward(
        x, h0, eps, params, hidden=HIDDEN, latent=LATENT)
    jax.block_until_ready((recon, mu, logvar))

    assert recon.shape == (B, T, F)
    assert mu.shape == (B, T, LATENT)
    assert logvar.shape == (B, T, LATENT)

    # numerical sanity check against a pure-JAX reference
    with jax.default_matmul_precision("highest"):
        r_ref, mu_ref, lv_ref = reference_forward(
            x, h0, eps, params, hidden=HIDDEN, latent=LATENT)
        r_ref, mu_ref, lv_ref = jax.block_until_ready((r_ref, mu_ref, lv_ref))

    for got, want in ((recon, r_ref), (mu, mu_ref), (logvar, lv_ref)):
        err = float(jnp.max(jnp.abs(got - want)))
        assert err < 2e-3, f"kernel/reference mismatch: max abs err = {err}"

    print("KERNEL_OK")
</pallas_src>

<mosaic_0001>
module attributes {stable_mosaic.version = 11 : i64} {
  func.func @omni_anomaly_kernel(%arg0: i32, %arg1: memref<128x16xf32, #tpu.memory_space<vmem>>, %arg2: memref<2x16x64xf32, #tpu.memory_space<vmem>>, %arg3: memref<128x16xf32, #tpu.memory_space<vmem>>, %arg4: memref<16x384xf32, #tpu.memory_space<vmem>>, %arg5: memref<1x384xf32, #tpu.memory_space<vmem>>, %arg6: memref<128x896xbf16, #tpu.memory_space<vmem>>, %arg7: memref<8x64xf32, #tpu.memory_space<vmem>>, %arg8: memref<64x64xf32, #tpu.memory_space<vmem>>, %arg9: memref<1x64xf32, #tpu.memory_space<vmem>>, %arg10: memref<1x1xf32, #tpu.memory_space<vmem>>, %arg11: memref<64x64xf32, #tpu.memory_space<vmem>>, %arg12: memref<1x64xf32, #tpu.memory_space<vmem>>, %arg13: memref<1x1xf32, #tpu.memory_space<vmem>>, %arg14: memref<64x32xf32, #tpu.memory_space<vmem>>, %arg15: memref<1x32xf32, #tpu.memory_space<vmem>>, %arg16: memref<16x64xf32, #tpu.memory_space<vmem>>, %arg17: memref<1x64xf32, #tpu.memory_space<vmem>>, %arg18: memref<1x1xf32, #tpu.memory_space<vmem>>, %arg19: memref<64x64xf32, #tpu.memory_space<vmem>>, %arg20: memref<1x64xf32, #tpu.memory_space<vmem>>, %arg21: memref<1x1xf32, #tpu.memory_space<vmem>>, %arg22: memref<64x16xf32, #tpu.memory_space<vmem>>, %arg23: memref<1x16xf32, #tpu.memory_space<vmem>>, %arg24: memref<128x16xf32, #tpu.memory_space<vmem>>, %arg25: memref<128x32xf32, #tpu.memory_space<vmem>>, %arg26: memref<128x384xf32, #tpu.memory_space<vmem>>, %arg27: memref<128x64xf32, #tpu.memory_space<vmem>>, %arg28: memref<16x128xf32, #tpu.memory_space<vmem>>) attributes {dimension_semantics = [#tpu.dimension_semantics<parallel>], iteration_bounds = array<i64: 1>, scalar_prefetch = 0 : i64, scratch_operands = 3 : i64, tpu.core_type = #tpu.core_type<tc>, window_params = [{transform_indices = @transform_0, window_bounds = array<i64: 128, 16>}, {transform_indices = @transform_1, window_bounds = array<i64: 2, 16, 64>}, {transform_indices = @transform_2, window_bounds = array<i64: 128, 16>}, {pipeline_mode = #tpu.pipeline_mode<synchronous>, transform_indices = @transform_3, window_bounds = array<i64: 16, 384>}, {pipeline_mode = #tpu.pipeline_mode<synchronous>, transform_indices = @transform_4, window_bounds = array<i64: 1, 384>}, {pipeline_mode = #tpu.pipeline_mode<synchronous>, transform_indices = @transform_5, window_bounds = array<i64: 128, 896>}, {pipeline_mode = #tpu.pipeline_mode<synchronous>, transform_indices = @transform_6, window_bounds = array<i64: 8, 64>}, {pipeline_mode = #tpu.pipeline_mode<synchronous>, transform_indices = @transform_7, window_bounds = array<i64: 64, 64>}, {pipeline_mode = #tpu.pipeline_mode<synchronous>, transform_indices = @transform_8, window_bounds = array<i64: 1, 64>}, {pipeline_mode = #tpu.pipeline_mode<synchronous>, transform_indices = @transform_9, window_bounds = array<i64: 1, 1>}, {pipeline_mode = #tpu.pipeline_mode<synchronous>, transform_indices = @transform_10, window_bounds = array<i64: 64, 64>}, {pipeline_mode = #tpu.pipeline_mode<synchronous>, transform_indices = @transform_11, window_bounds = array<i64: 1, 64>}, {pipeline_mode = #tpu.pipeline_mode<synchronous>, transform_indices = @transform_12, window_bounds = array<i64: 1, 1>}, {pipeline_mode = #tpu.pipeline_mode<synchronous>, transform_indices = @transform_13, window_bounds = array<i64: 64, 32>}, {pipeline_mode = #tpu.pipeline_mode<synchronous>, transform_indices = @transform_14, window_bounds = array<i64: 1, 32>}, {pipeline_mode = #tpu.pipeline_mode<synchronous>, transform_indices = @transform_15, window_bounds = array<i64: 16, 64>}, {pipeline_mode = #tpu.pipeline_mode<synchronous>, transform_indices = @transform_16, window_bounds = array<i64: 1, 64>}, {pipeline_mode = #tpu.pipeline_mode<synchronous>, transform_indices = @transform_17, window_bounds = array<i64: 1, 1>}, {pipeline_mode = #tpu.pipeline_mode<synchronous>, transform_indices = @transform_18, window_bounds = array<i64: 64, 64>}, {pipeline_mode = #tpu.pipeline_mode<synchronous>, transform_indices = @transform_19, window_bounds = array<i64: 1, 64>}, {pipeline_mode = #tpu.pipeline_mode<synchronous>, transform_indices = @transform_20, window_bounds = array<i64: 1, 1>}, {pipeline_mode = #tpu.pipeline_mode<synchronous>, transform_indices = @transform_21, window_bounds = array<i64: 64, 16>}, {pipeline_mode = #tpu.pipeline_mode<synchronous>, transform_indices = @transform_22, window_bounds = array<i64: 1, 16>}, {transform_indices = @transform_23, window_bounds = array<i64: 128, 16>}, {transform_indices = @transform_24, window_bounds = array<i64: 128, 32>}]} {
    %c0 = arith.constant 0 : index
    %c0_0 = arith.constant 0 : index
    %0 = vector.load %arg1[%c0, %c0_0] : memref<128x16xf32, #tpu.memory_space<vmem>>, vector<128x16xf32>
    %c0_1 = arith.constant 0 : index
    %c0_2 = arith.constant 0 : index
    %1 = vector.load %arg4[%c0_1, %c0_2] : memref<16x384xf32, #tpu.memory_space<vmem>>, vector<16x384xf32>
    %cst = arith.constant dense<0.000000e+00> : vector<128x384xf32>
    %2 = tpu.matmul %0, %1, %cst {dimension_numbers = #tpu.dot_dimension_numbers<[1], [0], [0], [1], [0, 0, 1, 1], [], []>} : vector<128x16xf32>, vector<16x384xf32>, vector<128x384xf32> -> vector<128x384xf32>
    %c0_3 = arith.constant 0 : index
    %c0_4 = arith.constant 0 : index
    %3 = vector.load %arg5[%c0_3, %c0_4] : memref<1x384xf32, #tpu.memory_space<vmem>>, vector<1x384xf32>
    %4 = vector.broadcast %3 : vector<1x384xf32> to vector<128x384xf32>
    %5 = arith.addf %2, %4 : vector<128x384xf32>
    %c0_5 = arith.constant 0 : index
    %c0_6 = arith.constant 0 : index
    %6 = vector.load %arg26[%c0_5, %c0_6] : memref<128x384xf32, #tpu.memory_space<vmem>>, vector<128x384xf32>
    tpu.vector_store %arg26[%c0_5, %c0_6], %5 {strides = array<i32>} : memref<128x384xf32, #tpu.memory_space<vmem>>, vector<128x384xf32>,
    %c0_7 = arith.constant 0 : index
    %c0_8 = arith.constant 0 : index
    %7 = vector.load %arg6[%c0_7, %c0_8] : memref<128x896xbf16, #tpu.memory_space<vmem>>, vector<128x896xbf16>
    %c0_9 = arith.constant 0 : index
    %c0_10 = arith.constant 0 : index
    %8 = vector.load %arg7[%c0_9, %c0_10] : memref<8x64xf32, #tpu.memory_space<vmem>>, vector<8x64xf32>
    %9 = vector.extract_strided_slice %8 {offsets = [0, 0], sizes = [1, 64], strides = [1, 1]} : vector<8x64xf32> to vector<1x64xf32>
    %10 = vector.shape_cast %9 : vector<1x64xf32> to vector<1x64xf32>
    %11 = vector.broadcast %10 : vector<1x64xf32> to vector<16x64xf32>
    %12 = vector.extract_strided_slice %8 {offsets = [1, 0], sizes = [1, 64], strides = [1, 1]} : vector<8x64xf32> to vector<1x64xf32>
    %13 = vector.shape_cast %12 : vector<1x64xf32> to vector<1x64xf32>
    %14 = vector.broadcast %13 : vector<1x64xf32> to vector<16x64xf32>
    %15 = vector.extract_strided_slice %8 {offsets = [2, 0], sizes = [1, 64], strides = [1, 1]} : vector<8x64xf32> to vector<1x64xf32>
    %16 = vector.shape_cast %15 : vector<1x64xf32> to vector<1x64xf32>
    %17 = vector.broadcast %16 : vector<1x64xf32> to vector<16x64xf32>
    %18 = vector.extract_strided_slice %8 {offsets = [3, 0], sizes = [1, 64], strides = [1, 1]} : vector<8x64xf32> to vector<1x64xf32>
    %19 = vector.shape_cast %18 : vector<1x64xf32> to vector<1x64xf32>
    %20 = vector.broadcast %19 : vector<1x64xf32> to vector<16x64xf32>
    %21 = vector.extract_strided_slice %8 {offsets = [4, 0], sizes = [1, 64], strides = [1, 1]} : vector<8x64xf32> to vector<1x64xf32>
    %22 = vector.shape_cast %21 : vector<1x64xf32> to vector<1x64xf32>
    %23 = vector.broadcast %22 : vector<1x64xf32> to vector<16x64xf32>
    %c0_11 = arith.constant 0 : index
    %c0_12 = arith.constant 0 : index
    %c0_13 = arith.constant 0 : index
    %24 = vector.load %arg2[%c0_11, %c0_12, %c0_13] : memref<2x16x64xf32, #tpu.memory_space<vmem>>, vector<1x16x64xf32>
    %25 = vector.shape_cast %24 : vector<1x16x64xf32> to vector<16x64xf32>
    %c1 = arith.constant 1 : index
    %c0_14 = arith.constant 0 : index
    %c0_15 = arith.constant 0 : index
    %26 = vector.load %arg2[%c1, %c0_14, %c0_15] : memref<2x16x64xf32, #tpu.memory_space<vmem>>, vector<1x16x64xf32>
    %27 = vector.shape_cast %26 : vector<1x16x64xf32> to vector<16x64xf32>
    %c0_16 = arith.constant 0 : index
    %c0_17 = arith.constant 0 : index
    %28 = vector.load %arg28[%c0_16, %c0_17] : memref<16x128xf32, #tpu.memory_space<vmem>>, vector<16x64xf32>
    tpu.vector_store %arg28[%c0_16, %c0_17], %25 {strides = array<i32>} : memref<16x128xf32, #tpu.memory_space<vmem>>, vector<16x64xf32>,
    %c0_18 = arith.constant 0 : index
    %c64 = arith.constant 64 : index
    %29 = vector.load %arg28[%c0_18, %c64] : memref<16x128xf32, #tpu.memory_space<vmem>>, vector<16x64xf32>
    tpu.vector_store %arg28[%c0_18, %c64], %27 {strides = array<i32>} : memref<16x128xf32, #tpu.memory_space<vmem>>, vector<16x64xf32>,
    %c0_19 = arith.constant 0 : index
    %c0_20 = arith.constant 0 : index
    %30 = vector.load %arg28[%c0_19, %c0_20] : memref<16x128xf32, #tpu.memory_space<vmem>>, vector<16x128xf32>
    %31 = arith.truncf %30 : vector<16x128xf32> to vector<16x128xbf16>
    %cst_21 = arith.constant dense<0.000000e+00> : vector<16x896xf32>
    %32 = tpu.matmul %31, %7, %cst_21 {dimension_numbers = #tpu.dot_dimension_numbers<[1], [0], [0], [1], [0, 0, 1, 1], [], []>} : vector<16x128xbf16>, vector<128x896xbf16>, vector<16x896xf32> -> vector<16x896xf32>
    %33 = vector.extract_strided_slice %32 {offsets = [0, 0], sizes = [16, 384], strides = [1, 1]} : vector<16x896xf32> to vector<16x384xf32>
    %c0_22 = arith.constant 0 : index
    %c0_23 = arith.constant 0 : index
    %34 = vector.load %arg26[%c0_22, %c0_23] : memref<128x384xf32, #tpu.memory_space<vmem>>, vector<16x384xf32>
    %35 = vector.extract_strided_slice %34 {offsets = [0, 0], sizes = [16, 64], strides = [1, 1]} : vector<16x384xf32> to vector<16x64xf32>
    %36 = vector.extract_strided_slice %33 {offsets = [0, 0], sizes = [16, 64], strides = [1, 1]} : vector<16x384xf32> to vector<16x64xf32>
    %37 = arith.addf %35, %36 : vector<16x64xf32>
    %38 = arith.negf %37 : vector<16x64xf32>
    %39 = math.exp %38 : vector<16x64xf32>
    %cst_24 = arith.constant 1.000000e+00 : f32
    %40 = vector.broadcast %cst_24 : f32 to vector<16x64xf32>
    %41 = arith.addf %40, %39 : vector<16x64xf32>
    %42 = arith.divf %40, %41 : vector<16x64xf32>
    %43 = vector.extract_strided_slice %34 {offsets = [0, 128], sizes = [16, 64], strides = [1, 1]} : vector<16x384xf32> to vector<16x64xf32>
    %44 = vector.extract_strided_slice %33 {offsets = [0, 128], sizes = [16, 64], strides = [1, 1]} : vector<16x384xf32> to vector<16x64xf32>
    %45 = arith.addf %43, %44 : vector<16x64xf32>
    %46 = arith.negf %45 : vector<16x64xf32>
    %47 = math.exp %46 : vector<16x64xf32>
    %cst_25 = arith.constant 1.000000e+00 : f32
    %48 = vector.broadcast %cst_25 : f32 to vector<16x64xf32>
    %49 = arith.addf %48, %47 : vector<16x64xf32>
    %50 = arith.divf %48, %49 : vector<16x64xf32>
    %51 = vector.extract_strided_slice %34 {offsets = [0, 256], sizes = [16, 64], strides = [1, 1]} : vector<16x384xf32> to vector<16x64xf32>
    %52 = vector.extract_strided_slice %33 {offsets = [0, 256], sizes = [16, 64], strides = [1, 1]} : vector<16x384xf32> to vector<16x64xf32>
    %53 = arith.addf %52, %11 : vector<16x64xf32>
    %54 = arith.mulf %42, %53 : vector<16x64xf32>
    %55 = arith.addf %51, %54 : vector<16x64xf32>
    %56 = math.tanh %55 : vector<16x64xf32>
    %cst_26 = arith.constant 1.000000e+00 : f32
    %57 = vector.broadcast %cst_26 : f32 to vector<16x64xf32>
    %58 = arith.subf %57, %50 : vector<16x64xf32>
    %59 = arith.mulf %58, %56 : vector<16x64xf32>
    %60 = arith.mulf %50, %25 : vector<16x64xf32>
    %61 = arith.addf %59, %60 : vector<16x64xf32>
    %c0_27 = arith.constant 0 : index
    %c0_28 = arith.constant 0 : index
    %62 = vector.load %arg28[%c0_27, %c0_28] : memref<16x128xf32, #tpu.memory_space<vmem>>, vector<16x64xf32>
    tpu.vector_store %arg28[%c0_27, %c0_28], %61 {strides = array<i32>} : memref<16x128xf32, #tpu.memory_space<vmem>>, vector<16x64xf32>,
    %c0_29 = arith.constant 0 : index
    %c0_30 = arith.constant 0 : index
    %63 = vector.load %arg28[%c0_29, %c0_30] : memref<16x128xf32, #tpu.memory_space<vmem>>, vector<16x128xf32>
    %64 = arith.truncf %63 : vector<16x128xf32> to vector<16x128xbf16>
    %cst_31 = arith.constant dense<0.000000e+00> : vector<16x896xf32>
    %65 = tpu.matmul %64, %7, %cst_31 {dimension_numbers = #tpu.dot_dimension_numbers<[1], [0], [0], [1], [0, 0, 1, 1], [], []>} : vector<16x128xbf16>, vector<128x896xbf16>, vector<16x896xf32> -> vector<16x896xf32>
    %66 = vector.extract_strided_slice %65 {offsets = [0, 0], sizes = [16, 384], strides = [1, 1]} : vector<16x896xf32> to vector<16x384xf32>
    %67 = vector.extract_strided_slice %65 {offsets = [0, 384], sizes = [16, 64], strides = [1, 1]} : vector<16x896xf32> to vector<16x64xf32>
    %68 = arith.addf %67, %14 : vector<16x64xf32>
    %69 = arith.negf %68 : vector<16x64xf32>
    %70 = math.exp %69 : vector<16x64xf32>
    %cst_32 = arith.constant 1.000000e+00 : f32
    %71 = vector.broadcast %cst_32 : f32 to vector<16x64xf32>
    %72 = arith.addf %71, %70 : vector<16x64xf32>
    %73 = arith.divf %71, %72 : vector<16x64xf32>
    %74 = vector.extract_strided_slice %65 {offsets = [0, 512], sizes = [16, 64], strides = [1, 1]} : vector<16x896xf32> to vector<16x64xf32>
    %75 = arith.addf %74, %17 : vector<16x64xf32>
    %76 = arith.negf %75 : vector<16x64xf32>
    %77 = math.exp %76 : vector<16x64xf32>
    %cst_33 = arith.constant 1.000000e+00 : f32
    %78 = vector.broadcast %cst_33 : f32 to vector<16x64xf32>
    %79 = arith.addf %78, %77 : vector<16x64xf32>
    %80 = arith.divf %78, %79 : vector<16x64xf32>
    %81 = vector.extract_strided_slice %65 {offsets = [0, 640], sizes = [16, 64], strides = [1, 1]} : vector<16x896xf32> to vector<16x64xf32>
    %82 = arith.addf %81, %20 : vector<16x64xf32>
    %83 = vector.extract_strided_slice %65 {offsets = [0, 768], sizes = [16, 64], strides = [1, 1]} : vector<16x896xf32> to vector<16x64xf32>
    %84 = arith.addf %83, %23 : vector<16x64xf32>
    %85 = arith.mulf %73, %84 : vector<16x64xf32>
    %86 = arith.addf %82, %85 : vector<16x64xf32>
    %87 = math.tanh %86 : vector<16x64xf32>
    %cst_34 = arith.constant 1.000000e+00 : f32
    %88 = vector.broadcast %cst_34 : f32 to vector<16x64xf32>
    %89 = arith.subf %88, %80 : vector<16x64xf32>
    %90 = arith.mulf %89, %87 : vector<16x64xf32>
    %91 = arith.mulf %80, %27 : vector<16x64xf32>
    %92 = arith.addf %90, %91 : vector<16x64xf32>
    %c0_35 = arith.constant 0 : index
    %c0_36 = arith.constant 0 : index
    %93 = vector.load %arg27[%c0_35, %c0_36] : memref<128x64xf32, #tpu.memory_space<vmem>>, vector<16x64xf32>
    tpu.vector_store %arg27[%c0_35, %c0_36], %92 {strides = array<i32>} : memref<128x64xf32, #tpu.memory_space<vmem>>, vector<16x64xf32>,
    %c0_37 = arith.constant 0 : index
    %c64_38 = arith.constant 64 : index
    %94 = vector.load %arg28[%c0_37, %c64_38] : memref<16x128xf32, #tpu.memory_space<vmem>>, vector<16x64xf32>
    tpu.vector_store %arg28[%c0_37, %c64_38], %92 {strides = array<i32>} : memref<16x128xf32, #tpu.memory_space<vmem>>, vector<16x64xf32>,
    %c16 = arith.constant 16 : index
    %c0_39 = arith.constant 0 : index
    %95 = vector.load %arg26[%c16, %c0_39] : memref<128x384xf32, #tpu.memory_space<vmem>>, vector<16x384xf32>
    %96 = vector.extract_strided_slice %95 {offsets = [0, 0], sizes = [16, 64], strides = [1, 1]} : vector<16x384xf32> to vector<16x64xf32>
    %97 = vector.extract_strided_slice %66 {offsets = [0, 0], sizes = [16, 64], strides = [1, 1]} : vector<16x384xf32> to vector<16x64xf32>
    %98 = arith.addf %96, %97 : vector<16x64xf32>
    %99 = arith.negf %98 : vector<16x64xf32>
    %100 = math.exp %99 : vector<16x64xf32>
    %cst_40 = arith.constant 1.000000e+00 : f32
    %101 = vector.broadcast %cst_40 : f32 to vector<16x64xf32>
    %102 = arith.addf %101, %100 : vector<16x64xf32>
    %103 = arith.divf %101, %102 : vector<16x64xf32>
    %104 = vector.extract_strided_slice %95 {offsets = [0, 128], sizes = [16, 64], strides = [1, 1]} : vector<16x384xf32> to vector<16x64xf32>
    %105 = vector.extract_strided_slice %66 {offsets = [0, 128], sizes = [16, 64], strides = [1, 1]} : vector<16x384xf32> to vector<16x64xf32>
    %106 = arith.addf %104, %105 : vector<16x64xf32>
    %107 = arith.negf %106 : vector<16x64xf32>
    %108 = math.exp %107 : vector<16x64xf32>
    %cst_41 = arith.constant 1.000000e+00 : f32
    %109 = vector.broadcast %cst_41 : f32 to vector<16x64xf32>
    %110 = arith.addf %109, %108 : vector<16x64xf32>
    %111 = arith.divf %109, %110 : vector<16x64xf32>
    %112 = vector.extract_strided_slice %95 {offsets = [0, 256], sizes = [16, 64], strides = [1, 1]} : vector<16x384xf32> to vector<16x64xf32>
    %113 = vector.extract_strided_slice %66 {offsets = [0, 256], sizes = [16, 64], strides = [1, 1]} : vector<16x384xf32> to vector<16x64xf32>
    %114 = arith.addf %113, %11 : vector<16x64xf32>
    %115 = arith.mulf %103, %114 : vector<16x64xf32>
    %116 = arith.addf %112, %115 : vector<16x64xf32>
    %117 = math.tanh %116 : vector<16x64xf32>
    %cst_42 = arith.constant 1.000000e+00 : f32
    %118 = vector.broadcast %cst_42 : f32 to vector<16x64xf32>
    %119 = arith.subf %118, %111 : vector<16x64xf32>
    %120 = arith.mulf %119, %117 : vector<16x64xf32>
    %121 = arith.mulf %111, %61 : vector<16x64xf32>
    %122 = arith.addf %120, %121 : vector<16x64xf32>
    %c0_43 = arith.constant 0 : index
    %c0_44 = arith.constant 0 : index
    %123 = vector.load %arg28[%c0_43, %c0_44] : memref<16x128xf32, #tpu.memory_space<vmem>>, vector<16x64xf32>
    tpu.vector_store %arg28[%c0_43, %c0_44], %122 {strides = array<i32>} : memref<16x128xf32, #tpu.memory_space<vmem>>, vector<16x64xf32>,
    %c0_45 = arith.constant 0 : index
    %c0_46 = arith.constant 0 : index
    %124 = vector.load %arg28[%c0_45, %c0_46] : memref<16x128xf32, #tpu.memory_space<vmem>>, vector<16x128xf32>
    %125 = arith.truncf %124 : vector<16x128xf32> to vector<16x128xbf16>
    %cst_47 = arith.constant dense<0.000000e+00> : vector<16x896xf32>
    %126 = tpu.matmul %125, %7, %cst_47 {dimension_numbers = #tpu.dot_dimension_numbers<[1], [0], [0], [1], [0, 0, 1, 1], [], []>} : vector<16x128xbf16>, vector<128x896xbf16>, vector<16x896xf32> -> vector<16x896xf32>
    %127 = vector.extract_strided_slice %126 {offsets = [0, 0], sizes = [16, 384], strides = [1, 1]} : vector<16x896xf32> to vector<16x384xf32>
    %128 = vector.extract_strided_slice %126 {offsets = [0, 384], sizes = [16, 64], strides = [1, 1]} : vector<16x896xf32> to vector<16x64xf32>
    %129 = arith.addf %128, %14 : vector<16x64xf32>
    %130 = arith.negf %129 : vector<16x64xf32>
    %131 = math.exp %130 : vector<16x64xf32>
    %cst_48 = arith.constant 1.000000e+00 : f32
    %132 = vector.broadcast %cst_48 : f32 to vector<16x64xf32>
    %133 = arith.addf %132, %131 : vector<16x64xf32>
    %134 = arith.divf %132, %133 : vector<16x64xf32>
    %135 = vector.extract_strided_slice %126 {offsets = [0, 512], sizes = [16, 64], strides = [1, 1]} : vector<16x896xf32> to vector<16x64xf32>
    %136 = arith.addf %135, %17 : vector<16x64xf32>
    %137 = arith.negf %136 : vector<16x64xf32>
    %138 = math.exp %137 : vector<16x64xf32>
    %cst_49 = arith.constant 1.000000e+00 : f32
    %139 = vector.broadcast %cst_49 : f32 to vector<16x64xf32>
    %140 = arith.addf %139, %138 : vector<16x64xf32>
    %141 = arith.divf %139, %140 : vector<16x64xf32>
    %142 = vector.extract_strided_slice %126 {offsets = [0, 640], sizes = [16, 64], strides = [1, 1]} : vector<16x896xf32> to vector<16x64xf32>
    %143 = arith.addf %142, %20 : vector<16x64xf32>
    %144 = vector.extract_strided_slice %126 {offsets = [0, 768], sizes = [16, 64], strides = [1, 1]} : vector<16x896xf32> to vector<16x64xf32>
    %145 = arith.addf %144, %23 : vector<16x64xf32>
    %146 = arith.mulf %134, %145 : vector<16x64xf32>
    %147 = arith.addf %143, %146 : vector<16x64xf32>
    %148 = math.tanh %147 : vector<16x64xf32>
    %cst_50 = arith.constant 1.000000e+00 : f32
    %149 = vector.broadcast %cst_50 : f32 to vector<16x64xf32>
    %150 = arith.subf %149, %141 : vector<16x64xf32>
    %151 = arith.mulf %150, %148 : vector<16x64xf32>
    %152 = arith.mulf %141, %92 : vector<16x64xf32>
    %153 = arith.addf %151, %152 : vector<16x64xf32>
    %c16_51 = arith.constant 16 : index
    %c0_52 = arith.constant 0 : index
    %154 = vector.load %arg27[%c16_51, %c0_52] : memref<128x64xf32, #tpu.memory_space<vmem>>, vector<16x64xf32>
    tpu.vector_store %arg27[%c16_51, %c0_52], %153 {strides = array<i32>} : memref<128x64xf32, #tpu.memory_space<vmem>>, vector<16x64xf32>,
    %c0_53 = arith.constant 0 : index
    %c64_54 = arith.constant 64 : index
    %155 = vector.load %arg28[%c0_53, %c64_54] : memref<16x128xf32, #tpu.memory_space<vmem>>, vector<16x64xf32>
    tpu.vector_store %arg28[%c0_53, %c64_54], %153 {strides = array<i32>} : memref<16x128xf32, #tpu.memory_space<vmem>>, vector<16x64xf32>,
    %c32 = arith.constant 32 : index
    %c0_55 = arith.constant 0 : index
    %156 = vector.load %arg26[%c32, %c0_55] : memref<128x384xf32, #tpu.memory_space<vmem>>, vector<16x384xf32>
    %157 = vector.extract_strided_slice %156 {offsets = [0, 0], sizes = [16, 64], strides = [1, 1]} : vector<16x384xf32> to vector<16x64xf32>
    %158 = vector.extract_strided_slice %127 {offsets = [0, 0], sizes = [16, 64], strides = [1, 1]} : vector<16x384xf32> to vector<16x64xf32>
    %159 = arith.addf %157, %158 : vector<16x64xf32>
    %160 = arith.negf %159 : vector<16x64xf32>
    %161 = math.exp %160 : vector<16x64xf32>
    %cst_56 = arith.constant 1.000000e+00 : f32
    %162 = vector.broadcast %cst_56 : f32 to vector<16x64xf32>
    %163 = arith.addf %162, %161 : vector<16x64xf32>
    %164 = arith.divf %162, %163 : vector<16x64xf32>
    %165 = vector.extract_strided_slice %156 {offsets = [0, 128], sizes = [16, 64], strides = [1, 1]} : vector<16x384xf32> to vector<16x64xf32>
    %166 = vector.extract_strided_slice %127 {offsets = [0, 128], sizes = [16, 64], strides = [1, 1]} : vector<16x384xf32> to vector<16x64xf32>
    %167 = arith.addf %165, %166 : vector<16x64xf32>
    %168 = arith.negf %167 : vector<16x64xf32>
    %169 = math.exp %168 : vector<16x64xf32>
    %cst_57 = arith.constant 1.000000e+00 : f32
    %170 = vector.broadcast %cst_57 : f32 to vector<16x64xf32>
    %171 = arith.addf %170, %169 : vector<16x64xf32>
    %172 = arith.divf %170, %171 : vector<16x64xf32>
    %173 = vector.extract_strided_slice %156 {offsets = [0, 256], sizes = [16, 64], strides = [1, 1]} : vector<16x384xf32> to vector<16x64xf32>
    %174 = vector.extract_strided_slice %127 {offsets = [0, 256], sizes = [16, 64], strides = [1, 1]} : vector<16x384xf32> to vector<16x64xf32>
    %175 = arith.addf %174, %11 : vector<16x64xf32>
    %176 = arith.mulf %164, %175 : vector<16x64xf32>
    %177 = arith.addf %173, %176 : vector<16x64xf32>
    %178 = math.tanh %177 : vector<16x64xf32>
    %cst_58 = arith.constant 1.000000e+00 : f32
    %179 = vector.broadcast %cst_58 : f32 to vector<16x64xf32>
    %180 = arith.subf %179, %172 : vector<16x64xf32>
    %181 = arith.mulf %180, %178 : vector<16x64xf32>
    %182 = arith.mulf %172, %122 : vector<16x64xf32>
    %183 = arith.addf %181, %182 : vector<16x64xf32>
    %c0_59 = arith.constant 0 : index
    %c0_60 = arith.constant 0 : index
    %184 = vector.load %arg28[%c0_59, %c0_60] : memref<16x128xf32, #tpu.memory_space<vmem>>, vector<16x64xf32>
    tpu.vector_store %arg28[%c0_59, %c0_60], %183 {strides = array<i32>} : memref<16x128xf32, #tpu.memory_space<vmem>>, vector<16x64xf32>,
    %c0_61 = arith.constant 0 : index
    %c0_62 = arith.constant 0 : index
    %185 = vector.load %arg28[%c0_61, %c0_62] : memref<16x128xf32, #tpu.memory_space<vmem>>, vector<16x128xf32>
    %186 = arith.truncf %185 : vector<16x128xf32> to vector<16x128xbf16>
    %cst_63 = arith.constant dense<0.000000e+00> : vector<16x896xf32>
    %187 = tpu.matmul %186, %7, %cst_63 {dimension_numbers = #tpu.dot_dimension_numbers<[1], [0], [0], [1], [0, 0, 1, 1], [], []>} : vector<16x128xbf16>, vector<128x896xbf16>, vector<16x896xf32> -> vector<16x896xf32>
    %188 = vector.extract_strided_slice %187 {offsets = [0, 0], sizes = [16, 384], strides = [1, 1]} : vector<16x896xf32> to vector<16x384xf32>
    %189 = vector.extract_strided_slice %187 {offsets = [0, 384], sizes = [16, 64], strides = [1, 1]} : vector<16x896xf32> to vector<16x64xf32>
    %190 = arith.addf %189, %14 : vector<16x64xf32>
    %191 = arith.negf %190 : vector<16x64xf32>
    %192 = math.exp %191 : vector<16x64xf32>
    %cst_64 = arith.constant 1.000000e+00 : f32
    %193 = vector.broadcast %cst_64 : f32 to vector<16x64xf32>
    %194 = arith.addf %193, %192 : vector<16x64xf32>
    %195 = arith.divf %193, %194 : vector<16x64xf32>
    %196 = vector.extract_strided_slice %187 {offsets = [0, 512], sizes = [16, 64], strides = [1, 1]} : vector<16x896xf32> to vector<16x64xf32>
    %197 = arith.addf %196, %17 : vector<16x64xf32>
    %198 = arith.negf %197 : vector<16x64xf32>
    %199 = math.exp %198 : vector<16x64xf32>
    %cst_65 = arith.constant 1.000000e+00 : f32
    %200 = vector.broadcast %cst_65 : f32 to vector<16x64xf32>
    %201 = arith.addf %200, %199 : vector<16x64xf32>
    %202 = arith.divf %200, %201 : vector<16x64xf32>
    %203 = vector.extract_strided_slice %187 {offsets = [0, 640], sizes = [16, 64], strides = [1, 1]} : vector<16x896xf32> to vector<16x64xf32>
    %204 = arith.addf %203, %20 : vector<16x64xf32>
    %205 = vector.extract_strided_slice %187 {offsets = [0, 768], sizes = [16, 64], strides = [1, 1]} : vector<16x896xf32> to vector<16x64xf32>
    %206 = arith.addf %205, %23 : vector<16x64xf32>
    %207 = arith.mulf %195, %206 : vector<16x64xf32>
    %208 = arith.addf %204, %207 : vector<16x64xf32>
    %209 = math.tanh %208 : vector<16x64xf32>
    %cst_66 = arith.constant 1.000000e+00 : f32
    %210 = vector.broadcast %cst_66 : f32 to vector<16x64xf32>
    %211 = arith.subf %210, %202 : vector<16x64xf32>
    %212 = arith.mulf %211, %209 : vector<16x64xf32>
    %213 = arith.mulf %202, %153 : vector<16x64xf32>
    %214 = arith.addf %212, %213 : vector<16x64xf32>
    %c32_67 = arith.constant 32 : index
    %c0_68 = arith.constant 0 : index
    %215 = vector.load %arg27[%c32_67, %c0_68] : memref<128x64xf32, #tpu.memory_space<vmem>>, vector<16x64xf32>
    tpu.vector_store %arg27[%c32_67, %c0_68], %214 {strides = array<i32>} : memref<128x64xf32, #tpu.memory_space<vmem>>, vector<16x64xf32>,
    %c0_69 = arith.constant 0 : index
    %c64_70 = arith.constant 64 : index
    %216 = vector.load %arg28[%c0_69, %c64_70] : memref<16x128xf32, #tpu.memory_space<vmem>>, vector<16x64xf32>
    tpu.vector_store %arg28[%c0_69, %c64_70], %214 {strides = array<i32>} : memref<16x128xf32, #tpu.memory_space<vmem>>, vector<16x64xf32>,
    %c48 = arith.constant 48 : index
    %c0_71 = arith.constant 0 : index
    %217 = vector.load %arg26[%c48, %c0_71] : memref<128x384xf32, #tpu.memory_space<vmem>>, vector<16x384xf32>
    %218 = vector.extract_strided_slice %217 {offsets = [0, 0], sizes = [16, 64], strides = [1, 1]} : vector<16x384xf32> to vector<16x64xf32>
    %219 = vector.extract_strided_slice %188 {offsets = [0, 0], sizes = [16, 64], strides = [1, 1]} : vector<16x384xf32> to vector<16x64xf32>
    %220 = arith.addf %218, %219 : vector<16x64xf32>
    %221 = arith.negf %220 : vector<16x64xf32>
    %222 = math.exp %221 : vector<16x64xf32>
    %cst_72 = arith.constant 1.000000e+00 : f32
    %223 = vector.broadcast %cst_72 : f32 to vector<16x64xf32>
    %224 = arith.addf %223, %222 : vector<16x64xf32>
    %225 = arith.divf %223, %224 : vector<16x64xf32>
    %226 = vector.extract_strided_slice %217 {offsets = [0, 128], sizes = [16, 64], strides = [1, 1]} : vector<16x384xf32> to vector<16x64xf32>
    %227 = vector.extract_strided_slice %188 {offsets = [0, 128], sizes = [16, 64], strides = [1, 1]} : vector<16x384xf32> to vector<16x64xf32>
    %228 = arith.addf %226, %227 : vector<16x64xf32>
    %229 = arith.negf %228 : vector<16x64xf32>
    %230 = math.exp %229 : vector<16x64xf32>
    %cst_73 = arith.constant 1.000000e+00 : f32
    %231 = vector.broadcast %cst_73 : f32 to vector<16x64xf32>
    %232 = arith.addf %231, %230 : vector<16x64xf32>
    %233 = arith.divf %231, %232 : vector<16x64xf32>
    %234 = vector.extract_strided_slice %217 {offsets = [0, 256], sizes = [16, 64], strides = [1, 1]} : vector<16x384xf32> to vector<16x64xf32>
    %235 = vector.extract_strided_slice %188 {offsets = [0, 256], sizes = [16, 64], strides = [1, 1]} : vector<16x384xf32> to vector<16x64xf32>
    %236 = arith.addf %235, %11 : vector<16x64xf32>
    %237 = arith.mulf %225, %236 : vector<16x64xf32>
    %238 = arith.addf %234, %237 : vector<16x64xf32>
    %239 = math.tanh %238 : vector<16x64xf32>
    %cst_74 = arith.constant 1.000000e+00 : f32
    %240 = vector.broadcast %cst_74 : f32 to vector<16x64xf32>
    %241 = arith.subf %240, %233 : vector<16x64xf32>
    %242 = arith.mulf %241, %239 : vector<16x64xf32>
    %243 = arith.mulf %233, %183 : vector<16x64xf32>
    %244 = arith.addf %242, %243 : vector<16x64xf32>
    %c0_75 = arith.constant 0 : index
    %c0_76 = arith.constant 0 : index
    %245 = vector.load %arg28[%c0_75, %c0_76] : memref<16x128xf32, #tpu.memory_space<vmem>>, vector<16x64xf32>
    tpu.vector_store %arg28[%c0_75, %c0_76], %244 {strides = array<i32>} : memref<16x128xf32, #tpu.memory_space<vmem>>, vector<16x64xf32>,
    %c0_77 = arith.constant 0 : index
    %c0_78 = arith.constant 0 : index
    %246 = vector.load %arg28[%c0_77, %c0_78] : memref<16x128xf32, #tpu.memory_space<vmem>>, vector<16x128xf32>
    %247 = arith.truncf %246 : vector<16x128xf32> to vector<16x128xbf16>
    %cst_79 = arith.constant dense<0.000000e+00> : vector<16x896xf32>
    %248 = tpu.matmul %247, %7, %cst_79 {dimension_numbers = #tpu.dot_dimension_numbers<[1], [0], [0], [1], [0, 0, 1, 1], [], []>} : vector<16x128xbf16>, vector<128x896xbf16>, vector<16x896xf32> -> vector<16x896xf32>
    %249 = vector.extract_strided_slice %248 {offsets = [0, 0], sizes = [16, 384], strides = [1, 1]} : vector<16x896xf32> to vector<16x384xf32>
    %250 = vector.extract_strided_slice %248 {offsets = [0, 384], sizes = [16, 64], strides = [1, 1]} : vector<16x896xf32> to vector<16x64xf32>
    %251 = arith.addf %250, %14 : vector<16x64xf32>
    %252 = arith.negf %251 : vector<16x64xf32>
    %253 = math.exp %252 : vector<16x64xf32>
    %cst_80 = arith.constant 1.000000e+00 : f32
    %254 = vector.broadcast %cst_80 : f32 to vector<16x64xf32>
    %255 = arith.addf %254, %253 : vector<16x64xf32>
    %256 = arith.divf %254, %255 : vector<16x64xf32>
    %257 = vector.extract_strided_slice %248 {offsets = [0, 512], sizes = [16, 64], strides = [1, 1]} : vector<16x896xf32> to vector<16x64xf32>
    %258 = arith.addf %257, %17 : vector<16x64xf32>
    %259 = arith.negf %258 : vector<16x64xf32>
    %260 = math.exp %259 : vector<16x64xf32>
    %cst_81 = arith.constant 1.000000e+00 : f32
    %261 = vector.broadcast %cst_81 : f32 to vector<16x64xf32>
    %262 = arith.addf %261, %260 : vector<16x64xf32>
    %263 = arith.divf %261, %262 : vector<16x64xf32>
    %264 = vector.extract_strided_slice %248 {offsets = [0, 640], sizes = [16, 64], strides = [1, 1]} : vector<16x896xf32> to vector<16x64xf32>
    %265 = arith.addf %264, %20 : vector<16x64xf32>
    %266 = vector.extract_strided_slice %248 {offsets = [0, 768], sizes = [16, 64], strides = [1, 1]} : vector<16x896xf32> to vector<16x64xf32>
    %267 = arith.addf %266, %23 : vector<16x64xf32>
    %268 = arith.mulf %256, %267 : vector<16x64xf32>
    %269 = arith.addf %265, %268 : vector<16x64xf32>
    %270 = math.tanh %269 : vector<16x64xf32>
    %cst_82 = arith.constant 1.000000e+00 : f32
    %271 = vector.broadcast %cst_82 : f32 to vector<16x64xf32>
    %272 = arith.subf %271, %263 : vector<16x64xf32>
    %273 = arith.mulf %272, %270 : vector<16x64xf32>
    %274 = arith.mulf %263, %214 : vector<16x64xf32>
    %275 = arith.addf %273, %274 : vector<16x64xf32>
    %c48_83 = arith.constant 48 : index
    %c0_84 = arith.constant 0 : index
    %276 = vector.load %arg27[%c48_83, %c0_84] : memref<128x64xf32, #tpu.memory_space<vmem>>, vector<16x64xf32>
    tpu.vector_store %arg27[%c48_83, %c0_84], %275 {strides = array<i32>} : memref<128x64xf32, #tpu.memory_space<vmem>>, vector<16x64xf32>,
    %c0_85 = arith.constant 0 : index
    %c64_86 = arith.constant 64 : index
    %277 = vector.load %arg28[%c0_85, %c64_86] : memref<16x128xf32, #tpu.memory_space<vmem>>, vector<16x64xf32>
    tpu.vector_store %arg28[%c0_85, %c64_86], %275 {strides = array<i32>} : memref<16x128xf32, #tpu.memory_space<vmem>>, vector<16x64xf32>,
    %c64_87 = arith.constant 64 : index
    %c0_88 = arith.constant 0 : index
    %278 = vector.load %arg26[%c64_87, %c0_88] : memref<128x384xf32, #tpu.memory_space<vmem>>, vector<16x384xf32>
    %279 = vector.extract_strided_slice %278 {offsets = [0, 0], sizes = [16, 64], strides = [1, 1]} : vector<16x384xf32> to vector<16x64xf32>
    %280 = vector.extract_strided_slice %249 {offsets = [0, 0], sizes = [16, 64], strides = [1, 1]} : vector<16x384xf32> to vector<16x64xf32>
    %281 = arith.addf %279, %280 : vector<16x64xf32>
    %282 = arith.negf %281 : vector<16x64xf32>
    %283 = math.exp %282 : vector<16x64xf32>
    %cst_89 = arith.constant 1.000000e+00 : f32
    %284 = vector.broadcast %cst_89 : f32 to vector<16x64xf32>
    %285 = arith.addf %284, %283 : vector<16x64xf32>
    %286 = arith.divf %284, %285 : vector<16x64xf32>
    %287 = vector.extract_strided_slice %278 {offsets = [0, 128], sizes = [16, 64], strides = [1, 1]} : vector<16x384xf32> to vector<16x64xf32>
    %288 = vector.extract_strided_slice %249 {offsets = [0, 128], sizes = [16, 64], strides = [1, 1]} : vector<16x384xf32> to vector<16x64xf32>
    %289 = arith.addf %287, %288 : vector<16x64xf32>
    %290 = arith.negf %289 : vector<16x64xf32>
    %291 = math.exp %290 : vector<16x64xf32>
    %cst_90 = arith.constant 1.000000e+00 : f32
    %292 = vector.broadcast %cst_90 : f32 to vector<16x64xf32>
    %293 = arith.addf %292, %291 : vector<16x64xf32>
    %294 = arith.divf %292, %293 : vector<16x64xf32>
    %295 = vector.extract_strided_slice %278 {offsets = [0, 256], sizes = [16, 64], strides = [1, 1]} : vector<16x384xf32> to vector<16x64xf32>
    %296 = vector.extract_strided_slice %249 {offsets = [0, 256], sizes = [16, 64], strides = [1, 1]} : vector<16x384xf32> to vector<16x64xf32>
    %297 = arith.addf %296, %11 : vector<16x64xf32>
    %298 = arith.mulf %286, %297 : vector<16x64xf32>
    %299 = arith.addf %295, %298 : vector<16x64xf32>
    %300 = math.tanh %299 : vector<16x64xf32>
    %cst_91 = arith.constant 1.000000e+00 : f32
    %301 = vector.broadcast %cst_91 : f32 to vector<16x64xf32>
    %302 = arith.subf %301, %294 : vector<16x64xf32>
    %303 = arith.mulf %302, %300 : vector<16x64xf32>
    %304 = arith.mulf %294, %244 : vector<16x64xf32>
    %305 = arith.addf %303, %304 : vector<16x64xf32>
    %c0_92 = arith.constant 0 : index
    %c0_93 = arith.constant 0 : index
    %306 = vector.load %arg28[%c0_92, %c0_93] : memref<16x128xf32, #tpu.memory_space<vmem>>, vector<16x64xf32>
    tpu.vector_store %arg28[%c0_92, %c0_93], %305 {strides = array<i32>} : memref<16x128xf32, #tpu.memory_space<vmem>>, vector<16x64xf32>,
    %c0_94 = arith.constant 0 : index
    %c0_95 = arith.constant 0 : index
    %307 = vector.load %arg28[%c0_94, %c0_95] : memref<16x128xf32, #tpu.memory_space<vmem>>, vector<16x128xf32>
    %308 = arith.truncf %307 : vector<16x128xf32> to vector<16x128xbf16>
    %cst_96 = arith.constant dense<0.000000e+00> : vector<16x896xf32>
    %309 = tpu.matmul %308, %7, %cst_96 {dimension_numbers = #tpu.dot_dimension_numbers<[1], [0], [0], [1], [0, 0, 1, 1], [], []>} : vector<16x128xbf16>, vector<128x896xbf16>, vector<16x896xf32> -> vector<16x896xf32>
    %310 = vector.extract_strided_slice %309 {offsets = [0, 0], sizes = [16, 384], strides = [1, 1]} : vector<16x896xf32> to vector<16x384xf32>
    %311 = vector.extract_strided_slice %309 {offsets = [0, 384], sizes = [16, 64], strides = [1, 1]} : vector<16x896xf32> to vector<16x64xf32>
    %312 = arith.addf %311, %14 : vector<16x64xf32>
    %313 = arith.negf %312 : vector<16x64xf32>
    %314 = math.exp %313 : vector<16x64xf32>
    %cst_97 = arith.constant 1.000000e+00 : f32
    %315 = vector.broadcast %cst_97 : f32 to vector<16x64xf32>
    %316 = arith.addf %315, %314 : vector<16x64xf32>
    %317 = arith.divf %315, %316 : vector<16x64xf32>
    %318 = vector.extract_strided_slice %309 {offsets = [0, 512], sizes = [16, 64], strides = [1, 1]} : vector<16x896xf32> to vector<16x64xf32>
    %319 = arith.addf %318, %17 : vector<16x64xf32>
    %320 = arith.negf %319 : vector<16x64xf32>
    %321 = math.exp %320 : vector<16x64xf32>
    %cst_98 = arith.constant 1.000000e+00 : f32
    %322 = vector.broadcast %cst_98 : f32 to vector<16x64xf32>
    %323 = arith.addf %322, %321 : vector<16x64xf32>
    %324 = arith.divf %322, %323 : vector<16x64xf32>
    %325 = vector.extract_strided_slice %309 {offsets = [0, 640], sizes = [16, 64], strides = [1, 1]} : vector<16x896xf32> to vector<16x64xf32>
    %326 = arith.addf %325, %20 : vector<16x64xf32>
    %327 = vector.extract_strided_slice %309 {offsets = [0, 768], sizes = [16, 64], strides = [1, 1]} : vector<16x896xf32> to vector<16x64xf32>
    %328 = arith.addf %327, %23 : vector<16x64xf32>
    %329 = arith.mulf %317, %328 : vector<16x64xf32>
    %330 = arith.addf %326, %329 : vector<16x64xf32>
    %331 = math.tanh %330 : vector<16x64xf32>
    %cst_99 = arith.constant 1.000000e+00 : f32
    %332 = vector.broadcast %cst_99 : f32 to vector<16x64xf32>
    %333 = arith.subf %332, %324 : vector<16x64xf32>
    %334 = arith.mulf %333, %331 : vector<16x64xf32>
    %335 = arith.mulf %324, %275 : vector<16x64xf32>
    %336 = arith.addf %334, %335 : vector<16x64xf32>
    %c64_100 = arith.constant 64 : index
    %c0_101 = arith.constant 0 : index
    %337 = vector.load %arg27[%c64_100, %c0_101] : memref<128x64xf32, #tpu.memory_space<vmem>>, vector<16x64xf32>
    tpu.vector_store %arg27[%c64_100, %c0_101], %336 {strides = array<i32>} : memref<128x64xf32, #tpu.memory_space<vmem>>, vector<16x64xf32>,
    %c0_102 = arith.constant 0 : index
    %c64_103 = arith.constant 64 : index
    %338 = vector.load %arg28[%c0_102, %c64_103] : memref<16x128xf32, #tpu.memory_space<vmem>>, vector<16x64xf32>
    tpu.vector_store %arg28[%c0_102, %c64_103], %336 {strides = array<i32>} : memref<16x128xf32, #tpu.memory_space<vmem>>, vector<16x64xf32>,
    %c80 = arith.constant 80 : index
    %c0_104 = arith.constant 0 : index
    %339 = vector.load %arg26[%c80, %c0_104] : memref<128x384xf32, #tpu.memory_space<vmem>>, vector<16x384xf32>
    %340 = vector.extract_strided_slice %339 {offsets = [0, 0], sizes = [16, 64], strides = [1, 1]} : vector<16x384xf32> to vector<16x64xf32>
    %341 = vector.extract_strided_slice %310 {offsets = [0, 0], sizes = [16, 64], strides = [1, 1]} : vector<16x384xf32> to vector<16x64xf32>
    %342 = arith.addf %340, %341 : vector<16x64xf32>
    %343 = arith.negf %342 : vector<16x64xf32>
    %344 = math.exp %343 : vector<16x64xf32>
    %cst_105 = arith.constant 1.000000e+00 : f32
    %345 = vector.broadcast %cst_105 : f32 to vector<16x64xf32>
    %346 = arith.addf %345, %344 : vector<16x64xf32>
    %347 = arith.divf %345, %346 : vector<16x64xf32>
    %348 = vector.extract_strided_slice %339 {offsets = [0, 128], sizes = [16, 64], strides = [1, 1]} : vector<16x384xf32> to vector<16x64xf32>
    %349 = vector.extract_strided_slice %310 {offsets = [0, 128], sizes = [16, 64], strides = [1, 1]} : vector<16x384xf32> to vector<16x64xf32>
    %350 = arith.addf %348, %349 : vector<16x64xf32>
    %351 = arith.negf %350 : vector<16x64xf32>
    %352 = math.exp %351 : vector<16x64xf32>
    %cst_106 = arith.constant 1.000000e+00 : f32
    %353 = vector.broadcast %cst_106 : f32 to vector<16x64xf32>
    %354 = arith.addf %353, %352 : vector<16x64xf32>
    %355 = arith.divf %353, %354 : vector<16x64xf32>
    %356 = vector.extract_strided_slice %339 {offsets = [0, 256], sizes = [16, 64], strides = [1, 1]} : vector<16x384xf32> to vector<16x64xf32>
    %357 = vector.extract_strided_slice %310 {offsets = [0, 256], sizes = [16, 64], strides = [1, 1]} : vector<16x384xf32> to vector<16x64xf32>
    %358 = arith.addf %357, %11 : vector<16x64xf32>
    %359 = arith.mulf %347, %358 : vector<16x64xf32>
    %360 = arith.addf %356, %359 : vector<16x64xf32>
    %361 = math.tanh %360 : vector<16x64xf32>
    %cst_107 = arith.constant 1.000000e+00 : f32
    %362 = vector.broadcast %cst_107 : f32 to vector<16x64xf32>
    %363 = arith.subf %362, %355 : vector<16x64xf32>
    %364 = arith.mulf %363, %361 : vector<16x64xf32>
    %365 = arith.mulf %355, %305 : vector<16x64xf32>
    %366 = arith.addf %364, %365 : vector<16x64xf32>
    %c0_108 = arith.constant 0 : index
    %c0_109 = arith.constant 0 : index
    %367 = vector.load %arg28[%c0_108, %c0_109] : memref<16x128xf32, #tpu.memory_space<vmem>>, vector<16x64xf32>
    tpu.vector_store %arg28[%c0_108, %c0_109], %366 {strides = array<i32>} : memref<16x128xf32, #tpu.memory_space<vmem>>, vector<16x64xf32>,
    %c0_110 = arith.constant 0 : index
    %c0_111 = arith.constant 0 : index
    %368 = vector.load %arg28[%c0_110, %c0_111] : memref<16x128xf32, #tpu.memory_space<vmem>>, vector<16x128xf32>
    %369 = arith.truncf %368 : vector<16x128xf32> to vector<16x128xbf16>
    %cst_112 = arith.constant dense<0.000000e+00> : vector<16x896xf32>
    %370 = tpu.matmul %369, %7, %cst_112 {dimension_numbers = #tpu.dot_dimension_numbers<[1], [0], [0], [1], [0, 0, 1, 1], [], []>} : vector<16x128xbf16>, vector<128x896xbf16>, vector<16x896xf32> -> vector<16x896xf32>
    %371 = vector.extract_strided_slice %370 {offsets = [0, 0], sizes = [16, 384], strides = [1, 1]} : vector<16x896xf32> to vector<16x384xf32>
    %372 = vector.extract_strided_slice %370 {offsets = [0, 384], sizes = [16, 64], strides = [1, 1]} : vector<16x896xf32> to vector<16x64xf32>
    %373 = arith.addf %372, %14 : vector<16x64xf32>
    %374 = arith.negf %373 : vector<16x64xf32>
    %375 = math.exp %374 : vector<16x64xf32>
    %cst_113 = arith.constant 1.000000e+00 : f32
    %376 = vector.broadcast %cst_113 : f32 to vector<16x64xf32>
    %377 = arith.addf %376, %375 : vector<16x64xf32>
    %378 = arith.divf %376, %377 : vector<16x64xf32>
    %379 = vector.extract_strided_slice %370 {offsets = [0, 512], sizes = [16, 64], strides = [1, 1]} : vector<16x896xf32> to vector<16x64xf32>
    %380 = arith.addf %379, %17 : vector<16x64xf32>
    %381 = arith.negf %380 : vector<16x64xf32>
    %382 = math.exp %381 : vector<16x64xf32>
    %cst_114 = arith.constant 1.000000e+00 : f32
    %383 = vector.broadcast %cst_114 : f32 to vector<16x64xf32>
    %384 = arith.addf %383, %382 : vector<16x64xf32>
    %385 = arith.divf %383, %384 : vector<16x64xf32>
    %386 = vector.extract_strided_slice %370 {offsets = [0, 640], sizes = [16, 64], strides = [1, 1]} : vector<16x896xf32> to vector<16x64xf32>
    %387 = arith.addf %386, %20 : vector<16x64xf32>
    %388 = vector.extract_strided_slice %370 {offsets = [0, 768], sizes = [16, 64], strides = [1, 1]} : vector<16x896xf32> to vector<16x64xf32>
    %389 = arith.addf %388, %23 : vector<16x64xf32>
    %390 = arith.mulf %378, %389 : vector<16x64xf32>
    %391 = arith.addf %387, %390 : vector<16x64xf32>
    %392 = math.tanh %391 : vector<16x64xf32>
    %cst_115 = arith.constant 1.000000e+00 : f32
    %393 = vector.broadcast %cst_115 : f32 to vector<16x64xf32>
    %394 = arith.subf %393, %385 : vector<16x64xf32>
    %395 = arith.mulf %394, %392 : vector<16x64xf32>
    %396 = arith.mulf %385, %336 : vector<16x64xf32>
    %397 = arith.addf %395, %396 : vector<16x64xf32>
    %c80_116 = arith.constant 80 : index
    %c0_117 = arith.constant 0 : index
    %398 = vector.load %arg27[%c80_116, %c0_117] : memref<128x64xf32, #tpu.memory_space<vmem>>, vector<16x64xf32>
    tpu.vector_store %arg27[%c80_116, %c0_117], %397 {strides = array<i32>} : memref<128x64xf32, #tpu.memory_space<vmem>>, vector<16x64xf32>,
    %c0_118 = arith.constant 0 : index
    %c64_119 = arith.constant 64 : index
    %399 = vector.load %arg28[%c0_118, %c64_119] : memref<16x128xf32, #tpu.memory_space<vmem>>, vector<16x64xf32>
    tpu.vector_store %arg28[%c0_118, %c64_119], %397 {strides = array<i32>} : memref<16x128xf32, #tpu.memory_space<vmem>>, vector<16x64xf32>,
    %c96 = arith.constant 96 : index
    %c0_120 = arith.constant 0 : index
    %400 = vector.load %arg26[%c96, %c0_120] : memref<128x384xf32, #tpu.memory_space<vmem>>, vector<16x384xf32>
    %401 = vector.extract_strided_slice %400 {offsets = [0, 0], sizes = [16, 64], strides = [1, 1]} : vector<16x384xf32> to vector<16x64xf32>
    %402 = vector.extract_strided_slice %371 {offsets = [0, 0], sizes = [16, 64], strides = [1, 1]} : vector<16x384xf32> to vector<16x64xf32>
    %403 = arith.addf %401, %402 : vector<16x64xf32>
    %404 = arith.negf %403 : vector<16x64xf32>
    %405 = math.exp %404 : vector<16x64xf32>
    %cst_121 = arith.constant 1.000000e+00 : f32
    %406 = vector.broadcast %cst_121 : f32 to vector<16x64xf32>
    %407 = arith.addf %406, %405 : vector<16x64xf32>
    %408 = arith.divf %406, %407 : vector<16x64xf32>
    %409 = vector.extract_strided_slice %400 {offsets = [0, 128], sizes = [16, 64], strides = [1, 1]} : vector<16x384xf32> to vector<16x64xf32>
    %410 = vector.extract_strided_slice %371 {offsets = [0, 128], sizes = [16, 64], strides = [1, 1]} : vector<16x384xf32> to vector<16x64xf32>
    %411 = arith.addf %409, %410 : vector<16x64xf32>
    %412 = arith.negf %411 : vector<16x64xf32>
    %413 = math.exp %412 : vector<16x64xf32>
    %cst_122 = arith.constant 1.000000e+00 : f32
    %414 = vector.broadcast %cst_122 : f32 to vector<16x64xf32>
    %415 = arith.addf %414, %413 : vector<16x64xf32>
    %416 = arith.divf %414, %415 : vector<16x64xf32>
    %417 = vector.extract_strided_slice %400 {offsets = [0, 256], sizes = [16, 64], strides = [1, 1]} : vector<16x384xf32> to vector<16x64xf32>
    %418 = vector.extract_strided_slice %371 {offsets = [0, 256], sizes = [16, 64], strides = [1, 1]} : vector<16x384xf32> to vector<16x64xf32>
    %419 = arith.addf %418, %11 : vector<16x64xf32>
    %420 = arith.mulf %408, %419 : vector<16x64xf32>
    %421 = arith.addf %417, %420 : vector<16x64xf32>
    %422 = math.tanh %421 : vector<16x64xf32>
    %cst_123 = arith.constant 1.000000e+00 : f32
    %423 = vector.broadcast %cst_123 : f32 to vector<16x64xf32>
    %424 = arith.subf %423, %416 : vector<16x64xf32>
    %425 = arith.mulf %424, %422 : vector<16x64xf32>
    %426 = arith.mulf %416, %366 : vector<16x64xf32>
    %427 = arith.addf %425, %426 : vector<16x64xf32>
    %c0_124 = arith.constant 0 : index
    %c0_125 = arith.constant 0 : index
    %428 = vector.load %arg28[%c0_124, %c0_125] : memref<16x128xf32, #tpu.memory_space<vmem>>, vector<16x64xf32>
    tpu.vector_store %arg28[%c0_124, %c0_125], %427 {strides = array<i32>} : memref<16x128xf32, #tpu.memory_space<vmem>>, vector<16x64xf32>,
    %c0_126 = arith.constant 0 : index
    %c0_127 = arith.constant 0 : index
    %429 = vector.load %arg28[%c0_126, %c0_127] : memref<16x128xf32, #tpu.memory_space<vmem>>, vector<16x128xf32>
    %430 = arith.truncf %429 : vector<16x128xf32> to vector<16x128xbf16>
    %cst_128 = arith.constant dense<0.000000e+00> : vector<16x896xf32>
    %431 = tpu.matmul %430, %7, %cst_128 {dimension_numbers = #tpu.dot_dimension_numbers<[1], [0], [0], [1], [0, 0, 1, 1], [], []>} : vector<16x128xbf16>, vector<128x896xbf16>, vector<16x896xf32> -> vector<16x896xf32>
    %432 = vector.extract_strided_slice %431 {offsets = [0, 0], sizes = [16, 384], strides = [1, 1]} : vector<16x896xf32> to vector<16x384xf32>
    %433 = vector.extract_strided_slice %431 {offsets = [0, 384], sizes = [16, 64], strides = [1, 1]} : vector<16x896xf32> to vector<16x64xf32>
    %434 = arith.addf %433, %14 : vector<16x64xf32>
    %435 = arith.negf %434 : vector<16x64xf32>
    %436 = math.exp %435 : vector<16x64xf32>
    %cst_129 = arith.constant 1.000000e+00 : f32
    %437 = vector.broadcast %cst_129 : f32 to vector<16x64xf32>
    %438 = arith.addf %437, %436 : vector<16x64xf32>
    %439 = arith.divf %437, %438 : vector<16x64xf32>
    %440 = vector.extract_strided_slice %431 {offsets = [0, 512], sizes = [16, 64], strides = [1, 1]} : vector<16x896xf32> to vector<16x64xf32>
    %441 = arith.addf %440, %17 : vector<16x64xf32>
    %442 = arith.negf %441 : vector<16x64xf32>
    %443 = math.exp %442 : vector<16x64xf32>
    %cst_130 = arith.constant 1.000000e+00 : f32
    %444 = vector.broadcast %cst_130 : f32 to vector<16x64xf32>
    %445 = arith.addf %444, %443 : vector<16x64xf32>
    %446 = arith.divf %444, %445 : vector<16x64xf32>
    %447 = vector.extract_strided_slice %431 {offsets = [0, 640], sizes = [16, 64], strides = [1, 1]} : vector<16x896xf32> to vector<16x64xf32>
    %448 = arith.addf %447, %20 : vector<16x64xf32>
    %449 = vector.extract_strided_slice %431 {offsets = [0, 768], sizes = [16, 64], strides = [1, 1]} : vector<16x896xf32> to vector<16x64xf32>
    %450 = arith.addf %449, %23 : vector<16x64xf32>
    %451 = arith.mulf %439, %450 : vector<16x64xf32>
    %452 = arith.addf %448, %451 : vector<16x64xf32>
    %453 = math.tanh %452 : vector<16x64xf32>
    %cst_131 = arith.constant 1.000000e+00 : f32
    %454 = vector.broadcast %cst_131 : f32 to vector<16x64xf32>
    %455 = arith.subf %454, %446 : vector<16x64xf32>
    %456 = arith.mulf %455, %453 : vector<16x64xf32>
    %457 = arith.mulf %446, %397 : vector<16x64xf32>
    %458 = arith.addf %456, %457 : vector<16x64xf32>
    %c96_132 = arith.constant 96 : index
    %c0_133 = arith.constant 0 : index
    %459 = vector.load %arg27[%c96_132, %c0_133] : memref<128x64xf32, #tpu.memory_space<vmem>>, vector<16x64xf32>
    tpu.vector_store %arg27[%c96_132, %c0_133], %458 {strides = array<i32>} : memref<128x64xf32, #tpu.memory_space<vmem>>, vector<16x64xf32>,
    %c0_134 = arith.constant 0 : index
    %c64_135 = arith.constant 64 : index
    %460 = vector.load %arg28[%c0_134, %c64_135] : memref<16x128xf32, #tpu.memory_space<vmem>>, vector<16x64xf32>
    tpu.vector_store %arg28[%c0_134, %c64_135], %458 {strides = array<i32>} : memref<16x128xf32, #tpu.memory_space<vmem>>, vector<16x64xf32>,
    %c112 = arith.constant 112 : index
    %c0_136 = arith.constant 0 : index
    %461 = vector.load %arg26[%c112, %c0_136] : memref<128x384xf32, #tpu.memory_space<vmem>>, vector<16x384xf32>
    %462 = vector.extract_strided_slice %461 {offsets = [0, 0], sizes = [16, 64], strides = [1, 1]} : vector<16x384xf32> to vector<16x64xf32>
    %463 = vector.extract_strided_slice %432 {offsets = [0, 0], sizes = [16, 64], strides = [1, 1]} : vector<16x384xf32> to vector<16x64xf32>
    %464 = arith.addf %462, %463 : vector<16x64xf32>
    %465 = arith.negf %464 : vector<16x64xf32>
    %466 = math.exp %465 : vector<16x64xf32>
    %cst_137 = arith.constant 1.000000e+00 : f32
    %467 = vector.broadcast %cst_137 : f32 to vector<16x64xf32>
    %468 = arith.addf %467, %466 : vector<16x64xf32>
    %469 = arith.divf %467, %468 : vector<16x64xf32>
    %470 = vector.extract_strided_slice %461 {offsets = [0, 128], sizes = [16, 64], strides = [1, 1]} : vector<16x384xf32> to vector<16x64xf32>
    %471 = vector.extract_strided_slice %432 {offsets = [0, 128], sizes = [16, 64], strides = [1, 1]} : vector<16x384xf32> to vector<16x64xf32>
    %472 = arith.addf %470, %471 : vector<16x64xf32>
    %473 = arith.negf %472 : vector<16x64xf32>
    %474 = math.exp %473 : vector<16x64xf32>
    %cst_138 = arith.constant 1.000000e+00 : f32
    %475 = vector.broadcast %cst_138 : f32 to vector<16x64xf32>
    %476 = arith.addf %475, %474 : vector<16x64xf32>
    %477 = arith.divf %475, %476 : vector<16x64xf32>
    %478 = vector.extract_strided_slice %461 {offsets = [0, 256], sizes = [16, 64], strides = [1, 1]} : vector<16x384xf32> to vector<16x64xf32>
    %479 = vector.extract_strided_slice %432 {offsets = [0, 256], sizes = [16, 64], strides = [1, 1]} : vector<16x384xf32> to vector<16x64xf32>
    %480 = arith.addf %479, %11 : vector<16x64xf32>
    %481 = arith.mulf %469, %480 : vector<16x64xf32>
    %482 = arith.addf %478, %481 : vector<16x64xf32>
    %483 = math.tanh %482 : vector<16x64xf32>
    %cst_139 = arith.constant 1.000000e+00 : f32
    %484 = vector.broadcast %cst_139 : f32 to vector<16x64xf32>
    %485 = arith.subf %484, %477 : vector<16x64xf32>
    %486 = arith.mulf %485, %483 : vector<16x64xf32>
    %487 = arith.mulf %477, %427 : vector<16x64xf32>
    %488 = arith.addf %486, %487 : vector<16x64xf32>
    %c0_140 = arith.constant 0 : index
    %c0_141 = arith.constant 0 : index
    %489 = vector.load %arg28[%c0_140, %c0_141] : memref<16x128xf32, #tpu.memory_space<vmem>>, vector<16x64xf32>
    tpu.vector_store %arg28[%c0_140, %c0_141], %488 {strides = array<i32>} : memref<16x128xf32, #tpu.memory_space<vmem>>, vector<16x64xf32>,
    %c0_142 = arith.constant 0 : index
    %c0_143 = arith.constant 0 : index
    %490 = vector.load %arg28[%c0_142, %c0_143] : memref<16x128xf32, #tpu.memory_space<vmem>>, vector<16x128xf32>
    %491 = arith.truncf %490 : vector<16x128xf32> to vector<16x128xbf16>
    %cst_144 = arith.constant dense<0.000000e+00> : vector<16x896xf32>
    %492 = tpu.matmul %491, %7, %cst_144 {dimension_numbers = #tpu.dot_dimension_numbers<[1], [0], [0], [1], [0, 0, 1, 1], [], []>} : vector<16x128xbf16>, vector<128x896xbf16>, vector<16x896xf32> -> vector<16x896xf32>
    %493 = vector.extract_strided_slice %492 {offsets = [0, 384], sizes = [16, 64], strides = [1, 1]} : vector<16x896xf32> to vector<16x64xf32>
    %494 = arith.addf %493, %14 : vector<16x64xf32>
    %495 = arith.negf %494 : vector<16x64xf32>
    %496 = math.exp %495 : vector<16x64xf32>
    %cst_145 = arith.constant 1.000000e+00 : f32
    %497 = vector.broadcast %cst_145 : f32 to vector<16x64xf32>
    %498 = arith.addf %497, %496 : vector<16x64xf32>
    %499 = arith.divf %497, %498 : vector<16x64xf32>
    %500 = vector.extract_strided_slice %492 {offsets = [0, 512], sizes = [16, 64], strides = [1, 1]} : vector<16x896xf32> to vector<16x64xf32>
    %501 = arith.addf %500, %17 : vector<16x64xf32>
    %502 = arith.negf %501 : vector<16x64xf32>
    %503 = math.exp %502 : vector<16x64xf32>
    %cst_146 = arith.constant 1.000000e+00 : f32
    %504 = vector.broadcast %cst_146 : f32 to vector<16x64xf32>
    %505 = arith.addf %504, %503 : vector<16x64xf32>
    %506 = arith.divf %504, %505 : vector<16x64xf32>
    %507 = vector.extract_strided_slice %492 {offsets = [0, 640], sizes = [16, 64], strides = [1, 1]} : vector<16x896xf32> to vector<16x64xf32>
    %508 = arith.addf %507, %20 : vector<16x64xf32>
    %509 = vector.extract_strided_slice %492 {offsets = [0, 768], sizes = [16, 64], strides = [1, 1]} : vector<16x896xf32> to vector<16x64xf32>
    %510 = arith.addf %509, %23 : vector<16x64xf32>
    %511 = arith.mulf %499, %510 : vector<16x64xf32>
    %512 = arith.addf %508, %511 : vector<16x64xf32>
    %513 = math.tanh %512 : vector<16x64xf32>
    %cst_147 = arith.constant 1.000000e+00 : f32
    %514 = vector.broadcast %cst_147 : f32 to vector<16x64xf32>
    %515 = arith.subf %514, %506 : vector<16x64xf32>
    %516 = arith.mulf %515, %513 : vector<16x64xf32>
    %517 = arith.mulf %506, %458 : vector<16x64xf32>
    %518 = arith.addf %516, %517 : vector<16x64xf32>
    %c112_148 = arith.constant 112 : index
    %c0_149 = arith.constant 0 : index
    %519 = vector.load %arg27[%c112_148, %c0_149] : memref<128x64xf32, #tpu.memory_space<vmem>>, vector<16x64xf32>
    tpu.vector_store %arg27[%c112_148, %c0_149], %518 {strides = array<i32>} : memref<128x64xf32, #tpu.memory_space<vmem>>, vector<16x64xf32>,
    %c0_150 = arith.constant 0 : index
    %c0_151 = arith.constant 0 : index
    %520 = vector.load %arg27[%c0_150, %c0_151] : memref<128x64xf32, #tpu.memory_space<vmem>>, vector<128x64xf32>
    %c0_152 = arith.constant 0 : index
    %c0_153 = arith.constant 0 : index
    %521 = vector.load %arg8[%c0_152, %c0_153] : memref<64x64xf32, #tpu.memory_space<vmem>>, vector<64x64xf32>
    %cst_154 = arith.constant dense<0.000000e+00> : vector<128x64xf32>
    %522 = tpu.matmul %520, %521, %cst_154 {dimension_numbers = #tpu.dot_dimension_numbers<[1], [0], [0], [1], [0, 0, 1, 1], [], []>} : vector<128x64xf32>, vector<64x64xf32>, vector<128x64xf32> -> vector<128x64xf32>
    %c0_155 = arith.constant 0 : index
    %c0_156 = arith.constant 0 : index
    %523 = vector.load %arg9[%c0_155, %c0_156] : memref<1x64xf32, #tpu.memory_space<vmem>>, vector<1x64xf32>
    %524 = vector.broadcast %523 : vector<1x64xf32> to vector<128x64xf32>
    %525 = arith.addf %522, %524 : vector<128x64xf32>
    %c0_157 = arith.constant 0 : index
    %c0_158 = arith.constant 0 : index
    %526 = vector.load %arg10[%c0_157, %c0_158] : memref<1x1xf32, #tpu.memory_space<vmem>>, vector<1x1xf32>
    %cst_159 = arith.constant 0.000000e+00 : f32
    %527 = vector.broadcast %cst_159 : f32 to vector<128x64xf32>
    %528 = arith.cmpf ogt, %525, %527 : vector<128x64xf32>
    %529 = vector.broadcast %526 : vector<1x1xf32> to vector<128x64xf32>
    %530 = arith.mulf %529, %525 : vector<128x64xf32>
    %531 = arith.select %528, %525, %530 : vector<128x64xi1>, vector<128x64xf32>
    %c0_160 = arith.constant 0 : index
    %c0_161 = arith.constant 0 : index
    %532 = vector.load %arg11[%c0_160, %c0_161] : memref<64x64xf32, #tpu.memory_space<vmem>>, vector<64x64xf32>
    %cst_162 = arith.constant dense<0.000000e+00> : vector<128x64xf32>
    %533 = tpu.matmul %531, %532, %cst_162 {dimension_numbers = #tpu.dot_dimension_numbers<[1], [0], [0], [1], [0, 0, 1, 1], [], []>} : vector<128x64xf32>, vector<64x64xf32>, vector<128x64xf32> -> vector<128x64xf32>
    %c0_163 = arith.constant 0 : index
    %c0_164 = arith.constant 0 : index
    %534 = vector.load %arg12[%c0_163, %c0_164] : memref<1x64xf32, #tpu.memory_space<vmem>>, vector<1x64xf32>
    %535 = vector.broadcast %534 : vector<1x64xf32> to vector<128x64xf32>
    %536 = arith.addf %533, %535 : vector<128x64xf32>
    %c0_165 = arith.constant 0 : index
    %c0_166 = arith.constant 0 : index
    %537 = vector.load %arg13[%c0_165, %c0_166] : memref<1x1xf32, #tpu.memory_space<vmem>>, vector<1x1xf32>
    %cst_167 = arith.constant 0.000000e+00 : f32
    %538 = vector.broadcast %cst_167 : f32 to vector<128x64xf32>
    %539 = arith.cmpf ogt, %536, %538 : vector<128x64xf32>
    %540 = vector.broadcast %537 : vector<1x1xf32> to vector<128x64xf32>
    %541 = arith.mulf %540, %536 : vector<128x64xf32>
    %542 = arith.select %539, %536, %541 : vector<128x64xi1>, vector<128x64xf32>
    %c0_168 = arith.constant 0 : index
    %c0_169 = arith.constant 0 : index
    %543 = vector.load %arg14[%c0_168, %c0_169] : memref<64x32xf32, #tpu.memory_space<vmem>>, vector<64x32xf32>
    %cst_170 = arith.constant dense<0.000000e+00> : vector<128x32xf32>
    %544 = tpu.matmul %542, %543, %cst_170 {dimension_numbers = #tpu.dot_dimension_numbers<[1], [0], [0], [1], [0, 0, 1, 1], [], []>} : vector<128x64xf32>, vector<64x32xf32>, vector<128x32xf32> -> vector<128x32xf32>
    %c0_171 = arith.constant 0 : index
    %c0_172 = arith.constant 0 : index
    %545 = vector.load %arg15[%c0_171, %c0_172] : memref<1x32xf32, #tpu.memory_space<vmem>>, vector<1x32xf32>
    %546 = vector.broadcast %545 : vector<1x32xf32> to vector<128x32xf32>
    %547 = arith.addf %544, %546 : vector<128x32xf32>
    %548 = vector.extract_strided_slice %547 {offsets = [0, 0], sizes = [128, 16], strides = [1, 1]} : vector<128x32xf32> to vector<128x16xf32>
    %549 = vector.extract_strided_slice %547 {offsets = [0, 16], sizes = [128, 16], strides = [1, 1]} : vector<128x32xf32> to vector<128x16xf32>
    %c0_173 = arith.constant 0 : index
    %c0_174 = arith.constant 0 : index
    %550 = vector.load %arg3[%c0_173, %c0_174] : memref<128x16xf32, #tpu.memory_space<vmem>>, vector<128x16xf32>
    %cst_175 = arith.constant 5.000000e-01 : f32
    %551 = vector.broadcast %cst_175 : f32 to vector<128x16xf32>
    %552 = arith.mulf %551, %549 : vector<128x16xf32>
    %553 = math.exp %552 : vector<128x16xf32>
    %554 = arith.mulf %550, %553 : vector<128x16xf32>
    %555 = arith.addf %548, %554 : vector<128x16xf32>
    %c0_176 = arith.constant 0 : index
    %c0_177 = arith.constant 0 : index
    %556 = vector.load %arg16[%c0_176, %c0_177] : memref<16x64xf32, #tpu.memory_space<vmem>>, vector<16x64xf32>
    %cst_178 = arith.constant dense<0.000000e+00> : vector<128x64xf32>
    %557 = tpu.matmul %555, %556, %cst_178 {dimension_numbers = #tpu.dot_dimension_numbers<[1], [0], [0], [1], [0, 0, 1, 1], [], []>} : vector<128x16xf32>, vector<16x64xf32>, vector<128x64xf32> -> vector<128x64xf32>
    %c0_179 = arith.constant 0 : index
    %c0_180 = arith.constant 0 : index
    %558 = vector.load %arg17[%c0_179, %c0_180] : memref<1x64xf32, #tpu.memory_space<vmem>>, vector<1x64xf32>
    %559 = vector.broadcast %558 : vector<1x64xf32> to vector<128x64xf32>
    %560 = arith.addf %557, %559 : vector<128x64xf32>
    %c0_181 = arith.constant 0 : index
    %c0_182 = arith.constant 0 : index
    %561 = vector.load %arg18[%c0_181, %c0_182] : memref<1x1xf32, #tpu.memory_space<vmem>>, vector<1x1xf32>
    %cst_183 = arith.constant 0.000000e+00 : f32
    %562 = vector.broadcast %cst_183 : f32 to vector<128x64xf32>
    %563 = arith.cmpf ogt, %560, %562 : vector<128x64xf32>
    %564 = vector.broadcast %561 : vector<1x1xf32> to vector<128x64xf32>
    %565 = arith.mulf %564, %560 : vector<128x64xf32>
    %566 = arith.select %563, %560, %565 : vector<128x64xi1>, vector<128x64xf32>
    %c0_184 = arith.constant 0 : index
    %c0_185 = arith.constant 0 : index
    %567 = vector.load %arg19[%c0_184, %c0_185] : memref<64x64xf32, #tpu.memory_space<vmem>>, vector<64x64xf32>
    %cst_186 = arith.constant dense<0.000000e+00> : vector<128x64xf32>
    %568 = tpu.matmul %566, %567, %cst_186 {dimension_numbers = #tpu.dot_dimension_numbers<[1], [0], [0], [1], [0, 0, 1, 1], [], []>} : vector<128x64xf32>, vector<64x64xf32>, vector<128x64xf32> -> vector<128x64xf32>
    %c0_187 = arith.constant 0 : index
    %c0_188 = arith.constant 0 : index
    %569 = vector.load %arg20[%c0_187, %c0_188] : memref<1x64xf32, #tpu.memory_space<vmem>>, vector<1x64xf32>
    %570 = vector.broadcast %569 : vector<1x64xf32> to vector<128x64xf32>
    %571 = arith.addf %568, %570 : vector<128x64xf32>
    %c0_189 = arith.constant 0 : index
    %c0_190 = arith.constant 0 : index
    %572 = vector.load %arg21[%c0_189, %c0_190] : memref<1x1xf32, #tpu.memory_space<vmem>>, vector<1x1xf32>
    %cst_191 = arith.constant 0.000000e+00 : f32
    %573 = vector.broadcast %cst_191 : f32 to vector<128x64xf32>
    %574 = arith.cmpf ogt, %571, %573 : vector<128x64xf32>
    %575 = vector.broadcast %572 : vector<1x1xf32> to vector<128x64xf32>
    %576 = arith.mulf %575, %571 : vector<128x64xf32>
    %577 = arith.select %574, %571, %576 : vector<128x64xi1>, vector<128x64xf32>
    %c0_192 = arith.constant 0 : index
    %c0_193 = arith.constant 0 : index
    %578 = vector.load %arg22[%c0_192, %c0_193] : memref<64x16xf32, #tpu.memory_space<vmem>>, vector<64x16xf32>
    %cst_194 = arith.constant dense<0.000000e+00> : vector<128x16xf32>
    %579 = tpu.matmul %577, %578, %cst_194 {dimension_numbers = #tpu.dot_dimension_numbers<[1], [0], [0], [1], [0, 0, 1, 1], [], []>} : vector<128x64xf32>, vector<64x16xf32>, vector<128x16xf32> -> vector<128x16xf32>
    %c0_195 = arith.constant 0 : index
    %c0_196 = arith.constant 0 : index
    %580 = vector.load %arg23[%c0_195, %c0_196] : memref<1x16xf32, #tpu.memory_space<vmem>>, vector<1x16xf32>
    %581 = vector.broadcast %580 : vector<1x16xf32> to vector<128x16xf32>
    %582 = arith.addf %579, %581 : vector<128x16xf32>
    %583 = arith.negf %582 : vector<128x16xf32>
    %584 = math.exp %583 : vector<128x16xf32>
    %cst_197 = arith.constant 1.000000e+00 : f32
    %585 = vector.broadcast %cst_197 : f32 to vector<128x16xf32>
    %586 = arith.addf %585, %584 : vector<128x16xf32>
    %587 = arith.divf %585, %586 : vector<128x16xf32>
    %c0_198 = arith.constant 0 : index
    %c0_199 = arith.constant 0 : index
    %588 = vector.load %arg24[%c0_198, %c0_199] : memref<128x16xf32, #tpu.memory_space<vmem>>, vector<128x16xf32>
    tpu.vector_store %arg24[%c0_198, %c0_199], %587 {strides = array<i32>} : memref<128x16xf32, #tpu.memory_space<vmem>>, vector<128x16xf32>,
    %c0_200 = arith.constant 0 : index
    %c0_201 = arith.constant 0 : index
    %589 = vector.load %arg25[%c0_200, %c0_201] : memref<128x32xf32, #tpu.memory_space<vmem>>, vector<128x32xf32>
    tpu.vector_store %arg25[%c0_200, %c0_201], %547 {strides = array<i32>} : memref<128x32xf32, #tpu.memory_space<vmem>>, vector<128x32xf32>,
    return
  }
  func.func @transform_0(%arg0: i32) -> (i32, i32) {
    %c0_i32 = arith.constant 0 : i32
    %c0_i32_0 = arith.constant 0 : i32
    return %arg0, %c0_i32 : i32, i32
  }
  func.func @transform_1(%arg0: i32) -> (i32, i32, i32) {
    %c0_i32 = arith.constant 0 : i32
    %c0_i32_0 = arith.constant 0 : i32
    %c0_i32_1 = arith.constant 0 : i32
    return %c0_i32, %arg0, %c0_i32_0 : i32, i32, i32
  }
  func.func @transform_2(%arg0: i32) -> (i32, i32) {
    %c0_i32 = arith.constant 0 : i32
    %c0_i32_0 = arith.constant 0 : i32
    return %arg0, %c0_i32 : i32, i32
  }
  func.func @transform_3(%arg0: i32) -> (i32, i32) {
    %c0_i32 = arith.constant 0 : i32
    %c0_i32_0 = arith.constant 0 : i32
    %c0_i32_1 = arith.constant 0 : i32
    return %c0_i32, %c0_i32_0 : i32, i32
  }
  func.func @transform_4(%arg0: i32) -> (i32, i32) {
    %c0_i32 = arith.constant 0 : i32
    %c0_i32_0 = arith.constant 0 : i32
    %c0_i32_1 = arith.constant 0 : i32
    return %c0_i32, %c0_i32_0 : i32, i32
  }
  func.func @transform_5(%arg0: i32) -> (i32, i32) {
    %c0_i32 = arith.constant 0 : i32
    %c0_i32_0 = arith.constant 0 : i32
    %c0_i32_1 = arith.constant 0 : i32
    return %c0_i32, %c0_i32_0 : i32, i32
  }
  func.func @transform_6(%arg0: i32) -> (i32, i32) {
    %c0_i32 = arith.constant 0 : i32
    %c0_i32_0 = arith.constant 0 : i32
    %c0_i32_1 = arith.constant 0 : i32
    return %c0_i32, %c0_i32_0 : i32, i32
  }
  func.func @transform_7(%arg0: i32) -> (i32, i32) {
    %c0_i32 = arith.constant 0 : i32
    %c0_i32_0 = arith.constant 0 : i32
    %c0_i32_1 = arith.constant 0 : i32
    return %c0_i32, %c0_i32_0 : i32, i32
  }
  func.func @transform_8(%arg0: i32) -> (i32, i32) {
    %c0_i32 = arith.constant 0 : i32
    %c0_i32_0 = arith.constant 0 : i32
    %c0_i32_1 = arith.constant 0 : i32
    return %c0_i32, %c0_i32_0 : i32, i32
  }
  func.func @transform_9(%arg0: i32) -> (i32, i32) {
    %c0_i32 = arith.constant 0 : i32
    %c0_i32_0 = arith.constant 0 : i32
    %c0_i32_1 = arith.constant 0 : i32
    return %c0_i32, %c0_i32_0 : i32, i32
  }
  func.func @transform_10(%arg0: i32) -> (i32, i32) {
    %c0_i32 = arith.constant 0 : i32
    %c0_i32_0 = arith.constant 0 : i32
    %c0_i32_1 = arith.constant 0 : i32
    return %c0_i32, %c0_i32_0 : i32, i32
  }
  func.func @transform_11(%arg0: i32) -> (i32, i32) {
    %c0_i32 = arith.constant 0 : i32
    %c0_i32_0 = arith.constant 0 : i32
    %c0_i32_1 = arith.constant 0 : i32
    return %c0_i32, %c0_i32_0 : i32, i32
  }
  func.func @transform_12(%arg0: i32) -> (i32, i32) {
    %c0_i32 = arith.constant 0 : i32
    %c0_i32_0 = arith.constant 0 : i32
    %c0_i32_1 = arith.constant 0 : i32
    return %c0_i32, %c0_i32_0 : i32, i32
  }
  func.func @transform_13(%arg0: i32) -> (i32, i32) {
    %c0_i32 = arith.constant 0 : i32
    %c0_i32_0 = arith.constant 0 : i32
    %c0_i32_1 = arith.constant 0 : i32
    return %c0_i32, %c0_i32_0 : i32, i32
  }
  func.func @transform_14(%arg0: i32) -> (i32, i32) {
    %c0_i32 = arith.constant 0 : i32
    %c0_i32_0 = arith.constant 0 : i32
    %c0_i32_1 = arith.constant 0 : i32
    return %c0_i32, %c0_i32_0 : i32, i32
  }
  func.func @transform_15(%arg0: i32) -> (i32, i32) {
    %c0_i32 = arith.constant 0 : i32
    %c0_i32_0 = arith.constant 0 : i32
    %c0_i32_1 = arith.constant 0 : i32
    return %c0_i32, %c0_i32_0 : i32, i32
  }
  func.func @transform_16(%arg0: i32) -> (i32, i32) {
    %c0_i32 = arith.constant 0 : i32
    %c0_i32_0 = arith.constant 0 : i32
    %c0_i32_1 = arith.constant 0 : i32
    return %c0_i32, %c0_i32_0 : i32, i32
  }
  func.func @transform_17(%arg0: i32) -> (i32, i32) {
    %c0_i32 = arith.constant 0 : i32
    %c0_i32_0 = arith.constant 0 : i32
    %c0_i32_1 = arith.constant 0 : i32
    return %c0_i32, %c0_i32_0 : i32, i32
  }
  func.func @transform_18(%arg0: i32) -> (i32, i32) {
    %c0_i32 = arith.constant 0 : i32
    %c0_i32_0 = arith.constant 0 : i32
    %c0_i32_1 = arith.constant 0 : i32
    return %c0_i32, %c0_i32_0 : i32, i32
  }
  func.func @transform_19(%arg0: i32) -> (i32, i32) {
    %c0_i32 = arith.constant 0 : i32
    %c0_i32_0 = arith.constant 0 : i32
    %c0_i32_1 = arith.constant 0 : i32
    return %c0_i32, %c0_i32_0 : i32, i32
  }
  func.func @transform_20(%arg0: i32) -> (i32, i32) {
    %c0_i32 = arith.constant 0 : i32
    %c0_i32_0 = arith.constant 0 : i32
    %c0_i32_1 = arith.constant 0 : i32
    return %c0_i32, %c0_i32_0 : i32, i32
  }
  func.func @transform_21(%arg0: i32) -> (i32, i32) {
    %c0_i32 = arith.constant 0 : i32
    %c0_i32_0 = arith.constant 0 : i32
    %c0_i32_1 = arith.constant 0 : i32
    return %c0_i32, %c0_i32_0 : i32, i32
  }
  func.func @transform_22(%arg0: i32) -> (i32, i32) {
    %c0_i32 = arith.constant 0 : i32
    %c0_i32_0 = arith.constant 0 : i32
    %c0_i32_1 = arith.constant 0 : i32
    return %c0_i32, %c0_i32_0 : i32, i32
  }
  func.func @transform_23(%arg0: i32) -> (i32, i32) {
    %c0_i32 = arith.constant 0 : i32
    %c0_i32_0 = arith.constant 0 : i32
    return %arg0, %c0_i32 : i32, i32
  }
  func.func @transform_24(%arg0: i32) -> (i32, i32) {
    %c0_i32 = arith.constant 0 : i32
    %c0_i32_0 = arith.constant 0 : i32
    return %arg0, %c0_i32 : i32, i32
  }
}

</mosaic_0001>

<bundles_post_ra>
// kernel: omni_anomaly_forward.1
= control target key start
LH: loop header
LB: loop body
LE: loop exit
PB: predicated region body
PF: predicated region fallthrough
CT: control target
= control target key end

     0   :  { %vm114_vm0 = vcmask 130048   ;;  %vm481_vm1 = vcmask 523264   ;;  %vm492_vm2 = vcmask 1048064   ;;  %s5727_s29 = smov 112   ;;  %s8677_s1 = inlined_call_operand.vmem [shape: f32[2,16,64], index: 1, kind: input, shape index: {}]   ;;  %s8678_s3 = inlined_call_operand.vmem [shape: f32[16,384], index: 3, kind: input, shape index: {}]   ;;  %s8679_s0 = inlined_call_operand.vmem [shape: f32[128,16], index: 0, kind: input, shape index: {}]   ;;  %s8680_s5 = inlined_call_operand.vmem [shape: bf16[128,896], index: 5, kind: input, shape index: {}]   ;;  %s8681_s4 = inlined_call_operand.vmem [shape: f32[1,384], index: 4, kind: input, shape index: {}]   ;;  %s8682_s6 = inlined_call_operand.vmem [shape: f32[8,64], index: 6, kind: input, shape index: {}]   ;;  %s8683_s7 = inlined_call_operand.vmem [shape: f32[64,64], index: 7, kind: input, shape index: {}]   ;;  %s8684_s9 = inlined_call_operand.<no memory space> [shape: f32[1,1], index: 9, kind: input, shape index: {}]   ;;  %s8685_s8 = inlined_call_operand.vmem [shape: f32[1,64], index: 8, kind: input, shape index: {}]   ;;  %s8686_s10 = inlined_call_operand.vmem [shape: f32[64,64], index: 10, kind: input, shape index: {}]   ;;  %s8687_s11 = inlined_call_operand.vmem [shape: f32[1,64], index: 11, kind: input, shape index: {}]   ;;  %s8688_s12 = inlined_call_operand.<no memory space> [shape: f32[1,1], index: 12, kind: input, shape index: {}]   ;;  %s8689_s13 = inlined_call_operand.vmem [shape: f32[64,32], index: 13, kind: input, shape index: {}]   ;;  %s8690_s14 = inlined_call_operand.vmem [shape: f32[1,32], index: 14, kind: input, shape index: {}]   ;;  %s8691_s24 = inlined_call_operand.vmem [shape: f32[128,32], index: 24, kind: output, shape index: {1}]   ;;  %s8692_s17 = inlined_call_operand.<no memory space> [shape: f32[1,1], index: 17, kind: input, shape index: {}]   ;;  %s8693_s15 = inlined_call_operand.vmem [shape: f32[16,64], index: 15, kind: input, shape index: {}]   ;;  %s8694_s16 = inlined_call_operand.vmem [shape: f32[1,64], index: 16, kind: input, shape index: {}]   ;;  %s8695_s2 = inlined_call_operand.vmem [shape: f32[128,16], index: 2, kind: input, shape index: {}]   ;;  %s8696_s20 = inlined_call_operand.<no memory space> [shape: f32[1,1], index: 20, kind: input, shape index: {}]   ;;  %s8697_s18 = inlined_call_operand.vmem [shape: f32[64,64], index: 18, kind: input, shape index: {}]   ;;  %s8698_s19 = inlined_call_operand.vmem [shape: f32[1,64], index: 19, kind: input, shape index: {}]   ;;  %s8699_s21 = inlined_call_operand.vmem [shape: f32[64,16], index: 21, kind: input, shape index: {}]   ;;  %s8700_s22 = inlined_call_operand.vmem [shape: f32[1,16], index: 22, kind: input, shape index: {}]   ;;  %s8701_s23 = inlined_call_operand.vmem [shape: f32[128,16], index: 23, kind: output, shape index: {0}]  }
   0x1   :  { %8798 = sst [smem:[#allocation83_spill]] %s8677_s1 }
   0x2   :  { %8799 = sst [smem:[#allocation84_spill]] %s8678_s3 }
   0x3   :  { %8800 = sst [smem:[#allocation85_spill]] %s8679_s0  ;;  %s5725_s0 = smov 64  }
   0x4   :  { %8801 = sst [smem:[#allocation86_spill]] %s8680_s5 }
   0x5   :  { %8802 = sst [smem:[#allocation87_spill]] %s8681_s4 }
   0x6   :  { %8803 = sst [smem:[#allocation88_spill]] %s8682_s6 }
   0x7   :  { %8804 = sst [smem:[#allocation89_spill]] %s8683_s7 }
   0x8   :  { %8805 = sst [smem:[#allocation90_spill]] %s8684_s9 }
   0x9   :  { %8806 = sst [smem:[#allocation91_spill]] %s8685_s8 }
   0xa   :  { %8807 = sst [smem:[#allocation92_spill]] %s8694_s16 }
   0xb   :  { %s8808_s27 = sld [smem:[#allocation83_spill]] }
   0xc   :  { %s8809_s16 = sld [smem:[#allocation84_spill]] }
   0xd   :  { %s8810_s5 = sld [smem:[#allocation85_spill]] }
   0xe   :  { %s8811_s4 = sld [smem:[#allocation86_spill]] }
   0xf   :  { %s8837_s3 = sld [smem:[#allocation87_spill]] }
  0x10   :  { %s9152_s8 = sld [smem:[#allocation89_spill]] }
  0x11   :  { %v4829_v0 = vld [vmem:[%s8808_s27 + $0x10] sm:$0xff]  ;;  %v4830_v9 = vld [vmem:[%s8808_s27 + $0x18] sm:$0xff]  ;;  %v6035_v46 = vld [vmem:[%s8808_s27] sm:$0xff]  ;;  %s9154_s6 = sld [smem:[#allocation91_spill]] }
  0x12   :  { %v104_v1 = vld [vmem:[%s8809_s16 + $0x20] sm:$0xff]  ;;  %486 = vrot.lane.b32.xlu0 %v4829_v0, %s5725_s0  ;;  %v101_v2 = vld [vmem:[%s8809_s16 + $0x8] sm:$0xff]  ;;  %v103_v13 = vld [vmem:[%s8809_s16 + $0x18] sm:$0xff]  ;;  %482 = vst.msk [vmem:[#allocation4] sm:$0xff] %vm481_vm1, %v6035_v46 }
  0x13   :  { %5289 = vmatpush.msra.mxu3 %v104_v1  ;;  %v5866_v3 = vld [vmem:[%s8810_s5 + $0x40] sm:$0xff]  ;;  %242 = vmatpush.msra.mxu1 %v104_v1  ;;  %v5902_v14 = vld [vmem:[%s8810_s5 + $0x48] sm:$0xff]  ;;  %v5959_v31 = vld [vmem:[%s8810_s5 + $0x50] sm:$0xff] }
  0x14   :  { %v4917_v4 = vld [vmem:[%s8811_s4 + $0x188] sm:$0xf]  ;;  %v5283_v5 = vld [vmem:[%s8811_s4 + $0x1a0] sm:$0xf0]  ;;  %v4905_v6 = vld [vmem:[%s8811_s4 + $0x150] sm:$0xf]  ;;  %5287 = vmatpush.msra.mxu2 %v103_v13  ;;  %177 = vmatpush.msra.mxu0 %v103_v13 }
  0x15   :  { %5290 = vmatpush.msra.mxu3 %v101_v2  ;;  %v5877_v7 = vor.u32 %v5283_v5, %v4917_v4  ;;  %v5276_v8 = vld [vmem:[%s8811_s4 + $0x168] sm:$0xf0]  ;;  %243 = vmatpush.msra.mxu1 %v101_v2  ;;  %v4893_v11 = vld [vmem:[%s8811_s4 + $0x118] sm:$0xf]  ;;  %v5269_v12 = vld [vmem:[%s8811_s4 + $0x130] sm:$0xf0] }
  0x16   :  { %4805 = vmatmul.msk.f32.vlgmr.msra.gmra.mxu3 %vm114_vm0, %v5866_v3  ;;  %v5888_v10 = vor.u32 %v5276_v8, %v4905_v6  ;;  %v100_v15 = vld [vmem:[%s8809_s16] sm:$0xff]  ;;  %v5909_v16 = vor.u32 %v5269_v12, %v4893_v11  ;;  %v5280_v17 = vld [vmem:[%s8811_s4 + $0x18c] sm:$0xf]  ;;  %v4919_v18 = vld [vmem:[%s8811_s4 + $0x1a4] sm:$0xf0] }
  0x17   :  { %8812 = vst [vmem:[#allocation9_spill] sm:$0xff] %v5877_v7  ;;  %626 = vmatpush.bf16.msrb.mxu3 %v5877_v7  ;;  %v105_v19 = vld [vmem:[%s8809_s16 + $0x28] sm:$0xff]  ;;  %v4881_v20 = vld [vmem:[%s8811_s4 + $0xe0] sm:$0xf]  ;;  %v5262_v21 = vld [vmem:[%s8811_s4 + $0xf8] sm:$0xf0]  ;;  %5288 = vmatpush.msra.mxu2 %v100_v15  ;;  %v5928_v22 = vor.u32 %v5280_v17, %v4919_v18 }
  0x18   :  { %8813 = vst [vmem:[#allocation10_spill] sm:$0xff] %v5888_v10  ;;  %178 = vmatpush.msra.mxu0 %v100_v15  ;;  %4789 = vmatmul.msk.f32.vlgmr.msra.gmra.mxu2 %vm114_vm0, %v5866_v3  ;;  %v5273_v23 = vld [vmem:[%s8811_s4 + $0x154] sm:$0xf]  ;;  %v4907_v24 = vld [vmem:[%s8811_s4 + $0x16c] sm:$0xf0]  ;;  %v5939_v25 = vor.u32 %v5262_v21, %v4881_v20  ;;  %v5990_v39 = vld [vmem:[%s8810_s5 + $0x58] sm:$0xff] }
  0x19   :  { %8814 = vst [vmem:[#allocation11_spill] sm:$0xff] %v5909_v16  ;;  %307 = vmatpush.msrb.mxu2 %v105_v19  ;;  %v4869_v26 = vld [vmem:[%s8811_s4 + $0xa8] sm:$0xf]  ;;  %v5255_v27 = vld [vmem:[%s8811_s4 + $0xc0] sm:$0xf0]  ;;  %v5948_v28 = vor.u32 %v5273_v23, %v4907_v24  ;;  %v6048_v49 = vld [vmem:[%s8810_s5 + $0x70] sm:$0xff] }
  0x1a   :  { %488 = vrot.lane.b32.xlu0 %v4830_v9, %s5725_s0  ;;  %8815 = vst [vmem:[#allocation12_spill] sm:$0xff] %v5939_v25  ;;  %949 = vmatpush.bf16.msrb.mxu0 %v5928_v22  ;;  %v5266_v29 = vld [vmem:[%s8811_s4 + $0x11c] sm:$0xf]  ;;  %v4895_v30 = vld [vmem:[%s8811_s4 + $0x134] sm:$0xf0]  ;;  %v5962_v32 = vor.u32 %v5255_v27, %v4869_v26  ;;  %v6011_v44 = vld [vmem:[%s8810_s5 + $0x60] sm:$0xff] }
  0x1b   :  { %627 = vmatpush.bf16.msrb.mxu3 %v5888_v10  ;;  %v4857_v33 = vld [vmem:[%s8811_s4 + $0x70] sm:$0xf]  ;;  %v5248_v34 = vld [vmem:[%s8811_s4 + $0x88] sm:$0xf0]  ;;  %v5973_v35 = vor.u32 %v5266_v29, %v4895_v30  ;;  %v4845_v37 = vld [vmem:[%s8811_s4 + $0x38] sm:$0xf] }
  0x1c   :  { %8816 = vst [vmem:[#allocation13_spill] sm:$0xff] %v5962_v32  ;;  %v5978_v36 = vor.u32 %v5248_v34, %v4857_v33  ;;  %v5241_v38 = vld [vmem:[%s8811_s4 + $0x50] sm:$0xf0]  ;;  %v4833_v41 = vld [vmem:[%s8811_s4] sm:$0xf]  ;;  %v6023_v45 = vld [vmem:[%s8810_s5 + $0x68] sm:$0xff] }
  0x1d   :  { %v5993_v40 = vor.u32 %v5241_v38, %v4845_v37  ;;  %v5234_v42 = vld [vmem:[%s8811_s4 + $0x18] sm:$0xf0]  ;;  %v5259_v47 = vld [vmem:[%s8811_s4 + $0xe4] sm:$0xf]  ;;  %v4883_v48 = vld [vmem:[%s8811_s4 + $0xfc] sm:$0xf0] }
  0x1e   :  { %4806 = vmatmul.msk.f32.gmra.mxu3 %vm114_vm0, %v5902_v14  ;;  %950 = vmatpush.bf16.msrb.mxu0 %v5948_v28  ;;  %8817 = vst [vmem:[#allocation14_spill] sm:$0xff] %v5978_v36  ;;  %v6006_v43 = vor.u32 %v5234_v42, %v4833_v41  ;;  %v6050_v50 = vor.u32 %v5259_v47, %v4883_v48  ;;  %v5252_v51 = vld [vmem:[%s8811_s4 + $0xac] sm:$0xf]  ;;  %v4871_v52 = vld [vmem:[%s8811_s4 + $0xc4] sm:$0xf0]  ;;  %v6084_v57 = vld [vmem:[%s8810_s5 + $0x78] sm:$0xff] }
  0x1f   :  { %628 = vmatpush.bf16.msrb.mxu3 %v5909_v16  ;;  %8818 = vst [vmem:[#allocation15_spill] sm:$0xff] %v5993_v40  ;;  %v6063_v53 = vor.u32 %v5252_v51, %v4871_v52  ;;  %v6070_v54 = vld [vmem:[%s8808_s27 + $0x8] sm:$0xff]  ;;  %v5245_v55 = vld [vmem:[%s8811_s4 + $0x74] sm:$0xf]  ;;  %v4859_v56 = vld [vmem:[%s8811_s4 + $0x8c] sm:$0xf0] }
  0x20   :  { %4790 = vmatmul.msk.f32.gmra.mxu2 %vm114_vm0, %v5902_v14  ;;  %8819 = vst [vmem:[#allocation16_spill] sm:$0xff] %v6006_v43  ;;  %v6086_v58 = vor.u32 %v5245_v55, %v4859_v56  ;;  %v5238_v59 = vld [vmem:[%s8811_s4 + $0x3c] sm:$0xf]  ;;  %v4847_v60 = vld [vmem:[%s8811_s4 + $0x54] sm:$0xf0]  ;;  %v84_v5 = vld [vmem:[%s8810_s5] sm:$0xff] }
  0x21   :  { %483 = vst.msk [vmem:[#allocation4 + $0x8] sm:$0xff] %vm481_vm1, %v6070_v54  ;;  %v6099_v61 = vor.u32 %v5238_v59, %v4847_v60  ;;  %v5231_v62 = vld [vmem:[%s8811_s4 + $0x4] sm:$0xf]  ;;  %v4835_v63 = vld [vmem:[%s8811_s4 + $0x1c] sm:$0xf0]  ;;  %v102_v6 = vld [vmem:[%s8809_s16 + $0x10] sm:$0xff]  ;;  %4781 = vmatmul.msk.f32.vlgmr.msra.gmra.mxu0 %vm114_vm0, %v84_v5  ;;  %4797 = vmatmul.msk.f32.vlgmr.msra.gmra.mxu1 %vm114_vm0, %v84_v5 }
  0x22   :  { %951 = vmatpush.bf16.msrb.mxu0 %v5973_v35  ;;  %v6110_v0 = vor.u32 %v5231_v62, %v4835_v63  ;;  %v4925_v1 = vld [vmem:[%s8811_s4 + $0x190] sm:$0xf]  ;;  %v5284_v2 = vld [vmem:[%s8811_s4 + $0x1a8] sm:$0xf0]  ;;  %v4913_v8 = vld [vmem:[%s8811_s4 + $0x158] sm:$0xf]  ;;  %308 = vmatpush.msrb.mxu2 %v102_v6 }
  0x23   :  { %629 = vmatpush.bf16.msrb.mxu3 %v5939_v25  ;;  %8820 = vst [vmem:[#allocation17_spill] sm:$0xff] %v6099_v61  ;;  %v6118_v4 = vor.u32 %v5284_v2, %v4925_v1  ;;  %v5277_v9 = vld [vmem:[%s8811_s4 + $0x170] sm:$0xf0]  ;;  %v4901_v12 = vld [vmem:[%s8811_s4 + $0x120] sm:$0xf]  ;;  %v85_v17 = vld [vmem:[%s8810_s5 + $0x8] sm:$0xff] }
  0x24   :  { %8821 = vst [vmem:[#allocation18_spill] sm:$0xff] %v6110_v0  ;;  %v6136_v11 = vor.u32 %v5277_v9, %v4913_v8  ;;  %v5270_v13 = vld [vmem:[%s8811_s4 + $0x138] sm:$0xf0]  ;;  %v4889_v18 = vld [vmem:[%s8811_s4 + $0xe8] sm:$0xf]  ;;  %v86_v60 = vld [vmem:[%s8810_s5 + $0x10] sm:$0xff] }
  0x25   :  { %963 = vmatpush.bf16.msrb.mxu1 %v6118_v4  ;;  %v6147_v15 = vor.u32 %v5270_v13, %v4901_v12  ;;  %v5263_v19 = vld [vmem:[%s8811_s4 + $0x100] sm:$0xf0]  ;;  %v4877_v23 = vld [vmem:[%s8811_s4 + $0xb0] sm:$0xf]  ;;  %v5256_v24 = vld [vmem:[%s8811_s4 + $0xc8] sm:$0xf0] }
  0x26   :  { %4807 = vmatmul.msk.f32.gmra.mxu3 %vm114_vm0, %v5959_v31  ;;  %952 = vmatpush.bf16.msrb.mxu0 %v6050_v50  ;;  %v6160_v20 = vor.u32 %v5263_v19, %v4889_v18  ;;  %v6172_v26 = vor.u32 %v5256_v24, %v4877_v23  ;;  %v4865_v27 = vld [vmem:[%s8811_s4 + $0x78] sm:$0xf]  ;;  %v5249_v29 = vld [vmem:[%s8811_s4 + $0x90] sm:$0xf0]  ;;  %v4853_v34 = vld [vmem:[%s8811_s4 + $0x40] sm:$0xf] }
  0x27   :  { %630 = vmatpush.bf16.msrb.mxu3 %v5962_v32  ;;  %v6181_v30 = vor.u32 %v5249_v29, %v4865_v27  ;;  %v5242_v37 = vld [vmem:[%s8811_s4 + $0x58] sm:$0xf0]  ;;  %v4841_v41 = vld [vmem:[%s8811_s4 + $0x8] sm:$0xf]  ;;  %v5235_v42 = vld [vmem:[%s8811_s4 + $0x20] sm:$0xf0] }
  0x28   :  { %4791 = vmatmul.msk.f32.gmra.mxu2 %vm114_vm0, %v5959_v31  ;;  %v6191_v38 = vor.u32 %v5242_v37, %v4853_v34  ;;  %v6200_v47 = vor.u32 %v5235_v42, %v4841_v41  ;;  %v5281_v55 = vld [vmem:[%s8811_s4 + $0x194] sm:$0xf]  ;;  %v5043_v56 = vld [vmem:[%s8811_s4 + $0x1ac] sm:$0xf0]  ;;  %v5274_v62 = vld [vmem:[%s8811_s4 + $0x15c] sm:$0xf] }
  0x29   :  { %964 = vmatpush.bf16.msrb.mxu1 %v6136_v11  ;;  %4782 = vmatmul.msk.f32.gmra.mxu0 %vm114_vm0, %v85_v17  ;;  %v6210_v59 = vor.u32 %v5281_v55, %v5043_v56  ;;  %v5027_v63 = vld [vmem:[%s8811_s4 + $0x174] sm:$0xf0]  ;;  %v5011_v6 = vld [vmem:[%s8811_s4 + $0x13c] sm:$0xf0]  ;;  %v89_v12 = vld [vmem:[%s8810_s5 + $0x28] sm:$0xff]  ;;  %s9153_s16 = sld [smem:[#allocation90_spill]] }
  0x2a   :  { %953 = vmatpush.bf16.msrb.mxu0 %v6063_v53  ;;  %4798 = vmatmul.msk.f32.gmra.mxu1 %vm114_vm0, %v85_v17  ;;  %8822 = vst [vmem:[#allocation19_spill] sm:$0xff] %v6191_v38  ;;  %v6224_v1 = vor.u32 %v5274_v62, %v5027_v63  ;;  %v87_v2 = vld [vmem:[%s8810_s5 + $0x18] sm:$0xff]  ;;  %v88_v9 = vld [vmem:[%s8810_s5 + $0x20] sm:$0xff]  ;;  %v5260_v19 = vld [vmem:[%s8811_s4 + $0xec] sm:$0xf] }
  0x2b   :  { %631 = vmatpush.bf16.msrb.mxu3 %v5978_v36  ;;  %8823 = vst [vmem:[#allocation20_spill] sm:$0xff] %v6200_v47  ;;  %977 = vmatpush.bf16.msra.mxu2 %v6210_v59  ;;  %v91_v23 = vld [vmem:[%s8810_s5 + $0x38] sm:$0xff] }
  0x2d   :  { %965 = vmatpush.bf16.msrb.mxu1 %v6147_v15 }
  0x2e   :  { %4808 = vmatmul.msk.f32.gmra.mxu3 %vm114_vm0, %v5990_v39  ;;  %954 = vmatpush.bf16.msrb.mxu0 %v6086_v58 }
  0x2f   :  { %632 = vmatpush.bf16.msrb.mxu3 %v5993_v40  ;;  %978 = vmatpush.bf16.msra.mxu2 %v6224_v1 }
  0x30   :  { %4792 = vmatmul.msk.f32.gmra.mxu2 %vm114_vm0, %v5990_v39 }
  0x31   :  { %966 = vmatpush.bf16.msrb.mxu1 %v6160_v20  ;;  %4783 = vmatmul.msk.f32.gmra.mxu0 %vm114_vm0, %v86_v60 }
  0x32   :  { %955 = vmatpush.bf16.msrb.mxu0 %v6099_v61  ;;  %4799 = vmatmul.msk.f32.gmra.mxu1 %vm114_vm0, %v86_v60 }
  0x33   :  { %633 = vmatpush.bf16.msrb.mxu3 %v6006_v43 }
  0x35   :  { %967 = vmatpush.bf16.msrb.mxu1 %v6172_v26 }
  0x36   :  { %4809 = vmatmul.msk.f32.gmra.mxu3 %vm114_vm0, %v6011_v44  ;;  %956 = vmatpush.bf16.msrb.mxu0 %v6110_v0 }
  0x37   :  { %640 = vmatpush.bf16.msra.mxu3 %v5928_v22 }
  0x38   :  { %4793 = vmatmul.msk.f32.gmra.mxu2 %vm114_vm0, %v6011_v44 }
  0x39   :  { %968 = vmatpush.bf16.msrb.mxu1 %v6181_v30  ;;  %4784 = vmatmul.msk.f32.gmra.mxu0 %vm114_vm0, %v87_v2 }
  0x3a   :  { %4800 = vmatmul.msk.f32.gmra.mxu1 %vm114_vm0, %v87_v2 }
  0x3b   :  { %641 = vmatpush.bf16.msra.mxu3 %v5948_v28 }
  0x3d   :  { %969 = vmatpush.bf16.msrb.mxu1 %v6191_v38 }
  0x3e   :  { %4810 = vmatmul.msk.f32.gmra.mxu3 %vm114_vm0, %v6023_v45 }
  0x3f   :  { %642 = vmatpush.bf16.msra.mxu3 %v5973_v35 }
  0x40   :  { %4794 = vmatmul.msk.f32.gmra.mxu2 %vm114_vm0, %v6023_v45 }
  0x41   :  { %970 = vmatpush.bf16.msrb.mxu1 %v6200_v47  ;;  %4785 = vmatmul.msk.f32.gmra.mxu0 %vm114_vm0, %v88_v9 }
  0x42   :  { %4801 = vmatmul.msk.f32.gmra.mxu1 %vm114_vm0, %v88_v9 }
  0x43   :  { %643 = vmatpush.bf16.msra.mxu3 %v6050_v50 }
  0x46   :  { %4811 = vmatmul.msk.f32.gmra.mxu3 %vm114_vm0, %v6048_v49 }
  0x47   :  { %644 = vmatpush.bf16.msra.mxu3 %v6063_v53 }
  0x48   :  { %4795 = vmatmul.msk.f32.gmra.mxu2 %vm114_vm0, %v6048_v49 }
  0x49   :  { %4786 = vmatmul.msk.f32.gmra.mxu0 %vm114_vm0, %v89_v12 }
  0x4a   :  { %4802 = vmatmul.msk.f32.gmra.mxu1 %vm114_vm0, %v89_v12 }
  0x4b   :  { %645 = vmatpush.bf16.msra.mxu3 %v6086_v58 }
  0x4e   :  { %4812 = vmatmul.msk.f32.gmra.mxu3 %vm114_vm0, %v6084_v57 }
  0x4f   :  { %646 = vmatpush.bf16.msra.mxu3 %v6099_v61 }
  0x50   :  { %4796 = vmatmul.msk.f32.gmra.mxu2 %vm114_vm0, %v6084_v57 }
  0x53   :  { %647 = vmatpush.bf16.msra.mxu3 %v6110_v0 }
  0x58   :  { %4813 = vmatmul.msk.f32.vlgmr.msrb.gmra.mxu2 %vm114_vm0, %v84_v5  ;;  %v5267_v5 = vld [vmem:[%s8811_s4 + $0x124] sm:$0xf] }
  0x59   :  { %v6241_v8 = vor.u32 %v5267_v5, %v5011_v6 }
  0x5b   :  { %979 = vmatpush.bf16.msra.mxu2 %v6241_v8 }
  0x60   :  { %4814 = vmatmul.msk.f32.gmra.mxu2 %vm114_vm0, %v85_v17  ;;  %v90_v17 = vld [vmem:[%s8810_s5 + $0x30] sm:$0xff]  ;;  %s8844_s5 = sld [smem:[#allocation88_spill]] }
  0x61   :  { %4787 = vmatmul.msk.f32.gmra.mxu0 %vm114_vm0, %v90_v17  ;;  %4803 = vmatmul.msk.f32.gmra.mxu1 %vm114_vm0, %v90_v17 }
  0x68   :  { %4815 = vmatmul.msk.f32.gmra.mxu2 %vm114_vm0, %v86_v60 }
  0x69   :  { %4788 = vmatmul.msk.f32.gmra.mxu0 %vm114_vm0, %v91_v23  ;;  %4804 = vmatmul.msk.f32.gmra.mxu1 %vm114_vm0, %v91_v23 }
  0x70   :  { %4816 = vmatmul.msk.f32.gmra.mxu2 %vm114_vm0, %v87_v2 }
  0x78   :  { %4817 = vmatmul.msk.f32.gmra.mxu2 %vm114_vm0, %v88_v9 }
  0x80   :  { %4818 = vmatmul.msk.f32.gmra.mxu2 %vm114_vm0, %v89_v12 }
  0x84   :  { %v487_v21 = vpop.permute.xlu0 %486 }
  0x85   :  { %493 = vst.msk [vmem:[#allocation4] sm:$0xff] %vm492_vm2, %v487_v21  ;;  %v4995_v21 = vld [vmem:[%s8811_s4 + $0x104] sm:$0xf0] }
  0x86   :  { %v6289_v24 = vor.u32 %v5260_v19, %v4995_v21 }
  0x88   :  { %4819 = vmatmul.msk.f32.gmra.mxu2 %vm114_vm0, %v90_v17 }
  0x89   :  { %980 = vmatpush.bf16.msra.mxu2 %v6289_v24 }
  0x8c   :  { %v489_v33 = vpop.permute.xlu0 %488  ;;  %v495_v48 = vld [vmem:[#allocation4] sm:$0xff] }
  0x8d   :  { %494 = vst.msk [vmem:[#allocation4 + $0x8] sm:$0xff] %vm492_vm2, %v489_v33 }
  0x90   :  { %4820 = vmatmul.msk.f32.gmra.mxu2 %vm114_vm0, %v91_v23 }
  0x94   :  { %v496_v51 = vld [vmem:[#allocation4 + $0x8] sm:$0xff] }
  0x95   :  { %v497_v52 = vpack.c.bf16 %v496_v51, %v495_v48  ;;  %v4979_v51 = vld [vmem:[%s8811_s4 + $0xcc] sm:$0xf0] }
  0x97   :  { %634 = vmatmul.bf16.vlgmr.msrb.gmra.mxu3 %v497_v52 }
  0x98   :  { %654 = vmatpush.bf16.msrb.mxu3 %v6118_v4  ;;  %4821 = vmatmul.msk.f32.gmra.mxu2 %vm114_vm0, %v5866_v3 }
  0x99   :  { %v6268_v13 = vpop.f32.mrf.mxu3 }
  0x9a   :  { %8824 = vst [vmem:[#allocation21_spill] sm:$0xff] %v6268_v13  ;;  %v5271_v13 = vld [vmem:[%s8811_s4 + $0x140] sm:$0xf0] }
  0x9b   :  { %v6299_v29 = vpop.f32.mrf.mxu2 }
  0x9c   :  { %655 = vmatpush.bf16.msrb.mxu3 %v6136_v11  ;;  %8827 = vst [vmem:[#allocation24_spill] sm:$0xff] %v6299_v29 }
  0x9e   :  { %v245_v9 = vpop.f32.mrf.mxu1 }
  0xa0   :  { %656 = vmatpush.bf16.msrb.mxu3 %v6147_v15  ;;  %4822 = vmatmul.msk.f32.gmra.mxu2 %vm114_vm0, %v5902_v14 }
  0xa1   :  { %v6278_v18 = vpop.f32.mrf.mxu3 }
  0xa2   :  { %8825 = vst [vmem:[#allocation22_spill] sm:$0xff] %v6278_v18  ;;  %v5017_v18 = vld [vmem:[%s8811_s4 + $0x128] sm:$0xf] }
  0xa3   :  { %v6307_v34 = vpop.f32.mrf.mxu2 }
  0xa4   :  { %657 = vmatpush.bf16.msrb.mxu3 %v6160_v20  ;;  %8829 = vst [vmem:[#allocation26_spill] sm:$0xff] %v6307_v34 }
  0xa7   :  { %648 = vmatmul.bf16.vlgmr.msra.gmra.mxu3 %v497_v52 }
  0xa8   :  { %658 = vmatpush.bf16.msrb.mxu3 %v6172_v26  ;;  %4823 = vmatmul.msk.f32.gmra.mxu2 %vm114_vm0, %v5959_v31 }
  0xa9   :  { %v6295_v27 = vpop.f32.mrf.mxu3 }
  0xaa   :  { %8826 = vst [vmem:[#allocation23_spill] sm:$0xff] %v6295_v27  ;;  %v4931_v27 = vld [vmem:[%s8811_s4 + $0x24] sm:$0xf0] }
  0xab   :  { %v6313_v41 = vpop.f32.mrf.mxu2 }
  0xac   :  { %659 = vmatpush.bf16.msrb.mxu3 %v6181_v30  ;;  %8831 = vst [vmem:[#allocation28_spill] sm:$0xff] %v6313_v41 }
  0xb0   :  { %660 = vmatpush.bf16.msrb.mxu3 %v6191_v38  ;;  %4824 = vmatmul.msk.f32.gmra.mxu2 %vm114_vm0, %v5990_v39  ;;  %v5253_v39 = vld [vmem:[%s8811_s4 + $0xb4] sm:$0xf] }
  0xb1   :  { %v6301_v33 = vpop.f32.mrf.mxu3 }
  0xb2   :  { %8828 = vst [vmem:[#allocation25_spill] sm:$0xff] %v6301_v33 }
  0xb3   :  { %v6319_v42 = vpop.f32.mrf.mxu2 }
  0xb4   :  { %661 = vmatpush.bf16.msrb.mxu3 %v6200_v47  ;;  %8833 = vst [vmem:[#allocation30_spill] sm:$0xff] %v6319_v42 }
  0xb7   :  { %662 = vmatmul.bf16.vlgmr.msrb.gmra.mxu3 %v497_v52  ;;  %v180_v52 = vpop.f32.mrf.mxu0 }
  0xb8   :  { %935 = vmatpush.bf16.msra.mxu3 %v5877_v7  ;;  %4825 = vmatmul.msk.f32.gmra.mxu2 %vm114_vm0, %v6011_v44  ;;  %v6337_v44 = vor.u32 %v5253_v39, %v4979_v51 }
  0xb9   :  { %v6309_v37 = vpop.f32.mrf.mxu3 }
  0xba   :  { %8830 = vst [vmem:[#allocation27_spill] sm:$0xff] %v6309_v37  ;;  %981 = vmatpush.bf16.msra.mxu2 %v6337_v44 }
  0xbb   :  { %v6325_v31 = vpop.f32.mrf.mxu2 }
  0xbc   :  { %936 = vmatpush.bf16.msra.mxu3 %v5888_v10  ;;  %8835 = vst [vmem:[#allocation32_spill] sm:$0xff] %v6325_v31  ;;  %v5033_v31 = vld [vmem:[%s8811_s4 + $0x160] sm:$0xf] }
  0xbf   :  { %v183_v63 = vpop.f32.mrf.mxu0 }
  0xc0   :  { %937 = vmatpush.bf16.msra.mxu3 %v5909_v16  ;;  %4826 = vmatmul.msk.f32.gmra.mxu2 %vm114_vm0, %v6023_v45  ;;  %v6343_v45 = vld [vmem:[%s8837_s3] sm:$0x7] }
  0xc1   :  { %v6315_v3 = vpop.f32.mrf.mxu3  ;;  %v6346_v55 = vperm.slane %v6343_v45, 0  ;;  %v6357_v21 = vperm.slane %v6343_v45, 1  ;;  %v6440_v42 = vperm.slane %v6343_v45, 2 }
  0xc2   :  { %8832 = vst [vmem:[#allocation29_spill] sm:$0xff] %v6315_v3 }
  0xc3   :  { %8838 = vst [vmem:[#allocation34_spill] sm:$0xff] %v6346_v55  ;;  %v181_v56 = vadd.f32 %v180_v52, %v6346_v55  ;;  %v6351_v60 = vpop.f32.mrf.mxu2  ;;  %v184_v5 = vadd.f32 %v183_v63, %v6346_v55  ;;  %v246_v39 = vadd.f32 %v245_v9, %v6357_v21 }
  0xc4   :  { %938 = vmatpush.bf16.msra.mxu3 %v5939_v25  ;;  %8839 = vst [vmem:[#allocation35_spill] sm:$0xff] %v6351_v60 }
  0xc5   :  { %8841 = vst [vmem:[#allocation37_spill] sm:$0xff] %v6357_v21 }
  0xc6   :  { %8849 = vst [vmem:[#allocation44_spill] sm:$0xff] %v6440_v42 }
  0xc8   :  { %939 = vmatpush.bf16.msra.mxu3 %v5962_v32  ;;  %4827 = vmatmul.msk.f32.gmra.mxu2 %vm114_vm0, %v6048_v49 }
  0xc9   :  { %v6321_v14 = vpop.f32.mrf.mxu3 }
  0xca   :  { %8834 = vst [vmem:[#allocation31_spill] sm:$0xff] %v6321_v14 }
  0xcb   :  { %v6354_v17 = vpop.f32.mrf.mxu2 }
  0xcc   :  { %940 = vmatpush.bf16.msra.mxu3 %v5978_v36  ;;  %8840 = vst [vmem:[#allocation36_spill] sm:$0xff] %v6354_v17 }
  0xd0   :  { %941 = vmatpush.bf16.msra.mxu3 %v5993_v40  ;;  %4828 = vmatmul.msk.f32.gmra.mxu2 %vm114_vm0, %v6084_v57 }
  0xd1   :  { %v6327_v48 = vpop.f32.mrf.mxu3 }
  0xd2   :  { %8836 = vst [vmem:[#allocation33_spill] sm:$0xff] %v6327_v48 }
  0xd4   :  { %942 = vmatpush.bf16.msra.mxu3 %v6006_v43 }
 0x11a   :  { %v635_v49 = vpop.f32.mrf.mxu3 }
 0x11b   :  { %v674_v62 = vadd.f32 %v635_v49, %v181_v56  ;;  %v5246_v56 = vld [vmem:[%s8811_s4 + $0x7c] sm:$0xf]  ;;  %v4963_v49 = vld [vmem:[%s8811_s4 + $0x94] sm:$0xf0] }
 0x11c   :  { %v6369_v63 = vor.u32 %v5246_v56, %v4963_v49  ;;  %v5285_v49 = vld [vmem:[%s8811_s4 + $0x1b0] sm:$0xf0] }
 0x11d   :  { %v4927_v2 = vmul.f32 -1.442695, %v674_v62  ;;  %v248_v62 = vpop.f32.mrf.mxu1 }
 0x11e   :  { %8842 = vst [vmem:[#allocation38_spill] sm:$0xff] %v6369_v63  ;;  %982 = vmatpush.bf16.msra.mxu2 %v6369_v63 }
 0x11f   :  { %5307 = vpow2.f32 %v4927_v2 }
 0x122   :  { %v637_v6 = vpop.f32.mrf.mxu3 }
 0x123   :  { %v675_v12 = vadd.f32 %v637_v6, %v184_v5  ;;  %v6371_v6 = vpop.f32.mrf.mxu2 }
 0x124   :  { %8843 = vst [vmem:[#allocation39_spill] sm:$0xff] %v6371_v6  ;;  %v5051_v6 = vld [vmem:[%s8811_s4 + $0x1b4] sm:$0xf0] }
 0x125   :  { %v5308_v19 = vpop.eup %5307  ;;  %v4928_v23 = vmul.f32 -1.442695, %v675_v12 }
 0x126   :  { %v6359_v57 = vadd.f32 1.0, %v5308_v19  ;;  %v6381_v19 = vld [vmem:[%s8844_s5] sm:$0xff] }
 0x127   :  { %5309 = vpow2.f32 %v4928_v23  ;;  %8845 = vst [vmem:[#allocation40_spill] sm:$0xff] %v6381_v19  ;;  %v249_v23 = vadd.f32 %v248_v62, %v6357_v21  ;;  %v5282_v62 = vld [vmem:[%s8811_s4 + $0x19c] sm:$0xf] }
 0x128   :  { %5311 = vrcp.f32 %v6359_v57  ;;  %v695_v3 = vand.u32 2147483648, %v6359_v57  ;;  %v6410_v60 = vor.u32 %v5282_v62, %v5051_v6  ;;  %v5275_v6 = vld [vmem:[%s8811_s4 + $0x164] sm:$0xf]  ;;  %vm689_vm4 = vweird.f32 %v6359_v57 }
 0x12a   :  { %v649_v51 = vpop.f32.mrf.mxu3  ;;  %8847 = vst [vmem:[#allocation42_spill] sm:$0xff] %v6410_v60  ;;  %1005 = vmatpush.bf16.msra.mxu0 %v6410_v60  ;;  %v696_v41 = vor.u32 1.1754944e-38, %v695_v3 }
 0x12b   :  { %v714_v52 = vadd.f32 %v649_v51, %v246_v39  ;;  %v5049_v51 = vld [vmem:[%s8811_s4 + $0x198] sm:$0xf] }
 0x12c   :  { %v6400_v48 = vor.u32 %v5285_v49, %v5049_v51  ;;  %v5286_v51 = vld [vmem:[%s8811_s4 + $0x1b8] sm:$0xf0] }
 0x12d   :  { %v5310_v2 = vpop.eup %5309  ;;  %v4929_v5 = vmul.f32 -1.442695, %v714_v52  ;;  %v6391_v52 = vperm.slane %v6381_v19, 0 }
 0x12e   :  { %v6373_v9 = vpop.eup %5311  ;;  %v6375_v12 = vadd.f32 1.0, %v5310_v2  ;;  %991 = vmatpush.bf16.msrb.mxu3 %v6400_v48 }
 0x12f   :  { %5313 = vpow2.f32 %v4929_v5  ;;  %v685_v39 = vmul.f32 %v6373_v9, %v6359_v57  ;;  %8846 = vst [vmem:[#allocation41_spill] sm:$0xff] %v6391_v52  ;;  %v693_v5 = vand.u32 2147483647, %v6359_v57  ;;  %vm690_vm3 = vweird.f32 %v6373_v9  ;;  %v5261_v57 = vld [vmem:[%s8811_s4 + $0xf4] sm:$0xf] }
 0x130   :  { %5315 = vrcp.f32 %v6375_v12  ;;  %vm6466_vm5 = vmor %vm689_vm4, %vm690_vm3  ;;  %v708_v19 = vand.u32 2147483647, %v6375_v12  ;;  %vm704_vm8 = vweird.f32 %v6375_v12 }
 0x131   :  { %v686_v56 = vsub.f32 1.0, %v685_v39  ;;  %v5057_v39 = vld [vmem:[%s8811_s4 + $0x1a0] sm:$0xf]  ;;  %vm6470_vm6 = vcmp.eq.f32.partialorder %v693_v5, 8.507059e+37 }
 0x132   :  { %v651_v2 = vpop.f32.mrf.mxu3  ;;  %v6416_v49 = vor.u32 %v5286_v51, %v5057_v39  ;;  %v5035_v51 = vld [vmem:[%s8811_s4 + $0x17c] sm:$0xf0]  ;;  %vm6567_vm11 = vcmp.eq.f32.partialorder %v708_v19, 8.507059e+37 }
 0x133   :  { %v715_v14 = vadd.f32 %v651_v2, %v249_v23  ;;  %v687_v17 = vmul.f32 %v6373_v9, %v686_v56  ;;  %v5278_v23 = vld [vmem:[%s8811_s4 + $0x178] sm:$0xf0] }
 0x134   :  { %8848 = vst [vmem:[#allocation43_spill] sm:$0xff] %v6416_v49  ;;  %v6430_v39 = vor.u32 %v5278_v23, %v5033_v31  ;;  %1019 = vmatpush.bf16.msra.mxu1 %v6416_v49  ;;  %v5041_v31 = vld [vmem:[%s8811_s4 + $0x168] sm:$0xf]  ;;  %v310_v23 = vpop.f32.mrf.mxu2  ;;  %v6495_v49 = vor.u32 %v5271_v13, %v5017_v18  ;;  %v5025_v18 = vld [vmem:[%s8811_s4 + $0x130] sm:$0xf] }
 0x135   :  { %v5314_v56 = vpop.eup %5313  ;;  %v4930_v62 = vmul.f32 -1.442695, %v715_v14  ;;  %v688_v2 = vadd.f32 %v6373_v9, %v687_v17  ;;  %v6443_v14 = vor.u32 %v5275_v6, %v5035_v51  ;;  %v5279_v17 = vld [vmem:[%s8811_s4 + $0x180] sm:$0xf0]  ;;  %v5232_v51 = vld [vmem:[%s8811_s4 + $0xc] sm:$0xf] }
 0x136   :  { %v6435_v37 = vpop.eup %5315  ;;  %v6437_v33 = vadd.f32 1.0, %v5314_v56  ;;  %v5239_v6 = vld [vmem:[%s8811_s4 + $0x44] sm:$0xf]  ;;  %v4947_v56 = vld [vmem:[%s8811_s4 + $0x5c] sm:$0xf0]  ;;  %992 = vmatpush.bf16.msrb.mxu3 %v6430_v39  ;;  %v6487_v3 = vor.u32 %v5279_v17, %v5041_v31  ;;  %v6493_v21 = vor.u32 %v5232_v51, %v4931_v27 }
 0x137   :  { %8850 = vst [vmem:[#allocation45_spill] sm:$0xff] %v6443_v14  ;;  %5317 = vpow2.f32 %v4930_v62  ;;  %v700_v45 = vmul.f32 %v6435_v37, %v6375_v12  ;;  %v692_v34 = vsel %vm6466_vm5, %v6373_v9, %v688_v2  ;;  %v6484_v5 = vor.u32 %v5239_v6, %v4947_v56  ;;  %1006 = vmatpush.bf16.msra.mxu0 %v6443_v14  ;;  %v5268_v9 = vld [vmem:[%s8811_s4 + $0x12c] sm:$0xf]  ;;  %v5019_v2 = vld [vmem:[%s8811_s4 + $0x144] sm:$0xf0] }
 0x138   :  { %5319 = vrcp.f32 %v6437_v33  ;;  %8856 = vst [vmem:[#allocation47_spill] sm:$0xff] %v6487_v3  ;;  %1020 = vmatpush.bf16.msra.mxu1 %v6487_v3  ;;  %v6508_v13 = vor.u32 %v5268_v9, %v5019_v2  ;;  %v5272_v27 = vld [vmem:[%s8811_s4 + $0x148] sm:$0xf0]  ;;  %v5001_v56 = vld [vmem:[%s8811_s4 + $0xf0] sm:$0xf]  ;;  %vm705_vm7 = vweird.f32 %v6435_v37  ;;  %vm729_vm12 = vweird.f32 %v6437_v33 }
 0x139   :  { %v701_v29 = vsub.f32 1.0, %v700_v45  ;;  %8855 = vst [vmem:[#allocation46_spill] sm:$0xff] %v6484_v5  ;;  %v710_v45 = vand.u32 2147483648, %v6375_v12  ;;  %983 = vmatpush.bf16.msra.mxu2 %v6484_v5  ;;  %v6520_v6 = vor.u32 %v5272_v27, %v5025_v18  ;;  %v5264_v51 = vld [vmem:[%s8811_s4 + $0x108] sm:$0xf0]  ;;  %vm6563_vm10 = vmor %vm704_vm8, %vm705_vm7 }
 0x13a   :  { %v663_v55 = vpop.f32.mrf.mxu3  ;;  %8857 = vst [vmem:[#allocation48_spill] sm:$0xff] %v6493_v21  ;;  %993 = vmatpush.bf16.msrb.mxu3 %v6495_v49  ;;  %v5003_v9 = vld [vmem:[%s8811_s4 + $0x10c] sm:$0xf0]  ;;  %v5009_v2 = vld [vmem:[%s8811_s4 + $0xf8] sm:$0xf] }
 0x13b   :  { %v754_v31 = vadd.f32 %v663_v55, %v6391_v52  ;;  %v702_v17 = vmul.f32 %v6435_v37, %v701_v29  ;;  %8858 = vst [vmem:[#allocation49_spill] sm:$0xff] %v6508_v13  ;;  %v697_v55 = vsel %vm6470_vm6, %v696_v41, %v692_v34  ;;  %v311_v29 = vadd.f32 %v310_v23, %v6440_v42  ;;  %v4985_v12 = vld [vmem:[%s8811_s4 + $0xb8] sm:$0xf] }
 0x13c   :  { %8859 = vst [vmem:[#allocation50_spill] sm:$0xff] %v6520_v6  ;;  %1007 = vmatpush.bf16.msra.mxu0 %v6508_v13  ;;  %v6534_v23 = vor.u32 %v5264_v51, %v5001_v56  ;;  %v6549_v27 = vor.u32 %v5261_v57, %v5003_v9  ;;  %v735_v56 = vand.u32 2147483648, %v6437_v33  ;;  %1021 = vmatpush.bf16.msra.mxu1 %v6520_v6  ;;  %v5254_v13 = vld [vmem:[%s8811_s4 + $0xbc] sm:$0xf]  ;;  %v733_v3 = vand.u32 2147483647, %v6437_v33 }
 0x13d   :  { %v5318_v62 = vpop.eup %5317  ;;  %v756_v34 = vmul.f32 %v754_v31, %v697_v55  ;;  %v703_v41 = vadd.f32 %v6435_v37, %v702_v17  ;;  %v5265_v31 = vld [vmem:[%s8811_s4 + $0x110] sm:$0xf0]  ;;  %984 = vmatpush.bf16.msra.mxu2 %v6493_v21 }
 0x13e   :  { %v6545_v18 = vpop.eup %5319  ;;  %v6547_v17 = vadd.f32 1.0, %v5318_v62  ;;  %8860 = vst [vmem:[#allocation51_spill] sm:$0xff] %v6549_v27  ;;  %v6557_v51 = vor.u32 %v5265_v31, %v5009_v2  ;;  %994 = vmatpush.bf16.msrb.mxu3 %v6534_v23  ;;  %v711_v2 = vor.u32 1.1754944e-38, %v710_v45  ;;  %v313_v31 = vpop.f32.mrf.mxu2  ;;  %v736_v57 = vor.u32 1.1754944e-38, %v735_v56 }
 0x13f   :  { %v725_v55 = vmul.f32 %v6545_v18, %v6437_v33  ;;  %vm730_vm9 = vweird.f32 %v6545_v18  ;;  %v758_v62 = vadd.f32 %v756_v34, %v311_v29  ;;  %v5257_v29 = vld [vmem:[%s8811_s4 + $0xd0] sm:$0xf0]  ;;  %v707_v19 = vsel %vm6563_vm10, %v6435_v37, %v703_v41  ;;  %v4993_v37 = vld [vmem:[%s8811_s4 + $0xc0] sm:$0xf] }
 0x140   :  { %8861 = vst [vmem:[#allocation52_spill] sm:$0xff] %v6557_v51  ;;  %5321 = vrcp.f32 %v6547_v17  ;;  %1008 = vmatpush.bf16.msra.mxu0 %v6549_v27  ;;  %v6583_v6 = vor.u32 %v5257_v29, %v4985_v12  ;;  %vm6599_vm13 = vmor %vm729_vm12, %vm730_vm9  ;;  %1022 = vmatpush.bf16.msra.mxu1 %v6557_v51  ;;  %v5258_v29 = vld [vmem:[%s8811_s4 + $0xd8] sm:$0xf0]  ;;  %v712_v27 = vsel %vm6567_vm11, %v711_v2, %v707_v19  ;;  %vm734_vm14 = vcmp.eq.f32.partialorder %v733_v3, 8.507059e+37  ;;  %v5244_v3 = vld [vmem:[%s8811_s4 + $0x68] sm:$0xf0] }
 0x141   :  { %1250 = vmatpush.bf16.msrb.mxu2 %v5877_v7  ;;  %v726_v34 = vsub.f32 1.0, %v725_v55  ;;  %v4987_v55 = vld [vmem:[%s8811_s4 + $0xd4] sm:$0xf0]  ;;  %5323 = vtanh.f32 %v758_v62  ;;  %v314_v56 = vadd.f32 %v313_v31, %v6440_v42  ;;  %v4971_v62 = vld [vmem:[%s8811_s4 + $0x9c] sm:$0xf0]  ;;  %vm744_vm3 = vweird.f32 %v6547_v17 }
 0x142   :  { %v665_v14 = vpop.f32.mrf.mxu3  ;;  %v6605_v12 = vor.u32 %v5254_v13, %v4987_v55  ;;  %995 = vmatpush.bf16.msrb.mxu3 %v6583_v6  ;;  %v5250_v13 = vld [vmem:[%s8811_s4 + $0x98] sm:$0xf0]  ;;  %v5247_v55 = vld [vmem:[%s8811_s4 + $0x84] sm:$0xf]  ;;  %v4953_v42 = vld [vmem:[%s8811_s4 + $0x48] sm:$0xf] }
 0x143   :  { %v727_v45 = vmul.f32 %v6545_v18, %v726_v34  ;;  %v755_v33 = vadd.f32 %v665_v14, %v6391_v52  ;;  %v4969_v34 = vld [vmem:[%s8811_s4 + $0x80] sm:$0xf]  ;;  %v6617_v14 = vor.u32 %v5258_v29, %v4993_v37  ;;  %v6633_v31 = vor.u32 %v5247_v55, %v4971_v62  ;;  %v4977_v37 = vld [vmem:[%s8811_s4 + $0x88] sm:$0xf]  ;;  %v5251_v29 = vld [vmem:[%s8811_s4 + $0xa0] sm:$0xf0] }
 0x144   :  { %8868 = vst [vmem:[#allocation53_spill] sm:$0xff] %v6605_v12  ;;  %1009 = vmatpush.bf16.msra.mxu0 %v6605_v12  ;;  %v6631_v2 = vor.u32 %v5250_v13, %v4969_v34  ;;  %v4955_v34 = vld [vmem:[%s8811_s4 + $0x64] sm:$0xf0]  ;;  %v6658_v62 = vor.u32 %v5251_v29, %v4977_v37  ;;  %v750_v52 = vand.u32 2147483648, %v6547_v17  ;;  %v4961_v7 = vld [vmem:[%s8811_s4 + $0x50] sm:$0xf] }
 0x145   :  { %8869 = vst [vmem:[#allocation54_spill] sm:$0xff] %v6617_v14  ;;  %1251 = vmatpush.bf16.msrb.mxu2 %v5888_v10  ;;  %v728_v9 = vadd.f32 %v6545_v18, %v727_v45  ;;  %v757_v19 = vmul.f32 %v755_v33, %v712_v27  ;;  %v5243_v27 = vld [vmem:[%s8811_s4 + $0x60] sm:$0xf0]  ;;  %v5240_v33 = vld [vmem:[%s8811_s4 + $0x4c] sm:$0xf]  ;;  %1023 = vmatpush.bf16.msra.mxu1 %v6617_v14 }
 0x146   :  { %8870 = vst [vmem:[#allocation55_spill] sm:$0xff] %v6631_v2  ;;  %v5322_v45 = vpop.eup %5321  ;;  %996 = vmatpush.bf16.msrb.mxu3 %v6631_v2  ;;  %v6662_v10 = vor.u32 %v5243_v27, %v4953_v42  ;;  %v5236_v42 = vld [vmem:[%s8811_s4 + $0x28] sm:$0xf0]  ;;  %v5233_v37 = vld [vmem:[%s8811_s4 + $0x14] sm:$0xf] }
 0x147   :  { %8871 = vst [vmem:[#allocation56_spill] sm:$0xff] %v6633_v31  ;;  %v740_v13 = vmul.f32 %v5322_v45, %v6547_v17  ;;  %v732_v55 = vsel %vm6599_vm13, %v6545_v18, %v728_v9  ;;  %v759_v51 = vadd.f32 %v757_v19, %v314_v56  ;;  %v6671_v9 = vor.u32 %v5240_v33, %v4955_v34  ;;  %v5324_v56 = vpop.eup %5323  ;;  %v4939_v29 = vld [vmem:[%s8811_s4 + $0x2c] sm:$0xf0] }
 0x148   :  { %8872 = vst [vmem:[#allocation57_spill] sm:$0xff] %v6658_v62  ;;  %v737_v12 = vsel %vm734_vm14, %v736_v57, %v732_v55  ;;  %1010 = vmatpush.bf16.msra.mxu0 %v6633_v31  ;;  %v4937_v57 = vld [vmem:[%s8811_s4 + $0x10] sm:$0xf]  ;;  %vm745_vm15 = vweird.f32 %v5322_v45  ;;  %v748_v19 = vand.u32 2147483647, %v6547_v17 }
 0x149   :  { %8873 = vst [vmem:[#allocation58_spill] sm:$0xff] %v6662_v10  ;;  %v741_v18 = vsub.f32 1.0, %v740_v13  ;;  %v762_v41 = vsub.f32 1.0, %v737_v12  ;;  %1252 = vmatpush.bf16.msrb.mxu2 %v5909_v16  ;;  %v766_v34 = vmul.f32 %v737_v12, %v6035_v46  ;;  %1024 = vmatpush.bf16.msra.mxu1 %v6658_v62  ;;  %v6689_v13 = vor.u32 %v5244_v3, %v4961_v7  ;;  %v4945_v31 = vld [vmem:[%s8811_s4 + $0x18] sm:$0xf]  ;;  %vm746_vm4 = vmor %vm744_vm3, %vm745_vm15 }
 0x14a   :  { %8874 = vst [vmem:[#allocation59_spill] sm:$0xff] %v6671_v9  ;;  %5325 = vtanh.f32 %v759_v51  ;;  %997 = vmatpush.bf16.msrb.mxu3 %v6662_v10  ;;  %v6692_v55 = vor.u32 %v5236_v42, %v4937_v57  ;;  %v6704_v7 = vor.u32 %v5233_v37, %v4939_v29  ;;  %v751_v51 = vor.u32 1.1754944e-38, %v750_v52 }
 0x14b   :  { %v742_v27 = vmul.f32 %v5322_v45, %v741_v18  ;;  %v764_v33 = vmul.f32 %v5324_v56, %v762_v41  ;;  %8875 = vst [vmem:[#allocation60_spill] sm:$0xff] %v6689_v13  ;;  %v5237_v18 = vld [vmem:[%s8811_s4 + $0x30] sm:$0xf0]  ;;  %vm749_vm5 = vcmp.eq.f32.partialorder %v748_v19, 8.507059e+37 }
 0x14c   :  { %8876 = vst [vmem:[#allocation61_spill] sm:$0xff] %v6692_v55  ;;  %1011 = vmatpush.bf16.msra.mxu0 %v6671_v9  ;;  %v6711_v17 = vor.u32 %v5237_v18, %v4945_v31  ;;  %v6723_v31 = vpop.f32.mrf.mxu2 }
 0x14d   :  { %v6701_v46 = vadd.f32 %v766_v34, %v764_v33  ;;  %v743_v12 = vadd.f32 %v5322_v45, %v742_v27  ;;  %8877 = vst [vmem:[#allocation62_spill] sm:$0xff] %v6704_v7  ;;  %1253 = vmatpush.bf16.msrb.mxu2 %v5939_v25  ;;  %1025 = vmatpush.bf16.msra.mxu1 %v6689_v13  ;;  %v8881_v34 = vld [vmem:[#allocation43_spill] sm:$0xff] }
 0x14e   :  { %8878 = vst [vmem:[#allocation63_spill] sm:$0xff] %v6711_v17  ;;  %998 = vmatpush.bf16.msrb.mxu3 %v6692_v55 }
 0x14f   :  { %770 = vst.msk [vmem:[#allocation4] sm:$0xff] %vm481_vm1, %v6701_v46  ;;  %v747_v3 = vsel %vm746_vm4, %v5322_v45, %v743_v12  ;;  %v8883_v12 = vld [vmem:[#allocation9_spill] sm:$0xff] }
 0x150   :  { %v752_v41 = vsel %vm749_vm5, %v751_v51, %v747_v3  ;;  %1012 = vmatpush.bf16.msra.mxu0 %v6704_v7  ;;  %v5326_v42 = vpop.eup %5325  ;;  %v8884_v51 = vld [vmem:[#allocation45_spill] sm:$0xff]  ;;  %v8885_v3 = vld [vmem:[#allocation47_spill] sm:$0xff] }
 0x151   :  { %v763_v57 = vsub.f32 1.0, %v752_v41  ;;  %1254 = vmatpush.bf16.msrb.mxu2 %v5962_v32  ;;  %v767_v52 = vmul.f32 %v752_v41, %v6070_v54  ;;  %1026 = vmatpush.bf16.msra.mxu1 %v6711_v17  ;;  %v8886_v41 = vld [vmem:[#allocation10_spill] sm:$0xff] }
 0x153   :  { %v765_v56 = vmul.f32 %v5326_v42, %v763_v57  ;;  %v8887_v57 = vld [vmem:[#allocation49_spill] sm:$0xff]  ;;  %v8888_v42 = vld [vmem:[#allocation50_spill] sm:$0xff] }
 0x154   :  { %v6727_v54 = vpop.f32.mrf.mxu2 }
 0x155   :  { %v6718_v45 = vadd.f32 %v767_v52, %v765_v56  ;;  %1255 = vmatpush.bf16.msrb.mxu2 %v5978_v36  ;;  %v8890_v52 = vld [vmem:[#allocation51_spill] sm:$0xff] }
 0x156   :  { %v772_v19 = vld [vmem:[#allocation4] sm:$0xff] }
 0x157   :  { %771 = vst.msk [vmem:[#allocation4 + $0x8] sm:$0xff] %vm481_vm1, %v6718_v45 }
 0x159   :  { %1256 = vmatpush.bf16.msrb.mxu2 %v5993_v40 }
 0x15c   :  { %v6741_v27 = vpop.f32.mrf.mxu2 }
 0x15d   :  { %1257 = vmatpush.bf16.msrb.mxu2 %v6006_v43  ;;  %8879 = vst [vmem:[#allocation64_spill] sm:$0xff] %v6741_v27 }
 0x15e   :  { %v773_v37 = vld [vmem:[#allocation4 + $0x8] sm:$0xff] }
 0x15f   :  { %v774_v29 = vpack.c.bf16 %v773_v37, %v772_v19  ;;  %v8891_v19 = vld [vmem:[#allocation52_spill] sm:$0xff]  ;;  %v8892_v37 = vld [vmem:[#allocation53_spill] sm:$0xff] }
 0x161   :  { %943 = vmatmul.bf16.vlgmr.msra.gmra.mxu3 %v774_v29  ;;  %957 = vmatmul.bf16.vlgmr.msrb.gmra.mxu0 %v774_v29 }
 0x162   :  { %971 = vmatmul.bf16.vlgmr.msrb.gmra.mxu1 %v774_v29  ;;  %985 = vmatmul.bf16.vlgmr.msra.gmra.mxu2 %v774_v29 }
 0x163   :  { %1264 = vmatpush.bf16.msra.mxu3 %v5928_v22  ;;  %1278 = vmatpush.bf16.msrb.mxu0 %v6118_v4 }
 0x164   :  { %1292 = vmatpush.bf16.msrb.mxu1 %v6210_v59  ;;  %1306 = vmatpush.bf16.msra.mxu2 %v6400_v48  ;;  %v6751_v33 = vpop.f32.mrf.mxu2 }
 0x165   :  { %8880 = vst [vmem:[#allocation65_spill] sm:$0xff] %v6751_v33  ;;  %v186_v33 = vpop.f32.mrf.mxu0 }
 0x167   :  { %1265 = vmatpush.bf16.msra.mxu3 %v5948_v28  ;;  %1279 = vmatpush.bf16.msrb.mxu0 %v6136_v11 }
 0x168   :  { %1293 = vmatpush.bf16.msrb.mxu1 %v6224_v1  ;;  %1307 = vmatpush.bf16.msra.mxu2 %v6430_v39 }
 0x16b   :  { %1266 = vmatpush.bf16.msra.mxu3 %v5973_v35  ;;  %1280 = vmatpush.bf16.msrb.mxu0 %v6147_v15 }
 0x16c   :  { %1294 = vmatpush.bf16.msrb.mxu1 %v6241_v8  ;;  %1308 = vmatpush.bf16.msra.mxu2 %v6495_v49  ;;  %v6765_v18 = vpop.f32.mrf.mxu2 }
 0x16d   :  { %8882 = vst [vmem:[#allocation66_spill] sm:$0xff] %v6765_v18 }
 0x16f   :  { %1267 = vmatpush.bf16.msra.mxu3 %v6050_v50  ;;  %1281 = vmatpush.bf16.msrb.mxu0 %v6160_v20 }
 0x170   :  { %1295 = vmatpush.bf16.msrb.mxu1 %v6289_v24  ;;  %1309 = vmatpush.bf16.msra.mxu2 %v6534_v23 }
 0x171   :  { %999 = vmatmul.bf16.vlgmr.msrb.gmra.mxu3 %v774_v29  ;;  %1013 = vmatmul.bf16.vlgmr.msra.gmra.mxu0 %v774_v29 }
 0x172   :  { %1027 = vmatmul.bf16.vlgmr.msra.gmra.mxu1 %v774_v29  ;;  %v8893_v29 = vld [vmem:[#allocation56_spill] sm:$0xff] }
 0x173   :  { %1268 = vmatpush.bf16.msra.mxu3 %v6063_v53  ;;  %1282 = vmatpush.bf16.msrb.mxu0 %v6172_v26 }
 0x174   :  { %1296 = vmatpush.bf16.msrb.mxu1 %v6337_v44  ;;  %1310 = vmatpush.bf16.msra.mxu2 %v6583_v6  ;;  %v6776_v56 = vpop.f32.mrf.mxu2 }
 0x175   :  { %8889 = vst [vmem:[#allocation67_spill] sm:$0xff] %v6776_v56 }
 0x177   :  { %1269 = vmatpush.bf16.msra.mxu3 %v6086_v58  ;;  %1283 = vmatpush.bf16.msrb.mxu0 %v6181_v30 }
 0x178   :  { %1297 = vmatpush.bf16.msrb.mxu1 %v6369_v63  ;;  %1311 = vmatpush.bf16.msra.mxu2 %v6631_v2  ;;  %v8916_v2 = vld [vmem:[#allocation44_spill] sm:$0xff] }
 0x17b   :  { %1270 = vmatpush.bf16.msra.mxu3 %v6099_v61  ;;  %1284 = vmatpush.bf16.msrb.mxu0 %v6191_v38 }
 0x17c   :  { %1298 = vmatpush.bf16.msrb.mxu1 %v6484_v5  ;;  %1312 = vmatpush.bf16.msra.mxu2 %v6662_v10  ;;  %v6786_v18 = vpop.f32.mrf.mxu2 }
 0x17d   :  { %8894 = vst [vmem:[#allocation68_spill] sm:$0xff] %v6786_v18  ;;  %v6799_v18 = vpop.f32.mrf.mxu0 }
 0x17f   :  { %1271 = vmatpush.bf16.msra.mxu3 %v6110_v0  ;;  %1285 = vmatpush.bf16.msrb.mxu0 %v6200_v47 }
 0x180   :  { %1299 = vmatpush.bf16.msrb.mxu1 %v6493_v21  ;;  %1313 = vmatpush.bf16.msra.mxu2 %v6692_v55 }
 0x183   :  { %1320 = vmatpush.bf16.msrb.mxu3 %v6410_v60  ;;  %1334 = vmatpush.bf16.msra.mxu0 %v8881_v34 }
 0x184   :  { %1565 = vmatpush.bf16.msra.mxu1 %v8883_v12  ;;  %v6795_v56 = vpop.f32.mrf.mxu2 }
 0x185   :  { %8895 = vst [vmem:[#allocation69_spill] sm:$0xff] %v6795_v56 }
 0x187   :  { %1321 = vmatpush.bf16.msrb.mxu3 %v8884_v51  ;;  %1335 = vmatpush.bf16.msra.mxu0 %v8885_v3 }
 0x188   :  { %1566 = vmatpush.bf16.msra.mxu1 %v8886_v41 }
 0x18b   :  { %1322 = vmatpush.bf16.msrb.mxu3 %v8887_v57  ;;  %1336 = vmatpush.bf16.msra.mxu0 %v8888_v42 }
 0x18c   :  { %1567 = vmatpush.bf16.msra.mxu1 %v5909_v16  ;;  %v6797_v27 = vpop.f32.mrf.mxu2 }
 0x18d   :  { %8896 = vst [vmem:[#allocation70_spill] sm:$0xff] %v6797_v27 }
 0x18f   :  { %1323 = vmatpush.bf16.msrb.mxu3 %v8890_v52  ;;  %1337 = vmatpush.bf16.msra.mxu0 %v8891_v19 }
 0x190   :  { %1568 = vmatpush.bf16.msra.mxu1 %v5939_v25 }
 0x193   :  { %1324 = vmatpush.bf16.msrb.mxu3 %v8892_v37  ;;  %1338 = vmatpush.bf16.msra.mxu0 %v6617_v14  ;;  %v8909_v14 = vld [vmem:[#allocation37_spill] sm:$0xff] }
 0x194   :  { %1569 = vmatpush.bf16.msra.mxu1 %v5962_v32 }
 0x197   :  { %1325 = vmatpush.bf16.msrb.mxu3 %v8893_v29  ;;  %1339 = vmatpush.bf16.msra.mxu0 %v6658_v62  ;;  %v6801_v62 = vpop.f32.mrf.mxu2 }
 0x198   :  { %1570 = vmatpush.bf16.msra.mxu1 %v5978_v36  ;;  %v251_v36 = vpop.f32.mrf.mxu1  ;;  %8897 = vst [vmem:[#allocation71_spill] sm:$0xff] %v6801_v62 }
 0x19b   :  { %1326 = vmatpush.bf16.msrb.mxu3 %v6671_v9  ;;  %1340 = vmatpush.bf16.msra.mxu0 %v6689_v13  ;;  %v6803_v9 = vpop.f32.mrf.mxu0 }
 0x19c   :  { %1571 = vmatpush.bf16.msra.mxu1 %v5993_v40  ;;  %8898 = vst [vmem:[#allocation72_spill] sm:$0xff] %v6803_v9 }
 0x19f   :  { %1327 = vmatpush.bf16.msrb.mxu3 %v6704_v7  ;;  %1341 = vmatpush.bf16.msra.mxu0 %v6711_v17  ;;  %v6807_v40 = vpop.f32.mrf.mxu2 }
 0x1a0   :  { %1572 = vmatpush.bf16.msra.mxu1 %v6006_v43  ;;  %v6805_v13 = vpop.f32.mrf.mxu1  ;;  %8899 = vst [vmem:[#allocation73_spill] sm:$0xff] %v6807_v40  ;;  %v252_v40 = vadd.f32 %v251_v36, %v8909_v14 }
 0x1a3   :  { %v6809_v7 = vpop.f32.mrf.mxu0 }
 0x1a4   :  { %8900 = vst [vmem:[#allocation74_spill] sm:$0xff] %v6809_v7 }
 0x1a7   :  { %v6813_v43 = vpop.f32.mrf.mxu2 }
 0x1a8   :  { %v6811_v17 = vpop.f32.mrf.mxu1  ;;  %8902 = vst [vmem:[#allocation76_spill] sm:$0xff] %v6813_v43  ;;  %v8912_v43 = vld [vmem:[#allocation34_spill] sm:$0xff] }
 0x1a9   :  { %8901 = vst [vmem:[#allocation75_spill] sm:$0xff] %v6811_v17  ;;  %v8910_v17 = vld [vmem:[#allocation40_spill] sm:$0xff] }
 0x1aa   :  { %v6829_v19 = vperm.slane %v8910_v17, 1 }
 0x1ab   :  { %v6815_v56 = vpop.f32.mrf.mxu0 }
 0x1ac   :  { %8903 = vst [vmem:[#allocation77_spill] sm:$0xff] %v6815_v56  ;;  %v187_v56 = vadd.f32 %v186_v33, %v8912_v43 }
 0x1ad   :  { %8911 = vst [vmem:[#allocation37_spill] sm:$0xff] %v6829_v19 }
 0x1af   :  { %v6819_v29 = vpop.f32.mrf.mxu2 }
 0x1b0   :  { %v6817_v27 = vpop.f32.mrf.mxu1  ;;  %8905 = vst [vmem:[#allocation79_spill] sm:$0xff] %v6819_v29 }
 0x1b1   :  { %8904 = vst [vmem:[#allocation78_spill] sm:$0xff] %v6817_v27 }
 0x1b3   :  { %v6821_v32 = vpop.f32.mrf.mxu0 }
 0x1b4   :  { %8906 = vst [vmem:[#allocation80_spill] sm:$0xff] %v6821_v32 }
 0x1b7   :  { %v6825_v9 = vpop.f32.mrf.mxu2 }
 0x1b8   :  { %v6823_v62 = vpop.f32.mrf.mxu1  ;;  %8908 = vst [vmem:[#allocation82_spill] sm:$0xff] %v6825_v9 }
 0x1b9   :  { %8907 = vst [vmem:[#allocation81_spill] sm:$0xff] %v6823_v62 }
 0x1c0   :  { %v6832_v27 = vpop.f32.mrf.mxu1 }
 0x1c1   :  { %8913 = vst [vmem:[#allocation40_spill] sm:$0xff] %v6832_v27 }
 0x1de   :  { %v958_v37 = vpop.f32.mrf.mxu0 }
 0x1df   :  { %v1189_v7 = vadd.f32 %v958_v37, %v252_v40  ;;  %v972_v37 = vpop.f32.mrf.mxu1 }
 0x1e1   :  { %v5065_v25 = vmul.f32 -1.442695, %v1189_v7 }
 0x1e3   :  { %5327 = vpow2.f32 %v5065_v25 }
 0x1e4   :  { %v944_v29 = vpop.f32.mrf.mxu3 }
 0x1e5   :  { %v1149_v52 = vadd.f32 %v944_v29, %v187_v56  ;;  %v986_v32 = vpop.f32.mrf.mxu2 }
 0x1e6   :  { %v1033_v62 = vadd.f32 %v986_v32, %v6829_v19  ;;  %v6853_v21 = vpop.f32.mrf.mxu0 }
 0x1e7   :  { %v5063_v16 = vmul.f32 -1.442695, %v1149_v52 }
 0x1e8   :  { %v5059_v9 = vmul.f32 -1.442695, %v1033_v62  ;;  %v6842_v62 = vperm.slane %v8910_v17, 2 }
 0x1e9   :  { %v5328_v42 = vpop.eup %5327  ;;  %5329 = vpow2.f32 %v5063_v16 }
 0x1ea   :  { %5331 = vpow2.f32 %v5059_v9  ;;  %v6835_v36 = vadd.f32 1.0, %v5328_v42  ;;  %8914 = vst [vmem:[#allocation34_spill] sm:$0xff] %v6842_v62 }
 0x1ec   :  { %v6837_v40 = vpop.f32.mrf.mxu3  ;;  %5333 = vrcp.f32 %v6835_v36  ;;  %vm1204_vm14 = vweird.f32 %v6835_v36 }
 0x1ed   :  { %v988_v7 = vpop.f32.mrf.mxu2 }
 0x1ee   :  { %v1034_v25 = vadd.f32 %v988_v7, %v6829_v19  ;;  %v6849_v19 = vpop.f32.mrf.mxu1 }
 0x1ef   :  { %v5330_v33 = vpop.eup %5329 }
 0x1f0   :  { %v5332_v56 = vpop.eup %5331  ;;  %v1157_v29 = vadd.f32 1.0, %v5330_v33  ;;  %v5060_v27 = vmul.f32 -1.442695, %v1034_v25 }
 0x1f1   :  { %v1041_v32 = vadd.f32 1.0, %v5332_v56 }
 0x1f2   :  { %5335 = vrcp.f32 %v1157_v29  ;;  %v6844_v9 = vpop.eup %5333  ;;  %v1168_v51 = vand.u32 2147483647, %v1157_v29  ;;  %v1170_v55 = vand.u32 2147483648, %v1157_v29  ;;  %vm1164_vm7 = vweird.f32 %v1157_v29 }
 0x1f3   :  { %5337 = vrcp.f32 %v1041_v32  ;;  %v1200_v7 = vmul.f32 %v6844_v9, %v6835_v36  ;;  %vm1048_vm11 = vweird.f32 %v1041_v32  ;;  %vm1205_vm13 = vweird.f32 %v6844_v9 }
 0x1f4   :  { %5339 = vpow2.f32 %v5060_v27  ;;  %v1000_v16 = vpop.f32.mrf.mxu3  ;;  %vm1169_vm8 = vcmp.eq.f32.partialorder %v1168_v51, 8.507059e+37  ;;  %vm6882_vm3 = vmor %vm1204_vm14, %vm1205_vm13 }
 0x1f5   :  { %v1073_v42 = vadd.f32 %v1000_v16, %v6842_v62  ;;  %v1201_v27 = vsub.f32 1.0, %v1200_v7 }
 0x1f6   :  { %v1028_v51 = vpop.f32.mrf.mxu1 }
 0x1f7   :  { %v5061_v33 = vmul.f32 -1.442695, %v1073_v42  ;;  %v8915_v42 = vld [vmem:[#allocation41_spill] sm:$0xff]  ;;  %v1202_v7 = vmul.f32 %v6844_v9, %v1201_v27  ;;  %v1210_v27 = vand.u32 2147483648, %v6835_v36 }
 0x1f8   :  { %v5336_v52 = vpop.eup %5335  ;;  %v1229_v47 = vadd.f32 %v972_v37, %v8915_v42  ;;  %v317_v37 = vadd.f32 %v6723_v31, %v8916_v2 }
 0x1f9   :  { %v5338_v25 = vpop.eup %5337  ;;  %v1160_v56 = vmul.f32 %v5336_v52, %v1157_v29  ;;  %5341 = vpow2.f32 %v5061_v33  ;;  %vm1165_vm6 = vweird.f32 %v5336_v52  ;;  %v1054_v33 = vand.u32 2147483648, %v1041_v32 }
 0x1fa   :  { %v5340_v57 = vpop.eup %5339  ;;  %v1044_v41 = vmul.f32 %v5338_v25, %v1041_v32  ;;  %vm1049_vm9 = vweird.f32 %v5338_v25  ;;  %vm1166_vm10 = vmor %vm1164_vm7, %vm1165_vm6 }
 0x1fb   :  { %v1161_v3 = vsub.f32 1.0, %v1160_v56  ;;  %v6851_v12 = vadd.f32 1.0, %v5340_v57  ;;  %v1171_v56 = vor.u32 1.1754944e-38, %v1170_v55  ;;  %vm6865_vm12 = vmor %vm1048_vm11, %vm1049_vm9  ;;  %v1055_v31 = vor.u32 1.1754944e-38, %v1054_v33 }
 0x1fc   :  { %v1045_v16 = vsub.f32 1.0, %v1044_v41  ;;  %v1002_v34 = vpop.f32.mrf.mxu3 }
 0x1fd   :  { %v1162_v60 = vmul.f32 %v5336_v52, %v1161_v3  ;;  %5343 = vrcp.f32 %v6851_v12  ;;  %v1074_v57 = vadd.f32 %v1002_v34, %v6842_v62  ;;  %v1052_v3 = vand.u32 2147483647, %v1041_v32 }
 0x1fe   :  { %v1046_v0 = vmul.f32 %v5338_v25, %v1045_v16  ;;  %v1014_v16 = vpop.f32.mrf.mxu0  ;;  %v1069_v33 = vand.u32 2147483648, %v6851_v12  ;;  %vm1063_vm5 = vweird.f32 %v6851_v12 }
 0x1ff   :  { %v1163_v10 = vadd.f32 %v5336_v52, %v1162_v60  ;;  %v5062_v38 = vmul.f32 -1.442695, %v1074_v57  ;;  %v5342_v61 = vpop.eup %5341  ;;  %v6862_v60 = vperm.slane %v8910_v17, 4  ;;  %vm1053_vm15 = vcmp.eq.f32.partialorder %v1052_v3, 8.507059e+37 }
 0x200   :  { %v1047_v41 = vadd.f32 %v5338_v25, %v1046_v0  ;;  %v6872_v32 = vadd.f32 1.0, %v5342_v61  ;;  %v1211_v3 = vor.u32 1.1754944e-38, %v1210_v27 }
 0x201   :  { %v1167_v5 = vsel %vm1166_vm10, %v5336_v52, %v1163_v10  ;;  %5345 = vpow2.f32 %v5062_v38  ;;  %v1203_v52 = vadd.f32 %v6844_v9, %v1202_v7  ;;  %v6887_v38 = vperm.slane %v8910_v17, 3 }
 0x202   :  { %v1172_v29 = vsel %vm1169_vm8, %v1171_v56, %v1167_v5  ;;  %v1051_v55 = vsel %vm6865_vm12, %v5338_v25, %v1047_v41  ;;  %5347 = vrcp.f32 %v6872_v32  ;;  %v1115_v7 = vadd.f32 %v1028_v51, %v6862_v60 }
 0x203   :  { %v5344_v0 = vpop.eup %5343  ;;  %v1231_v10 = vmul.f32 %v1229_v47, %v1172_v29  ;;  %v1208_v47 = vand.u32 2147483647, %v6835_v36  ;;  %v1056_v57 = vsel %vm1053_vm15, %v1055_v31, %v1051_v55  ;;  %v1207_v36 = vsel %vm6882_vm3, %v6844_v9, %v1203_v52 }
 0x204   :  { %v1059_v5 = vmul.f32 %v5344_v0, %v6851_v12  ;;  %vm1064_vm4 = vweird.f32 %v5344_v0  ;;  %v1067_v29 = vand.u32 2147483647, %v6851_v12  ;;  %v1113_v51 = vadd.f32 %v1014_v16, %v6887_v38 }
 0x205   :  { %v1233_v61 = vadd.f32 %v1231_v10, %v317_v37  ;;  %v1117_v37 = vmul.f32 %v1115_v7, %v1056_v57  ;;  %vm1209_vm6 = vcmp.eq.f32.partialorder %v1208_v47, 8.507059e+37  ;;  %vm1065_vm7 = vmor %vm1063_vm5, %vm1064_vm4  ;;  %v1070_v52 = vor.u32 1.1754944e-38, %v1069_v33 }
 0x206   :  { %v1060_v25 = vsub.f32 1.0, %v1059_v5  ;;  %v1212_v31 = vsel %vm1209_vm6, %v1211_v3, %v1207_v36  ;;  %vm1068_vm8 = vcmp.eq.f32.partialorder %v1067_v29, 8.507059e+37  ;;  %v1092_v47 = vand.u32 2147483647, %v6872_v32 }
 0x207   :  { %5349 = vtanh.f32 %v1233_v61  ;;  %v5346_v34 = vpop.eup %5345  ;;  %v1119_v27 = vadd.f32 %v1117_v37, %v1113_v51  ;;  %v1237_v56 = vsub.f32 1.0, %v1212_v31  ;;  %v1094_v16 = vand.u32 2147483648, %v6872_v32 }
 0x208   :  { %v1061_v41 = vmul.f32 %v5344_v0, %v1060_v25  ;;  %v5348_v17 = vpop.eup %5347  ;;  %v1082_v55 = vadd.f32 1.0, %v5346_v34  ;;  %v1030_v25 = vpop.f32.mrf.mxu1  ;;  %vm1088_vm10 = vweird.f32 %v6872_v32  ;;  %vm1093_vm12 = vcmp.eq.f32.partialorder %v1092_v47, 8.507059e+37 }
 0x209   :  { %v1084_v5 = vmul.f32 %v5348_v17, %v6872_v32  ;;  %v1116_v12 = vadd.f32 %v1030_v25, %v6862_v60  ;;  %vm1089_vm9 = vweird.f32 %v5348_v17  ;;  %v1095_v51 = vor.u32 1.1754944e-38, %v1094_v16  ;;  %v5723_v32 = vld [vmem:[%s8808_s27 + $0x10] sm:$0xff] }
 0x20a   :  { %v1062_v10 = vadd.f32 %v5344_v0, %v1061_v41  ;;  %5351 = vrcp.f32 %v1082_v55  ;;  %v1016_v41 = vpop.f32.mrf.mxu0  ;;  %vm1090_vm11 = vmor %vm1088_vm10, %vm1089_vm9  ;;  %vm1103_vm14 = vweird.f32 %v1082_v55 }
 0x20b   :  { %v1085_v57 = vsub.f32 1.0, %v1084_v5  ;;  %5353 = vtanh.f32 %v1119_v27  ;;  %v1109_v27 = vand.u32 2147483648, %v1082_v55 }
 0x20c   :  { %v1066_v9 = vsel %vm1065_vm7, %v5344_v0, %v1062_v10  ;;  %v1241_v0 = vmul.f32 %v1212_v31, %v6701_v46  ;;  %v1114_v10 = vadd.f32 %v1016_v41, %v6887_v38  ;;  %v1107_v31 = vand.u32 2147483647, %v1082_v55 }
 0x20d   :  { %v1071_v61 = vsel %vm1068_vm8, %v1070_v52, %v1066_v9  ;;  %v5350_v7 = vpop.eup %5349  ;;  %v1086_v36 = vmul.f32 %v5348_v17, %v1085_v57  ;;  %v1110_v47 = vor.u32 1.1754944e-38, %v1109_v27 }
 0x20e   :  { %v1239_v3 = vmul.f32 %v5350_v7, %v1237_v56  ;;  %v1118_v33 = vmul.f32 %v1116_v12, %v1071_v61  ;;  %vm1108_vm3 = vcmp.eq.f32.partialorder %v1107_v31, 8.507059e+37 }
 0x20f   :  { %v1087_v37 = vadd.f32 %v5348_v17, %v1086_v36 }
 0x210   :  { %v6903_v29 = vadd.f32 %v1241_v0, %v1239_v3  ;;  %v5352_v34 = vpop.eup %5351  ;;  %v1120_v9 = vadd.f32 %v1118_v33, %v1114_v10 }
 0x211   :  { %v1099_v5 = vmul.f32 %v5352_v34, %v1082_v55  ;;  %v1091_v25 = vsel %vm1090_vm11, %v5348_v17, %v1087_v37  ;;  %v5354_v46 = vpop.eup %5353  ;;  %vm1104_vm13 = vweird.f32 %v5352_v34  ;;  %v5724_v37 = vld [vmem:[%s8808_s27 + $0x18] sm:$0xff] }
 0x212   :  { %v1096_v52 = vsel %vm1093_vm12, %v1095_v51, %v1091_v25  ;;  %5355 = vtanh.f32 %v1120_v9  ;;  %vm1105_vm15 = vmor %vm1103_vm14, %vm1104_vm13  ;;  %v255_v25 = vadd.f32 %v6805_v13, %v8909_v14 }
 0x213   :  { %v1100_v57 = vsub.f32 1.0, %v1099_v5  ;;  %v1123_v56 = vsub.f32 1.0, %v1096_v52  ;;  %v1127_v7 = vmul.f32 %v5723_v32, %v1096_v52 }
 0x214   :  { %v1190_v52 = vadd.f32 %v6853_v21, %v255_v25 }
 0x215   :  { %v1125_v61 = vmul.f32 %v5354_v46, %v1123_v56  ;;  %v1101_v12 = vmul.f32 %v5352_v34, %v1100_v57 }
 0x216   :  { %v5066_v56 = vmul.f32 -1.442695, %v1190_v52 }
 0x217   :  { %v6909_v16 = vadd.f32 %v1127_v7, %v1125_v61  ;;  %v1102_v17 = vadd.f32 %v5352_v34, %v1101_v12 }
 0x218   :  { %v5356_v0 = vpop.eup %5355 }
 0x219   :  { %1135 = vrot.lane.b32.xlu1 %v6909_v16, %s5725_s0  ;;  %1131 = vst.msk [vmem:[#allocation3] sm:$0xff] %vm481_vm1, %v6909_v16  ;;  %v1106_v41 = vsel %vm1105_vm15, %v5352_v34, %v1102_v17  ;;  %v190_v34 = vadd.f32 %v6799_v18, %v8912_v43 }
 0x21a   :  { %v1111_v36 = vsel %vm1108_vm3, %v1110_v47, %v1106_v41 }
 0x21b   :  { %v1124_v3 = vsub.f32 1.0, %v1111_v36  ;;  %v1128_v10 = vmul.f32 %v5724_v37, %v1111_v36  ;;  %v1150_v51 = vadd.f32 %v6837_v40, %v190_v34  ;;  %v320_v37 = vadd.f32 %v6727_v54, %v8916_v2 }
 0x21d   :  { %v1126_v33 = vmul.f32 %v5356_v0, %v1124_v3  ;;  %v5064_v5 = vmul.f32 -1.442695, %v1150_v51  ;;  %v1230_v3 = vadd.f32 %v6849_v19, %v8915_v42 }
 0x21f   :  { %v6918_v55 = vadd.f32 %v1128_v10, %v1126_v33  ;;  %5357 = vpow2.f32 %v5064_v5 }
 0x221   :  { %1137 = vrot.lane.b32.xlu1 %v6918_v55, %s5725_s0  ;;  %1132 = vst.msk [vmem:[#allocation3 + $0x8] sm:$0xff] %vm481_vm1, %v6918_v55 }
 0x225   :  { %v5358_v9 = vpop.eup %5357 }
 0x226   :  { %v1158_v57 = vadd.f32 1.0, %v5358_v9 }
 0x228   :  { %5359 = vrcp.f32 %v1158_v57  ;;  %v1185_v12 = vand.u32 2147483648, %v1158_v57  ;;  %vm1179_vm5 = vweird.f32 %v1158_v57  ;;  %v1183_v13 = vand.u32 2147483647, %v1158_v57 }
 0x229   :  { %5361 = vpow2.f32 %v5066_v56 }
 0x22a   :  { %v1186_v47 = vor.u32 1.1754944e-38, %v1185_v12  ;;  %vm1184_vm7 = vcmp.eq.f32.partialorder %v1183_v13, 8.507059e+37  ;;  %v8924_v12 = vld [vmem:[#allocation46_spill] sm:$0xff] }
 0x22b   :  { %v8925_v13 = vld [vmem:[#allocation58_spill] sm:$0xff] }
 0x22e   :  { %v5360_v46 = vpop.eup %5359 }
 0x22f   :  { %v5362_v31 = vpop.eup %5361  ;;  %v1175_v27 = vmul.f32 %v5360_v46, %v1158_v57  ;;  %vm1180_vm4 = vweird.f32 %v5360_v46 }
 0x230   :  { %v1198_v61 = vadd.f32 1.0, %v5362_v31  ;;  %vm1181_vm6 = vmor %vm1179_vm5, %vm1180_vm4 }
 0x231   :  { %v1176_v32 = vsub.f32 1.0, %v1175_v27 }
 0x232   :  { %5363 = vrcp.f32 %v1198_v61  ;;  %v1225_v51 = vand.u32 2147483648, %v1198_v61  ;;  %vm1219_vm9 = vweird.f32 %v1198_v61  ;;  %v1223_v5 = vand.u32 2147483647, %v1198_v61 }
 0x233   :  { %v1177_v18 = vmul.f32 %v5360_v46, %v1176_v32 }
 0x234   :  { %v1226_v9 = vor.u32 1.1754944e-38, %v1225_v51  ;;  %vm1224_vm11 = vcmp.eq.f32.partialorder %v1223_v5, 8.507059e+37  ;;  %v8937_v51 = vld [vmem:[#allocation50_spill] sm:$0xff]  ;;  %v8938_v5 = vld [vmem:[#allocation11_spill] sm:$0xff] }
 0x235   :  { %v1178_v7 = vadd.f32 %v5360_v46, %v1177_v18 }
 0x237   :  { %v1182_v21 = vsel %vm1181_vm6, %v5360_v46, %v1178_v7  ;;  %v8923_v7 = vld [vmem:[#allocation19_spill] sm:$0xff] }
 0x238   :  { %v5364_v40 = vpop.eup %5363  ;;  %v1187_v36 = vsel %vm1184_vm7, %v1186_v47, %v1182_v21  ;;  %v8927_v21 = vld [vmem:[#allocation20_spill] sm:$0xff]  ;;  %v8928_v47 = vld [vmem:[#allocation42_spill] sm:$0xff] }
 0x239   :  { %v1215_v17 = vmul.f32 %v5364_v40, %v1198_v61  ;;  %v1232_v0 = vmul.f32 %v1230_v3, %v1187_v36  ;;  %vm1220_vm8 = vweird.f32 %v5364_v40  ;;  %v8930_v36 = vld [vmem:[#allocation48_spill] sm:$0xff]  ;;  %v8931_v3 = vld [vmem:[#allocation61_spill] sm:$0xff] }
 0x23a   :  { %vm1221_vm10 = vmor %vm1219_vm9, %vm1220_vm8 }
 0x23b   :  { %v1216_v41 = vsub.f32 1.0, %v1215_v17  ;;  %v1234_v10 = vadd.f32 %v1232_v0, %v320_v37  ;;  %v8926_v17 = vld [vmem:[#allocation18_spill] sm:$0xff]  ;;  %v8932_v0 = vld [vmem:[#allocation9_spill] sm:$0xff]  ;;  %v8934_v37 = vld [vmem:[#allocation47_spill] sm:$0xff] }
 0x23d   :  { %v1217_v33 = vmul.f32 %v5364_v40, %v1216_v41  ;;  %5365 = vtanh.f32 %v1234_v10  ;;  %v8929_v41 = vld [vmem:[#allocation43_spill] sm:$0xff]  ;;  %v8935_v10 = vld [vmem:[#allocation10_spill] sm:$0xff] }
 0x23f   :  { %v1218_v34 = vadd.f32 %v5364_v40, %v1217_v33  ;;  %v8933_v33 = vld [vmem:[#allocation45_spill] sm:$0xff] }
 0x241   :  { %v1222_v25 = vsel %vm1221_vm10, %v5364_v40, %v1218_v34  ;;  %v8922_v40 = vld [vmem:[#allocation17_spill] sm:$0xff] }
 0x242   :  { %v1227_v52 = vsel %vm1224_vm11, %v1226_v9, %v1222_v25  ;;  %v8936_v34 = vld [vmem:[#allocation49_spill] sm:$0xff]  ;;  %v8939_v25 = vld [vmem:[#allocation51_spill] sm:$0xff]  ;;  %v8940_v9 = vld [vmem:[#allocation52_spill] sm:$0xff] }
 0x243   :  { %v5366_v56 = vpop.eup %5365  ;;  %v1238_v54 = vsub.f32 1.0, %v1227_v52  ;;  %v1242_v46 = vmul.f32 %v1227_v52, %v6718_v45  ;;  %v8921_v45 = vld [vmem:[#allocation55_spill] sm:$0xff]  ;;  %v8941_v52 = vld [vmem:[#allocation12_spill] sm:$0xff] }
 0x245   :  { %v1240_v19 = vmul.f32 %v5366_v56, %v1238_v54  ;;  %v8943_v56 = vld [vmem:[#allocation54_spill] sm:$0xff]  ;;  %v8944_v54 = vld [vmem:[#allocation13_spill] sm:$0xff] }
 0x247   :  { %v6938_v31 = vadd.f32 %v1242_v46, %v1240_v19  ;;  %v8945_v19 = vld [vmem:[#allocation56_spill] sm:$0xff]  ;;  %v8946_v46 = vld [vmem:[#allocation57_spill] sm:$0xff] }
 0x28b   :  { %v1136_v57 = vpop.permute.xlu1 %1135 }
 0x28c   :  { %1141 = vst.msk [vmem:[#allocation4] sm:$0xff] %vm492_vm2, %v1136_v57  ;;  %v8942_v57 = vld [vmem:[#allocation53_spill] sm:$0xff] }
 0x28d   :  { %1245 = vst.msk [vmem:[#allocation4] sm:$0xff] %vm481_vm1, %v6903_v29 }
 0x293   :  { %v1138_v27 = vpop.permute.xlu1 %1137 }
 0x294   :  { %1142 = vst.msk [vmem:[#allocation4 + $0x8] sm:$0xff] %vm492_vm2, %v1138_v27  ;;  %v1247_v61 = vld [vmem:[#allocation4] sm:$0xff] }
 0x295   :  { %1246 = vst.msk [vmem:[#allocation4 + $0x8] sm:$0xff] %vm481_vm1, %v6938_v31  ;;  %v8947_v27 = vld [vmem:[#allocation14_spill] sm:$0xff] }
 0x29c   :  { %v1248_v32 = vld [vmem:[#allocation4 + $0x8] sm:$0xff] }
 0x29d   :  { %v1249_v18 = vpack.c.bf16 %v1248_v32, %v1247_v61  ;;  %v8948_v61 = vld [vmem:[#allocation59_spill] sm:$0xff]  ;;  %v8949_v32 = vld [vmem:[#allocation60_spill] sm:$0xff] }
 0x29f   :  { %1258 = vmatmul.bf16.vlgmr.msrb.gmra.mxu2 %v1249_v18  ;;  %1272 = vmatmul.bf16.vlgmr.msra.gmra.mxu3 %v1249_v18 }
 0x2a0   :  { %1286 = vmatmul.bf16.vlgmr.msrb.gmra.mxu0 %v1249_v18  ;;  %1300 = vmatmul.bf16.vlgmr.msrb.gmra.mxu1 %v1249_v18 }
 0x2a1   :  { %1579 = vmatpush.bf16.msrb.mxu2 %v5928_v22  ;;  %1593 = vmatpush.bf16.msra.mxu3 %v6118_v4 }
 0x2a2   :  { %1607 = vmatpush.bf16.msrb.mxu0 %v6210_v59  ;;  %1621 = vmatpush.bf16.msrb.mxu1 %v6400_v48 }
 0x2a5   :  { %1580 = vmatpush.bf16.msrb.mxu2 %v5948_v28  ;;  %1594 = vmatpush.bf16.msra.mxu3 %v6136_v11 }
 0x2a6   :  { %1608 = vmatpush.bf16.msrb.mxu0 %v6224_v1  ;;  %1622 = vmatpush.bf16.msrb.mxu1 %v6430_v39 }
 0x2a9   :  { %1581 = vmatpush.bf16.msrb.mxu2 %v5973_v35  ;;  %1595 = vmatpush.bf16.msra.mxu3 %v6147_v15 }
 0x2aa   :  { %1609 = vmatpush.bf16.msrb.mxu0 %v6241_v8  ;;  %1623 = vmatpush.bf16.msrb.mxu1 %v6495_v49 }
 0x2ad   :  { %1582 = vmatpush.bf16.msrb.mxu2 %v6050_v50  ;;  %1596 = vmatpush.bf16.msra.mxu3 %v6160_v20 }
 0x2ae   :  { %1610 = vmatpush.bf16.msrb.mxu0 %v6289_v24  ;;  %1624 = vmatpush.bf16.msrb.mxu1 %v6534_v23 }
 0x2af   :  { %1314 = vmatmul.bf16.vlgmr.msra.gmra.mxu2 %v1249_v18  ;;  %1328 = vmatmul.bf16.vlgmr.msrb.gmra.mxu3 %v1249_v18 }
 0x2b0   :  { %1342 = vmatmul.bf16.vlgmr.msra.gmra.mxu0 %v1249_v18  ;;  %v8950_v18 = vld [vmem:[#allocation15_spill] sm:$0xff] }
 0x2b1   :  { %1583 = vmatpush.bf16.msrb.mxu2 %v6063_v53  ;;  %1597 = vmatpush.bf16.msra.mxu3 %v6172_v26 }
 0x2b2   :  { %1611 = vmatpush.bf16.msrb.mxu0 %v6337_v44  ;;  %1625 = vmatpush.bf16.msrb.mxu1 %v6583_v6 }
 0x2b5   :  { %1584 = vmatpush.bf16.msrb.mxu2 %v6086_v58  ;;  %1598 = vmatpush.bf16.msra.mxu3 %v6181_v30 }
 0x2b6   :  { %1612 = vmatpush.bf16.msrb.mxu0 %v6369_v63  ;;  %1626 = vmatpush.bf16.msrb.mxu1 %v8921_v45 }
 0x2b9   :  { %1585 = vmatpush.bf16.msrb.mxu2 %v8922_v40  ;;  %1599 = vmatpush.bf16.msra.mxu3 %v8923_v7 }
 0x2ba   :  { %1613 = vmatpush.bf16.msrb.mxu0 %v8924_v12  ;;  %1627 = vmatpush.bf16.msrb.mxu1 %v8925_v13 }
 0x2bd   :  { %1586 = vmatpush.bf16.msrb.mxu2 %v8926_v17  ;;  %1600 = vmatpush.bf16.msra.mxu3 %v8927_v21 }
 0x2be   :  { %1614 = vmatpush.bf16.msrb.mxu0 %v8930_v36  ;;  %1628 = vmatpush.bf16.msrb.mxu1 %v8931_v3 }
 0x2c1   :  { %1635 = vmatpush.bf16.msra.mxu2 %v8928_v47  ;;  %1649 = vmatpush.bf16.msrb.mxu3 %v8929_v41 }
 0x2c2   :  { %1880 = vmatpush.bf16.msra.mxu0 %v8932_v0 }
 0x2c5   :  { %1636 = vmatpush.bf16.msra.mxu2 %v8933_v33  ;;  %1650 = vmatpush.bf16.msrb.mxu3 %v8934_v37 }
 0x2c6   :  { %1881 = vmatpush.bf16.msra.mxu0 %v8935_v10 }
 0x2c9   :  { %1637 = vmatpush.bf16.msra.mxu2 %v8936_v34  ;;  %1651 = vmatpush.bf16.msrb.mxu3 %v8937_v51 }
 0x2ca   :  { %1882 = vmatpush.bf16.msra.mxu0 %v8938_v5 }
 0x2cd   :  { %1638 = vmatpush.bf16.msra.mxu2 %v8939_v25  ;;  %1652 = vmatpush.bf16.msrb.mxu3 %v8940_v9  ;;  %v8951_v9 = vld [vmem:[#allocation62_spill] sm:$0xff] }
 0x2ce   :  { %1883 = vmatpush.bf16.msra.mxu0 %v8941_v52  ;;  %v8952_v52 = vld [vmem:[#allocation63_spill] sm:$0xff] }
 0x2d1   :  { %1639 = vmatpush.bf16.msra.mxu2 %v8942_v57  ;;  %1653 = vmatpush.bf16.msrb.mxu3 %v8943_v56  ;;  %v8953_v57 = vld [vmem:[#allocation16_spill] sm:$0xff] }
 0x2d2   :  { %1884 = vmatpush.bf16.msra.mxu0 %v8944_v54  ;;  %v8954_v54 = vld [vmem:[#allocation37_spill] sm:$0xff] }
 0x2d5   :  { %1640 = vmatpush.bf16.msra.mxu2 %v8945_v19  ;;  %1654 = vmatpush.bf16.msrb.mxu3 %v8946_v46  ;;  %v8955_v46 = vld [vmem:[#allocation72_spill] sm:$0xff] }
 0x2d6   :  { %1885 = vmatpush.bf16.msra.mxu0 %v8947_v27  ;;  %v193_v5 = vadd.f32 %v8955_v46, %v8912_v43  ;;  %v8956_v27 = vld [vmem:[#allocation75_spill] sm:$0xff] }
 0x2d9   :  { %1641 = vmatpush.bf16.msra.mxu2 %v8948_v61  ;;  %1655 = vmatpush.bf16.msrb.mxu3 %v8949_v32  ;;  %v258_v61 = vadd.f32 %v8956_v27, %v8909_v14 }
 0x2da   :  { %1886 = vmatpush.bf16.msra.mxu0 %v8950_v18 }
 0x2dd   :  { %1642 = vmatpush.bf16.msra.mxu2 %v8951_v9  ;;  %1656 = vmatpush.bf16.msrb.mxu3 %v8952_v52 }
 0x2de   :  { %1887 = vmatpush.bf16.msra.mxu0 %v8953_v57 }
 0x31d   :  { %v1301_v56 = vpop.f32.mrf.mxu1  ;;  %v1287_v33 = vpop.f32.mrf.mxu0 }
 0x31e   :  { %v1348_v25 = vadd.f32 %v1301_v56, %v8954_v54 }
 0x320   :  { %v5067_v19 = vmul.f32 -1.442695, %v1348_v25 }
 0x322   :  { %5367 = vpow2.f32 %v5067_v19  ;;  %v1259_v32 = vpop.f32.mrf.mxu2  ;;  %v1273_v51 = vpop.f32.mrf.mxu3 }
 0x323   :  { %v1464_v18 = vadd.f32 %v1259_v32, %v193_v5  ;;  %v1504_v34 = vadd.f32 %v1273_v51, %v258_v61 }
 0x325   :  { %v5071_v9 = vmul.f32 -1.442695, %v1464_v18  ;;  %v5073_v10 = vmul.f32 -1.442695, %v1504_v34  ;;  %v1303_v52 = vpop.f32.mrf.mxu1  ;;  %v7014_v61 = vpop.f32.mrf.mxu0 }
 0x326   :  { %v1349_v57 = vadd.f32 %v1303_v52, %v8954_v54 }
 0x327   :  { %5369 = vpow2.f32 %v5071_v9 }
 0x328   :  { %v5368_v37 = vpop.eup %5367  ;;  %5371 = vpow2.f32 %v5073_v10  ;;  %v5068_v25 = vmul.f32 -1.442695, %v1349_v57 }
 0x329   :  { %v1356_v56 = vadd.f32 1.0, %v5368_v37 }
 0x32a   :  { %5373 = vpow2.f32 %v5068_v25  ;;  %v7005_v46 = vpop.f32.mrf.mxu2  ;;  %v7022_v36 = vpop.f32.mrf.mxu3 }
 0x32b   :  { %5375 = vrcp.f32 %v1356_v56  ;;  %v1367_v41 = vand.u32 2147483647, %v1356_v56  ;;  %vm1363_vm14 = vweird.f32 %v1356_v56 }
 0x32d   :  { %v5370_v19 = vpop.eup %5369  ;;  %vm1368_vm5 = vcmp.eq.f32.partialorder %v1367_v41, 8.507059e+37 }
 0x32e   :  { %v5372_v27 = vpop.eup %5371  ;;  %v1472_v0 = vadd.f32 1.0, %v5370_v19 }
 0x32f   :  { %v7007_v5 = vadd.f32 1.0, %v5372_v27 }
 0x330   :  { %v5374_v51 = vpop.eup %5373  ;;  %5377 = vrcp.f32 %v1472_v0  ;;  %v1483_v21 = vand.u32 2147483647, %v1472_v0  ;;  %vm1479_vm15 = vweird.f32 %v1472_v0 }
 0x331   :  { %v5376_v34 = vpop.eup %5375  ;;  %5379 = vrcp.f32 %v7007_v5  ;;  %v7010_v9 = vadd.f32 1.0, %v5374_v51  ;;  %vm1519_vm10 = vweird.f32 %v7007_v5 }
 0x332   :  { %v1359_v10 = vmul.f32 %v5376_v34, %v1356_v56  ;;  %v1315_v52 = vpop.f32.mrf.mxu2  ;;  %vm1364_vm12 = vweird.f32 %v5376_v34  ;;  %vm1484_vm6 = vcmp.eq.f32.partialorder %v1483_v21, 8.507059e+37  ;;  %v1329_v21 = vpop.f32.mrf.mxu3 }
 0x333   :  { %5381 = vrcp.f32 %v7010_v9  ;;  %v1388_v37 = vadd.f32 %v1315_v52, %v6842_v62  ;;  %v1485_v52 = vand.u32 2147483648, %v1472_v0  ;;  %vm7027_vm3 = vmor %vm1363_vm14, %vm1364_vm12  ;;  %vm1378_vm9 = vweird.f32 %v7010_v9 }
 0x334   :  { %v1360_v57 = vsub.f32 1.0, %v1359_v10 }
 0x335   :  { %v5069_v32 = vmul.f32 -1.442695, %v1388_v37  ;;  %v1486_v45 = vor.u32 1.1754944e-38, %v1485_v52 }
 0x336   :  { %v5378_v18 = vpop.eup %5377  ;;  %v1361_v25 = vmul.f32 %v5376_v34, %v1360_v57 }
 0x337   :  { %v7016_v19 = vpop.eup %5379  ;;  %v1475_v27 = vmul.f32 %v5378_v18, %v1472_v0  ;;  %5383 = vpow2.f32 %v5069_v32  ;;  %vm1480_vm13 = vweird.f32 %v5378_v18  ;;  %v1369_v32 = vand.u32 2147483648, %v1356_v56 }
 0x338   :  { %v1515_v51 = vmul.f32 %v7016_v19, %v7007_v5  ;;  %v1362_v10 = vadd.f32 %v5376_v34, %v1361_v25  ;;  %vm1481_vm4 = vmor %vm1479_vm15, %vm1480_vm13  ;;  %vm1520_vm8 = vweird.f32 %v7016_v19 }
 0x339   :  { %v7020_v54 = vpop.eup %5381  ;;  %v1476_v3 = vsub.f32 1.0, %v1475_v27  ;;  %v1544_v27 = vadd.f32 %v1287_v33, %v8915_v42  ;;  %v1370_v33 = vor.u32 1.1754944e-38, %v1369_v32  ;;  %vm7058_vm12 = vmor %vm1519_vm10, %vm1520_vm8 }
 0x33a   :  { %v1374_v37 = vmul.f32 %v7020_v54, %v7010_v9  ;;  %v1317_v57 = vpop.f32.mrf.mxu2  ;;  %v1516_v17 = vsub.f32 1.0, %v1515_v51  ;;  %vm1379_vm7 = vweird.f32 %v7020_v54 }
 0x33b   :  { %v1477_v47 = vmul.f32 %v5378_v18, %v1476_v3  ;;  %v1389_v25 = vadd.f32 %v1317_v57, %v6842_v62  ;;  %v1366_v3 = vsel %vm7027_vm3, %v5376_v34, %v1362_v10  ;;  %vm7052_vm11 = vmor %vm1378_vm9, %vm1379_vm7 }
 0x33c   :  { %v1375_v13 = vsub.f32 1.0, %v1374_v37  ;;  %v1343_v37 = vpop.f32.mrf.mxu0  ;;  %v1517_v63 = vmul.f32 %v7016_v19, %v1516_v17  ;;  %v1371_v52 = vsel %vm1368_vm5, %v1370_v33, %v1366_v3 }
 0x33d   :  { %v5384_v12 = vpop.eup %5383  ;;  %v1478_v7 = vadd.f32 %v5378_v18, %v1477_v47  ;;  %v5070_v47 = vmul.f32 -1.442695, %v1389_v25  ;;  %v1430_v40 = vadd.f32 %v1343_v37, %v6862_v60 }
 0x33e   :  { %v7034_v51 = vadd.f32 1.0, %v5384_v12  ;;  %v1376_v57 = vmul.f32 %v7020_v54, %v1375_v13  ;;  %v8959_v12 = vld [vmem:[#allocation64_spill] sm:$0xff]  ;;  %v1518_v34 = vadd.f32 %v7016_v19, %v1517_v63  ;;  %v1382_v13 = vand.u32 2147483647, %v7010_v9 }
 0x33f   :  { %v1482_v56 = vsel %vm1481_vm4, %v5378_v18, %v1478_v7  ;;  %v323_v41 = vadd.f32 %v8959_v12, %v8916_v2  ;;  %v1525_v7 = vand.u32 2147483648, %v7007_v5  ;;  %v1384_v18 = vand.u32 2147483648, %v7010_v9 }
 0x340   :  { %v1487_v0 = vsel %vm1484_vm6, %v1486_v45, %v1482_v56  ;;  %5385 = vrcp.f32 %v7034_v51  ;;  %v1432_v45 = vmul.f32 %v1430_v40, %v1371_v52  ;;  %v1377_v17 = vadd.f32 %v7020_v54, %v1376_v57 }
 0x341   :  { %v1546_v62 = vmul.f32 %v1544_v27, %v1487_v0  ;;  %5387 = vpow2.f32 %v5070_v47  ;;  %v1428_v27 = vadd.f32 %v1329_v21, %v6887_v38  ;;  %v1523_v63 = vand.u32 2147483647, %v7007_v5 }
 0x342   :  { %v1526_v56 = vor.u32 1.1754944e-38, %v1525_v7  ;;  %v1381_v9 = vsel %vm7052_vm11, %v7020_v54, %v1377_v17  ;;  %v1522_v0 = vsel %vm7058_vm12, %v7016_v19, %v1518_v34  ;;  %vm1383_vm13 = vcmp.eq.f32.partialorder %v1382_v13, 8.507059e+37 }
 0x343   :  { %v1548_v10 = vadd.f32 %v1546_v62, %v323_v41  ;;  %v1434_v62 = vadd.f32 %v1432_v45, %v1428_v27  ;;  %v1385_v52 = vor.u32 1.1754944e-38, %v1384_v18  ;;  %v1407_v40 = vand.u32 2147483647, %v7034_v51  ;;  %v1331_v45 = vpop.f32.mrf.mxu3 }
 0x344   :  { %v1345_v5 = vpop.f32.mrf.mxu0  ;;  %v1409_v12 = vand.u32 2147483648, %v7034_v51  ;;  %vm1524_vm14 = vcmp.eq.f32.partialorder %v1523_v63, 8.507059e+37  ;;  %vm1403_vm3 = vweird.f32 %v7034_v51  ;;  %v1429_v25 = vadd.f32 %v1331_v45, %v6887_v38 }
 0x345   :  { %5389 = vtanh.f32 %v1548_v10  ;;  %v1386_v41 = vsel %vm1383_vm13, %v1385_v52, %v1381_v9  ;;  %v1527_v54 = vsel %vm1524_vm14, %v1526_v56, %v1522_v0  ;;  %v1431_v21 = vadd.f32 %v1345_v5, %v6862_v60 }
 0x346   :  { %v5386_v32 = vpop.eup %5385  ;;  %v1410_v34 = vor.u32 1.1754944e-38, %v1409_v12  ;;  %v1552_v13 = vsub.f32 1.0, %v1527_v54  ;;  %vm1408_vm5 = vcmp.eq.f32.partialorder %v1407_v40, 8.507059e+37  ;;  %v1556_v56 = vmul.f32 %v1527_v54, %v6903_v29 }
 0x347   :  { %v5388_v3 = vpop.eup %5387  ;;  %v1399_v37 = vmul.f32 %v5386_v32, %v7034_v51  ;;  %vm1404_vm15 = vweird.f32 %v5386_v32  ;;  %v1433_v17 = vmul.f32 %v1431_v21, %v1386_v41 }
 0x348   :  { %v1397_v47 = vadd.f32 1.0, %v5388_v3  ;;  %vm1405_vm4 = vmor %vm1403_vm3, %vm1404_vm15 }
 0x349   :  { %v1400_v57 = vsub.f32 1.0, %v1399_v37  ;;  %v1435_v9 = vadd.f32 %v1433_v17, %v1429_v25 }
 0x34a   :  { %5391 = vrcp.f32 %v1397_v47  ;;  %v1424_v52 = vand.u32 2147483648, %v1397_v47  ;;  %v1422_v12 = vand.u32 2147483647, %v1397_v47  ;;  %vm1418_vm7 = vweird.f32 %v1397_v47 }
 0x34b   :  { %v1401_v7 = vmul.f32 %v5386_v32, %v1400_v57  ;;  %5393 = vtanh.f32 %v1434_v62  ;;  %v5390_v18 = vpop.eup %5389 }
 0x34c   :  { %v1554_v3 = vmul.f32 %v5390_v18, %v1552_v13  ;;  %5395 = vtanh.f32 %v1435_v9  ;;  %v1425_v41 = vor.u32 1.1754944e-38, %v1424_v52  ;;  %vm1423_vm9 = vcmp.eq.f32.partialorder %v1422_v12, 8.507059e+37 }
 0x34d   :  { %v1402_v19 = vadd.f32 %v5386_v32, %v1401_v7 }
 0x34e   :  { %v7074_v0 = vadd.f32 %v1556_v56, %v1554_v3 }
 0x34f   :  { %v1406_v10 = vsel %vm1405_vm4, %v5386_v32, %v1402_v19 }
 0x350   :  { %v5392_v27 = vpop.eup %5391  ;;  %v1411_v63 = vsel %vm1408_vm5, %v1410_v34, %v1406_v10  ;;  %v8965_v10 = vld [vmem:[#allocation78_spill] sm:$0xff] }
 0x351   :  { %v1414_v37 = vmul.f32 %v5392_v27, %v1397_v47  ;;  %v1438_v33 = vsub.f32 1.0, %v1411_v63  ;;  %v5394_v62 = vpop.eup %5393  ;;  %v1442_v5 = vmul.f32 %v1411_v63, %v6909_v16  ;;  %vm1419_vm6 = vweird.f32 %v5392_v27  ;;  %v8964_v47 = vld [vmem:[#allocation74_spill] sm:$0xff] }
 0x352   :  { %vm1420_vm8 = vmor %vm1418_vm7, %vm1419_vm6  ;;  %v5396_v21 = vpop.eup %5395  ;;  %v196_v34 = vadd.f32 %v8964_v47, %v8912_v43 }
 0x353   :  { %v1415_v51 = vsub.f32 1.0, %v1414_v37  ;;  %v1440_v57 = vmul.f32 %v5394_v62, %v1438_v33 }
 0x354   :  { %v1465_v13 = vadd.f32 %v7005_v46, %v196_v34 }
 0x355   :  { %v7077_v32 = vadd.f32 %v1442_v5, %v1440_v57  ;;  %v1416_v40 = vmul.f32 %v5392_v27, %v1415_v51 }
 0x356   :  { %v5072_v18 = vmul.f32 -1.442695, %v1465_v13 }
 0x357   :  { %1450 = vrot.lane.b32.xlu2 %v7077_v32, %s5725_s0  ;;  %1446 = vst.msk [vmem:[#allocation3 + $0x10] sm:$0xff] %vm481_vm1, %v7077_v32  ;;  %v1417_v29 = vadd.f32 %v5392_v27, %v1416_v40 }
 0x358   :  { %5397 = vpow2.f32 %v5072_v18 }
 0x359   :  { %v1421_v7 = vsel %vm1420_vm8, %v5392_v27, %v1417_v29  ;;  %v261_v27 = vadd.f32 %v8965_v10, %v8909_v14 }
 0x35a   :  { %v1426_v16 = vsel %vm1423_vm9, %v1425_v41, %v1421_v7  ;;  %v1545_v7 = vadd.f32 %v7014_v61, %v8915_v42 }
 0x35b   :  { %v1439_v54 = vsub.f32 1.0, %v1426_v16  ;;  %v1443_v19 = vmul.f32 %v1426_v16, %v6918_v55  ;;  %v1505_v55 = vadd.f32 %v7022_v36, %v261_v27 }
 0x35d   :  { %v1441_v45 = vmul.f32 %v5396_v21, %v1439_v54  ;;  %v5074_v3 = vmul.f32 -1.442695, %v1505_v55  ;;  %v8966_v21 = vld [vmem:[#allocation65_spill] sm:$0xff] }
 0x35e   :  { %v5398_v25 = vpop.eup %5397 }
 0x35f   :  { %v7084_v17 = vadd.f32 %v1443_v19, %v1441_v45  ;;  %v1473_v63 = vadd.f32 1.0, %v5398_v25  ;;  %v326_v45 = vadd.f32 %v8966_v21, %v8916_v2  ;;  %v8981_v21 = vld [vmem:[#allocation47_spill] sm:$0xff] }
 0x361   :  { %1452 = vrot.lane.b32.xlu2 %v7084_v17, %s5725_s0  ;;  %1447 = vst.msk [vmem:[#allocation3 + $0x18] sm:$0xff] %vm481_vm1, %v7084_v17  ;;  %5399 = vrcp.f32 %v1473_v63  ;;  %v1500_v5 = vand.u32 2147483648, %v1473_v63  ;;  %vm1494_vm11 = vweird.f32 %v1473_v63  ;;  %v1498_v52 = vand.u32 2147483647, %v1473_v63 }
 0x362   :  { %5401 = vpow2.f32 %v5074_v3 }
 0x363   :  { %v1501_v12 = vor.u32 1.1754944e-38, %v1500_v5  ;;  %vm1499_vm13 = vcmp.eq.f32.partialorder %v1498_v52, 8.507059e+37  ;;  %v8971_v5 = vld [vmem:[#allocation46_spill] sm:$0xff] }
 0x364   :  { %v8972_v52 = vld [vmem:[#allocation58_spill] sm:$0xff] }
 0x367   :  { %v5400_v56 = vpop.eup %5399 }
 0x368   :  { %v5402_v37 = vpop.eup %5401  ;;  %v1490_v33 = vmul.f32 %v5400_v56, %v1473_v63  ;;  %vm1495_vm10 = vweird.f32 %v5400_v56 }
 0x369   :  { %v1513_v62 = vadd.f32 1.0, %v5402_v37  ;;  %vm1496_vm12 = vmor %vm1494_vm11, %vm1495_vm10 }
 0x36a   :  { %v1491_v9 = vsub.f32 1.0, %v1490_v33 }
 0x36b   :  { %5403 = vrcp.f32 %v1513_v62  ;;  %v1540_v34 = vand.u32 2147483648, %v1513_v62  ;;  %vm1534_vm15 = vweird.f32 %v1513_v62  ;;  %v1538_v13 = vand.u32 2147483647, %v1513_v62 }
 0x36c   :  { %v1492_v51 = vmul.f32 %v5400_v56, %v1491_v9 }
 0x36d   :  { %v1541_v10 = vor.u32 1.1754944e-38, %v1540_v34  ;;  %vm1539_vm4 = vcmp.eq.f32.partialorder %v1538_v13, 8.507059e+37  ;;  %v8985_v34 = vld [vmem:[#allocation11_spill] sm:$0xff] }
 0x36e   :  { %v1493_v57 = vadd.f32 %v5400_v56, %v1492_v51  ;;  %v8968_v51 = vld [vmem:[#allocation55_spill] sm:$0xff] }
 0x36f   :  { %v8986_v13 = vld [vmem:[#allocation51_spill] sm:$0xff] }
 0x370   :  { %v1497_v36 = vsel %vm1496_vm12, %v5400_v56, %v1493_v57  ;;  %v8970_v57 = vld [vmem:[#allocation19_spill] sm:$0xff] }
 0x371   :  { %v5404_v46 = vpop.eup %5403  ;;  %v1502_v29 = vsel %vm1499_vm13, %v1501_v12, %v1497_v36  ;;  %v8974_v36 = vld [vmem:[#allocation20_spill] sm:$0xff]  ;;  %v8975_v12 = vld [vmem:[#allocation42_spill] sm:$0xff] }
 0x372   :  { %v1530_v40 = vmul.f32 %v5404_v46, %v1513_v62  ;;  %v1547_v16 = vmul.f32 %v1545_v7, %v1502_v29  ;;  %vm1535_vm14 = vweird.f32 %v5404_v46  ;;  %v8976_v29 = vld [vmem:[#allocation43_spill] sm:$0xff]  ;;  %v8978_v7 = vld [vmem:[#allocation61_spill] sm:$0xff] }
 0x373   :  { %vm1536_vm3 = vmor %vm1534_vm15, %vm1535_vm14 }
 0x374   :  { %v1531_v41 = vsub.f32 1.0, %v1530_v40  ;;  %v1549_v19 = vadd.f32 %v1547_v16, %v326_v45  ;;  %v8973_v40 = vld [vmem:[#allocation18_spill] sm:$0xff]  ;;  %v8979_v16 = vld [vmem:[#allocation9_spill] sm:$0xff] }
 0x375   :  { %v8982_v45 = vld [vmem:[#allocation10_spill] sm:$0xff] }
 0x376   :  { %v1532_v54 = vmul.f32 %v5404_v46, %v1531_v41  ;;  %5405 = vtanh.f32 %v1549_v19  ;;  %v8977_v41 = vld [vmem:[#allocation48_spill] sm:$0xff]  ;;  %v8983_v19 = vld [vmem:[#allocation49_spill] sm:$0xff] }
 0x378   :  { %v1533_v47 = vadd.f32 %v5404_v46, %v1532_v54  ;;  %v8980_v54 = vld [vmem:[#allocation45_spill] sm:$0xff] }
 0x37a   :  { %v1537_v18 = vsel %vm1536_vm3, %v5404_v46, %v1533_v47  ;;  %v8969_v46 = vld [vmem:[#allocation17_spill] sm:$0xff]  ;;  %v8984_v47 = vld [vmem:[#allocation50_spill] sm:$0xff] }
 0x37b   :  { %v1542_v61 = vsel %vm1539_vm4, %v1541_v10, %v1537_v18  ;;  %v8987_v18 = vld [vmem:[#allocation52_spill] sm:$0xff] }
 0x37c   :  { %v5406_v25 = vpop.eup %5405  ;;  %v1553_v55 = vsub.f32 1.0, %v1542_v61  ;;  %v1557_v3 = vmul.f32 %v1542_v61, %v6938_v31  ;;  %v8967_v31 = vld [vmem:[#allocation38_spill] sm:$0xff]  ;;  %v8988_v10 = vld [vmem:[#allocation12_spill] sm:$0xff] }
 0x37d   :  { %v8990_v61 = vld [vmem:[#allocation54_spill] sm:$0xff] }
 0x37e   :  { %v1555_v63 = vmul.f32 %v5406_v25, %v1553_v55  ;;  %v8991_v25 = vld [vmem:[#allocation13_spill] sm:$0xff]  ;;  %v8992_v55 = vld [vmem:[#allocation56_spill] sm:$0xff] }
 0x380   :  { %v7104_v56 = vadd.f32 %v1557_v3, %v1555_v63  ;;  %v8993_v63 = vld [vmem:[#allocation57_spill] sm:$0xff]  ;;  %v8994_v3 = vld [vmem:[#allocation14_spill] sm:$0xff] }
 0x3b1   :  { %v1451_v27 = vpop.permute.xlu2 %1450 }
 0x3b2   :  { %1456 = vst.msk [vmem:[#allocation4] sm:$0xff] %vm492_vm2, %v1451_v27  ;;  %v8989_v27 = vld [vmem:[#allocation53_spill] sm:$0xff] }
 0x3b3   :  { %1560 = vst.msk [vmem:[#allocation4] sm:$0xff] %vm481_vm1, %v7074_v0 }
 0x3ba   :  { %v1562_v33 = vld [vmem:[#allocation4] sm:$0xff] }
 0x3bb   :  { %v1453_v37 = vpop.permute.xlu2 %1452 }
 0x3bc   :  { %1457 = vst.msk [vmem:[#allocation4 + $0x8] sm:$0xff] %vm492_vm2, %v1453_v37  ;;  %v8995_v37 = vld [vmem:[#allocation59_spill] sm:$0xff] }
 0x3bd   :  { %1561 = vst.msk [vmem:[#allocation4 + $0x8] sm:$0xff] %vm481_vm1, %v7104_v56 }
 0x3c4   :  { %v1563_v62 = vld [vmem:[#allocation4 + $0x8] sm:$0xff] }
 0x3c5   :  { %v1564_v9 = vpack.c.bf16 %v1563_v62, %v1562_v33  ;;  %v8996_v33 = vld [vmem:[#allocation60_spill] sm:$0xff]  ;;  %v8997_v62 = vld [vmem:[#allocation15_spill] sm:$0xff] }
 0x3c7   :  { %1573 = vmatmul.bf16.vlgmr.msra.gmra.mxu1 %v1564_v9  ;;  %1587 = vmatmul.bf16.vlgmr.msrb.gmra.mxu2 %v1564_v9 }
 0x3c8   :  { %1601 = vmatmul.bf16.vlgmr.msra.gmra.mxu3 %v1564_v9  ;;  %1615 = vmatmul.bf16.vlgmr.msrb.gmra.mxu0 %v1564_v9 }
 0x3c9   :  { %1894 = vmatpush.bf16.msra.mxu1 %v5928_v22  ;;  %1908 = vmatpush.bf16.msrb.mxu2 %v6118_v4 }
 0x3ca   :  { %1922 = vmatpush.bf16.msra.mxu3 %v6210_v59  ;;  %1936 = vmatpush.bf16.msrb.mxu0 %v6400_v48 }
 0x3cd   :  { %1895 = vmatpush.bf16.msra.mxu1 %v5948_v28  ;;  %1909 = vmatpush.bf16.msrb.mxu2 %v6136_v11 }
 0x3ce   :  { %1923 = vmatpush.bf16.msra.mxu3 %v6224_v1  ;;  %1937 = vmatpush.bf16.msrb.mxu0 %v6430_v39 }
 0x3d1   :  { %1896 = vmatpush.bf16.msra.mxu1 %v5973_v35  ;;  %1910 = vmatpush.bf16.msrb.mxu2 %v6147_v15 }
 0x3d2   :  { %1924 = vmatpush.bf16.msra.mxu3 %v6241_v8  ;;  %1938 = vmatpush.bf16.msrb.mxu0 %v6495_v49 }
 0x3d5   :  { %1897 = vmatpush.bf16.msra.mxu1 %v6050_v50  ;;  %1911 = vmatpush.bf16.msrb.mxu2 %v6160_v20 }
 0x3d6   :  { %1925 = vmatpush.bf16.msra.mxu3 %v6289_v24  ;;  %1939 = vmatpush.bf16.msrb.mxu0 %v6534_v23 }
 0x3d7   :  { %1629 = vmatmul.bf16.vlgmr.msrb.gmra.mxu1 %v1564_v9  ;;  %1643 = vmatmul.bf16.vlgmr.msra.gmra.mxu2 %v1564_v9 }
 0x3d8   :  { %1657 = vmatmul.bf16.vlgmr.msrb.gmra.mxu3 %v1564_v9  ;;  %v8998_v9 = vld [vmem:[#allocation62_spill] sm:$0xff] }
 0x3d9   :  { %1898 = vmatpush.bf16.msra.mxu1 %v6063_v53  ;;  %1912 = vmatpush.bf16.msrb.mxu2 %v6172_v26 }
 0x3da   :  { %1926 = vmatpush.bf16.msra.mxu3 %v6337_v44  ;;  %1940 = vmatpush.bf16.msrb.mxu0 %v6583_v6 }
 0x3dd   :  { %1899 = vmatpush.bf16.msra.mxu1 %v6086_v58  ;;  %1913 = vmatpush.bf16.msrb.mxu2 %v6181_v30 }
 0x3de   :  { %1927 = vmatpush.bf16.msra.mxu3 %v8967_v31  ;;  %1941 = vmatpush.bf16.msrb.mxu0 %v8968_v51 }
 0x3e1   :  { %1900 = vmatpush.bf16.msra.mxu1 %v8969_v46  ;;  %1914 = vmatpush.bf16.msrb.mxu2 %v8970_v57 }
 0x3e2   :  { %1928 = vmatpush.bf16.msra.mxu3 %v8971_v5  ;;  %1942 = vmatpush.bf16.msrb.mxu0 %v8972_v52 }
 0x3e5   :  { %1901 = vmatpush.bf16.msra.mxu1 %v8973_v40  ;;  %1915 = vmatpush.bf16.msrb.mxu2 %v8974_v36 }
 0x3e6   :  { %1929 = vmatpush.bf16.msra.mxu3 %v8977_v41  ;;  %1943 = vmatpush.bf16.msrb.mxu0 %v8978_v7 }
 0x3e9   :  { %1950 = vmatpush.bf16.msrb.mxu1 %v8975_v12  ;;  %1964 = vmatpush.bf16.msra.mxu2 %v8976_v29 }
 0x3ea   :  { %2195 = vmatpush.bf16.msrb.mxu3 %v8979_v16 }
 0x3ed   :  { %1951 = vmatpush.bf16.msrb.mxu1 %v8980_v54  ;;  %1965 = vmatpush.bf16.msra.mxu2 %v8981_v21 }
 0x3ee   :  { %2196 = vmatpush.bf16.msrb.mxu3 %v8982_v45 }
 0x3f1   :  { %1952 = vmatpush.bf16.msrb.mxu1 %v8983_v19  ;;  %1966 = vmatpush.bf16.msra.mxu2 %v8984_v47 }
 0x3f2   :  { %2197 = vmatpush.bf16.msrb.mxu3 %v8985_v34 }
 0x3f5   :  { %1953 = vmatpush.bf16.msrb.mxu1 %v8986_v13  ;;  %1967 = vmatpush.bf16.msra.mxu2 %v8987_v18  ;;  %v9002_v13 = vld [vmem:[#allocation37_spill] sm:$0xff] }
 0x3f6   :  { %2198 = vmatpush.bf16.msrb.mxu3 %v8988_v10  ;;  %v8999_v10 = vld [vmem:[#allocation63_spill] sm:$0xff] }
 0x3f9   :  { %1954 = vmatpush.bf16.msrb.mxu1 %v8989_v27  ;;  %1968 = vmatpush.bf16.msra.mxu2 %v8990_v61  ;;  %v9000_v27 = vld [vmem:[#allocation16_spill] sm:$0xff] }
 0x3fa   :  { %2199 = vmatpush.bf16.msrb.mxu3 %v8991_v25  ;;  %v9001_v25 = vld [vmem:[#allocation77_spill] sm:$0xff] }
 0x3fb   :  { %v199_v61 = vadd.f32 %v9001_v25, %v8912_v43 }
 0x3fd   :  { %1955 = vmatpush.bf16.msrb.mxu1 %v8992_v55  ;;  %1969 = vmatpush.bf16.msra.mxu2 %v8993_v63 }
 0x3fe   :  { %2200 = vmatpush.bf16.msrb.mxu3 %v8994_v3 }
 0x401   :  { %1956 = vmatpush.bf16.msrb.mxu1 %v8995_v37  ;;  %1970 = vmatpush.bf16.msra.mxu2 %v8996_v33  ;;  %v9003_v33 = vld [vmem:[#allocation81_spill] sm:$0xff] }
 0x402   :  { %2201 = vmatpush.bf16.msrb.mxu3 %v8997_v62  ;;  %v264_v47 = vadd.f32 %v9003_v33, %v8909_v14  ;;  %v9004_v33 = vld [vmem:[#allocation34_spill] sm:$0xff] }
 0x405   :  { %1957 = vmatpush.bf16.msrb.mxu1 %v8998_v9  ;;  %1971 = vmatpush.bf16.msra.mxu2 %v8999_v10 }
 0x406   :  { %2202 = vmatpush.bf16.msrb.mxu3 %v9000_v27 }
 0x444   :  { %v1574_v55 = vpop.f32.mrf.mxu1 }
 0x445   :  { %v1779_v18 = vadd.f32 %v1574_v55, %v199_v61  ;;  %v1616_v63 = vpop.f32.mrf.mxu0 }
 0x446   :  { %v1663_v3 = vadd.f32 %v1616_v63, %v9002_v13 }
 0x447   :  { %v5079_v34 = vmul.f32 -1.442695, %v1779_v18 }
 0x448   :  { %v5075_v37 = vmul.f32 -1.442695, %v1663_v3 }
 0x449   :  { %5407 = vpow2.f32 %v5079_v34 }
 0x44a   :  { %5409 = vpow2.f32 %v5075_v37  ;;  %v1588_v9 = vpop.f32.mrf.mxu2 }
 0x44b   :  { %v1819_v62 = vadd.f32 %v1588_v9, %v264_v47  ;;  %v1602_v19 = vpop.f32.mrf.mxu3 }
 0x44c   :  { %v7170_v10 = vpop.f32.mrf.mxu1  ;;  %v1859_v36 = vadd.f32 %v1602_v19, %v8915_v42 }
 0x44d   :  { %v5081_v27 = vmul.f32 -1.442695, %v1819_v62  ;;  %v1618_v45 = vpop.f32.mrf.mxu0 }
 0x44e   :  { %v1664_v25 = vadd.f32 %v1618_v45, %v9002_v13 }
 0x44f   :  { %v5408_v61 = vpop.eup %5407  ;;  %5411 = vpow2.f32 %v5081_v27 }
 0x450   :  { %v5410_v55 = vpop.eup %5409  ;;  %v1787_v63 = vadd.f32 1.0, %v5408_v61  ;;  %v5076_v18 = vmul.f32 -1.442695, %v1664_v25 }
 0x451   :  { %v1671_v3 = vadd.f32 1.0, %v5410_v55 }
 0x452   :  { %5413 = vrcp.f32 %v1787_v63  ;;  %v1798_v13 = vand.u32 2147483647, %v1787_v63  ;;  %v1800_v16 = vand.u32 2147483648, %v1787_v63  ;;  %vm1794_vm6 = vweird.f32 %v1787_v63 }
 0x453   :  { %5415 = vrcp.f32 %v1671_v3  ;;  %v7176_v62 = vpop.f32.mrf.mxu3  ;;  %v1682_v52 = vand.u32 2147483647, %v1671_v3  ;;  %v1684_v57 = vand.u32 2147483648, %v1671_v3  ;;  %vm1678_vm10 = vweird.f32 %v1671_v3 }
 0x454   :  { %5417 = vpow2.f32 %v5076_v18  ;;  %v1630_v34 = vpop.f32.mrf.mxu1  ;;  %v7181_v18 = vpop.f32.mrf.mxu2  ;;  %vm1799_vm8 = vcmp.eq.f32.partialorder %v1798_v13, 8.507059e+37 }
 0x455   :  { %v5412_v37 = vpop.eup %5411  ;;  %v1703_v47 = vadd.f32 %v1630_v34, %v9004_v33  ;;  %vm1683_vm12 = vcmp.eq.f32.partialorder %v1682_v52, 8.507059e+37 }
 0x456   :  { %v7174_v9 = vadd.f32 1.0, %v5412_v37 }
 0x457   :  { %v5077_v21 = vmul.f32 -1.442695, %v1703_v47 }
 0x458   :  { %v5414_v54 = vpop.eup %5413  ;;  %5419 = vrcp.f32 %v7174_v9  ;;  %v1840_v52 = vand.u32 2147483648, %v7174_v9 }
 0x459   :  { %v5416_v45 = vpop.eup %5415  ;;  %v1790_v27 = vmul.f32 %v5414_v54, %v1787_v63  ;;  %5421 = vpow2.f32 %v5077_v21  ;;  %vm1795_vm5 = vweird.f32 %v5414_v54 }
 0x45a   :  { %v5418_v25 = vpop.eup %5417  ;;  %v1674_v34 = vmul.f32 %v5416_v45, %v1671_v3  ;;  %vm1796_vm7 = vmor %vm1794_vm6, %vm1795_vm5  ;;  %vm1679_vm9 = vweird.f32 %v5416_v45  ;;  %vm1834_vm6 = vweird.f32 %v7174_v9 }
 0x45b   :  { %v1791_v61 = vsub.f32 1.0, %v1790_v27  ;;  %v7179_v55 = vadd.f32 1.0, %v5418_v25  ;;  %v1801_v25 = vor.u32 1.1754944e-38, %v1800_v16  ;;  %v1658_v5 = vpop.f32.mrf.mxu3  ;;  %v9005_v16 = vld [vmem:[#allocation66_spill] sm:$0xff]  ;;  %vm1680_vm11 = vmor %vm1678_vm10, %vm1679_vm9 }
 0x45c   :  { %v1632_v37 = vpop.f32.mrf.mxu1  ;;  %v1675_v29 = vsub.f32 1.0, %v1674_v34  ;;  %v1644_v13 = vpop.f32.mrf.mxu2 }
 0x45d   :  { %v1792_v7 = vmul.f32 %v5414_v54, %v1791_v61  ;;  %5423 = vrcp.f32 %v7179_v55  ;;  %v1704_v47 = vadd.f32 %v1632_v37, %v9004_v33  ;;  %v1685_v33 = vor.u32 1.1754944e-38, %v1684_v57 }
 0x45e   :  { %v7185_v41 = vpop.eup %5419  ;;  %v1743_v3 = vadd.f32 %v1644_v13, %v6887_v38  ;;  %vm1693_vm14 = vweird.f32 %v7179_v55 }
 0x45f   :  { %v5422_v21 = vpop.eup %5421  ;;  %v1793_v12 = vadd.f32 %v5414_v54, %v1792_v7  ;;  %v5078_v27 = vmul.f32 -1.442695, %v1704_v47  ;;  %v1830_v37 = vmul.f32 %v7185_v41, %v7174_v9  ;;  %v1676_v7 = vmul.f32 %v5416_v45, %v1675_v29 }
 0x460   :  { %v7188_v40 = vadd.f32 1.0, %v5422_v21  ;;  %v329_v47 = vadd.f32 %v9005_v16, %v8916_v2  ;;  %v1745_v29 = vadd.f32 %v1658_v5, %v6862_v60  ;;  %v1697_v16 = vand.u32 2147483647, %v7179_v55 }
 0x461   :  { %v1797_v61 = vsel %vm1796_vm7, %v5414_v54, %v1793_v12  ;;  %v1677_v21 = vadd.f32 %v5416_v45, %v1676_v7 }
 0x462   :  { %v1802_v34 = vsel %vm1799_vm8, %v1801_v25, %v1797_v61  ;;  %5425 = vrcp.f32 %v7188_v40  ;;  %v1831_v25 = vsub.f32 1.0, %v1830_v37  ;;  %vm1698_vm3 = vcmp.eq.f32.partialorder %v1697_v16, 8.507059e+37 }
 0x463   :  { %v5424_v63 = vpop.eup %5423  ;;  %v1861_v19 = vmul.f32 %v1859_v36, %v1802_v34  ;;  %5427 = vpow2.f32 %v5078_v27  ;;  %v1681_v61 = vsel %vm1680_vm11, %v5416_v45, %v1677_v21  ;;  %v1699_v36 = vand.u32 2147483648, %v7179_v55  ;;  %v1660_v21 = vpop.f32.mrf.mxu3 }
 0x464   :  { %v1689_v12 = vmul.f32 %v5424_v63, %v7179_v55  ;;  %v1686_v51 = vsel %vm1683_vm12, %v1685_v33, %v1681_v61  ;;  %vm1694_vm13 = vweird.f32 %v5424_v63  ;;  %v1832_v5 = vmul.f32 %v7185_v41, %v1831_v25 }
 0x465   :  { %v1863_v54 = vadd.f32 %v1861_v19, %v329_v47  ;;  %v1747_v34 = vmul.f32 %v1745_v29, %v1686_v51  ;;  %vm1695_vm15 = vmor %vm1693_vm14, %vm1694_vm13  ;;  %v1700_v51 = vor.u32 1.1754944e-38, %v1699_v36  ;;  %v1724_v13 = vand.u32 2147483648, %v7188_v40 }
 0x466   :  { %v1690_v46 = vsub.f32 1.0, %v1689_v12  ;;  %v1722_v61 = vand.u32 2147483647, %v7188_v40  ;;  %v1746_v29 = vadd.f32 %v1660_v21, %v6862_v60  ;;  %vm1718_vm5 = vweird.f32 %v7188_v40 }
 0x467   :  { %v1749_v33 = vadd.f32 %v1747_v34, %v1743_v3  ;;  %5429 = vtanh.f32 %v1863_v54  ;;  %v1833_v16 = vadd.f32 %v7185_v41, %v1832_v5  ;;  %v1646_v54 = vpop.f32.mrf.mxu2  ;;  %vm1835_vm8 = vweird.f32 %v7185_v41 }
 0x468   :  { %v5426_v27 = vpop.eup %5425  ;;  %v1691_v7 = vmul.f32 %v5424_v63, %v1690_v46  ;;  %v1838_v46 = vand.u32 2147483647, %v7174_v9  ;;  %v1841_v36 = vor.u32 1.1754944e-38, %v1840_v52  ;;  %v1725_v34 = vor.u32 1.1754944e-38, %v1724_v13  ;;  %vm1836_vm9 = vmor %vm1834_vm6, %vm1835_vm8 }
 0x469   :  { %v5428_v47 = vpop.eup %5427  ;;  %v1714_v57 = vmul.f32 %v5426_v27, %v7188_v40  ;;  %vm1719_vm4 = vweird.f32 %v5426_v27  ;;  %vm1723_vm10 = vcmp.eq.f32.partialorder %v1722_v61, 8.507059e+37  ;;  %v1744_v40 = vadd.f32 %v1646_v54, %v6887_v38 }
 0x46a   :  { %v7205_v45 = vadd.f32 1.0, %v5428_v47  ;;  %v1692_v37 = vadd.f32 %v5424_v63, %v1691_v7  ;;  %vm1720_vm7 = vmor %vm1718_vm5, %vm1719_vm4  ;;  %v1837_v47 = vsel %vm1836_vm9, %v7185_v41, %v1833_v16  ;;  %vm1839_vm11 = vcmp.eq.f32.partialorder %v1838_v46, 8.507059e+37 }
 0x46b   :  { %v1715_v19 = vsub.f32 1.0, %v1714_v57 }
 0x46c   :  { %v1696_v12 = vsel %vm1695_vm15, %v5424_v63, %v1692_v37  ;;  %5431 = vrcp.f32 %v7205_v45  ;;  %v1737_v16 = vand.u32 2147483647, %v7205_v45  ;;  %vm1733_vm13 = vweird.f32 %v7205_v45 }
 0x46d   :  { %v1701_v55 = vsel %vm1698_vm3, %v1700_v51, %v1696_v12  ;;  %v1716_v25 = vmul.f32 %v5426_v27, %v1715_v19  ;;  %5433 = vtanh.f32 %v1749_v33  ;;  %v5430_v57 = vpop.eup %5429  ;;  %v1842_v33 = vsel %vm1839_vm11, %v1841_v36, %v1837_v47 }
 0x46e   :  { %v1748_v3 = vmul.f32 %v1746_v29, %v1701_v55  ;;  %v1867_v19 = vsub.f32 1.0, %v1842_v33  ;;  %v1871_v55 = vmul.f32 %v1842_v33, %v7074_v0  ;;  %vm1738_vm15 = vcmp.eq.f32.partialorder %v1737_v16, 8.507059e+37  ;;  %v9007_v33 = vld [vmem:[#allocation40_spill] sm:$0xff] }
 0x46f   :  { %v1717_v63 = vadd.f32 %v5426_v27, %v1716_v25  ;;  %v1739_v25 = vand.u32 2147483648, %v7205_v45 }
 0x470   :  { %v1750_v52 = vadd.f32 %v1748_v3, %v1744_v40 }
 0x471   :  { %v1721_v7 = vsel %vm1720_vm7, %v5426_v27, %v1717_v63  ;;  %v1869_v27 = vmul.f32 %v5430_v57, %v1867_v19  ;;  %v1740_v0 = vor.u32 1.1754944e-38, %v1739_v25 }
 0x472   :  { %v1726_v5 = vsel %vm1723_vm10, %v1725_v34, %v1721_v7  ;;  %v5432_v9 = vpop.eup %5431  ;;  %5435 = vtanh.f32 %v1750_v52 }
 0x473   :  { %v1753_v37 = vsub.f32 1.0, %v1726_v5  ;;  %v5434_v21 = vpop.eup %5433  ;;  %v1729_v51 = vmul.f32 %v5432_v9, %v7205_v45  ;;  %v1757_v13 = vmul.f32 %v1726_v5, %v7077_v32  ;;  %v7224_v61 = vadd.f32 %v1871_v55, %v1869_v27  ;;  %v9006_v45 = vld [vmem:[#allocation80_spill] sm:$0xff] }
 0x474   :  { %vm1734_vm12 = vweird.f32 %v5432_v9  ;;  %v202_v57 = vadd.f32 %v9006_v45, %v8912_v43 }
 0x475   :  { %v1755_v12 = vmul.f32 %v5434_v21, %v1753_v37  ;;  %v1730_v41 = vsub.f32 1.0, %v1729_v51  ;;  %vm1735_vm14 = vmor %vm1733_vm13, %vm1734_vm12 }
 0x476   :  { %v1780_v40 = vadd.f32 %v7170_v10, %v202_v57 }
 0x477   :  { %v7221_v46 = vadd.f32 %v1757_v13, %v1755_v12  ;;  %v1731_v29 = vmul.f32 %v5432_v9, %v1730_v41 }
 0x478   :  { %v5436_v3 = vpop.eup %5435  ;;  %v5080_v5 = vmul.f32 -1.442695, %v1780_v40 }
 0x479   :  { %1765 = vrot.lane.b32.xlu0 %v7221_v46, %s5725_s0  ;;  %1761 = vst.msk [vmem:[#allocation3 + $0x20] sm:$0xff] %vm481_vm1, %v7221_v46  ;;  %v1732_v32 = vadd.f32 %v5432_v9, %v1731_v29 }
 0x47a   :  { %5437 = vpow2.f32 %v5080_v5 }
 0x47b   :  { %v1736_v54 = vsel %vm1735_vm14, %v5432_v9, %v1732_v32  ;;  %v267_v9 = vadd.f32 %v9007_v33, %v8909_v14 }
 0x47c   :  { %v1741_v63 = vsel %vm1738_vm15, %v1740_v0, %v1736_v54 }
 0x47d   :  { %v1754_v36 = vsub.f32 1.0, %v1741_v63  ;;  %v1758_v7 = vmul.f32 %v1741_v63, %v7084_v17  ;;  %v1820_v17 = vadd.f32 %v7181_v18, %v267_v9  ;;  %v1860_v63 = vadd.f32 %v7176_v62, %v8915_v42 }
 0x47f   :  { %v1756_v34 = vmul.f32 %v5436_v3, %v1754_v36  ;;  %v5082_v21 = vmul.f32 -1.442695, %v1820_v17 }
 0x480   :  { %v5438_v37 = vpop.eup %5437 }
 0x481   :  { %v7233_v47 = vadd.f32 %v1758_v7, %v1756_v34  ;;  %v1788_v19 = vadd.f32 1.0, %v5438_v37  ;;  %v9008_v34 = vld [vmem:[#allocation67_spill] sm:$0xff] }
 0x482   :  { %v332_v7 = vadd.f32 %v9008_v34, %v8916_v2  ;;  %v9022_v34 = vld [vmem:[#allocation47_spill] sm:$0xff] }
 0x483   :  { %1767 = vrot.lane.b32.xlu1 %v7233_v47, %s5725_s0  ;;  %1762 = vst.msk [vmem:[#allocation3 + $0x28] sm:$0xff] %vm481_vm1, %v7233_v47  ;;  %5439 = vrcp.f32 %v1788_v19  ;;  %v1815_v25 = vand.u32 2147483648, %v1788_v19  ;;  %vm1809_vm4 = vweird.f32 %v1788_v19  ;;  %v1813_v29 = vand.u32 2147483647, %v1788_v19 }
 0x484   :  { %5441 = vpow2.f32 %v5082_v21 }
 0x485   :  { %v1816_v32 = vor.u32 1.1754944e-38, %v1815_v25  ;;  %vm1814_vm6 = vcmp.eq.f32.partialorder %v1813_v29, 8.507059e+37  ;;  %v9012_v25 = vld [vmem:[#allocation46_spill] sm:$0xff] }
 0x486   :  { %v9013_v29 = vld [vmem:[#allocation58_spill] sm:$0xff] }
 0x489   :  { %v5440_v51 = vpop.eup %5439 }
 0x48a   :  { %v5442_v52 = vpop.eup %5441  ;;  %v1805_v12 = vmul.f32 %v5440_v51, %v1788_v19  ;;  %vm1810_vm3 = vweird.f32 %v5440_v51 }
 0x48b   :  { %v1828_v13 = vadd.f32 1.0, %v5442_v52  ;;  %vm1811_vm5 = vmor %vm1809_vm4, %vm1810_vm3 }
 0x48c   :  { %v1806_v27 = vsub.f32 1.0, %v1805_v12 }
 0x48d   :  { %5443 = vrcp.f32 %v1828_v13  ;;  %v1855_v40 = vand.u32 2147483648, %v1828_v13  ;;  %vm1849_vm8 = vweird.f32 %v1828_v13  ;;  %v1853_v5 = vand.u32 2147483647, %v1828_v13 }
 0x48e   :  { %v1807_v55 = vmul.f32 %v5440_v51, %v1806_v27 }
 0x48f   :  { %v1856_v9 = vor.u32 1.1754944e-38, %v1855_v40  ;;  %vm1854_vm10 = vcmp.eq.f32.partialorder %v1853_v5, 8.507059e+37  ;;  %v9026_v40 = vld [vmem:[#allocation11_spill] sm:$0xff] }
 0x490   :  { %v1808_v41 = vadd.f32 %v5440_v51, %v1807_v55  ;;  %v9027_v5 = vld [vmem:[#allocation51_spill] sm:$0xff] }
 0x492   :  { %v1812_v18 = vsel %vm1811_vm5, %v5440_v51, %v1808_v41  ;;  %v9011_v41 = vld [vmem:[#allocation19_spill] sm:$0xff] }
 0x493   :  { %v5444_v10 = vpop.eup %5443  ;;  %v1817_v54 = vsel %vm1814_vm6, %v1816_v32, %v1812_v18  ;;  %v9015_v18 = vld [vmem:[#allocation20_spill] sm:$0xff]  ;;  %v9016_v32 = vld [vmem:[#allocation42_spill] sm:$0xff] }
 0x494   :  { %v1845_v16 = vmul.f32 %v5444_v10, %v1828_v13  ;;  %v1862_v36 = vmul.f32 %v1860_v63, %v1817_v54  ;;  %vm1850_vm7 = vweird.f32 %v5444_v10  ;;  %v9018_v54 = vld [vmem:[#allocation48_spill] sm:$0xff]  ;;  %v9019_v63 = vld [vmem:[#allocation61_spill] sm:$0xff] }
 0x495   :  { %vm1851_vm9 = vmor %vm1849_vm8, %vm1850_vm7 }
 0x496   :  { %v1846_v0 = vsub.f32 1.0, %v1845_v16  ;;  %v1864_v45 = vadd.f32 %v1862_v36, %v332_v7  ;;  %v9014_v16 = vld [vmem:[#allocation18_spill] sm:$0xff]  ;;  %v9020_v36 = vld [vmem:[#allocation9_spill] sm:$0xff] }
 0x497   :  { %v9023_v7 = vld [vmem:[#allocation10_spill] sm:$0xff] }
 0x498   :  { %v1847_v3 = vmul.f32 %v5444_v10, %v1846_v0  ;;  %5445 = vtanh.f32 %v1864_v45  ;;  %v9017_v0 = vld [vmem:[#allocation43_spill] sm:$0xff]  ;;  %v9024_v45 = vld [vmem:[#allocation49_spill] sm:$0xff] }
 0x49a   :  { %v1848_v57 = vadd.f32 %v5444_v10, %v1847_v3  ;;  %v9021_v3 = vld [vmem:[#allocation45_spill] sm:$0xff] }
 0x49c   :  { %v1852_v33 = vsel %vm1851_vm9, %v5444_v10, %v1848_v57  ;;  %v9010_v10 = vld [vmem:[#allocation17_spill] sm:$0xff]  ;;  %v9025_v57 = vld [vmem:[#allocation50_spill] sm:$0xff] }
 0x49d   :  { %v1857_v62 = vsel %vm1854_vm10, %v1856_v9, %v1852_v33  ;;  %v9028_v33 = vld [vmem:[#allocation52_spill] sm:$0xff] }
 0x49e   :  { %v5446_v17 = vpop.eup %5445  ;;  %v1868_v19 = vsub.f32 1.0, %v1857_v62  ;;  %v1872_v51 = vmul.f32 %v1857_v62, %v7104_v56  ;;  %v9009_v56 = vld [vmem:[#allocation55_spill] sm:$0xff]  ;;  %v9029_v9 = vld [vmem:[#allocation12_spill] sm:$0xff]  ;;  %v9031_v62 = vld [vmem:[#allocation54_spill] sm:$0xff] }
 0x4a0   :  { %v1870_v21 = vmul.f32 %v5446_v17, %v1868_v19  ;;  %v9032_v17 = vld [vmem:[#allocation13_spill] sm:$0xff]  ;;  %v9033_v19 = vld [vmem:[#allocation56_spill] sm:$0xff] }
 0x4a2   :  { %v7253_v52 = vadd.f32 %v1872_v51, %v1870_v21  ;;  %v9034_v21 = vld [vmem:[#allocation57_spill] sm:$0xff]  ;;  %v9035_v51 = vld [vmem:[#allocation14_spill] sm:$0xff] }
 0x4eb   :  { %v1766_v37 = vpop.permute.xlu0 %1765 }
 0x4ec   :  { %1771 = vst.msk [vmem:[#allocation4] sm:$0xff] %vm492_vm2, %v1766_v37  ;;  %v9030_v37 = vld [vmem:[#allocation53_spill] sm:$0xff] }
 0x4ed   :  { %1875 = vst.msk [vmem:[#allocation4] sm:$0xff] %vm481_vm1, %v7224_v61 }
 0x4f4   :  { %v1877_v13 = vld [vmem:[#allocation4] sm:$0xff] }
 0x4f5   :  { %v1768_v12 = vpop.permute.xlu1 %1767 }
 0x4f6   :  { %1772 = vst.msk [vmem:[#allocation4 + $0x8] sm:$0xff] %vm492_vm2, %v1768_v12  ;;  %v9036_v12 = vld [vmem:[#allocation59_spill] sm:$0xff] }
 0x4f7   :  { %1876 = vst.msk [vmem:[#allocation4 + $0x8] sm:$0xff] %vm481_vm1, %v7253_v52 }
 0x4fe   :  { %v1878_v27 = vld [vmem:[#allocation4 + $0x8] sm:$0xff] }
 0x4ff   :  { %v1879_v55 = vpack.c.bf16 %v1878_v27, %v1877_v13  ;;  %v9037_v13 = vld [vmem:[#allocation60_spill] sm:$0xff]  ;;  %v9038_v27 = vld [vmem:[#allocation15_spill] sm:$0xff] }
 0x501   :  { %1888 = vmatmul.bf16.vlgmr.msra.gmra.mxu0 %v1879_v55  ;;  %1902 = vmatmul.bf16.vlgmr.msra.gmra.mxu1 %v1879_v55 }
 0x502   :  { %1916 = vmatmul.bf16.vlgmr.msrb.gmra.mxu2 %v1879_v55  ;;  %1930 = vmatmul.bf16.vlgmr.msra.gmra.mxu3 %v1879_v55 }
 0x503   :  { %2209 = vmatpush.bf16.msra.mxu0 %v5928_v22  ;;  %2223 = vmatpush.bf16.msra.mxu1 %v6118_v4 }
 0x504   :  { %2237 = vmatpush.bf16.msrb.mxu2 %v6210_v59  ;;  %2251 = vmatpush.bf16.msra.mxu3 %v6400_v48 }
 0x507   :  { %2210 = vmatpush.bf16.msra.mxu0 %v5948_v28  ;;  %2224 = vmatpush.bf16.msra.mxu1 %v6136_v11 }
 0x508   :  { %2238 = vmatpush.bf16.msrb.mxu2 %v6224_v1  ;;  %2252 = vmatpush.bf16.msra.mxu3 %v6430_v39 }
 0x50b   :  { %2211 = vmatpush.bf16.msra.mxu0 %v5973_v35  ;;  %2225 = vmatpush.bf16.msra.mxu1 %v6147_v15 }
 0x50c   :  { %2239 = vmatpush.bf16.msrb.mxu2 %v6241_v8  ;;  %2253 = vmatpush.bf16.msra.mxu3 %v6495_v49 }
 0x50f   :  { %2212 = vmatpush.bf16.msra.mxu0 %v6050_v50  ;;  %2226 = vmatpush.bf16.msra.mxu1 %v6160_v20 }
 0x510   :  { %2240 = vmatpush.bf16.msrb.mxu2 %v6289_v24  ;;  %2254 = vmatpush.bf16.msra.mxu3 %v6534_v23 }
 0x511   :  { %1944 = vmatmul.bf16.vlgmr.msrb.gmra.mxu0 %v1879_v55  ;;  %1958 = vmatmul.bf16.vlgmr.msrb.gmra.mxu1 %v1879_v55 }
 0x512   :  { %1972 = vmatmul.bf16.vlgmr.msra.gmra.mxu2 %v1879_v55  ;;  %v9039_v55 = vld [vmem:[#allocation62_spill] sm:$0xff] }
 0x513   :  { %2213 = vmatpush.bf16.msra.mxu0 %v6063_v53  ;;  %2227 = vmatpush.bf16.msra.mxu1 %v6172_v26 }
 0x514   :  { %2241 = vmatpush.bf16.msrb.mxu2 %v6337_v44  ;;  %2255 = vmatpush.bf16.msra.mxu3 %v6583_v6 }
 0x517   :  { %2214 = vmatpush.bf16.msra.mxu0 %v6086_v58  ;;  %2228 = vmatpush.bf16.msra.mxu1 %v6181_v30 }
 0x518   :  { %2242 = vmatpush.bf16.msrb.mxu2 %v8967_v31  ;;  %2256 = vmatpush.bf16.msra.mxu3 %v9009_v56 }
 0x51b   :  { %2215 = vmatpush.bf16.msra.mxu0 %v9010_v10  ;;  %2229 = vmatpush.bf16.msra.mxu1 %v9011_v41 }
 0x51c   :  { %2243 = vmatpush.bf16.msrb.mxu2 %v9012_v25  ;;  %2257 = vmatpush.bf16.msra.mxu3 %v9013_v29 }
 0x51f   :  { %2216 = vmatpush.bf16.msra.mxu0 %v9014_v16  ;;  %2230 = vmatpush.bf16.msra.mxu1 %v9015_v18 }
 0x520   :  { %2244 = vmatpush.bf16.msrb.mxu2 %v9018_v54  ;;  %2258 = vmatpush.bf16.msra.mxu3 %v9019_v63 }
 0x523   :  { %2265 = vmatpush.bf16.msrb.mxu0 %v9016_v32  ;;  %2279 = vmatpush.bf16.msrb.mxu1 %v9017_v0  ;;  %v9046_v0 = vld [vmem:[#allocation68_spill] sm:$0xff] }
 0x524   :  { %2510 = vmatpush.bf16.msra.mxu2 %v9020_v36 }
 0x527   :  { %2266 = vmatpush.bf16.msrb.mxu0 %v9021_v3  ;;  %2280 = vmatpush.bf16.msrb.mxu1 %v9022_v34 }
 0x528   :  { %2511 = vmatpush.bf16.msra.mxu2 %v9023_v7 }
 0x52b   :  { %2267 = vmatpush.bf16.msrb.mxu0 %v9024_v45  ;;  %2281 = vmatpush.bf16.msrb.mxu1 %v9025_v57 }
 0x52c   :  { %2512 = vmatpush.bf16.msra.mxu2 %v9026_v40 }
 0x52f   :  { %2268 = vmatpush.bf16.msrb.mxu0 %v9027_v5  ;;  %2282 = vmatpush.bf16.msrb.mxu1 %v9028_v33 }
 0x530   :  { %2513 = vmatpush.bf16.msra.mxu2 %v9029_v9  ;;  %v9040_v9 = vld [vmem:[#allocation63_spill] sm:$0xff] }
 0x533   :  { %2269 = vmatpush.bf16.msrb.mxu0 %v9030_v37  ;;  %2283 = vmatpush.bf16.msrb.mxu1 %v9031_v62  ;;  %v9041_v37 = vld [vmem:[#allocation16_spill] sm:$0xff] }
 0x534   :  { %2514 = vmatpush.bf16.msra.mxu2 %v9032_v17  ;;  %v9042_v17 = vld [vmem:[#allocation21_spill] sm:$0xff] }
 0x535   :  { %v270_v62 = vadd.f32 %v9042_v17, %v8909_v14 }
 0x537   :  { %2270 = vmatpush.bf16.msrb.mxu0 %v9033_v19  ;;  %2284 = vmatpush.bf16.msrb.mxu1 %v9034_v21  ;;  %v9043_v19 = vld [vmem:[#allocation24_spill] sm:$0xff] }
 0x538   :  { %2515 = vmatpush.bf16.msra.mxu2 %v9035_v51  ;;  %v205_v21 = vadd.f32 %v9043_v19, %v8912_v43 }
 0x53b   :  { %2271 = vmatpush.bf16.msrb.mxu0 %v9036_v12  ;;  %2285 = vmatpush.bf16.msrb.mxu1 %v9037_v13 }
 0x53c   :  { %2516 = vmatpush.bf16.msra.mxu2 %v9038_v27 }
 0x53f   :  { %2272 = vmatpush.bf16.msrb.mxu0 %v9039_v55  ;;  %2286 = vmatpush.bf16.msrb.mxu1 %v9040_v9  ;;  %v9044_v55 = vld [vmem:[#allocation37_spill] sm:$0xff] }
 0x540   :  { %2517 = vmatpush.bf16.msra.mxu2 %v9041_v37 }
 0x57e   :  { %v1889_v33 = vpop.f32.mrf.mxu0  ;;  %v1903_v51 = vpop.f32.mrf.mxu1 }
 0x57f   :  { %v2094_v5 = vadd.f32 %v1889_v33, %v205_v21  ;;  %v2134_v12 = vadd.f32 %v1903_v51, %v270_v62 }
 0x581   :  { %v5087_v40 = vmul.f32 -1.442695, %v2094_v5  ;;  %v5089_v13 = vmul.f32 -1.442695, %v2134_v12  ;;  %v9045_v5 = vld [vmem:[#allocation34_spill] sm:$0xff] }
 0x583   :  { %5447 = vpow2.f32 %v5087_v40 }
 0x584   :  { %5449 = vpow2.f32 %v5089_v13 }
 0x585   :  { %v1931_v27 = vpop.f32.mrf.mxu3  ;;  %v1917_v34 = vpop.f32.mrf.mxu2 }
 0x586   :  { %v1978_v57 = vadd.f32 %v1931_v27, %v9044_v55  ;;  %v7319_v9 = vpop.f32.mrf.mxu0  ;;  %v7330_v63 = vpop.f32.mrf.mxu1 }
 0x588   :  { %v5083_v37 = vmul.f32 -1.442695, %v1978_v57 }
 0x589   :  { %v5448_v45 = vpop.eup %5447 }
 0x58a   :  { %v5450_v7 = vpop.eup %5449  ;;  %v2102_v17 = vadd.f32 1.0, %v5448_v45  ;;  %5451 = vpow2.f32 %v5083_v37 }
 0x58b   :  { %v7321_v19 = vadd.f32 1.0, %v5450_v7 }
 0x58c   :  { %5453 = vrcp.f32 %v2102_v17  ;;  %v2115_v36 = vand.u32 2147483648, %v2102_v17  ;;  %vm2109_vm12 = vweird.f32 %v2102_v17 }
 0x58d   :  { %v1933_v33 = vpop.f32.mrf.mxu3  ;;  %5455 = vrcp.f32 %v7321_v19  ;;  %v7326_v45 = vpop.f32.mrf.mxu2  ;;  %vm2149_vm7 = vweird.f32 %v7321_v19 }
 0x58e   :  { %v1945_v62 = vpop.f32.mrf.mxu0  ;;  %v1979_v40 = vadd.f32 %v1933_v33, %v9044_v55 }
 0x58f   :  { %v2018_v21 = vadd.f32 %v1945_v62, %v9045_v5  ;;  %v2113_v62 = vand.u32 2147483647, %v2102_v17 }
 0x590   :  { %v5452_v51 = vpop.eup %5451  ;;  %v5084_v13 = vmul.f32 -1.442695, %v1979_v40 }
 0x591   :  { %v1986_v12 = vadd.f32 1.0, %v5452_v51  ;;  %v5085_v27 = vmul.f32 -1.442695, %v2018_v21  ;;  %vm2114_vm14 = vcmp.eq.f32.partialorder %v2113_v62, 8.507059e+37 }
 0x592   :  { %v5454_v57 = vpop.eup %5453 }
 0x593   :  { %v2105_v3 = vmul.f32 %v5454_v57, %v2102_v17  ;;  %5457 = vrcp.f32 %v1986_v12  ;;  %v7328_v7 = vpop.eup %5455  ;;  %vm2110_vm11 = vweird.f32 %v5454_v57  ;;  %vm1993_vm3 = vweird.f32 %v1986_v12 }
 0x594   :  { %5459 = vpow2.f32 %v5084_v13  ;;  %v2145_v40 = vmul.f32 %v7328_v7, %v7321_v19  ;;  %vm2111_vm13 = vmor %vm2109_vm12, %vm2110_vm11  ;;  %v2116_v13 = vor.u32 1.1754944e-38, %v2115_v36  ;;  %vm2150_vm6 = vweird.f32 %v7328_v7 }
 0x595   :  { %v2106_v37 = vsub.f32 1.0, %v2105_v3  ;;  %5461 = vpow2.f32 %v5085_v27  ;;  %v335_v3 = vadd.f32 %v9046_v0, %v8916_v2  ;;  %v1973_v0 = vpop.f32.mrf.mxu2  ;;  %vm2151_vm8 = vmor %vm2149_vm7, %vm2150_vm6 }
 0x596   :  { %v1947_v33 = vpop.f32.mrf.mxu0  ;;  %v2146_v25 = vsub.f32 1.0, %v2145_v40 }
 0x597   :  { %v2107_v55 = vmul.f32 %v5454_v57, %v2106_v37  ;;  %v2019_v54 = vadd.f32 %v1947_v33, %v9045_v5  ;;  %v2174_v37 = vadd.f32 %v1917_v34, %v8915_v42  ;;  %v1999_v5 = vand.u32 2147483648, %v1986_v12  ;;  %v1959_v34 = vpop.f32.mrf.mxu1 }
 0x599   :  { %v5458_v21 = vpop.eup %5457  ;;  %v2108_v51 = vadd.f32 %v5454_v57, %v2107_v55  ;;  %v5086_v16 = vmul.f32 -1.442695, %v2019_v54  ;;  %v2147_v54 = vmul.f32 %v7328_v7, %v2146_v25 }
 0x59a   :  { %v1989_v32 = vmul.f32 %v5458_v21, %v1986_v12  ;;  %v5460_v18 = vpop.eup %5459  ;;  %vm1994_vm15 = vweird.f32 %v5458_v21 }
 0x59b   :  { %v2112_v27 = vsel %vm2111_vm13, %v5454_v57, %v2108_v51  ;;  %v5462_v29 = vpop.eup %5461  ;;  %v7338_v10 = vadd.f32 1.0, %v5460_v18  ;;  %5463 = vpow2.f32 %v5086_v16  ;;  %v1997_v57 = vand.u32 2147483647, %v1986_v12  ;;  %vm1995_vm4 = vmor %vm1993_vm3, %vm1994_vm15 }
 0x59c   :  { %v2117_v41 = vsel %vm2114_vm14, %v2116_v13, %v2112_v27  ;;  %v1990_v55 = vsub.f32 1.0, %v1989_v32  ;;  %v7340_v33 = vadd.f32 1.0, %v5462_v29  ;;  %v2155_v29 = vand.u32 2147483648, %v7321_v19 }
 0x59d   :  { %v2176_v17 = vmul.f32 %v2174_v37, %v2117_v41  ;;  %5465 = vrcp.f32 %v7338_v10  ;;  %v2000_v41 = vor.u32 1.1754944e-38, %v1999_v5  ;;  %vm1998_vm5 = vcmp.eq.f32.partialorder %v1997_v57, 8.507059e+37 }
 0x59e   :  { %v1991_v36 = vmul.f32 %v5458_v21, %v1990_v55  ;;  %5467 = vrcp.f32 %v7340_v33  ;;  %v2060_v16 = vadd.f32 %v1973_v0, %v6862_v60  ;;  %v2058_v51 = vadd.f32 %v1959_v34, %v6887_v38 }
 0x59f   :  { %v2178_v62 = vadd.f32 %v2176_v17, %v335_v3  ;;  %v2153_v13 = vand.u32 2147483647, %v7321_v19  ;;  %v2148_v12 = vadd.f32 %v7328_v7, %v2147_v54  ;;  %v2156_v0 = vor.u32 1.1754944e-38, %v2155_v29  ;;  %v1975_v54 = vpop.f32.mrf.mxu2 }
 0x5a0   :  { %v1992_v18 = vadd.f32 %v5458_v21, %v1991_v36  ;;  %v2012_v57 = vand.u32 2147483647, %v7338_v10  ;;  %v2014_v34 = vand.u32 2147483648, %v7338_v10  ;;  %v2037_v29 = vand.u32 2147483647, %v7340_v33 }
 0x5a1   :  { %v5464_v40 = vpop.eup %5463  ;;  %5469 = vtanh.f32 %v2178_v62  ;;  %vm2154_vm9 = vcmp.eq.f32.partialorder %v2153_v13, 8.507059e+37  ;;  %vm2008_vm12 = vweird.f32 %v7338_v10  ;;  %v2061_v13 = vadd.f32 %v1975_v54, %v6862_v60 }
 0x5a2   :  { %v1996_v32 = vsel %vm1995_vm4, %v5458_v21, %v1992_v18  ;;  %v7349_v37 = vadd.f32 1.0, %v5464_v40  ;;  %v2039_v18 = vand.u32 2147483648, %v7340_v33  ;;  %vm2033_vm13 = vweird.f32 %v7340_v33 }
 0x5a3   :  { %v2001_v3 = vsel %vm1998_vm5, %v2000_v41, %v1996_v32  ;;  %v5466_v27 = vpop.eup %5465  ;;  %v2152_v41 = vsel %vm2151_vm8, %v7328_v7, %v2148_v12  ;;  %v2015_v7 = vor.u32 1.1754944e-38, %v2014_v34  ;;  %vm2013_vm15 = vcmp.eq.f32.partialorder %v2012_v57, 8.507059e+37 }
 0x5a4   :  { %v2062_v25 = vmul.f32 %v2060_v16, %v2001_v3  ;;  %v5468_v5 = vpop.eup %5467  ;;  %v2004_v21 = vmul.f32 %v5466_v27, %v7338_v10  ;;  %5471 = vrcp.f32 %v7349_v37  ;;  %vm2009_vm10 = vweird.f32 %v5466_v27 }
 0x5a5   :  { %v2029_v55 = vmul.f32 %v5468_v5, %v7340_v33  ;;  %v2157_v16 = vsel %vm2154_vm9, %v2156_v0, %v2152_v41  ;;  %vm2034_vm11 = vweird.f32 %v5468_v5  ;;  %vm2010_vm14 = vmor %vm2008_vm12, %vm2009_vm10  ;;  %vm2038_vm4 = vcmp.eq.f32.partialorder %v2037_v29, 8.507059e+37 }
 0x5a6   :  { %v2064_v17 = vadd.f32 %v2062_v25, %v2058_v51  ;;  %v2005_v36 = vsub.f32 1.0, %v2004_v21  ;;  %v2182_v51 = vsub.f32 1.0, %v2157_v16  ;;  %v1961_v21 = vpop.f32.mrf.mxu1  ;;  %vm2035_vm3 = vmor %vm2033_vm13, %vm2034_vm11  ;;  %v2052_v57 = vand.u32 2147483647, %v7349_v37 }
 0x5a7   :  { %v2030_v62 = vsub.f32 1.0, %v2029_v55  ;;  %v5470_v19 = vpop.eup %5469  ;;  %v2059_v34 = vadd.f32 %v1961_v21, %v6887_v38  ;;  %vm2048_vm6 = vweird.f32 %v7349_v37 }
 0x5a8   :  { %5473 = vtanh.f32 %v2064_v17  ;;  %v2006_v32 = vmul.f32 %v5466_v27, %v2005_v36  ;;  %v2184_v55 = vmul.f32 %v5470_v19, %v2182_v51  ;;  %v2186_v17 = vmul.f32 %v2157_v16, %v7224_v61 }
 0x5a9   :  { %v2031_v40 = vmul.f32 %v5468_v5, %v2030_v62  ;;  %v2040_v62 = vor.u32 1.1754944e-38, %v2039_v18  ;;  %v2054_v61 = vand.u32 2147483648, %v7349_v37  ;;  %vm2053_vm8 = vcmp.eq.f32.partialorder %v2052_v57, 8.507059e+37 }
 0x5aa   :  { %v2007_v3 = vadd.f32 %v5466_v27, %v2006_v32  ;;  %v5472_v25 = vpop.eup %5471  ;;  %v7368_v54 = vadd.f32 %v2186_v17, %v2184_v55 }
 0x5ab   :  { %v2032_v12 = vadd.f32 %v5468_v5, %v2031_v40  ;;  %v2044_v0 = vmul.f32 %v5472_v25, %v7349_v37  ;;  %vm2049_vm5 = vweird.f32 %v5472_v25  ;;  %v9047_v37 = vld [vmem:[#allocation26_spill] sm:$0xff] }
 0x5ac   :  { %v2011_v36 = vsel %vm2010_vm14, %v5466_v27, %v2007_v3  ;;  %vm2050_vm7 = vmor %vm2048_vm6, %vm2049_vm5 }
 0x5ad   :  { %v2016_v10 = vsel %vm2013_vm15, %v2015_v7, %v2011_v36  ;;  %v2036_v41 = vsel %vm2035_vm3, %v5468_v5, %v2032_v12  ;;  %v2045_v32 = vsub.f32 1.0, %v2044_v0 }
 0x5ae   :  { %v5474_v33 = vpop.eup %5473  ;;  %v2063_v40 = vmul.f32 %v2061_v13, %v2016_v10  ;;  %v2041_v19 = vsel %vm2038_vm4, %v2040_v62, %v2036_v41  ;;  %v2055_v13 = vor.u32 1.1754944e-38, %v2054_v61  ;;  %v9048_v10 = vld [vmem:[#allocation22_spill] sm:$0xff] }
 0x5af   :  { %v2068_v51 = vsub.f32 1.0, %v2041_v19  ;;  %v2046_v27 = vmul.f32 %v5472_v25, %v2045_v32  ;;  %v2072_v5 = vmul.f32 %v2041_v19, %v7221_v46  ;;  %v273_v41 = vadd.f32 %v9048_v10, %v8909_v14 }
 0x5b0   :  { %v2065_v16 = vadd.f32 %v2063_v40, %v2059_v34 }
 0x5b1   :  { %v2070_v18 = vmul.f32 %v5474_v33, %v2068_v51  ;;  %v2047_v29 = vadd.f32 %v5472_v25, %v2046_v27 }
 0x5b2   :  { %5475 = vtanh.f32 %v2065_v16 }
 0x5b3   :  { %v7375_v3 = vadd.f32 %v2072_v5, %v2070_v18  ;;  %v2051_v21 = vsel %vm2050_vm7, %v5472_v25, %v2047_v29  ;;  %v208_v25 = vadd.f32 %v9047_v37, %v8912_v43  ;;  %v9049_v37 = vld [vmem:[#allocation69_spill] sm:$0xff] }
 0x5b4   :  { %v2056_v7 = vsel %vm2053_vm8, %v2055_v13, %v2051_v21 }
 0x5b5   :  { %2080 = vrot.lane.b32.xlu2 %v7375_v3, %s5725_s0  ;;  %2076 = vst.msk [vmem:[#allocation3 + $0x30] sm:$0xff] %vm481_vm1, %v7375_v3  ;;  %v2069_v12 = vsub.f32 1.0, %v2056_v7  ;;  %v2073_v17 = vmul.f32 %v2056_v7, %v7233_v47  ;;  %v2095_v36 = vadd.f32 %v7319_v9, %v208_v25  ;;  %v2135_v47 = vadd.f32 %v7330_v63, %v273_v41 }
 0x5b6   :  { %v338_v25 = vadd.f32 %v9049_v37, %v8916_v2  ;;  %v9063_v37 = vld [vmem:[#allocation10_spill] sm:$0xff] }
 0x5b7   :  { %v5088_v62 = vmul.f32 -1.442695, %v2095_v36  ;;  %v5090_v34 = vmul.f32 -1.442695, %v2135_v47 }
 0x5b8   :  { %v5476_v55 = vpop.eup %5475 }
 0x5b9   :  { %v2071_v46 = vmul.f32 %v5476_v55, %v2069_v12  ;;  %5477 = vpow2.f32 %v5088_v62  ;;  %v2175_v55 = vadd.f32 %v7326_v45, %v8915_v42 }
 0x5bb   :  { %v7382_v0 = vadd.f32 %v2073_v17, %v2071_v46 }
 0x5bd   :  { %2082 = vrot.lane.b32.xlu0 %v7382_v0, %s5725_s0  ;;  %2077 = vst.msk [vmem:[#allocation3 + $0x38] sm:$0xff] %vm481_vm1, %v7382_v0 }
 0x5bf   :  { %v5478_v33 = vpop.eup %5477 }
 0x5c0   :  { %v2103_v32 = vadd.f32 1.0, %v5478_v33 }
 0x5c2   :  { %5479 = vrcp.f32 %v2103_v32  ;;  %v2130_v5 = vand.u32 2147483648, %v2103_v32  ;;  %vm2124_vm10 = vweird.f32 %v2103_v32  ;;  %v2128_v63 = vand.u32 2147483647, %v2103_v32 }
 0x5c3   :  { %5481 = vpow2.f32 %v5090_v34 }
 0x5c4   :  { %v2131_v21 = vor.u32 1.1754944e-38, %v2130_v5  ;;  %vm2129_vm12 = vcmp.eq.f32.partialorder %v2128_v63, 8.507059e+37  ;;  %v9053_v5 = vld [vmem:[#allocation58_spill] sm:$0xff] }
 0x5c5   :  { %v9054_v63 = vld [vmem:[#allocation18_spill] sm:$0xff] }
 0x5c8   :  { %v5480_v40 = vpop.eup %5479 }
 0x5c9   :  { %v5482_v19 = vpop.eup %5481  ;;  %v2120_v51 = vmul.f32 %v5480_v40, %v2103_v32  ;;  %vm2125_vm9 = vweird.f32 %v5480_v40 }
 0x5ca   :  { %v2143_v61 = vadd.f32 1.0, %v5482_v19  ;;  %vm2126_vm11 = vmor %vm2124_vm10, %vm2125_vm9 }
 0x5cb   :  { %v2121_v16 = vsub.f32 1.0, %v2120_v51 }
 0x5cc   :  { %5483 = vrcp.f32 %v2143_v61  ;;  %v2170_v10 = vand.u32 2147483648, %v2143_v61  ;;  %vm2164_vm14 = vweird.f32 %v2143_v61  ;;  %v2168_v41 = vand.u32 2147483647, %v2143_v61 }
 0x5cd   :  { %v2122_v27 = vmul.f32 %v5480_v40, %v2121_v16 }
 0x5ce   :  { %v2171_v47 = vor.u32 1.1754944e-38, %v2170_v10  ;;  %vm2169_vm3 = vcmp.eq.f32.partialorder %v2168_v41, 8.507059e+37  ;;  %v9067_v10 = vld [vmem:[#allocation51_spill] sm:$0xff]  ;;  %v9068_v41 = vld [vmem:[#allocation52_spill] sm:$0xff] }
 0x5cf   :  { %v2123_v18 = vadd.f32 %v5480_v40, %v2122_v27 }
 0x5d1   :  { %v2127_v13 = vsel %vm2126_vm11, %v5480_v40, %v2123_v18  ;;  %v9052_v18 = vld [vmem:[#allocation46_spill] sm:$0xff] }
 0x5d2   :  { %v5484_v57 = vpop.eup %5483  ;;  %v2132_v12 = vsel %vm2129_vm12, %v2131_v21, %v2127_v13  ;;  %v9056_v13 = vld [vmem:[#allocation42_spill] sm:$0xff]  ;;  %v9057_v21 = vld [vmem:[#allocation43_spill] sm:$0xff] }
 0x5d3   :  { %v2160_v29 = vmul.f32 %v5484_v57, %v2143_v61  ;;  %v2177_v46 = vmul.f32 %v2175_v55, %v2132_v12  ;;  %vm2165_vm13 = vweird.f32 %v5484_v57  ;;  %v9059_v12 = vld [vmem:[#allocation61_spill] sm:$0xff] }
 0x5d4   :  { %vm2166_vm15 = vmor %vm2164_vm14, %vm2165_vm13  ;;  %v9060_v55 = vld [vmem:[#allocation9_spill] sm:$0xff] }
 0x5d5   :  { %v2161_v7 = vsub.f32 1.0, %v2160_v29  ;;  %v2179_v36 = vadd.f32 %v2177_v46, %v338_v25  ;;  %v9055_v29 = vld [vmem:[#allocation20_spill] sm:$0xff]  ;;  %v9061_v46 = vld [vmem:[#allocation45_spill] sm:$0xff] }
 0x5d6   :  { %v9064_v25 = vld [vmem:[#allocation49_spill] sm:$0xff] }
 0x5d7   :  { %v2162_v17 = vmul.f32 %v5484_v57, %v2161_v7  ;;  %5485 = vtanh.f32 %v2179_v36  ;;  %v9058_v7 = vld [vmem:[#allocation48_spill] sm:$0xff]  ;;  %v9065_v36 = vld [vmem:[#allocation50_spill] sm:$0xff] }
 0x5d9   :  { %v2163_v62 = vadd.f32 %v5484_v57, %v2162_v17  ;;  %v9062_v17 = vld [vmem:[#allocation47_spill] sm:$0xff] }
 0x5db   :  { %v2167_v33 = vsel %vm2166_vm15, %v5484_v57, %v2163_v62  ;;  %v9051_v57 = vld [vmem:[#allocation19_spill] sm:$0xff] }
 0x5dc   :  { %v2172_v32 = vsel %vm2169_vm3, %v2171_v47, %v2167_v33  ;;  %v9066_v62 = vld [vmem:[#allocation11_spill] sm:$0xff]  ;;  %v9069_v33 = vld [vmem:[#allocation12_spill] sm:$0xff]  ;;  %v9070_v47 = vld [vmem:[#allocation53_spill] sm:$0xff] }
 0x5dd   :  { %v5486_v34 = vpop.eup %5485  ;;  %v2183_v40 = vsub.f32 1.0, %v2172_v32  ;;  %v2187_v19 = vmul.f32 %v2172_v32, %v7253_v52  ;;  %v9050_v52 = vld [vmem:[#allocation17_spill] sm:$0xff]  ;;  %v9071_v32 = vld [vmem:[#allocation54_spill] sm:$0xff] }
 0x5df   :  { %v2185_v45 = vmul.f32 %v5486_v34, %v2183_v40  ;;  %v9072_v34 = vld [vmem:[#allocation13_spill] sm:$0xff]  ;;  %v9073_v40 = vld [vmem:[#allocation56_spill] sm:$0xff] }
 0x5e1   :  { %v7402_v51 = vadd.f32 %v2187_v19, %v2185_v45  ;;  %v9074_v45 = vld [vmem:[#allocation57_spill] sm:$0xff]  ;;  %v9075_v19 = vld [vmem:[#allocation14_spill] sm:$0xff] }
 0x60f   :  { %v2081_v9 = vpop.permute.xlu2 %2080 }
 0x610   :  { %2086 = vst.msk [vmem:[#allocation4] sm:$0xff] %vm492_vm2, %v2081_v9 }
 0x611   :  { %2190 = vst.msk [vmem:[#allocation4] sm:$0xff] %vm481_vm1, %v7368_v54 }
 0x618   :  { %v2192_v61 = vld [vmem:[#allocation4] sm:$0xff] }
 0x62f   :  { %v2083_v16 = vpop.permute.xlu0 %2082 }
 0x630   :  { %2087 = vst.msk [vmem:[#allocation4 + $0x8] sm:$0xff] %vm492_vm2, %v2083_v16  ;;  %v9076_v16 = vld [vmem:[#allocation59_spill] sm:$0xff] }
 0x631   :  { %2191 = vst.msk [vmem:[#allocation4 + $0x8] sm:$0xff] %vm481_vm1, %v7402_v51 }
 0x638   :  { %v2193_v27 = vld [vmem:[#allocation4 + $0x8] sm:$0xff] }
 0x639   :  { %v2194_v9 = vpack.c.bf16 %v2193_v27, %v2192_v61  ;;  %v9077_v61 = vld [vmem:[#allocation60_spill] sm:$0xff]  ;;  %v9078_v27 = vld [vmem:[#allocation15_spill] sm:$0xff] }
 0x63b   :  { %2203 = vmatmul.bf16.vlgmr.msrb.gmra.mxu3 %v2194_v9  ;;  %2217 = vmatmul.bf16.vlgmr.msra.gmra.mxu0 %v2194_v9 }
 0x63c   :  { %2231 = vmatmul.bf16.vlgmr.msra.gmra.mxu1 %v2194_v9  ;;  %2245 = vmatmul.bf16.vlgmr.msrb.gmra.mxu2 %v2194_v9 }
 0x63d   :  { %2524 = vmatpush.bf16.msrb.mxu3 %v5928_v22  ;;  %2538 = vmatpush.bf16.msra.mxu0 %v6118_v4 }
 0x63e   :  { %2552 = vmatpush.bf16.msra.mxu1 %v6210_v59  ;;  %2566 = vmatpush.bf16.msrb.mxu2 %v6400_v48 }
 0x641   :  { %2525 = vmatpush.bf16.msrb.mxu3 %v5948_v28  ;;  %2539 = vmatpush.bf16.msra.mxu0 %v6136_v11 }
 0x642   :  { %2553 = vmatpush.bf16.msra.mxu1 %v6224_v1  ;;  %2567 = vmatpush.bf16.msrb.mxu2 %v6430_v39 }
 0x645   :  { %2526 = vmatpush.bf16.msrb.mxu3 %v5973_v35  ;;  %2540 = vmatpush.bf16.msra.mxu0 %v6147_v15 }
 0x646   :  { %2554 = vmatpush.bf16.msra.mxu1 %v6241_v8  ;;  %2568 = vmatpush.bf16.msrb.mxu2 %v6495_v49 }
 0x649   :  { %2527 = vmatpush.bf16.msrb.mxu3 %v6050_v50  ;;  %2541 = vmatpush.bf16.msra.mxu0 %v6160_v20 }
 0x64a   :  { %2555 = vmatpush.bf16.msra.mxu1 %v6289_v24  ;;  %2569 = vmatpush.bf16.msrb.mxu2 %v6534_v23 }
 0x64b   :  { %2259 = vmatmul.bf16.vlgmr.msra.gmra.mxu3 %v2194_v9  ;;  %2273 = vmatmul.bf16.vlgmr.msrb.gmra.mxu0 %v2194_v9 }
 0x64c   :  { %2287 = vmatmul.bf16.vlgmr.msrb.gmra.mxu1 %v2194_v9  ;;  %v9079_v9 = vld [vmem:[#allocation62_spill] sm:$0xff] }
 0x64d   :  { %2528 = vmatpush.bf16.msrb.mxu3 %v6063_v53  ;;  %2542 = vmatpush.bf16.msra.mxu0 %v6172_v26 }
 0x64e   :  { %2556 = vmatpush.bf16.msra.mxu1 %v6337_v44  ;;  %2570 = vmatpush.bf16.msrb.mxu2 %v6583_v6 }
 0x651   :  { %2529 = vmatpush.bf16.msrb.mxu3 %v6086_v58  ;;  %2543 = vmatpush.bf16.msra.mxu0 %v6181_v30 }
 0x652   :  { %2557 = vmatpush.bf16.msra.mxu1 %v8967_v31  ;;  %2571 = vmatpush.bf16.msrb.mxu2 %v9009_v56 }
 0x655   :  { %2530 = vmatpush.bf16.msrb.mxu3 %v9050_v52  ;;  %2544 = vmatpush.bf16.msra.mxu0 %v9051_v57 }
 0x656   :  { %2558 = vmatpush.bf16.msra.mxu1 %v9052_v18  ;;  %2572 = vmatpush.bf16.msrb.mxu2 %v9053_v5 }
 0x659   :  { %2531 = vmatpush.bf16.msrb.mxu3 %v9054_v63  ;;  %2545 = vmatpush.bf16.msra.mxu0 %v9055_v29 }
 0x65a   :  { %2559 = vmatpush.bf16.msra.mxu1 %v9058_v7  ;;  %2573 = vmatpush.bf16.msrb.mxu2 %v9059_v12 }
 0x65d   :  { %2580 = vmatpush.bf16.msra.mxu3 %v9056_v13  ;;  %2594 = vmatpush.bf16.msrb.mxu0 %v9057_v21 }
 0x65e   :  { %2825 = vmatpush.bf16.msrb.mxu1 %v9060_v55  ;;  %v9080_v55 = vld [vmem:[#allocation63_spill] sm:$0xff] }
 0x661   :  { %2581 = vmatpush.bf16.msra.mxu3 %v9061_v46  ;;  %2595 = vmatpush.bf16.msrb.mxu0 %v9062_v17 }
 0x662   :  { %2826 = vmatpush.bf16.msrb.mxu1 %v9063_v37  ;;  %v9081_v37 = vld [vmem:[#allocation16_spill] sm:$0xff] }
 0x665   :  { %2582 = vmatpush.bf16.msra.mxu3 %v9064_v25  ;;  %2596 = vmatpush.bf16.msrb.mxu0 %v9065_v36 }
 0x666   :  { %2827 = vmatpush.bf16.msrb.mxu1 %v9066_v62  ;;  %v9082_v62 = vld [vmem:[#allocation23_spill] sm:$0xff] }
 0x669   :  { %2583 = vmatpush.bf16.msra.mxu3 %v9067_v10  ;;  %2597 = vmatpush.bf16.msrb.mxu0 %v9068_v41 }
 0x66a   :  { %2828 = vmatpush.bf16.msrb.mxu1 %v9069_v33  ;;  %v276_v33 = vadd.f32 %v9082_v62, %v8909_v14 }
 0x66d   :  { %2584 = vmatpush.bf16.msra.mxu3 %v9070_v47  ;;  %2598 = vmatpush.bf16.msrb.mxu0 %v9071_v32 }
 0x66e   :  { %2829 = vmatpush.bf16.msrb.mxu1 %v9072_v34 }
 0x671   :  { %2585 = vmatpush.bf16.msra.mxu3 %v9073_v40  ;;  %2599 = vmatpush.bf16.msrb.mxu0 %v9074_v45 }
 0x672   :  { %2830 = vmatpush.bf16.msrb.mxu1 %v9075_v19  ;;  %v9083_v19 = vld [vmem:[#allocation28_spill] sm:$0xff] }
 0x673   :  { %v211_v32 = vadd.f32 %v9083_v19, %v8912_v43 }
 0x675   :  { %2586 = vmatpush.bf16.msra.mxu3 %v9076_v16  ;;  %2600 = vmatpush.bf16.msrb.mxu0 %v9077_v61 }
 0x676   :  { %2831 = vmatpush.bf16.msrb.mxu1 %v9078_v27  ;;  %v9084_v27 = vld [vmem:[#allocation37_spill] sm:$0xff] }
 0x679   :  { %2587 = vmatpush.bf16.msra.mxu3 %v9079_v9  ;;  %2601 = vmatpush.bf16.msrb.mxu0 %v9080_v55 }
 0x67a   :  { %2832 = vmatpush.bf16.msrb.mxu1 %v9081_v37 }
 0x6b8   :  { %v2218_v34 = vpop.f32.mrf.mxu0 }
 0x6b9   :  { %v2449_v40 = vadd.f32 %v2218_v34, %v276_v33  ;;  %v2232_v62 = vpop.f32.mrf.mxu1 }
 0x6bb   :  { %v5097_v45 = vmul.f32 -1.442695, %v2449_v40 }
 0x6bd   :  { %5487 = vpow2.f32 %v5097_v45 }
 0x6be   :  { %v2204_v16 = vpop.f32.mrf.mxu3 }
 0x6bf   :  { %v2409_v61 = vadd.f32 %v2204_v16, %v211_v32  ;;  %v2246_v47 = vpop.f32.mrf.mxu2 }
 0x6c0   :  { %v2293_v41 = vadd.f32 %v2246_v47, %v9084_v27 }
 0x6c1   :  { %v5095_v9 = vmul.f32 -1.442695, %v2409_v61  ;;  %v7476_v61 = vpop.f32.mrf.mxu1 }
 0x6c2   :  { %v5091_v10 = vmul.f32 -1.442695, %v2293_v41 }
 0x6c3   :  { %v5488_v55 = vpop.eup %5487  ;;  %5489 = vpow2.f32 %v5095_v9  ;;  %v9085_v9 = vld [vmem:[#allocation34_spill] sm:$0xff] }
 0x6c4   :  { %5491 = vpow2.f32 %v5091_v10  ;;  %v7468_v37 = vadd.f32 1.0, %v5488_v55 }
 0x6c6   :  { %v7470_v36 = vpop.f32.mrf.mxu3  ;;  %5493 = vrcp.f32 %v7468_v37  ;;  %vm2464_vm13 = vweird.f32 %v7468_v37 }
 0x6c7   :  { %v2248_v40 = vpop.f32.mrf.mxu2 }
 0x6c8   :  { %v2294_v33 = vadd.f32 %v2248_v40, %v9084_v27 }
 0x6c9   :  { %v5490_v34 = vpop.eup %5489 }
 0x6ca   :  { %v5492_v32 = vpop.eup %5491  ;;  %v2417_v45 = vadd.f32 1.0, %v5490_v34  ;;  %v5092_v16 = vmul.f32 -1.442695, %v2294_v33  ;;  %v7481_v33 = vpop.f32.mrf.mxu0 }
 0x6cb   :  { %v2301_v47 = vadd.f32 1.0, %v5492_v32 }
 0x6cc   :  { %5495 = vrcp.f32 %v2417_v45  ;;  %v7474_v10 = vpop.eup %5493  ;;  %v2428_v7 = vand.u32 2147483647, %v2417_v45  ;;  %v2430_v21 = vand.u32 2147483648, %v2417_v45  ;;  %vm2424_vm5 = vweird.f32 %v2417_v45 }
 0x6cd   :  { %5497 = vrcp.f32 %v2301_v47  ;;  %v2460_v40 = vmul.f32 %v7474_v10, %v7468_v37  ;;  %vm2308_vm6 = vweird.f32 %v2301_v47  ;;  %v2312_v52 = vand.u32 2147483647, %v2301_v47 }
 0x6ce   :  { %5499 = vpow2.f32 %v5092_v16  ;;  %v2260_v41 = vpop.f32.mrf.mxu3  ;;  %vm2429_vm9 = vcmp.eq.f32.partialorder %v2428_v7, 8.507059e+37  ;;  %vm2465_vm12 = vweird.f32 %v7474_v10 }
 0x6cf   :  { %v2333_v55 = vadd.f32 %v2260_v41, %v9085_v9  ;;  %v2461_v12 = vsub.f32 1.0, %v2460_v40  ;;  %v2288_v40 = vpop.f32.mrf.mxu1  ;;  %vm2313_vm11 = vcmp.eq.f32.partialorder %v2312_v52, 8.507059e+37  ;;  %v2468_v52 = vand.u32 2147483647, %v7468_v37  ;;  %vm7510_vm15 = vmor %vm2464_vm13, %vm2465_vm12 }
 0x6d1   :  { %v5093_v27 = vmul.f32 -1.442695, %v2333_v55 }
 0x6d2   :  { %v5496_v19 = vpop.eup %5495 }
 0x6d3   :  { %v5498_v25 = vpop.eup %5497  ;;  %v2420_v17 = vmul.f32 %v5496_v19, %v2417_v45  ;;  %5501 = vpow2.f32 %v5093_v27  ;;  %vm2425_vm4 = vweird.f32 %v5496_v19  ;;  %v2462_v27 = vmul.f32 %v7474_v10, %v2461_v12 }
 0x6d4   :  { %v5500_v34 = vpop.eup %5499  ;;  %v2304_v16 = vmul.f32 %v5498_v25, %v2301_v47  ;;  %vm2309_vm7 = vweird.f32 %v5498_v25  ;;  %vm2426_vm8 = vmor %vm2424_vm5, %vm2425_vm4  ;;  %v2489_v45 = vadd.f32 %v2232_v62, %v8915_v42  ;;  %vm2469_vm5 = vcmp.eq.f32.partialorder %v2468_v52, 8.507059e+37 }
 0x6d5   :  { %v2421_v32 = vsub.f32 1.0, %v2420_v17  ;;  %v7483_v46 = vadd.f32 1.0, %v5500_v34  ;;  %v2431_v17 = vor.u32 1.1754944e-38, %v2430_v21  ;;  %v2314_v34 = vand.u32 2147483648, %v2301_v47  ;;  %vm7490_vm10 = vmor %vm2308_vm6, %vm2309_vm7 }
 0x6d6   :  { %v2262_v13 = vpop.f32.mrf.mxu3  ;;  %v2305_v29 = vsub.f32 1.0, %v2304_v16  ;;  %v2463_v62 = vadd.f32 %v7474_v10, %v2462_v27 }
 0x6d7   :  { %v2422_v41 = vmul.f32 %v5496_v19, %v2421_v32  ;;  %5503 = vrcp.f32 %v7483_v46  ;;  %v2334_v55 = vadd.f32 %v2262_v13, %v9085_v9  ;;  %v2327_v27 = vand.u32 2147483647, %v7483_v46 }
 0x6d8   :  { %v2306_v5 = vmul.f32 %v5498_v25, %v2305_v29  ;;  %vm2323_vm3 = vweird.f32 %v7483_v46 }
 0x6d9   :  { %v2423_v63 = vadd.f32 %v5496_v19, %v2422_v41  ;;  %v5094_v18 = vmul.f32 -1.442695, %v2334_v55  ;;  %v5502_v56 = vpop.eup %5501  ;;  %v2470_v41 = vand.u32 2147483648, %v7468_v37  ;;  %v2329_v55 = vand.u32 2147483648, %v7483_v46 }
 0x6da   :  { %v2307_v57 = vadd.f32 %v5498_v25, %v2306_v5  ;;  %v7496_v7 = vadd.f32 1.0, %v5502_v56  ;;  %v2315_v5 = vor.u32 1.1754944e-38, %v2314_v34  ;;  %vm2328_vm6 = vcmp.eq.f32.partialorder %v2327_v27, 8.507059e+37 }
 0x6db   :  { %v2427_v32 = vsel %vm2426_vm8, %v5496_v19, %v2423_v63  ;;  %5505 = vpow2.f32 %v5094_v18  ;;  %v2274_v63 = vpop.f32.mrf.mxu0  ;;  %v9088_v18 = vld [vmem:[#allocation70_spill] sm:$0xff] }
 0x6dc   :  { %v2432_v16 = vsel %vm2429_vm9, %v2431_v17, %v2427_v32  ;;  %v2311_v21 = vsel %vm7490_vm10, %v5498_v25, %v2307_v57  ;;  %5507 = vrcp.f32 %v7496_v7  ;;  %v341_v47 = vadd.f32 %v9088_v18, %v8916_v2 }
 0x6dd   :  { %v5504_v13 = vpop.eup %5503  ;;  %v2491_v12 = vmul.f32 %v2489_v45, %v2432_v16  ;;  %v2316_v57 = vsel %vm2313_vm11, %v2315_v5, %v2311_v21  ;;  %v2375_v25 = vadd.f32 %v2288_v40, %v6862_v60  ;;  %v2467_v40 = vsel %vm7510_vm15, %v7474_v10, %v2463_v62  ;;  %v2290_v5 = vpop.f32.mrf.mxu1 }
 0x6de   :  { %v2319_v19 = vmul.f32 %v5504_v13, %v7483_v46  ;;  %vm2324_vm14 = vweird.f32 %v5504_v13  ;;  %v2471_v21 = vor.u32 1.1754944e-38, %v2470_v41  ;;  %v2373_v18 = vadd.f32 %v2274_v63, %v6887_v38 }
 0x6df   :  { %v2493_v45 = vadd.f32 %v2491_v12, %v341_v47  ;;  %v2377_v16 = vmul.f32 %v2375_v25, %v2316_v57  ;;  %vm2325_vm4 = vmor %vm2323_vm3, %vm2324_vm14  ;;  %v2376_v62 = vadd.f32 %v2290_v5, %v6862_v60  ;;  %vm2348_vm8 = vweird.f32 %v7496_v7 }
 0x6e0   :  { %v2320_v56 = vsub.f32 1.0, %v2319_v19  ;;  %v2472_v57 = vsel %vm2469_vm5, %v2471_v21, %v2467_v40 }
 0x6e1   :  { %v5506_v17 = vpop.eup %5505  ;;  %5509 = vtanh.f32 %v2493_v45  ;;  %v2379_v25 = vadd.f32 %v2377_v16, %v2373_v18  ;;  %v2497_v32 = vsub.f32 1.0, %v2472_v57  ;;  %v2501_v16 = vmul.f32 %v2472_v57, %v7368_v54 }
 0x6e2   :  { %v2321_v34 = vmul.f32 %v5504_v13, %v2320_v56  ;;  %v2342_v29 = vadd.f32 1.0, %v5506_v17  ;;  %v5508_v37 = vpop.eup %5507  ;;  %v2330_v56 = vor.u32 1.1754944e-38, %v2329_v55  ;;  %v2352_v55 = vand.u32 2147483647, %v7496_v7 }
 0x6e3   :  { %v2344_v12 = vmul.f32 %v5508_v37, %v7496_v7  ;;  %v2276_v17 = vpop.f32.mrf.mxu0  ;;  %vm2349_vm7 = vweird.f32 %v5508_v37 }
 0x6e4   :  { %v2322_v19 = vadd.f32 %v5504_v13, %v2321_v34  ;;  %5511 = vrcp.f32 %v2342_v29  ;;  %v2354_v34 = vand.u32 2147483648, %v7496_v7  ;;  %vm2350_vm9 = vmor %vm2348_vm8, %vm2349_vm7  ;;  %vm2353_vm10 = vcmp.eq.f32.partialorder %v2352_v55, 8.507059e+37 }
 0x6e5   :  { %v2345_v41 = vsub.f32 1.0, %v2344_v12  ;;  %5513 = vtanh.f32 %v2379_v25  ;;  %vm2363_vm12 = vweird.f32 %v2342_v29 }
 0x6e6   :  { %v2326_v47 = vsel %vm2325_vm4, %v5504_v13, %v2322_v19  ;;  %v2374_v13 = vadd.f32 %v2276_v17, %v6887_v38  ;;  %v2355_v19 = vor.u32 1.1754944e-38, %v2354_v34 }
 0x6e7   :  { %v2331_v10 = vsel %vm2328_vm6, %v2330_v56, %v2326_v47  ;;  %v5510_v63 = vpop.eup %5509  ;;  %v2346_v45 = vmul.f32 %v5508_v37, %v2345_v41  ;;  %v2367_v41 = vand.u32 2147483647, %v2342_v29 }
 0x6e8   :  { %v2378_v46 = vmul.f32 %v2376_v62, %v2331_v10  ;;  %v2499_v27 = vmul.f32 %v5510_v63, %v2497_v32  ;;  %v2369_v10 = vand.u32 2147483648, %v2342_v29 }
 0x6e9   :  { %v2347_v21 = vadd.f32 %v5508_v37, %v2346_v45  ;;  %vm2368_vm14 = vcmp.eq.f32.partialorder %v2367_v41, 8.507059e+37 }
 0x6ea   :  { %v5512_v52 = vpop.eup %5511  ;;  %v2380_v5 = vadd.f32 %v2378_v46, %v2374_v13  ;;  %v7526_v18 = vadd.f32 %v2501_v16, %v2499_v27  ;;  %v2370_v46 = vor.u32 1.1754944e-38, %v2369_v10 }
 0x6eb   :  { %v2359_v40 = vmul.f32 %v5512_v52, %v2342_v29  ;;  %v2351_v12 = vsel %vm2350_vm9, %v5508_v37, %v2347_v21  ;;  %vm2364_vm11 = vweird.f32 %v5512_v52  ;;  %v5514_v17 = vpop.eup %5513  ;;  %v9091_v29 = vld [vmem:[#allocation30_spill] sm:$0xff] }
 0x6ec   :  { %v2356_v47 = vsel %vm2353_vm10, %v2355_v19, %v2351_v12  ;;  %5515 = vtanh.f32 %v2380_v5  ;;  %vm2365_vm13 = vmor %vm2363_vm12, %vm2364_vm11 }
 0x6ed   :  { %v2360_v56 = vsub.f32 1.0, %v2359_v40  ;;  %v2383_v25 = vsub.f32 1.0, %v2356_v47  ;;  %v2387_v57 = vmul.f32 %v2356_v47, %v7375_v3  ;;  %v9092_v40 = vld [vmem:[#allocation25_spill] sm:$0xff] }
 0x6ee   :  { %v279_v21 = vadd.f32 %v9092_v40, %v8909_v14 }
 0x6ef   :  { %v2361_v62 = vmul.f32 %v5512_v52, %v2360_v56  ;;  %v2385_v54 = vmul.f32 %v5514_v17, %v2383_v25 }
 0x6f1   :  { %v2362_v7 = vadd.f32 %v5512_v52, %v2361_v62  ;;  %v7529_v34 = vadd.f32 %v2387_v57, %v2385_v54 }
 0x6f2   :  { %v5516_v45 = vpop.eup %5515 }
 0x6f3   :  { %v2366_v32 = vsel %vm2365_vm13, %v5512_v52, %v2362_v7  ;;  %2395 = vrot.lane.b32.xlu1 %v7529_v34, %s5725_s0  ;;  %2391 = vst.msk [vmem:[#allocation3 + $0x40] sm:$0xff] %vm481_vm1, %v7529_v34  ;;  %v214_v52 = vadd.f32 %v9091_v29, %v8912_v43 }
 0x6f4   :  { %v2371_v37 = vsel %vm2368_vm14, %v2370_v46, %v2366_v32 }
 0x6f5   :  { %v2384_v63 = vsub.f32 1.0, %v2371_v37  ;;  %v2388_v3 = vmul.f32 %v2371_v37, %v7382_v0  ;;  %v2410_v27 = vadd.f32 %v7470_v36, %v214_v52  ;;  %v2450_v0 = vadd.f32 %v7481_v33, %v279_v21 }
 0x6f7   :  { %v2386_v55 = vmul.f32 %v5516_v45, %v2384_v63  ;;  %v5096_v16 = vmul.f32 -1.442695, %v2410_v27  ;;  %v5098_v56 = vmul.f32 -1.442695, %v2450_v0  ;;  %v2490_v63 = vadd.f32 %v7476_v61, %v8915_v42 }
 0x6f9   :  { %v7536_v13 = vadd.f32 %v2388_v3, %v2386_v55  ;;  %5517 = vpow2.f32 %v5096_v16  ;;  %v9093_v3 = vld [vmem:[#allocation71_spill] sm:$0xff] }
 0x6fa   :  { %v344_v29 = vadd.f32 %v9093_v3, %v8916_v2  ;;  %v9120_v3 = vld [vmem:[#allocation27_spill] sm:$0xff] }
 0x6fb   :  { %2397 = vrot.lane.b32.xlu2 %v7536_v13, %s5725_s0  ;;  %2392 = vst.msk [vmem:[#allocation3 + $0x48] sm:$0xff] %vm481_vm1, %v7536_v13 }
 0x6ff   :  { %v5518_v5 = vpop.eup %5517 }
 0x700   :  { %v2418_v19 = vadd.f32 1.0, %v5518_v5 }
 0x702   :  { %5519 = vrcp.f32 %v2418_v19  ;;  %v2445_v54 = vand.u32 2147483648, %v2418_v19  ;;  %vm2439_vm3 = vweird.f32 %v2418_v19  ;;  %v2443_v57 = vand.u32 2147483647, %v2418_v19 }
 0x703   :  { %5521 = vpow2.f32 %v5098_v56 }
 0x704   :  { %v2446_v46 = vor.u32 1.1754944e-38, %v2445_v54  ;;  %vm2444_vm5 = vcmp.eq.f32.partialorder %v2443_v57, 8.507059e+37  ;;  %v9108_v54 = vld [vmem:[#allocation50_spill] sm:$0xff]  ;;  %v9109_v57 = vld [vmem:[#allocation51_spill] sm:$0xff] }
 0x708   :  { %v5520_v12 = vpop.eup %5519 }
 0x709   :  { %v5522_v47 = vpop.eup %5521  ;;  %v2435_v10 = vmul.f32 %v5520_v12, %v2418_v19  ;;  %vm2440_vm15 = vweird.f32 %v5520_v12 }
 0x70a   :  { %v2458_v25 = vadd.f32 1.0, %v5522_v47  ;;  %vm2441_vm4 = vmor %vm2439_vm3, %vm2440_vm15 }
 0x70b   :  { %v2436_v62 = vsub.f32 1.0, %v2435_v10 }
 0x70c   :  { %5523 = vrcp.f32 %v2458_v25  ;;  %v2485_v16 = vand.u32 2147483648, %v2458_v25  ;;  %vm2479_vm7 = vweird.f32 %v2458_v25  ;;  %v2483_v40 = vand.u32 2147483647, %v2458_v25 }
 0x70d   :  { %v2437_v41 = vmul.f32 %v5520_v12, %v2436_v62 }
 0x70e   :  { %v2486_v5 = vor.u32 1.1754944e-38, %v2485_v16  ;;  %vm2484_vm9 = vcmp.eq.f32.partialorder %v2483_v40, 8.507059e+37 }
 0x70f   :  { %v2438_v17 = vadd.f32 %v5520_v12, %v2437_v41 }
 0x711   :  { %v2442_v33 = vsel %vm2441_vm4, %v5520_v12, %v2438_v17  ;;  %v9107_v17 = vld [vmem:[#allocation49_spill] sm:$0xff] }
 0x712   :  { %v5524_v36 = vpop.eup %5523  ;;  %v2447_v37 = vsel %vm2444_vm5, %v2446_v46, %v2442_v33  ;;  %v9111_v33 = vld [vmem:[#allocation53_spill] sm:$0xff]  ;;  %v9113_v46 = vld [vmem:[#allocation56_spill] sm:$0xff] }
 0x713   :  { %v2475_v7 = vmul.f32 %v5524_v36, %v2458_v25  ;;  %v2492_v45 = vmul.f32 %v2490_v63, %v2447_v37  ;;  %vm2480_vm6 = vweird.f32 %v5524_v36  ;;  %v9117_v37 = vld [vmem:[#allocation62_spill] sm:$0xff] }
 0x714   :  { %vm2481_vm8 = vmor %vm2479_vm7, %vm2480_vm6 }
 0x715   :  { %v2476_v32 = vsub.f32 1.0, %v2475_v7  ;;  %v2494_v52 = vadd.f32 %v2492_v45, %v344_v29  ;;  %v9110_v7 = vld [vmem:[#allocation52_spill] sm:$0xff]  ;;  %v282_v29 = vadd.f32 %v9120_v3, %v8909_v14 }
 0x717   :  { %v2477_v55 = vmul.f32 %v5524_v36, %v2476_v32  ;;  %5525 = vtanh.f32 %v2494_v52  ;;  %v9115_v32 = vld [vmem:[#allocation59_spill] sm:$0xff] }
 0x719   :  { %v2478_v27 = vadd.f32 %v5524_v36, %v2477_v55 }
 0x71b   :  { %v2482_v21 = vsel %vm2481_vm8, %v5524_v36, %v2478_v27 }
 0x71c   :  { %v2487_v0 = vsel %vm2484_vm9, %v2486_v5, %v2482_v21 }
 0x71d   :  { %v5526_v19 = vpop.eup %5525  ;;  %v2498_v56 = vsub.f32 1.0, %v2487_v0  ;;  %v2502_v12 = vmul.f32 %v2487_v0, %v7402_v51  ;;  %v9106_v51 = vld [vmem:[#allocation47_spill] sm:$0xff] }
 0x71f   :  { %v2500_v61 = vmul.f32 %v5526_v19, %v2498_v56 }
 0x721   :  { %v7553_v47 = vadd.f32 %v2502_v12, %v2500_v61 }
 0x755   :  { %v2398_v10 = vpop.permute.xlu2 %2397 }
 0x756   :  { %2402 = vst.msk [vmem:[#allocation4 + $0x8] sm:$0xff] %vm492_vm2, %v2398_v10 }
 0x757   :  { %2506 = vst.msk [vmem:[#allocation4 + $0x8] sm:$0xff] %vm481_vm1, %v7553_v47 }
 0x75e   :  { %v2508_v41 = vld [vmem:[#allocation4 + $0x8] sm:$0xff] }
 0x765   :  { %v2396_v25 = vpop.permute.xlu1 %2395 }
 0x766   :  { %2401 = vst.msk [vmem:[#allocation4] sm:$0xff] %vm492_vm2, %v2396_v25 }
 0x767   :  { %2505 = vst.msk [vmem:[#allocation4] sm:$0xff] %vm481_vm1, %v7526_v18 }
 0x76e   :  { %v2507_v62 = vld [vmem:[#allocation4] sm:$0xff] }
 0x76f   :  { %v2509_v36 = vpack.c.bf16 %v2508_v41, %v2507_v62 }
 0x771   :  { %2518 = vmatmul.bf16.vlgmr.msra.gmra.mxu2 %v2509_v36  ;;  %2532 = vmatmul.bf16.vlgmr.msrb.gmra.mxu3 %v2509_v36 }
 0x772   :  { %2546 = vmatmul.bf16.vlgmr.msra.gmra.mxu0 %v2509_v36  ;;  %2560 = vmatmul.bf16.vlgmr.msra.gmra.mxu1 %v2509_v36 }
 0x773   :  { %2839 = vmatpush.bf16.msra.mxu2 %v5928_v22  ;;  %2853 = vmatpush.bf16.msrb.mxu3 %v6118_v4  ;;  %v9094_v22 = vld [vmem:[#allocation55_spill] sm:$0xff]  ;;  %v9099_v4 = vld [vmem:[#allocation18_spill] sm:$0xff] }
 0x774   :  { %2867 = vmatpush.bf16.msra.mxu0 %v6210_v59  ;;  %2881 = vmatpush.bf16.msra.mxu1 %v6400_v48 }
 0x777   :  { %2840 = vmatpush.bf16.msra.mxu2 %v5948_v28  ;;  %2854 = vmatpush.bf16.msrb.mxu3 %v6136_v11  ;;  %v9095_v28 = vld [vmem:[#allocation17_spill] sm:$0xff]  ;;  %v9100_v11 = vld [vmem:[#allocation20_spill] sm:$0xff] }
 0x778   :  { %2868 = vmatpush.bf16.msra.mxu0 %v6224_v1  ;;  %2882 = vmatpush.bf16.msra.mxu1 %v6430_v39 }
 0x77b   :  { %2841 = vmatpush.bf16.msra.mxu2 %v5973_v35  ;;  %2855 = vmatpush.bf16.msrb.mxu3 %v6147_v15  ;;  %v9096_v35 = vld [vmem:[#allocation19_spill] sm:$0xff]  ;;  %v9101_v15 = vld [vmem:[#allocation42_spill] sm:$0xff] }
 0x77c   :  { %2869 = vmatpush.bf16.msra.mxu0 %v6241_v8  ;;  %2883 = vmatpush.bf16.msra.mxu1 %v6495_v49 }
 0x77f   :  { %2842 = vmatpush.bf16.msra.mxu2 %v6050_v50  ;;  %2856 = vmatpush.bf16.msrb.mxu3 %v6160_v20  ;;  %v9097_v50 = vld [vmem:[#allocation46_spill] sm:$0xff]  ;;  %v9103_v20 = vld [vmem:[#allocation48_spill] sm:$0xff] }
 0x780   :  { %2870 = vmatpush.bf16.msra.mxu0 %v6289_v24  ;;  %2884 = vmatpush.bf16.msra.mxu1 %v6534_v23 }
 0x781   :  { %2574 = vmatmul.bf16.vlgmr.msrb.gmra.mxu2 %v2509_v36  ;;  %2588 = vmatmul.bf16.vlgmr.msra.gmra.mxu3 %v2509_v36 }
 0x782   :  { %2602 = vmatmul.bf16.vlgmr.msrb.gmra.mxu0 %v2509_v36 }
 0x783   :  { %2843 = vmatpush.bf16.msra.mxu2 %v6063_v53  ;;  %2857 = vmatpush.bf16.msrb.mxu3 %v6172_v26  ;;  %v9098_v53 = vld [vmem:[#allocation58_spill] sm:$0xff]  ;;  %v9104_v26 = vld [vmem:[#allocation61_spill] sm:$0xff] }
 0x784   :  { %2871 = vmatpush.bf16.msra.mxu0 %v6337_v44  ;;  %2885 = vmatpush.bf16.msra.mxu1 %v6583_v6 }
 0x787   :  { %2844 = vmatpush.bf16.msra.mxu2 %v6086_v58  ;;  %2858 = vmatpush.bf16.msrb.mxu3 %v6181_v30  ;;  %v9102_v58 = vld [vmem:[#allocation43_spill] sm:$0xff]  ;;  %v9105_v30 = vld [vmem:[#allocation45_spill] sm:$0xff] }
 0x788   :  { %2872 = vmatpush.bf16.msra.mxu0 %v8967_v31  ;;  %2886 = vmatpush.bf16.msra.mxu1 %v9094_v22 }
 0x78b   :  { %2845 = vmatpush.bf16.msra.mxu2 %v9095_v28  ;;  %2859 = vmatpush.bf16.msrb.mxu3 %v9096_v35 }
 0x78c   :  { %2873 = vmatpush.bf16.msra.mxu0 %v9097_v50  ;;  %2887 = vmatpush.bf16.msra.mxu1 %v9098_v53 }
 0x78f   :  { %2846 = vmatpush.bf16.msra.mxu2 %v9099_v4  ;;  %2860 = vmatpush.bf16.msrb.mxu3 %v9100_v11 }
 0x790   :  { %2874 = vmatpush.bf16.msra.mxu0 %v9103_v20  ;;  %2888 = vmatpush.bf16.msra.mxu1 %v9104_v26 }
 0x793   :  { %2895 = vmatpush.bf16.msrb.mxu2 %v9101_v15  ;;  %2909 = vmatpush.bf16.msra.mxu3 %v9102_v58 }
 0x794   :  { %3140 = vmatpush.bf16.msrb.mxu0 %v6210_v59  ;;  %v9112_v59 = vld [vmem:[#allocation54_spill] sm:$0xff] }
 0x797   :  { %2896 = vmatpush.bf16.msrb.mxu2 %v9105_v30  ;;  %2910 = vmatpush.bf16.msra.mxu3 %v9106_v51 }
 0x798   :  { %3141 = vmatpush.bf16.msrb.mxu0 %v6224_v1  ;;  %v9114_v1 = vld [vmem:[#allocation57_spill] sm:$0xff] }
 0x79b   :  { %2897 = vmatpush.bf16.msrb.mxu2 %v9107_v17  ;;  %2911 = vmatpush.bf16.msra.mxu3 %v9108_v54 }
 0x79c   :  { %3142 = vmatpush.bf16.msrb.mxu0 %v6241_v8  ;;  %v9116_v8 = vld [vmem:[#allocation60_spill] sm:$0xff] }
 0x79f   :  { %2898 = vmatpush.bf16.msrb.mxu2 %v9109_v57  ;;  %2912 = vmatpush.bf16.msra.mxu3 %v9110_v7 }
 0x7a0   :  { %3143 = vmatpush.bf16.msrb.mxu0 %v6289_v24  ;;  %v9118_v24 = vld [vmem:[#allocation63_spill] sm:$0xff] }
 0x7a3   :  { %2899 = vmatpush.bf16.msrb.mxu2 %v9111_v33  ;;  %2913 = vmatpush.bf16.msra.mxu3 %v9112_v59 }
 0x7a4   :  { %3144 = vmatpush.bf16.msrb.mxu0 %v6337_v44  ;;  %v9119_v44 = vld [vmem:[#allocation37_spill] sm:$0xff] }
 0x7a7   :  { %2900 = vmatpush.bf16.msrb.mxu2 %v9113_v46  ;;  %2914 = vmatpush.bf16.msra.mxu3 %v9114_v1 }
 0x7a8   :  { %3145 = vmatpush.bf16.msrb.mxu0 %v8967_v31  ;;  %v9121_v31 = vld [vmem:[#allocation32_spill] sm:$0xff] }
 0x7a9   :  { %v217_v52 = vadd.f32 %v9121_v31, %v8912_v43 }
 0x7ab   :  { %2901 = vmatpush.bf16.msrb.mxu2 %v9115_v32  ;;  %2915 = vmatpush.bf16.msra.mxu3 %v9116_v8 }
 0x7ac   :  { %3146 = vmatpush.bf16.msrb.mxu0 %v9097_v50 }
 0x7af   :  { %2902 = vmatpush.bf16.msrb.mxu2 %v9117_v37  ;;  %2916 = vmatpush.bf16.msra.mxu3 %v9118_v24 }
 0x7b0   :  { %3147 = vmatpush.bf16.msrb.mxu0 %v9103_v20 }
 0x7ef   :  { %v2561_v63 = vpop.f32.mrf.mxu1  ;;  %v2547_v62 = vpop.f32.mrf.mxu0 }
 0x7f0   :  { %v2608_v45 = vadd.f32 %v2561_v63, %v9119_v44 }
 0x7f2   :  { %v5099_v55 = vmul.f32 -1.442695, %v2608_v45 }
 0x7f4   :  { %5527 = vpow2.f32 %v5099_v55  ;;  %v2519_v27 = vpop.f32.mrf.mxu2  ;;  %v2533_v16 = vpop.f32.mrf.mxu3 }
 0x7f5   :  { %v2724_v40 = vadd.f32 %v2519_v27, %v217_v52  ;;  %v2764_v21 = vadd.f32 %v2533_v16, %v282_v29 }
 0x7f7   :  { %v5103_v5 = vmul.f32 -1.442695, %v2724_v40  ;;  %v5105_v0 = vmul.f32 -1.442695, %v2764_v21  ;;  %v2563_v19 = vpop.f32.mrf.mxu1  ;;  %v7632_v3 = vpop.f32.mrf.mxu0 }
 0x7f8   :  { %v2609_v56 = vadd.f32 %v2563_v19, %v9119_v44 }
 0x7f9   :  { %5529 = vpow2.f32 %v5103_v5 }
 0x7fa   :  { %v5528_v61 = vpop.eup %5527  ;;  %5531 = vpow2.f32 %v5105_v0  ;;  %v5100_v12 = vmul.f32 -1.442695, %v2609_v56 }
 0x7fb   :  { %v2616_v10 = vadd.f32 1.0, %v5528_v61 }
 0x7fc   :  { %5533 = vpow2.f32 %v5100_v12  ;;  %v7623_v25 = vpop.f32.mrf.mxu2  ;;  %v7640_v0 = vpop.f32.mrf.mxu3 }
 0x7fd   :  { %5535 = vrcp.f32 %v2616_v10  ;;  %v2627_v19 = vand.u32 2147483647, %v2616_v10  ;;  %vm2623_vm12 = vweird.f32 %v2616_v10 }
 0x7ff   :  { %v5530_v41 = vpop.eup %5529  ;;  %vm2628_vm3 = vcmp.eq.f32.partialorder %v2627_v19, 8.507059e+37 }
 0x800   :  { %v5532_v36 = vpop.eup %5531  ;;  %v2732_v28 = vadd.f32 1.0, %v5530_v41 }
 0x801   :  { %v7625_v35 = vadd.f32 1.0, %v5532_v36 }
 0x802   :  { %v5534_v50 = vpop.eup %5533  ;;  %5537 = vrcp.f32 %v2732_v28  ;;  %v2745_v56 = vand.u32 2147483648, %v2732_v28  ;;  %vm2739_vm13 = vweird.f32 %v2732_v28 }
 0x803   :  { %v5536_v4 = vpop.eup %5535  ;;  %5539 = vrcp.f32 %v7625_v35  ;;  %v7628_v11 = vadd.f32 1.0, %v5534_v50  ;;  %v2743_v50 = vand.u32 2147483647, %v2732_v28  ;;  %vm2779_vm8 = vweird.f32 %v7625_v35 }
 0x804   :  { %v2619_v20 = vmul.f32 %v5536_v4, %v2616_v10  ;;  %v2575_v63 = vpop.f32.mrf.mxu2  ;;  %vm2624_vm10 = vweird.f32 %v5536_v4  ;;  %v2746_v24 = vor.u32 1.1754944e-38, %v2745_v56 }
 0x805   :  { %5541 = vrcp.f32 %v7628_v11  ;;  %v2648_v45 = vadd.f32 %v2575_v63, %v9085_v9  ;;  %vm7645_vm14 = vmor %vm2623_vm12, %vm2624_vm10  ;;  %vm2744_vm4 = vcmp.eq.f32.partialorder %v2743_v50, 8.507059e+37  ;;  %vm2638_vm7 = vweird.f32 %v7628_v11 }
 0x806   :  { %v2620_v55 = vsub.f32 1.0, %v2619_v20  ;;  %v2629_v20 = vand.u32 2147483648, %v2616_v10 }
 0x807   :  { %v5101_v29 = vmul.f32 -1.442695, %v2648_v45 }
 0x808   :  { %v5538_v31 = vpop.eup %5537  ;;  %v2621_v52 = vmul.f32 %v5536_v4, %v2620_v55 }
 0x809   :  { %v7634_v27 = vpop.eup %5539  ;;  %v2735_v16 = vmul.f32 %v5538_v31, %v2732_v28  ;;  %5543 = vpow2.f32 %v5101_v29  ;;  %vm2740_vm11 = vweird.f32 %v5538_v31  ;;  %v2804_v29 = vadd.f32 %v2547_v62, %v8915_v42 }
 0x80a   :  { %v2775_v40 = vmul.f32 %v7634_v27, %v7625_v35  ;;  %v2622_v61 = vadd.f32 %v5536_v4, %v2621_v52  ;;  %vm2741_vm15 = vmor %vm2739_vm13, %vm2740_vm11  ;;  %v2630_v62 = vor.u32 1.1754944e-38, %v2629_v20  ;;  %vm2780_vm6 = vweird.f32 %v7634_v27 }
 0x80b   :  { %v7638_v21 = vpop.eup %5541  ;;  %v2736_v5 = vsub.f32 1.0, %v2735_v16  ;;  %vm7676_vm10 = vmor %vm2779_vm8, %vm2780_vm6 }
 0x80c   :  { %v2634_v12 = vmul.f32 %v7638_v21, %v7628_v11  ;;  %v2577_v41 = vpop.f32.mrf.mxu2  ;;  %v2776_v63 = vsub.f32 1.0, %v2775_v40  ;;  %vm2639_vm5 = vweird.f32 %v7638_v21 }
 0x80d   :  { %v2737_v36 = vmul.f32 %v5538_v31, %v2736_v5  ;;  %v2649_v52 = vadd.f32 %v2577_v41, %v9085_v9  ;;  %v2626_v5 = vsel %vm7645_vm14, %v5536_v4, %v2622_v61  ;;  %v9124_v4 = vld [vmem:[#allocation73_spill] sm:$0xff]  ;;  %v2589_v61 = vpop.f32.mrf.mxu3  ;;  %vm7670_vm9 = vmor %vm2638_vm7, %vm2639_vm5 }
 0x80e   :  { %v2635_v45 = vsub.f32 1.0, %v2634_v12  ;;  %v2603_v12 = vpop.f32.mrf.mxu0  ;;  %v2777_v37 = vmul.f32 %v7634_v27, %v2776_v63  ;;  %v2631_v56 = vsel %vm2628_vm3, %v2630_v62, %v2626_v5  ;;  %v347_v19 = vadd.f32 %v9124_v4, %v8916_v2 }
 0x80f   :  { %v5544_v55 = vpop.eup %5543  ;;  %v2738_v16 = vadd.f32 %v5538_v31, %v2737_v36  ;;  %v5102_v36 = vmul.f32 -1.442695, %v2649_v52  ;;  %v2690_v44 = vadd.f32 %v2603_v12, %v6862_v60  ;;  %v2642_v63 = vand.u32 2147483647, %v7628_v11 }
 0x810   :  { %v7652_v40 = vadd.f32 1.0, %v5544_v55  ;;  %v2636_v41 = vmul.f32 %v7638_v21, %v2635_v45  ;;  %v2778_v20 = vadd.f32 %v7634_v27, %v2777_v37  ;;  %v2644_v45 = vand.u32 2147483648, %v7628_v11 }
 0x811   :  { %v2742_v10 = vsel %vm2741_vm15, %v5538_v31, %v2738_v16  ;;  %v2785_v31 = vand.u32 2147483648, %v7625_v35  ;;  %v2688_v16 = vadd.f32 %v2589_v61, %v6887_v38  ;;  %v2783_v37 = vand.u32 2147483647, %v7625_v35 }
 0x812   :  { %v2747_v28 = vsel %vm2744_vm4, %v2746_v24, %v2742_v10  ;;  %5545 = vrcp.f32 %v7652_v40  ;;  %v2692_v24 = vmul.f32 %v2690_v44, %v2631_v56  ;;  %v2637_v50 = vadd.f32 %v7638_v21, %v2636_v41 }
 0x813   :  { %v2806_v9 = vmul.f32 %v2804_v29, %v2747_v28  ;;  %5547 = vpow2.f32 %v5102_v36  ;;  %v2786_v10 = vor.u32 1.1754944e-38, %v2785_v31  ;;  %v2782_v28 = vsel %vm7676_vm10, %v7634_v27, %v2778_v20 }
 0x814   :  { %v2641_v11 = vsel %vm7670_vm9, %v7638_v21, %v2637_v50  ;;  %vm2643_vm11 = vcmp.eq.f32.partialorder %v2642_v63, 8.507059e+37  ;;  %v2645_v56 = vor.u32 1.1754944e-38, %v2644_v45  ;;  %v2667_v44 = vand.u32 2147483647, %v7652_v40 }
 0x815   :  { %v2808_v55 = vadd.f32 %v2806_v9, %v347_v19  ;;  %v2694_v9 = vadd.f32 %v2692_v24, %v2688_v16  ;;  %v2669_v4 = vand.u32 2147483648, %v7652_v40  ;;  %vm2784_vm12 = vcmp.eq.f32.partialorder %v2783_v37, 8.507059e+37  ;;  %v2591_v24 = vpop.f32.mrf.mxu3 }
 0x816   :  { %v2605_v35 = vpop.f32.mrf.mxu0  ;;  %v2646_v19 = vsel %vm2643_vm11, %v2645_v56, %v2641_v11  ;;  %v2787_v21 = vsel %vm2784_vm12, %v2786_v10, %v2782_v28  ;;  %vm2663_vm14 = vweird.f32 %v7652_v40  ;;  %vm2668_vm3 = vcmp.eq.f32.partialorder %v2667_v44, 8.507059e+37 }
 0x817   :  { %5549 = vtanh.f32 %v2808_v55  ;;  %v2691_v61 = vadd.f32 %v2605_v35, %v6862_v60  ;;  %v2670_v20 = vor.u32 1.1754944e-38, %v2669_v4  ;;  %v2812_v63 = vsub.f32 1.0, %v2787_v21 }
 0x818   :  { %v5546_v29 = vpop.eup %5545  ;;  %v2689_v52 = vadd.f32 %v2591_v24, %v6887_v38  ;;  %v2816_v10 = vmul.f32 %v2787_v21, %v7526_v18 }
 0x819   :  { %v5548_v5 = vpop.eup %5547  ;;  %v2659_v12 = vmul.f32 %v5546_v29, %v7652_v40  ;;  %vm2664_vm13 = vweird.f32 %v5546_v29  ;;  %v2693_v50 = vmul.f32 %v2691_v61, %v2646_v19 }
 0x81a   :  { %v2657_v36 = vadd.f32 1.0, %v5548_v5  ;;  %vm2665_vm15 = vmor %vm2663_vm14, %vm2664_vm13 }
 0x81b   :  { %v2660_v41 = vsub.f32 1.0, %v2659_v12  ;;  %v2695_v11 = vadd.f32 %v2693_v50, %v2689_v52 }
 0x81c   :  { %5551 = vrcp.f32 %v2657_v36  ;;  %v2684_v56 = vand.u32 2147483648, %v2657_v36  ;;  %v2682_v4 = vand.u32 2147483647, %v2657_v36  ;;  %vm2678_vm5 = vweird.f32 %v2657_v36 }
 0x81d   :  { %v2661_v31 = vmul.f32 %v5546_v29, %v2660_v41  ;;  %5553 = vtanh.f32 %v2694_v9  ;;  %v5550_v45 = vpop.eup %5549 }
 0x81e   :  { %v2814_v5 = vmul.f32 %v5550_v45, %v2812_v63  ;;  %5555 = vtanh.f32 %v2695_v11  ;;  %v2685_v19 = vor.u32 1.1754944e-38, %v2684_v56  ;;  %vm2683_vm7 = vcmp.eq.f32.partialorder %v2682_v4, 8.507059e+37 }
 0x81f   :  { %v2662_v27 = vadd.f32 %v5546_v29, %v2661_v31 }
 0x820   :  { %v7692_v28 = vadd.f32 %v2816_v10, %v2814_v5 }
 0x821   :  { %v2666_v55 = vsel %vm2665_vm15, %v5546_v29, %v2662_v27 }
 0x822   :  { %v5552_v16 = vpop.eup %5551  ;;  %v2671_v37 = vsel %vm2668_vm3, %v2670_v20, %v2666_v55  ;;  %v9130_v55 = vld [vmem:[#allocation29_spill] sm:$0xff] }
 0x823   :  { %v2674_v12 = vmul.f32 %v5552_v16, %v2657_v36  ;;  %v2698_v62 = vsub.f32 1.0, %v2671_v37  ;;  %v5554_v9 = vpop.eup %5553  ;;  %v2702_v35 = vmul.f32 %v2671_v37, %v7529_v34  ;;  %vm2679_vm4 = vweird.f32 %v5552_v16  ;;  %v9129_v36 = vld [vmem:[#allocation35_spill] sm:$0xff] }
 0x824   :  { %vm2680_vm6 = vmor %vm2678_vm5, %vm2679_vm4  ;;  %v5556_v61 = vpop.eup %5555  ;;  %v220_v20 = vadd.f32 %v9129_v36, %v8912_v43 }
 0x825   :  { %v2675_v40 = vsub.f32 1.0, %v2674_v12  ;;  %v2700_v41 = vmul.f32 %v5554_v9, %v2698_v62 }
 0x826   :  { %v2725_v63 = vadd.f32 %v7623_v25, %v220_v20 }
 0x827   :  { %v7695_v29 = vadd.f32 %v2702_v35, %v2700_v41  ;;  %v2676_v44 = vmul.f32 %v5552_v16, %v2675_v40 }
 0x828   :  { %v5104_v45 = vmul.f32 -1.442695, %v2725_v63 }
 0x829   :  { %2710 = vrot.lane.b32.xlu0 %v7695_v29, %s5725_s0  ;;  %2706 = vst.msk [vmem:[#allocation3 + $0x50] sm:$0xff] %vm481_vm1, %v7695_v29  ;;  %v2677_v18 = vadd.f32 %v5552_v16, %v2676_v44 }
 0x82a   :  { %5557 = vpow2.f32 %v5104_v45 }
 0x82b   :  { %v2681_v31 = vsel %vm2680_vm6, %v5552_v16, %v2677_v18  ;;  %v285_v16 = vadd.f32 %v9130_v55, %v8909_v14 }
 0x82c   :  { %v2686_v34 = vsel %vm2683_vm7, %v2685_v19, %v2681_v31  ;;  %v2805_v31 = vadd.f32 %v7632_v3, %v8915_v42 }
 0x82d   :  { %v2699_v21 = vsub.f32 1.0, %v2686_v34  ;;  %v2703_v27 = vmul.f32 %v2686_v34, %v7536_v13  ;;  %v2765_v13 = vadd.f32 %v7640_v0, %v285_v16 }
 0x82f   :  { %v2701_v24 = vmul.f32 %v5556_v61, %v2699_v21  ;;  %v5106_v5 = vmul.f32 -1.442695, %v2765_v13  ;;  %v9131_v61 = vld [vmem:[#allocation76_spill] sm:$0xff] }
 0x830   :  { %v5558_v52 = vpop.eup %5557 }
 0x831   :  { %v7702_v50 = vadd.f32 %v2703_v27, %v2701_v24  ;;  %v2733_v37 = vadd.f32 1.0, %v5558_v52  ;;  %v350_v24 = vadd.f32 %v9131_v61, %v8916_v2  ;;  %v9139_v61 = vld [vmem:[#allocation34_spill] sm:$0xff] }
 0x833   :  { %2712 = vrot.lane.b32.xlu1 %v7702_v50, %s5725_s0  ;;  %2707 = vst.msk [vmem:[#allocation3 + $0x58] sm:$0xff] %vm481_vm1, %v7702_v50  ;;  %5559 = vrcp.f32 %v2733_v37  ;;  %v2760_v35 = vand.u32 2147483648, %v2733_v37  ;;  %vm2754_vm9 = vweird.f32 %v2733_v37  ;;  %v2758_v56 = vand.u32 2147483647, %v2733_v37 }
 0x834   :  { %5561 = vpow2.f32 %v5106_v5 }
 0x835   :  { %v2761_v4 = vor.u32 1.1754944e-38, %v2760_v35  ;;  %vm2759_vm11 = vcmp.eq.f32.partialorder %v2758_v56, 8.507059e+37 }
 0x839   :  { %v5560_v10 = vpop.eup %5559 }
 0x83a   :  { %v5562_v12 = vpop.eup %5561  ;;  %v2750_v62 = vmul.f32 %v5560_v10, %v2733_v37  ;;  %vm2755_vm8 = vweird.f32 %v5560_v10 }
 0x83b   :  { %v2773_v9 = vadd.f32 1.0, %v5562_v12  ;;  %vm2756_vm10 = vmor %vm2754_vm9, %vm2755_vm8 }
 0x83c   :  { %v2751_v11 = vsub.f32 1.0, %v2750_v62 }
 0x83d   :  { %5563 = vrcp.f32 %v2773_v9  ;;  %v2800_v20 = vand.u32 2147483648, %v2773_v9  ;;  %vm2794_vm13 = vweird.f32 %v2773_v9  ;;  %v2798_v63 = vand.u32 2147483647, %v2773_v9 }
 0x83e   :  { %v2752_v40 = vmul.f32 %v5560_v10, %v2751_v11 }
 0x83f   :  { %v2801_v55 = vor.u32 1.1754944e-38, %v2800_v20  ;;  %vm2799_vm15 = vcmp.eq.f32.partialorder %v2798_v63, 8.507059e+37  ;;  %v9140_v63 = vld [vmem:[#allocation79_spill] sm:$0xff] }
 0x840   :  { %v2753_v41 = vadd.f32 %v5560_v10, %v2752_v40 }
 0x842   :  { %v2757_v0 = vsel %vm2756_vm10, %v5560_v10, %v2753_v41 }
 0x843   :  { %v5564_v25 = vpop.eup %5563  ;;  %v2762_v18 = vsel %vm2759_vm11, %v2761_v4, %v2757_v0 }
 0x844   :  { %v2790_v44 = vmul.f32 %v5564_v25, %v2773_v9  ;;  %v2807_v34 = vmul.f32 %v2805_v31, %v2762_v18  ;;  %vm2795_vm12 = vweird.f32 %v5564_v25 }
 0x845   :  { %vm2796_vm14 = vmor %vm2794_vm13, %vm2795_vm12 }
 0x846   :  { %v2791_v19 = vsub.f32 1.0, %v2790_v44  ;;  %v2809_v27 = vadd.f32 %v2807_v34, %v350_v24  ;;  %v9138_v44 = vld [vmem:[#allocation33_spill] sm:$0xff] }
 0x847   :  { %v291_v0 = vadd.f32 %v9138_v44, %v8909_v14 }
 0x848   :  { %v2792_v21 = vmul.f32 %v5564_v25, %v2791_v19  ;;  %5565 = vtanh.f32 %v2809_v27 }
 0x84a   :  { %v2793_v36 = vadd.f32 %v5564_v25, %v2792_v21 }
 0x84c   :  { %v2797_v45 = vsel %vm2796_vm14, %v5564_v25, %v2793_v36 }
 0x84d   :  { %v2802_v3 = vsel %vm2799_vm15, %v2801_v55, %v2797_v45  ;;  %v7774_v45 = vadd.f32 %v9140_v63, %v8916_v2  ;;  %v9141_v55 = vld [vmem:[#allocation82_spill] sm:$0xff] }
 0x84e   :  { %v5566_v52 = vpop.eup %5565  ;;  %v2813_v13 = vsub.f32 1.0, %v2802_v3  ;;  %v2817_v5 = vmul.f32 %v2802_v3, %v7553_v47 }
 0x850   :  { %v2815_v37 = vmul.f32 %v5566_v52, %v2813_v13 }
 0x852   :  { %v7722_v10 = vadd.f32 %v2817_v5, %v2815_v37 }
 0x89b   :  { %v2711_v16 = vpop.permute.xlu0 %2710 }
 0x89c   :  { %2716 = vst.msk [vmem:[#allocation4] sm:$0xff] %vm492_vm2, %v2711_v16  ;;  %v7778_v16 = vadd.f32 %v9141_v55, %v8916_v2 }
 0x89d   :  { %2820 = vst.msk [vmem:[#allocation4] sm:$0xff] %vm481_vm1, %v7692_v28 }
 0x8a4   :  { %v2822_v62 = vld [vmem:[#allocation4] sm:$0xff] }
 0x8a5   :  { %v2713_v12 = vpop.permute.xlu1 %2712 }
 0x8a6   :  { %2717 = vst.msk [vmem:[#allocation4 + $0x8] sm:$0xff] %vm492_vm2, %v2713_v12 }
 0x8a7   :  { %2821 = vst.msk [vmem:[#allocation4 + $0x8] sm:$0xff] %vm481_vm1, %v7722_v10 }
 0x8ae   :  { %v2823_v9 = vld [vmem:[#allocation4 + $0x8] sm:$0xff] }
 0x8af   :  { %v2824_v11 = vpack.c.bf16 %v2823_v9, %v2822_v62 }
 0x8b1   :  { %2833 = vmatmul.bf16.vlgmr.msrb.gmra.mxu1 %v2824_v11  ;;  %2847 = vmatmul.bf16.vlgmr.msra.gmra.mxu2 %v2824_v11 }
 0x8b2   :  { %2861 = vmatmul.bf16.vlgmr.msrb.gmra.mxu3 %v2824_v11  ;;  %2875 = vmatmul.bf16.vlgmr.msra.gmra.mxu0 %v2824_v11 }
 0x8b3   :  { %3154 = vmatpush.bf16.msrb.mxu1 %v6400_v48  ;;  %3168 = vmatpush.bf16.msra.mxu2 %v9101_v15  ;;  %v9132_v48 = vld [vmem:[#allocation62_spill] sm:$0xff]  ;;  %v9135_v15 = vld [vmem:[#allocation37_spill] sm:$0xff] }
 0x8b4   :  { %3182 = vmatpush.bf16.msrb.mxu3 %v9102_v58 }
 0x8b7   :  { %3155 = vmatpush.bf16.msrb.mxu1 %v6430_v39  ;;  %3169 = vmatpush.bf16.msra.mxu2 %v9105_v30  ;;  %v9134_v39 = vld [vmem:[#allocation36_spill] sm:$0xff] }
 0x8b8   :  { %3183 = vmatpush.bf16.msrb.mxu3 %v9106_v51  ;;  %v9136_v51 = vld [vmem:[#allocation31_spill] sm:$0xff] }
 0x8bb   :  { %3156 = vmatpush.bf16.msrb.mxu1 %v6495_v49  ;;  %3170 = vmatpush.bf16.msra.mxu2 %v9107_v17  ;;  %v9133_v49 = vld [vmem:[#allocation63_spill] sm:$0xff]  ;;  %v288_v17 = vadd.f32 %v9136_v51, %v8909_v14 }
 0x8bc   :  { %3184 = vmatpush.bf16.msrb.mxu3 %v9108_v54  ;;  %v9137_v54 = vld [vmem:[#allocation39_spill] sm:$0xff] }
 0x8bf   :  { %3157 = vmatpush.bf16.msrb.mxu1 %v6534_v23  ;;  %3171 = vmatpush.bf16.msra.mxu2 %v9109_v57  ;;  %v226_v57 = vadd.f32 %v9137_v54, %v8912_v43 }
 0x8c0   :  { %3185 = vmatpush.bf16.msrb.mxu3 %v9110_v7 }
 0x8c1   :  { %2889 = vmatmul.bf16.vlgmr.msra.gmra.mxu1 %v2824_v11  ;;  %2903 = vmatmul.bf16.vlgmr.msrb.gmra.mxu2 %v2824_v11 }
 0x8c2   :  { %2917 = vmatmul.bf16.vlgmr.msra.gmra.mxu3 %v2824_v11 }
 0x8c3   :  { %3158 = vmatpush.bf16.msrb.mxu1 %v6583_v6  ;;  %3172 = vmatpush.bf16.msra.mxu2 %v9111_v33  ;;  %v223_v6 = vadd.f32 %v9134_v39, %v8912_v43 }
 0x8c4   :  { %3186 = vmatpush.bf16.msrb.mxu3 %v9112_v59 }
 0x8c7   :  { %3159 = vmatpush.bf16.msrb.mxu1 %v9094_v22  ;;  %3173 = vmatpush.bf16.msra.mxu2 %v9113_v46 }
 0x8c8   :  { %3187 = vmatpush.bf16.msrb.mxu3 %v9114_v1 }
 0x8cb   :  { %3160 = vmatpush.bf16.msrb.mxu1 %v9098_v53  ;;  %3174 = vmatpush.bf16.msra.mxu2 %v9115_v32 }
 0x8cc   :  { %3188 = vmatpush.bf16.msrb.mxu3 %v9116_v8 }
 0x8cf   :  { %3161 = vmatpush.bf16.msrb.mxu1 %v9104_v26  ;;  %3175 = vmatpush.bf16.msra.mxu2 %v9132_v48 }
 0x8d0   :  { %3189 = vmatpush.bf16.msrb.mxu3 %v9133_v49 }
 0x92e   :  { %v2834_v23 = vpop.f32.mrf.mxu1 }
 0x92f   :  { %v3039_v47 = vadd.f32 %v2834_v23, %v223_v6  ;;  %v2876_v22 = vpop.f32.mrf.mxu0 }
 0x930   :  { %v2923_v58 = vadd.f32 %v2876_v22, %v9135_v15 }
 0x931   :  { %v5111_v30 = vmul.f32 -1.442695, %v3039_v47 }
 0x932   :  { %v5107_v53 = vmul.f32 -1.442695, %v2923_v58 }
 0x933   :  { %5567 = vpow2.f32 %v5111_v30 }
 0x934   :  { %5569 = vpow2.f32 %v5107_v53  ;;  %v2848_v26 = vpop.f32.mrf.mxu2 }
 0x935   :  { %v3079_v7 = vadd.f32 %v2848_v26, %v288_v17  ;;  %v2862_v33 = vpop.f32.mrf.mxu3 }
 0x936   :  { %v2836_v59 = vpop.f32.mrf.mxu1  ;;  %v3119_v13 = vadd.f32 %v2862_v33, %v8915_v42 }
 0x937   :  { %v5113_v46 = vmul.f32 -1.442695, %v3079_v7  ;;  %v3040_v1 = vadd.f32 %v2836_v59, %v226_v57  ;;  %v2878_v32 = vpop.f32.mrf.mxu0 }
 0x938   :  { %v2924_v8 = vadd.f32 %v2878_v32, %v9135_v15 }
 0x939   :  { %v5568_v40 = vpop.eup %5567  ;;  %5571 = vpow2.f32 %v5113_v46  ;;  %v5112_v25 = vmul.f32 -1.442695, %v3040_v1 }
 0x93a   :  { %v5570_v41 = vpop.eup %5569  ;;  %v7759_v35 = vadd.f32 1.0, %v5568_v40  ;;  %v5108_v56 = vmul.f32 -1.442695, %v2924_v8 }
 0x93b   :  { %v7763_v4 = vadd.f32 1.0, %v5570_v41  ;;  %5573 = vpow2.f32 %v5112_v25 }
 0x93c   :  { %5575 = vrcp.f32 %v7759_v35  ;;  %v2850_v43 = vpop.f32.mrf.mxu2  ;;  %v3058_v14 = vand.u32 2147483647, %v7759_v35  ;;  %v3060_v36 = vand.u32 2147483648, %v7759_v35  ;;  %vm3054_vm3 = vweird.f32 %v7759_v35 }
 0x93d   :  { %5577 = vrcp.f32 %v7763_v4  ;;  %v3080_v18 = vadd.f32 %v2850_v43, %v291_v0  ;;  %v2864_v19 = vpop.f32.mrf.mxu3  ;;  %v2942_v37 = vand.u32 2147483647, %v7763_v4  ;;  %v2944_v5 = vand.u32 2147483648, %v7763_v4 }
 0x93e   :  { %5579 = vpow2.f32 %v5108_v56  ;;  %v2890_v31 = vpop.f32.mrf.mxu1  ;;  %vm7791_vm4 = vcmp.eq.f32.partialorder %v3058_v14, 8.507059e+37  ;;  %v3061_v49 = vor.u32 1.1754944e-38, %v3060_v36  ;;  %vm2938_vm5 = vweird.f32 %v7763_v4 }
 0x93f   :  { %v5572_v34 = vpop.eup %5571  ;;  %v5114_v21 = vmul.f32 -1.442695, %v3080_v18  ;;  %v2963_v24 = vadd.f32 %v2890_v31, %v9139_v61  ;;  %v7802_v47 = vadd.f32 %v2864_v19, %v8915_v42  ;;  %vm7805_vm6 = vcmp.eq.f32.partialorder %v2942_v37, 8.507059e+37 }
 0x940   :  { %v7768_v27 = vadd.f32 1.0, %v5572_v34  ;;  %v2945_v53 = vor.u32 1.1754944e-38, %v2944_v5 }
 0x941   :  { %v5574_v20 = vpop.eup %5573  ;;  %5581 = vpow2.f32 %v5114_v21  ;;  %v5109_v3 = vmul.f32 -1.442695, %v2963_v24 }
 0x942   :  { %v5576_v52 = vpop.eup %5575  ;;  %5583 = vrcp.f32 %v7768_v27  ;;  %v7788_v9 = vadd.f32 1.0, %v5574_v20  ;;  %v3100_v11 = vand.u32 2147483648, %v7768_v27  ;;  %v3098_v22 = vand.u32 2147483647, %v7768_v27 }
 0x943   :  { %v7784_v12 = vpop.eup %5577  ;;  %v3050_v62 = vmul.f32 %v5576_v52, %v7759_v35  ;;  %5585 = vpow2.f32 %v5109_v3  ;;  %vm3094_vm7 = vweird.f32 %v7768_v27  ;;  %vm3055_vm8 = vweird.f32 %v5576_v52 }
 0x944   :  { %v5580_v2 = vpop.eup %5579  ;;  %v2934_v39 = vmul.f32 %v7784_v12, %v7763_v4  ;;  %5587 = vrcp.f32 %v7788_v9  ;;  %v2904_v54 = vpop.f32.mrf.mxu2  ;;  %v3101_v33 = vor.u32 1.1754944e-38, %v3100_v11  ;;  %v3073_v46 = vand.u32 2147483647, %v7788_v9  ;;  %vm3056_vm11 = vmor %vm3054_vm3, %vm3055_vm8 }
 0x945   :  { %v3051_v6 = vsub.f32 1.0, %v3050_v62  ;;  %v7799_v23 = vadd.f32 1.0, %v5580_v2  ;;  %v2918_v57 = vpop.f32.mrf.mxu3  ;;  %v3075_v25 = vand.u32 2147483648, %v7788_v9  ;;  %vm2939_vm9 = vweird.f32 %v7784_v12 }
 0x946   :  { %v2935_v58 = vsub.f32 1.0, %v2934_v39  ;;  %v2892_v51 = vpop.f32.mrf.mxu1  ;;  %vm7819_vm10 = vcmp.eq.f32.partialorder %v3098_v22, 8.507059e+37  ;;  %vm3069_vm12 = vweird.f32 %v7788_v9  ;;  %v3003_v56 = vadd.f32 %v2904_v54, %v6887_v38  ;;  %vm2940_vm15 = vmor %vm2938_vm5, %vm2939_vm9 }
 0x947   :  { %v5582_v17 = vpop.eup %5581  ;;  %v3052_v26 = vmul.f32 %v5576_v52, %v3051_v6  ;;  %5589 = vrcp.f32 %v7799_v23  ;;  %v2964_v42 = vadd.f32 %v2892_v51, %v9139_v61  ;;  %v3005_v44 = vadd.f32 %v2918_v57, %v6862_v60 }
 0x948   :  { %v5584_v7 = vpop.eup %5583  ;;  %v7812_v59 = vadd.f32 1.0, %v5582_v17  ;;  %v2936_v1 = vmul.f32 %v7784_v12, %v2935_v58  ;;  %vm7837_vm13 = vcmp.eq.f32.partialorder %v3073_v46, 8.507059e+37  ;;  %v3076_v3 = vor.u32 1.1754944e-38, %v3075_v25 }
 0x949   :  { %v5586_v32 = vpop.eup %5585  ;;  %v3090_v8 = vmul.f32 %v5584_v7, %v7768_v27  ;;  %v3053_v40 = vadd.f32 %v5576_v52, %v3052_v26  ;;  %v5110_v0 = vmul.f32 -1.442695, %v2964_v42  ;;  %vm3095_vm14 = vweird.f32 %v5584_v7 }
 0x94a   :  { %5591 = vrcp.f32 %v7812_v59  ;;  %v5588_v43 = vpop.eup %5587  ;;  %v7830_v31 = vadd.f32 1.0, %v5586_v32  ;;  %v2937_v34 = vadd.f32 %v7784_v12, %v2936_v1  ;;  %v3115_v21 = vand.u32 2147483648, %v7812_v59 }
 0x94b   :  { %v3091_v18 = vsub.f32 1.0, %v3090_v8  ;;  %v3057_v19 = vsel %vm3056_vm11, %v5576_v52, %v3053_v40  ;;  %v3065_v24 = vmul.f32 %v5588_v43, %v7788_v9  ;;  %vm3109_vm3 = vweird.f32 %v7812_v59 }
 0x94c   :  { %v3062_v35 = vsel %vm7791_vm4, %v3061_v49, %v3057_v19  ;;  %5593 = vrcp.f32 %v7830_v31  ;;  %v2941_v52 = vsel %vm2940_vm15, %v7784_v12, %v2937_v34  ;;  %vm3096_vm4 = vmor %vm3094_vm7, %vm3095_vm14  ;;  %v3113_v4 = vand.u32 2147483647, %v7812_v59  ;;  %v2906_v34 = vpop.f32.mrf.mxu2 }
 0x94d   :  { %v7841_v36 = vpop.eup %5589  ;;  %v3092_v20 = vmul.f32 %v5584_v7, %v3091_v18  ;;  %v3121_v63 = vmul.f32 %v3119_v13, %v3062_v35  ;;  %v3066_v55 = vsub.f32 1.0, %v3065_v24  ;;  %5595 = vpow2.f32 %v5110_v0  ;;  %v2920_v32 = vpop.f32.mrf.mxu3 }
 0x94e   :  { %v2946_v13 = vsel %vm7805_vm6, %v2945_v53, %v2941_v52  ;;  %v2949_v62 = vmul.f32 %v7841_v36, %v7799_v23  ;;  %v3116_v11 = vor.u32 1.1754944e-38, %v3115_v21  ;;  %vm3070_vm5 = vweird.f32 %v5588_v43 }
 0x94f   :  { %v3093_v37 = vadd.f32 %v5584_v7, %v3092_v20  ;;  %v3123_v5 = vadd.f32 %v3121_v63, %v7774_v45  ;;  %v3067_v12 = vmul.f32 %v5588_v43, %v3066_v55  ;;  %v3007_v49 = vmul.f32 %v3005_v44, %v2946_v13  ;;  %vm3071_vm7 = vmor %vm3069_vm12, %vm3070_vm5 }
 0x950   :  { %v5592_v2 = vpop.eup %5591  ;;  %v2950_v6 = vsub.f32 1.0, %v2949_v62  ;;  %vm2953_vm6 = vweird.f32 %v7799_v23  ;;  %vm2954_vm8 = vweird.f32 %v7841_v36  ;;  %v2957_v30 = vand.u32 2147483647, %v7799_v23 }
 0x951   :  { %v3097_v48 = vsel %vm3096_vm4, %v5584_v7, %v3093_v37  ;;  %5597 = vtanh.f32 %v3123_v5  ;;  %v3105_v45 = vmul.f32 %v5592_v2, %v7812_v59  ;;  %v3068_v39 = vadd.f32 %v5588_v43, %v3067_v12 }
 0x952   :  { %v5594_v22 = vpop.eup %5593  ;;  %v3102_v27 = vsel %vm7819_vm10, %v3101_v33, %v3097_v48  ;;  %v2959_v53 = vand.u32 2147483648, %v7799_v23  ;;  %vm3110_vm9 = vweird.f32 %v5592_v2  ;;  %v2951_v54 = vmul.f32 %v7841_v36, %v2950_v6  ;;  %vm2955_vm10 = vmor %vm2953_vm6, %vm2954_vm8 }
 0x953   :  { %v3106_v58 = vsub.f32 1.0, %v3105_v45  ;;  %v5596_v51 = vpop.eup %5595  ;;  %v3072_v17 = vsel %vm3071_vm7, %v5588_v43, %v3068_v39  ;;  %v2974_v26 = vmul.f32 %v5594_v22, %v7830_v31  ;;  %v3009_v7 = vadd.f32 %v3007_v49, %v3003_v56  ;;  %vm7883_vm12 = vmor %vm3109_vm3, %vm3110_vm9 }
 0x954   :  { %v3077_v42 = vsel %vm7837_vm13, %v3076_v3, %v3072_v17  ;;  %v7871_v33 = vadd.f32 1.0, %v5596_v51  ;;  %v3127_v9 = vsub.f32 1.0, %v3102_v27  ;;  %v2952_v8 = vadd.f32 %v7841_v36, %v2951_v54 }
 0x955   :  { %v3107_v57 = vmul.f32 %v5592_v2, %v3106_v58  ;;  %v3122_v46 = vmul.f32 %v7802_v47, %v3077_v42  ;;  %v2975_v1 = vsub.f32 1.0, %v2974_v26  ;;  %vm2958_vm11 = vcmp.eq.f32.partialorder %v2957_v30, 8.507059e+37  ;;  %v3317_v42 = vld [vmem:[%s9152_s8 + $0x28] sm:$0xff] }
 0x956   :  { %5599 = vrcp.f32 %v7871_v33  ;;  %v2960_v41 = vor.u32 1.1754944e-38, %v2959_v53  ;;  %v2956_v0 = vsel %vm2955_vm10, %v7841_v36, %v2952_v8  ;;  %v3006_v19 = vadd.f32 %v2920_v32, %v6862_v60 }
 0x957   :  { %v5598_v40 = vpop.eup %5597  ;;  %v3108_v25 = vadd.f32 %v5592_v2, %v3107_v57  ;;  %v3124_v44 = vadd.f32 %v3122_v46, %v7778_v16  ;;  %v2976_v43 = vmul.f32 %v5594_v22, %v2975_v1  ;;  %vm2979_vm13 = vweird.f32 %v5594_v22  ;;  %v3319_v57 = vld [vmem:[%s9152_s8 + $0x38] sm:$0xff]  ;;  %v3313_v46 = vld [vmem:[%s9152_s8 + $0x8] sm:$0xff]  ;;  %v3312_v1 = vld [vmem:[%s9152_s8] sm:$0xff] }
 0x958   :  { %v3129_v56 = vmul.f32 %v5598_v40, %v3127_v9  ;;  %v2961_v23 = vsel %vm2958_vm11, %v2960_v41, %v2956_v0  ;;  %vm2978_vm14 = vweird.f32 %v7830_v31  ;;  %v2982_v59 = vand.u32 2147483647, %v7830_v31  ;;  %3380 = vmatpush.msra.mxu0 %v3319_v57  ;;  %v3314_v9 = vld [vmem:[%s9152_s8 + $0x10] sm:$0xff]  ;;  %v3297_v0 = vld [vmem:[#allocation3 + $0x8] sm:$0xff] }
 0x959   :  { %v3112_v18 = vsel %vm7883_vm12, %v5592_v2, %v3108_v25  ;;  %5601 = vtanh.f32 %v3124_v44  ;;  %v2977_v35 = vadd.f32 %v5594_v22, %v2976_v43  ;;  %vm3114_vm15 = vcmp.eq.f32.partialorder %v3113_v4, 8.507059e+37  ;;  %vm2980_vm3 = vmor %vm2978_vm14, %vm2979_vm13  ;;  %v3296_v44 = vld [vmem:[#allocation3] sm:$0xff]  ;;  %v3298_v43 = vld [vmem:[#allocation3 + $0x10] sm:$0xff] }
 0x95a   :  { %5603 = vtanh.f32 %v3009_v7  ;;  %v3008_v16 = vmul.f32 %v3006_v19, %v2961_v23  ;;  %v2984_v21 = vand.u32 2147483648, %v7830_v31  ;;  %v3117_v24 = vsel %vm3114_vm15, %v3116_v11, %v3112_v18  ;;  %v3316_v7 = vld [vmem:[%s9152_s8 + $0x20] sm:$0xff]  ;;  %v3299_v18 = vld [vmem:[#allocation3 + $0x18] sm:$0xff]  ;;  %v3301_v19 = vld [vmem:[#allocation3 + $0x28] sm:$0xff] }
 0x95b   :  { %v2981_v14 = vsel %vm2980_vm3, %v5594_v22, %v2977_v35  ;;  %v3004_v20 = vadd.f32 %v2906_v34, %v6887_v38  ;;  %v3131_v55 = vmul.f32 %v3102_v27, %v7692_v28  ;;  %vm2983_vm4 = vcmp.eq.f32.partialorder %v2982_v59, 8.507059e+37  ;;  %v3300_v23 = vld [vmem:[#allocation3 + $0x20] sm:$0xff]  ;;  %v3302_v34 = vld [vmem:[#allocation3 + $0x30] sm:$0xff]  ;;  %v3303_v35 = vld [vmem:[#allocation3 + $0x38] sm:$0xff] }
 0x95c   :  { %v5600_v36 = vpop.eup %5599  ;;  %v2985_v63 = vor.u32 1.1754944e-38, %v2984_v21  ;;  %v3128_v52 = vsub.f32 1.0, %v3117_v24  ;;  %v2997_v11 = vand.u32 2147483647, %v7871_v33  ;;  %v2999_v48 = vand.u32 2147483648, %v7871_v33  ;;  %v3304_v59 = vld [vmem:[#allocation3 + $0x40] sm:$0xff] }
 0x95d   :  { %v2989_v3 = vmul.f32 %v5600_v36, %v7871_v33  ;;  %v3010_v37 = vadd.f32 %v3008_v16, %v3004_v20  ;;  %v3133_v13 = vadd.f32 %v3131_v55, %v3129_v56  ;;  %v3132_v45 = vmul.f32 %v3117_v24, %v7722_v10  ;;  %v3305_v16 = vld [vmem:[#allocation3 + $0x48] sm:$0xff]  ;;  %v3306_v21 = vld [vmem:[#allocation3 + $0x50] sm:$0xff]  ;;  %v3307_v24 = vld [vmem:[#allocation3 + $0x58] sm:$0xff] }
 0x95e   :  { %v2986_v5 = vsel %vm2983_vm4, %v2985_v63, %v2981_v14  ;;  %vm2994_vm5 = vweird.f32 %v5600_v36  ;;  %vm2993_vm6 = vweird.f32 %v7871_v33  ;;  %v3000_v58 = vor.u32 1.1754944e-38, %v2999_v48  ;;  %v3315_v33 = vld [vmem:[%s9152_s8 + $0x18] sm:$0xff]  ;;  %v3498_v20 = vld [vmem:[%s8686_s10 + $0x30] sm:$0xff]  ;;  %v3497_v63 = vld [vmem:[%s8686_s10 + $0x28] sm:$0xff] }
 0x95f   :  { %v5602_v62 = vpop.eup %5601  ;;  %v2990_v2 = vsub.f32 1.0, %v2989_v3  ;;  %v3013_v4 = vsub.f32 1.0, %v2986_v5  ;;  %v3017_v28 = vmul.f32 %v2986_v5, %v7695_v29  ;;  %5605 = vtanh.f32 %v3010_v37  ;;  %vm2995_vm8 = vmor %vm2993_vm6, %vm2994_vm5  ;;  %v3496_v3 = vld [vmem:[%s8686_s10 + $0x20] sm:$0xff]  ;;  %v3494_v37 = vld [vmem:[%s8686_s10 + $0x10] sm:$0xff] }
 0x960   :  { %v5604_v12 = vpop.eup %5603  ;;  %v3130_v31 = vmul.f32 %v5602_v62, %v3128_v52  ;;  %vm2998_vm7 = vcmp.eq.f32.partialorder %v2997_v11, 8.507059e+37  ;;  %v30_v8 = vstv %s9153_s16  ;;  %v5726_v40 = vmov 0   ;;  %v3495_v52 = vld [vmem:[%s8686_s10 + $0x18] sm:$0xff]  ;;  %v3493_v62 = vld [vmem:[%s8686_s10 + $0x8] sm:$0xff] }
 0x961   :  { %v3015_v49 = vmul.f32 %v5604_v12, %v3013_v4  ;;  %v2991_v39 = vmul.f32 %v5600_v36, %v2990_v2  ;;  %5294 = vset.pattern.permute.xlu1 %v5726_v40  ;;  %31 = vst [vmem:[#allocation5] sm:$0x1] %v30_v8  ;;  %5295 = vset.pattern.permute.xlu2 %v5726_v40  ;;  %v3492_v12 = vld [vmem:[%s8686_s10] sm:$0xff] }
 0x962   :  { %v3134_v6 = vadd.f32 %v3132_v45, %v3130_v31  ;;  %5296 = vset.pattern.permute.xlu0 %v5726_v40 }
 0x963   :  { %v7902_v22 = vadd.f32 %v3017_v28, %v3015_v49  ;;  %v2992_v27 = vadd.f32 %v5600_v36, %v2991_v39 }
 0x965   :  { %3025 = vrot.lane.b32.xlu2 %v7902_v22, %s5725_s0  ;;  %3021 = vst.msk [vmem:[#allocation3 + $0x60] sm:$0xff] %vm481_vm1, %v7902_v22  ;;  %v2996_v10 = vsel %vm2995_vm8, %v5600_v36, %v2992_v27  ;;  %v5606_v53 = vpop.eup %5605  ;;  %v3499_v36 = vld [vmem:[%s8686_s10 + $0x38] sm:$0xff] }
 0x966   :  { %v3001_v29 = vsel %vm2998_vm7, %v3000_v58, %v2996_v10  ;;  %3560 = vmatpush.msra.mxu1 %v3499_v36 }
 0x967   :  { %v3014_v30 = vsub.f32 1.0, %v3001_v29  ;;  %v3018_v17 = vmul.f32 %v3001_v29, %v7702_v50  ;;  %v3318_v50 = vld [vmem:[%s9152_s8 + $0x30] sm:$0xff] }
 0x968   :  { %3381 = vmatpush.msra.mxu0 %v3318_v50  ;;  %v5297_v47 = vld [vmem:[#allocation5] ss:$0 sm:$0xff]  ;;  %3561 = vmatpush.msra.mxu1 %v3498_v20 }
 0x969   :  { %v3016_v51 = vmul.f32 %v5606_v53, %v3014_v30  ;;  %3457 = vperm.xlu1 %5294, %v5297_v47   ;;  %v7994_v30 = vld [vmem:[%s9154_s6] ss:$0 sm:$0xff]  ;;  %s9157_s6 = sld [smem:[#allocation92_spill]] }
 0x96a   :  { %3382 = vmatpush.msra.mxu0 %v3317_v42  ;;  %3562 = vmatpush.msra.mxu1 %v3497_v63 }
 0x96b   :  { %v7910_v26 = vadd.f32 %v3018_v17, %v3016_v51 }
 0x96c   :  { %3383 = vmatpush.msra.mxu0 %v3316_v7  ;;  %v3308_v14 = vld [vmem:[#allocation3 + $0x60] sm:$0xff]  ;;  %3563 = vmatpush.msra.mxu1 %v3496_v3 }
 0x96d   :  { %3027 = vrot.lane.b32.xlu0 %v7910_v26, %s5725_s0  ;;  %3022 = vst.msk [vmem:[#allocation3 + $0x68] sm:$0xff] %vm481_vm1, %v7910_v26 }
 0x96e   :  { %3384 = vmatpush.msra.mxu0 %v3315_v33  ;;  %3564 = vmatpush.msra.mxu1 %v3495_v52 }
 0x970   :  { %3385 = vmatpush.msra.mxu0 %v3314_v9  ;;  %3565 = vmatpush.msra.mxu1 %v3494_v37 }
 0x972   :  { %3386 = vmatpush.msra.mxu0 %v3313_v46  ;;  %3566 = vmatpush.msra.mxu1 %v3493_v62 }
 0x974   :  { %3387 = vmatpush.msra.mxu0 %v3312_v1  ;;  %v3309_v55 = vld [vmem:[#allocation3 + $0x68] sm:$0xff]  ;;  %3567 = vmatpush.msra.mxu1 %v3492_v12 }
 0x9bf   :  { %v3026_v54 = vpop.permute.xlu2 %3025 }
 0x9c0   :  { %3031 = vst.msk [vmem:[#allocation4] sm:$0xff] %vm492_vm2, %v3026_v54 }
 0x9c1   :  { %3135 = vst.msk [vmem:[#allocation4] sm:$0xff] %vm481_vm1, %v3133_v13 }
 0x9c8   :  { %v3137_v25 = vld [vmem:[#allocation4] sm:$0xff] }
 0x9db   :  { %v7997_v53 = vpop.permute.xlu1 %3457 }
 0x9df   :  { %v3028_v32 = vpop.permute.xlu0 %3027 }
 0x9e0   :  { %3032 = vst.msk [vmem:[#allocation4 + $0x8] sm:$0xff] %vm492_vm2, %v3028_v32 }
 0x9e1   :  { %3136 = vst.msk [vmem:[#allocation4 + $0x8] sm:$0xff] %vm481_vm1, %v3134_v6 }
 0x9e8   :  { %v3138_v41 = vld [vmem:[#allocation4 + $0x8] sm:$0xff] }
 0x9e9   :  { %v3139_v56 = vpack.c.bf16 %v3138_v41, %v3137_v25 }
 0x9eb   :  { %3148 = vmatmul.bf16.vlgmr.msrb.gmra.mxu0 %v3139_v56  ;;  %3162 = vmatmul.bf16.vlgmr.msrb.gmra.mxu1 %v3139_v56 }
 0x9ec   :  { %3176 = vmatmul.bf16.vlgmr.msra.gmra.mxu2 %v3139_v56  ;;  %3190 = vmatmul.bf16.vlgmr.msrb.gmra.mxu3 %v3139_v56 }
 0x9fb   :  { %5119 = vmatmul.msk.f32.vlgmr.msra.gmra.mxu0 %vm481_vm1, %v3296_v44 }
 0xa03   :  { %5120 = vmatmul.msk.f32.gmra.mxu0 %vm481_vm1, %v3297_v0 }
 0xa0b   :  { %5121 = vmatmul.msk.f32.gmra.mxu0 %vm481_vm1, %v3298_v43 }
 0xa13   :  { %5122 = vmatmul.msk.f32.gmra.mxu0 %vm481_vm1, %v3299_v18  ;;  %v32_v18 = vstv %s8688_s12 }
 0xa14   :  { %33 = vst [vmem:[#allocation6] sm:$0x1] %v32_v18 }
 0xa1b   :  { %5123 = vmatmul.msk.f32.gmra.mxu0 %vm481_vm1, %v3300_v23 }
 0xa23   :  { %5124 = vmatmul.msk.f32.gmra.mxu0 %vm481_vm1, %v3301_v19 }
 0xa2b   :  { %5125 = vmatmul.msk.f32.gmra.mxu0 %vm481_vm1, %v3302_v34 }
 0xa33   :  { %5126 = vmatmul.msk.f32.gmra.mxu0 %vm481_vm1, %v3303_v35 }
 0xa3b   :  { %5127 = vmatmul.msk.f32.gmra.mxu0 %vm481_vm1, %v3304_v59 }
 0xa43   :  { %5128 = vmatmul.msk.f32.gmra.mxu0 %vm481_vm1, %v3305_v16 }
 0xa4b   :  { %5129 = vmatmul.msk.f32.gmra.mxu0 %vm481_vm1, %v3306_v21 }
 0xa53   :  { %5130 = vmatmul.msk.f32.gmra.mxu0 %vm481_vm1, %v3307_v24 }
 0xa5b   :  { %5131 = vmatmul.msk.f32.gmra.mxu0 %vm481_vm1, %v3308_v14 }
 0xa63   :  { %5132 = vmatmul.msk.f32.gmra.mxu0 %vm481_vm1, %v3309_v55 }
 0xa68   :  { %v3149_v5 = vpop.f32.mrf.mxu0  ;;  %v3163_v13 = vpop.f32.mrf.mxu1 }
 0xa69   :  { %v3196_v2 = vadd.f32 %v3149_v5, %v9135_v15  ;;  %v3236_v4 = vadd.f32 %v3163_v13, %v9139_v61 }
 0xa6b   :  { %v5115_v31 = vmul.f32 -1.442695, %v3196_v2  ;;  %v5117_v11 = vmul.f32 -1.442695, %v3236_v4 }
 0xa6d   :  { %5607 = vpow2.f32 %v5115_v31 }
 0xa6e   :  { %5609 = vpow2.f32 %v5117_v11 }
 0xa6f   :  { %v3191_v46 = vpop.f32.mrf.mxu3  ;;  %v3177_v41 = vpop.f32.mrf.mxu2 }
 0xa70   :  { %v3151_v48 = vpop.f32.mrf.mxu0  ;;  %v3165_v45 = vpop.f32.mrf.mxu1  ;;  %v3276_v34 = vadd.f32 %v3177_v41, %v6887_v38  ;;  %v3278_v59 = vadd.f32 %v3191_v46, %v6862_v60 }
 0xa71   :  { %v3197_v49 = vadd.f32 %v3151_v48, %v9135_v15  ;;  %v3237_v28 = vadd.f32 %v3165_v45, %v9139_v61 }
 0xa73   :  { %v5608_v39 = vpop.eup %5607  ;;  %v5116_v6 = vmul.f32 -1.442695, %v3197_v49  ;;  %v5118_v10 = vmul.f32 -1.442695, %v3237_v28 }
 0xa74   :  { %v5610_v27 = vpop.eup %5609  ;;  %v3204_v58 = vadd.f32 1.0, %v5608_v39 }
 0xa75   :  { %v7989_v29 = vadd.f32 1.0, %v5610_v27  ;;  %5611 = vpow2.f32 %v5116_v6  ;;  %v5299_v6 = vld [vmem:[#allocation6] ss:$0 sm:$0xff] }
 0xa76   :  { %5613 = vrcp.f32 %v3204_v58  ;;  %v3217_v40 = vand.u32 2147483648, %v3204_v58  ;;  %v3215_v47 = vand.u32 2147483647, %v3204_v58  ;;  %vm3211_vm10 = vweird.f32 %v3204_v58  ;;  %3637 = vperm.xlu2 %5295, %v5299_v6   ;;  %v3677_v6 = vld [vmem:[%s8689_s13 + $0x28] sm:$0xff] }
 0xa77   :  { %5615 = vrcp.f32 %v7989_v29  ;;  %v3257_v19 = vand.u32 2147483648, %v7989_v29  ;;  %vm3251_vm15 = vweird.f32 %v7989_v29  ;;  %v3255_v52 = vand.u32 2147483647, %v7989_v29  ;;  %v3193_v12 = vpop.f32.mrf.mxu3 }
 0xa78   :  { %5617 = vpow2.f32 %v5118_v10  ;;  %v3389_v15 = vpop.f32.mrf.mxu0  ;;  %v3218_v35 = vor.u32 1.1754944e-38, %v3217_v40  ;;  %vm3216_vm12 = vcmp.eq.f32.partialorder %v3215_v47, 8.507059e+37 }
 0xa79   :  { %v3390_v61 = vadd.f32 %v7994_v30, %v3389_v15  ;;  %v3258_v48 = vor.u32 1.1754944e-38, %v3257_v19  ;;  %vm3256_vm8 = vcmp.eq.f32.partialorder %v3255_v52, 8.507059e+37 }
 0xa7b   :  { %v5612_v51 = vpop.eup %5611  ;;  %vm3438_vm2 = vcmp.gt.f32.partialorder %v3390_v61, 0.0  ;;  %v3460_v17 = vmul.f32 %v7997_v53, %v3390_v61 }
 0xa7c   :  { %v5614_v54 = vpop.eup %5613  ;;  %v8001_v57 = vadd.f32 1.0, %v5612_v51 }
 0xa7d   :  { %v8003_v50 = vpop.eup %5615  ;;  %v3207_v42 = vmul.f32 %v5614_v54, %v3204_v58  ;;  %v3476_v7 = vsel %vm3438_vm2, %v3390_v61, %v3460_v17  ;;  %vm3212_vm9 = vweird.f32 %v5614_v54  ;;  %v3179_v58 = vpop.f32.mrf.mxu2 }
 0xa7e   :  { %v5618_v33 = vpop.eup %5617  ;;  %v3247_v9 = vmul.f32 %v8003_v50, %v7989_v29  ;;  %5619 = vrcp.f32 %v8001_v57  ;;  %5135 = vmatmul.msk.f32.vlgmr.msra.gmra.mxu1 %vm481_vm1, %v3476_v7  ;;  %vm3213_vm11 = vmor %vm3211_vm10, %vm3212_vm9  ;;  %vm3252_vm13 = vweird.f32 %v8003_v50  ;;  %v3230_v5 = vand.u32 2147483647, %v8001_v57 }
 0xa7f   :  { %v3208_v1 = vsub.f32 1.0, %v3207_v42  ;;  %v8009_v32 = vadd.f32 1.0, %v5618_v33  ;;  %v3232_v13 = vand.u32 2147483648, %v8001_v57  ;;  %vm8033_vm3 = vmor %vm3251_vm15, %vm3252_vm13  ;;  %vm3226_vm5 = vweird.f32 %v8001_v57 }
 0xa80   :  { %v3248_v8 = vsub.f32 1.0, %v3247_v9  ;;  %v3392_v25 = vpop.f32.mrf.mxu0  ;;  %v3279_v29 = vadd.f32 %v3193_v12, %v6862_v60  ;;  %vm3231_vm2 = vcmp.eq.f32.partialorder %v3230_v5, 8.507059e+37 }
 0xa81   :  { %v3209_v56 = vmul.f32 %v5614_v54, %v3208_v1  ;;  %5621 = vrcp.f32 %v8009_v32  ;;  %v3393_v43 = vadd.f32 %v7994_v30, %v3392_v25  ;;  %v3233_v10 = vor.u32 1.1754944e-38, %v3232_v13 }
 0xa82   :  { %v3249_v44 = vmul.f32 %v8003_v50, %v3248_v8  ;;  %vm3266_vm10 = vweird.f32 %v8009_v32  ;;  %v3270_v60 = vand.u32 2147483647, %v8009_v32 }
 0xa83   :  { %v3210_v0 = vadd.f32 %v5614_v54, %v3209_v56  ;;  %v3461_v24 = vmul.f32 %v7997_v53, %v3393_v43  ;;  %vm3439_vm14 = vcmp.gt.f32.partialorder %v3393_v43, 0.0 }
 0xa84   :  { %v5620_v23 = vpop.eup %5619  ;;  %v3250_v14 = vadd.f32 %v8003_v50, %v3249_v44  ;;  %vm3271_vm13 = vcmp.eq.f32.partialorder %v3270_v60, 8.507059e+37  ;;  %v3673_v60 = vld [vmem:[%s8689_s13 + $0x8] sm:$0xff] }
 0xa85   :  { %v3214_v16 = vsel %vm3213_vm11, %v5614_v54, %v3210_v0  ;;  %v3222_v21 = vmul.f32 %v5620_v23, %v8001_v57  ;;  %v3477_v3 = vsel %vm3439_vm14, %v3393_v43, %v3461_v24  ;;  %vm3227_vm4 = vweird.f32 %v5620_v23 }
 0xa86   :  { %v3219_v36 = vsel %vm3216_vm12, %v3218_v35, %v3214_v16  ;;  %5136 = vmatmul.msk.f32.gmra.mxu1 %vm481_vm1, %v3477_v3  ;;  %v3254_v45 = vsel %vm8033_vm3, %v8003_v50, %v3250_v14  ;;  %vm3228_vm7 = vmor %vm3226_vm5, %vm3227_vm4  ;;  %v3272_v57 = vand.u32 2147483648, %v8009_v32  ;;  %v3277_v50 = vadd.f32 %v3179_v58, %v6887_v38  ;;  %v3676_v58 = vld [vmem:[%s8689_s13 + $0x20] sm:$0xff] }
 0xa87   :  { %v8024_v20 = vpop.eup %5621  ;;  %v3280_v63 = vmul.f32 %v3278_v59, %v3219_v36  ;;  %v3223_v55 = vsub.f32 1.0, %v3222_v21  ;;  %v3259_v15 = vsel %vm3256_vm8, %v3258_v48, %v3254_v45 }
 0xa88   :  { %v3262_v37 = vmul.f32 %v8024_v20, %v8009_v32  ;;  %v3395_v62 = vpop.f32.mrf.mxu0  ;;  %vm3267_vm9 = vweird.f32 %v8024_v20  ;;  %v3286_v7 = vsub.f32 1.0, %v3259_v15  ;;  %v3290_v40 = vmul.f32 %v3259_v15, %v7902_v22 }
 0xa89   :  { %v3282_v4 = vadd.f32 %v3280_v63, %v3276_v34  ;;  %v3224_v31 = vmul.f32 %v5620_v23, %v3223_v55  ;;  %v3396_v11 = vadd.f32 %v7994_v30, %v3395_v62  ;;  %vm3268_vm11 = vmor %vm3266_vm10, %vm3267_vm9  ;;  %v3273_v38 = vor.u32 1.1754944e-38, %v3272_v57 }
 0xa8a   :  { %v3263_v49 = vsub.f32 1.0, %v3262_v37 }
 0xa8b   :  { %5623 = vtanh.f32 %v3282_v4  ;;  %v3225_v28 = vadd.f32 %v5620_v23, %v3224_v31  ;;  %v3462_v39 = vmul.f32 %v7997_v53, %v3396_v11  ;;  %vm3440_vm6 = vcmp.gt.f32.partialorder %v3396_v11, 0.0 }
 0xa8c   :  { %v3264_v27 = vmul.f32 %v8024_v20, %v3263_v49  ;;  %v3679_v49 = vld [vmem:[%s8689_s13 + $0x38] sm:$0xff] }
 0xa8d   :  { %v3229_v61 = vsel %vm3228_vm7, %v5620_v23, %v3225_v28  ;;  %v3478_v51 = vsel %vm3440_vm6, %v3396_v11, %v3462_v39  ;;  %v3678_v28 = vld [vmem:[%s8689_s13 + $0x30] sm:$0xff]  ;;  %3740 = vmatpush.msrb.mxu2 %v3679_v49 }
 0xa8e   :  { %v3265_v17 = vadd.f32 %v8024_v20, %v3264_v27  ;;  %v3234_v54 = vsel %vm3231_vm2, %v3233_v10, %v3229_v61  ;;  %5137 = vmatmul.msk.f32.gmra.mxu1 %vm481_vm1, %v3478_v51 }
 0xa8f   :  { %v3281_v42 = vmul.f32 %v3279_v29, %v3234_v54  ;;  %3741 = vmatpush.msrb.mxu2 %v3678_v28  ;;  %v3675_v29 = vld [vmem:[%s8689_s13 + $0x18] sm:$0xff] }
 0xa90   :  { %v3398_v33 = vpop.f32.mrf.mxu0  ;;  %v3269_v25 = vsel %vm3268_vm11, %v8024_v20, %v3265_v17 }
 0xa91   :  { %v5624_v9 = vpop.eup %5623  ;;  %v3283_v46 = vadd.f32 %v3281_v42, %v3277_v50  ;;  %v3399_v1 = vadd.f32 %v7994_v30, %v3398_v33  ;;  %v3274_v32 = vsel %vm3271_vm13, %v3273_v38, %v3269_v25  ;;  %3742 = vmatpush.msrb.mxu2 %v3677_v6 }
 0xa92   :  { %v3288_v8 = vmul.f32 %v5624_v9, %v3286_v7  ;;  %v3287_v44 = vsub.f32 1.0, %v3274_v32  ;;  %v3291_v23 = vmul.f32 %v3274_v32, %v7910_v26  ;;  %v3674_v7 = vld [vmem:[%s8689_s13 + $0x10] sm:$0xff]  ;;  %v3672_v9 = vld [vmem:[%s8689_s13] sm:$0xff] }
 0xa93   :  { %5625 = vtanh.f32 %v3283_v46  ;;  %v3463_v41 = vmul.f32 %v7997_v53, %v3399_v1  ;;  %vm3441_vm12 = vcmp.gt.f32.partialorder %v3399_v1, 0.0  ;;  %3743 = vmatpush.msrb.mxu2 %v3676_v58 }
 0xa94   :  { %v3292_v56 = vadd.f32 %v3290_v40, %v3288_v8  ;;  %v8119_v40 = vld [vmem:[%s8687_s11] ss:$0 sm:$0xff] }
 0xa95   :  { %v3479_v47 = vsel %vm3441_vm12, %v3399_v1, %v3463_v41  ;;  %3744 = vmatpush.msrb.mxu2 %v3675_v29 }
 0xa96   :  { %3294 = vst.msk [vmem:[#allocation3 + $0x70] sm:$0xff] %vm481_vm1, %v3292_v56  ;;  %5138 = vmatmul.msk.f32.gmra.mxu1 %vm481_vm1, %v3479_v47 }
 0xa97   :  { %3745 = vmatpush.msrb.mxu2 %v3674_v7 }
 0xa98   :  { %v3401_v0 = vpop.f32.mrf.mxu0 }
 0xa99   :  { %v5626_v43 = vpop.eup %5625  ;;  %v3402_v22 = vadd.f32 %v7994_v30, %v3401_v0  ;;  %3746 = vmatpush.msrb.mxu2 %v3673_v60 }
 0xa9a   :  { %v3289_v18 = vmul.f32 %v5626_v43, %v3287_v44 }
 0xa9b   :  { %v3464_v19 = vmul.f32 %v7997_v53, %v3402_v22  ;;  %vm3442_vm14 = vcmp.gt.f32.partialorder %v3402_v22, 0.0  ;;  %3747 = vmatpush.msrb.mxu2 %v3672_v9 }
 0xa9c   :  { %v3293_v34 = vadd.f32 %v3291_v23, %v3289_v18 }
 0xa9d   :  { %v3310_v35 = vld [vmem:[#allocation3 + $0x70] sm:$0xff]  ;;  %v3480_v59 = vsel %vm3442_vm14, %v3402_v22, %v3464_v19 }
 0xa9e   :  { %3295 = vst.msk [vmem:[#allocation3 + $0x78] sm:$0xff] %vm481_vm1, %v3293_v34  ;;  %5133 = vmatmul.msk.f32.gmra.mxu0 %vm481_vm1, %v3310_v35  ;;  %5139 = vmatmul.msk.f32.gmra.mxu1 %vm481_vm1, %v3480_v59 }
 0xaa0   :  { %v3404_v16 = vpop.f32.mrf.mxu0 }
 0xaa1   :  { %v3405_v21 = vadd.f32 %v7994_v30, %v3404_v16 }
 0xaa3   :  { %v3465_v24 = vmul.f32 %v7997_v53, %v3405_v21  ;;  %vm3443_vm15 = vcmp.gt.f32.partialorder %v3405_v21, 0.0 }
 0xaa5   :  { %v3311_v14 = vld [vmem:[#allocation3 + $0x78] sm:$0xff]  ;;  %v3481_v26 = vsel %vm3443_vm15, %v3405_v21, %v3465_v24 }
 0xaa6   :  { %5134 = vmatmul.msk.f32.gmra.mxu0 %vm481_vm1, %v3311_v14  ;;  %5140 = vmatmul.msk.f32.gmra.mxu1 %vm481_vm1, %v3481_v26 }
 0xaa8   :  { %v3407_v36 = vpop.f32.mrf.mxu0 }
 0xaa9   :  { %v3408_v20 = vadd.f32 %v7994_v30, %v3407_v36 }
 0xaab   :  { %v3466_v63 = vmul.f32 %v7997_v53, %v3408_v20  ;;  %vm3444_vm3 = vcmp.gt.f32.partialorder %v3408_v20, 0.0 }
 0xaad   :  { %v3482_v55 = vsel %vm3444_vm3, %v3408_v20, %v3466_v63 }
 0xaae   :  { %5141 = vmatmul.msk.f32.gmra.mxu1 %vm481_vm1, %v3482_v55 }
 0xab0   :  { %v3410_v3 = vpop.f32.mrf.mxu0 }
 0xab1   :  { %v3411_v52 = vadd.f32 %v7994_v30, %v3410_v3 }
 0xab3   :  { %v3467_v37 = vmul.f32 %v7997_v53, %v3411_v52  ;;  %vm3445_vm4 = vcmp.gt.f32.partialorder %v3411_v52, 0.0 }
 0xab5   :  { %v3483_v5 = vsel %vm3445_vm4, %v3411_v52, %v3467_v37 }
 0xab6   :  { %5142 = vmatmul.msk.f32.gmra.mxu1 %vm481_vm1, %v3483_v5 }
 0xab8   :  { %v3413_v13 = vpop.f32.mrf.mxu0 }
 0xab9   :  { %v3414_v62 = vadd.f32 %v7994_v30, %v3413_v13 }
 0xabb   :  { %vm3446_vm5 = vcmp.gt.f32.partialorder %v3414_v62, 0.0  ;;  %v3468_v2 = vmul.f32 %v7997_v53, %v3414_v62 }
 0xabd   :  { %v3484_v4 = vsel %vm3446_vm5, %v3414_v62, %v3468_v2 }
 0xabe   :  { %5143 = vmatmul.msk.f32.gmra.mxu1 %vm481_vm1, %v3484_v4 }
 0xac0   :  { %v3416_v12 = vpop.f32.mrf.mxu0 }
 0xac1   :  { %v3417_v31 = vadd.f32 %v7994_v30, %v3416_v12 }
 0xac3   :  { %vm3447_vm6 = vcmp.gt.f32.partialorder %v3417_v31, 0.0  ;;  %v3469_v11 = vmul.f32 %v7997_v53, %v3417_v31 }
 0xac5   :  { %v3485_v48 = vsel %vm3447_vm6, %v3417_v31, %v3469_v11 }
 0xac6   :  { %5144 = vmatmul.msk.f32.gmra.mxu1 %vm481_vm1, %v3485_v48 }
 0xac8   :  { %v3419_v45 = vpop.f32.mrf.mxu0 }
 0xac9   :  { %v3420_v39 = vadd.f32 %v7994_v30, %v3419_v45 }
 0xacb   :  { %vm3448_vm8 = vcmp.gt.f32.partialorder %v3420_v39, 0.0  ;;  %v3470_v27 = vmul.f32 %v7997_v53, %v3420_v39 }
 0xacd   :  { %v3486_v10 = vsel %vm3448_vm8, %v3420_v39, %v3470_v27 }
 0xace   :  { %5145 = vmatmul.msk.f32.gmra.mxu1 %vm481_vm1, %v3486_v10 }
 0xad0   :  { %v3422_v15 = vpop.f32.mrf.mxu0  ;;  %v8121_v38 = vpop.permute.xlu2 %3637 }
 0xad1   :  { %v3423_v61 = vadd.f32 %v7994_v30, %v3422_v15 }
 0xad3   :  { %vm3449_vm7 = vcmp.gt.f32.partialorder %v3423_v61, 0.0  ;;  %v3471_v51 = vmul.f32 %v7997_v53, %v3423_v61 }
 0xad5   :  { %v3487_v17 = vsel %vm3449_vm7, %v3423_v61, %v3471_v51 }
 0xad6   :  { %5146 = vmatmul.msk.f32.gmra.mxu1 %vm481_vm1, %v3487_v17 }
 0xad8   :  { %v3425_v54 = vpop.f32.mrf.mxu0 }
 0xad9   :  { %v3426_v57 = vadd.f32 %v7994_v30, %v3425_v54 }
 0xadb   :  { %vm3450_vm2 = vcmp.gt.f32.partialorder %v3426_v57, 0.0  ;;  %v3472_v50 = vmul.f32 %v7997_v53, %v3426_v57 }
 0xadd   :  { %v3488_v42 = vsel %vm3450_vm2, %v3426_v57, %v3472_v50 }
 0xade   :  { %5147 = vmatmul.msk.f32.gmra.mxu1 %vm481_vm1, %v3488_v42 }
 0xae0   :  { %v3428_v33 = vpop.f32.mrf.mxu0 }
 0xae1   :  { %v3429_v46 = vadd.f32 %v7994_v30, %v3428_v33 }
 0xae3   :  { %vm3451_vm9 = vcmp.gt.f32.partialorder %v3429_v46, 0.0  ;;  %v3473_v1 = vmul.f32 %v7997_v53, %v3429_v46 }
 0xae5   :  { %v3489_v8 = vsel %vm3451_vm9, %v3429_v46, %v3473_v1 }
 0xae6   :  { %5148 = vmatmul.msk.f32.gmra.mxu1 %vm481_vm1, %v3489_v8 }
 0xafb   :  { %v3569_v25 = vpop.f32.mrf.mxu1 }
 0xafc   :  { %v3570_v41 = vadd.f32 %v8119_v40, %v3569_v25 }
 0xafe   :  { %vm3618_vm10 = vcmp.gt.f32.partialorder %v3570_v41, 0.0  ;;  %v3640_v56 = vmul.f32 %v8121_v38, %v3570_v41 }
 0xb00   :  { %v3656_v32 = vsel %vm3618_vm10, %v3570_v41, %v3640_v56  ;;  %v8174_v56 = vld [vmem:[%s8690_s14] ss:$0 sm:$0xff] }
 0xb01   :  { %5151 = vmatmul.msk.f32.vlgmr.msrb.gmra.mxu2 %vm481_vm1, %v3656_v32 }
 0xb03   :  { %v3572_v47 = vpop.f32.mrf.mxu1 }
 0xb04   :  { %v3573_v44 = vadd.f32 %v8119_v40, %v3572_v47 }
 0xb06   :  { %v3641_v0 = vmul.f32 %v8121_v38, %v3573_v44  ;;  %vm3619_vm11 = vcmp.gt.f32.partialorder %v3573_v44, 0.0 }
 0xb08   :  { %v3657_v43 = vsel %vm3619_vm11, %v3573_v44, %v3641_v0 }
 0xb09   :  { %5152 = vmatmul.msk.f32.gmra.mxu2 %vm481_vm1, %v3657_v43 }
 0xb0b   :  { %v3575_v22 = vpop.f32.mrf.mxu1 }
 0xb0c   :  { %v3576_v18 = vadd.f32 %v8119_v40, %v3575_v22 }
 0xb0e   :  { %v3642_v23 = vmul.f32 %v8121_v38, %v3576_v18  ;;  %vm3620_vm12 = vcmp.gt.f32.partialorder %v3576_v18, 0.0 }
 0xb10   :  { %v3658_v19 = vsel %vm3620_vm12, %v3576_v18, %v3642_v23  ;;  %vm4756_vm12 = vcmask 261120  }
 0xb11   :  { %5153 = vmatmul.msk.f32.gmra.mxu2 %vm481_vm1, %v3658_v19 }
 0xb13   :  { %v3578_v34 = vpop.f32.mrf.mxu1 }
 0xb14   :  { %v3579_v35 = vadd.f32 %v8119_v40, %v3578_v34 }
 0xb16   :  { %v3643_v59 = vmul.f32 %v8121_v38, %v3579_v35  ;;  %vm3621_vm13 = vcmp.gt.f32.partialorder %v3579_v35, 0.0 }
 0xb18   :  { %v3659_v16 = vsel %vm3621_vm13, %v3579_v35, %v3643_v59 }
 0xb19   :  { %5154 = vmatmul.msk.f32.gmra.mxu2 %vm481_vm1, %v3659_v16 }
 0xb1b   :  { %v3431_v21 = vpop.f32.mrf.mxu0  ;;  %v3581_v14 = vpop.f32.mrf.mxu1 }
 0xb1c   :  { %v3432_v24 = vadd.f32 %v7994_v30, %v3431_v21  ;;  %v3582_v36 = vadd.f32 %v8119_v40, %v3581_v14 }
 0xb1e   :  { %vm3452_vm14 = vcmp.gt.f32.partialorder %v3432_v24, 0.0  ;;  %v3474_v26 = vmul.f32 %v7997_v53, %v3432_v24  ;;  %v3644_v20 = vmul.f32 %v8121_v38, %v3582_v36  ;;  %vm3622_vm15 = vcmp.gt.f32.partialorder %v3582_v36, 0.0 }
 0xb20   :  { %v3490_v63 = vsel %vm3452_vm14, %v3432_v24, %v3474_v26  ;;  %v3660_v55 = vsel %vm3622_vm15, %v3582_v36, %v3644_v20 }
 0xb21   :  { %5149 = vmatmul.msk.f32.gmra.mxu1 %vm481_vm1, %v3490_v63  ;;  %5155 = vmatmul.msk.f32.gmra.mxu2 %vm481_vm1, %v3660_v55 }
 0xb23   :  { %v3434_v3 = vpop.f32.mrf.mxu0  ;;  %v3584_v37 = vpop.f32.mrf.mxu1 }
 0xb24   :  { %v3435_v52 = vadd.f32 %v7994_v30, %v3434_v3  ;;  %v3585_v13 = vadd.f32 %v8119_v40, %v3584_v37 }
 0xb26   :  { %vm3453_vm3 = vcmp.gt.f32.partialorder %v3435_v52, 0.0  ;;  %v3475_v5 = vmul.f32 %v7997_v53, %v3435_v52  ;;  %v3645_v62 = vmul.f32 %v8121_v38, %v3585_v13  ;;  %vm3623_vm4 = vcmp.gt.f32.partialorder %v3585_v13, 0.0 }
 0xb28   :  { %v3491_v2 = vsel %vm3453_vm3, %v3435_v52, %v3475_v5  ;;  %v3661_v4 = vsel %vm3623_vm4, %v3585_v13, %v3645_v62 }
 0xb29   :  { %5150 = vmatmul.msk.f32.gmra.mxu1 %vm481_vm1, %v3491_v2  ;;  %5156 = vmatmul.msk.f32.gmra.mxu2 %vm481_vm1, %v3661_v4 }
 0xb2b   :  { %v3587_v12 = vpop.f32.mrf.mxu1 }
 0xb2c   :  { %v3588_v31 = vadd.f32 %v8119_v40, %v3587_v12 }
 0xb2e   :  { %v3646_v30 = vmul.f32 %v8121_v38, %v3588_v31  ;;  %vm3624_vm5 = vcmp.gt.f32.partialorder %v3588_v31, 0.0 }
 0xb30   :  { %v3662_v11 = vsel %vm3624_vm5, %v3588_v31, %v3646_v30 }
 0xb31   :  { %5157 = vmatmul.msk.f32.gmra.mxu2 %vm481_vm1, %v3662_v11 }
 0xb33   :  { %v3590_v53 = vpop.f32.mrf.mxu1 }
 0xb34   :  { %v3591_v48 = vadd.f32 %v8119_v40, %v3590_v53 }
 0xb36   :  { %v3647_v45 = vmul.f32 %v8121_v38, %v3591_v48  ;;  %vm3625_vm6 = vcmp.gt.f32.partialorder %v3591_v48, 0.0 }
 0xb38   :  { %v3663_v49 = vsel %vm3625_vm6, %v3591_v48, %v3647_v45 }
 0xb39   :  { %5158 = vmatmul.msk.f32.gmra.mxu2 %vm481_vm1, %v3663_v49 }
 0xb3b   :  { %v3593_v28 = vpop.f32.mrf.mxu1 }
 0xb3c   :  { %v3594_v39 = vadd.f32 %v8119_v40, %v3593_v28 }
 0xb3e   :  { %vm3626_vm8 = vcmp.gt.f32.partialorder %v3594_v39, 0.0  ;;  %v3648_v6 = vmul.f32 %v8121_v38, %v3594_v39 }
 0xb40   :  { %v3664_v27 = vsel %vm3626_vm8, %v3594_v39, %v3648_v6 }
 0xb41   :  { %5159 = vmatmul.msk.f32.gmra.mxu2 %vm481_vm1, %v3664_v27 }
 0xb43   :  { %v3596_v58 = vpop.f32.mrf.mxu1 }
 0xb44   :  { %v3597_v10 = vadd.f32 %v8119_v40, %v3596_v58 }
 0xb46   :  { %vm3627_vm7 = vcmp.gt.f32.partialorder %v3597_v10, 0.0  ;;  %v3649_v29 = vmul.f32 %v8121_v38, %v3597_v10 }
 0xb48   :  { %v3665_v15 = vsel %vm3627_vm7, %v3597_v10, %v3649_v29 }
 0xb49   :  { %5160 = vmatmul.msk.f32.gmra.mxu2 %vm481_vm1, %v3665_v15 }
 0xb4b   :  { %v3599_v61 = vpop.f32.mrf.mxu1 }
 0xb4c   :  { %v3600_v51 = vadd.f32 %v8119_v40, %v3599_v61 }
 0xb4e   :  { %vm3628_vm2 = vcmp.gt.f32.partialorder %v3600_v51, 0.0  ;;  %v3650_v17 = vmul.f32 %v8121_v38, %v3600_v51 }
 0xb50   :  { %v3666_v54 = vsel %vm3628_vm2, %v3600_v51, %v3650_v17 }
 0xb51   :  { %5161 = vmatmul.msk.f32.gmra.mxu2 %vm481_vm1, %v3666_v54 }
 0xb53   :  { %v3602_v57 = vpop.f32.mrf.mxu1 }
 0xb54   :  { %v3603_v50 = vadd.f32 %v8119_v40, %v3602_v57 }
 0xb56   :  { %vm3629_vm9 = vcmp.gt.f32.partialorder %v3603_v50, 0.0  ;;  %v3651_v42 = vmul.f32 %v8121_v38, %v3603_v50 }
 0xb58   :  { %v3667_v7 = vsel %vm3629_vm9, %v3603_v50, %v3651_v42 }
 0xb59   :  { %5162 = vmatmul.msk.f32.gmra.mxu2 %vm481_vm1, %v3667_v7 }
 0xb5b   :  { %v3605_v60 = vpop.f32.mrf.mxu1 }
 0xb5c   :  { %v3606_v33 = vadd.f32 %v8119_v40, %v3605_v60 }
 0xb5e   :  { %vm3630_vm10 = vcmp.gt.f32.partialorder %v3606_v33, 0.0  ;;  %v3652_v9 = vmul.f32 %v8121_v38, %v3606_v33 }
 0xb60   :  { %v3668_v46 = vsel %vm3630_vm10, %v3606_v33, %v3652_v9 }
 0xb61   :  { %5163 = vmatmul.msk.f32.gmra.mxu2 %vm481_vm1, %v3668_v46 }
 0xb63   :  { %v3608_v1 = vpop.f32.mrf.mxu1 }
 0xb64   :  { %v3609_v8 = vadd.f32 %v8119_v40, %v3608_v1 }
 0xb66   :  { %vm3631_vm11 = vcmp.gt.f32.partialorder %v3609_v8, 0.0  ;;  %v3653_v25 = vmul.f32 %v8121_v38, %v3609_v8 }
 0xb68   :  { %v3669_v41 = vsel %vm3631_vm11, %v3609_v8, %v3653_v25 }
 0xb69   :  { %5164 = vmatmul.msk.f32.gmra.mxu2 %vm481_vm1, %v3669_v41 }
 0xb84   :  { %v3749_v32 = vpop.f32.mrf.mxu2 }
 0xb85   :  { %v8177_v47 = vadd.f32 %v8174_v56, %v3749_v32 }
 0xb87   :  { %v3813_v44 = vmul.f32 0.5, %v8177_v47  ;;  %4757 = vst.msk [vmem:[%s8691_s24] sm:$0xff] %vm4756_vm12, %v8177_v47 }
 0xb89   :  { %v3829_v0 = vmul.f32 1.442695, %v3813_v44 }
 0xb8b   :  { %5627 = vpow2.f32 %v3829_v0  ;;  %v34_v0 = vstv %s8692_s17 }
 0xb8c   :  { %v3752_v43 = vpop.f32.mrf.mxu2  ;;  %35 = vst [vmem:[#allocation7] sm:$0x1] %v34_v0 }
 0xb8d   :  { %v8186_v22 = vadd.f32 %v8174_v56, %v3752_v43 }
 0xb8f   :  { %v3814_v23 = vmul.f32 0.5, %v8186_v22  ;;  %4758 = vst.msk [vmem:[%s8691_s24 + $0x8] sm:$0xff] %vm4756_vm12, %v8186_v22 }
 0xb91   :  { %v5628_v18 = vpop.eup %5627  ;;  %v3831_v19 = vmul.f32 1.442695, %v3814_v23 }
 0xb92   :  { %3877 = vrot.lane.b32.xlu0 %v5628_v18, %s5727_s29 }
 0xb93   :  { %5629 = vpow2.f32 %v3831_v19 }
 0xb94   :  { %v3755_v34 = vpop.f32.mrf.mxu2 }
 0xb95   :  { %v8196_v35 = vadd.f32 %v8174_v56, %v3755_v34  ;;  %v3958_v34 = vld [vmem:[%s8693_s15 + $0x8] sm:$0xff] }
 0xb96   :  { %4025 = vmatpush.msra.mxu3 %v3958_v34  ;;  %v3805_v34 = vld [vmem:[%s8695_s2 + $0x40] sm:$0xff] }
 0xb97   :  { %v3815_v59 = vmul.f32 0.5, %v8196_v35  ;;  %4759 = vst.msk [vmem:[%s8691_s24 + $0x10] sm:$0xff] %vm4756_vm12, %v8196_v35 }
 0xb99   :  { %v5630_v16 = vpop.eup %5629  ;;  %v3833_v21 = vmul.f32 1.442695, %v3815_v59  ;;  %v3957_v59 = vld [vmem:[%s8693_s15] sm:$0xff] }
 0xb9a   :  { %3879 = vrot.lane.b32.xlu1 %v5630_v16, %s5727_s29  ;;  %4026 = vmatpush.msra.mxu3 %v3957_v59 }
 0xb9b   :  { %5631 = vpow2.f32 %v3833_v21 }
 0xb9c   :  { %v3758_v24 = vpop.f32.mrf.mxu2 }
 0xb9d   :  { %v8206_v26 = vadd.f32 %v8174_v56, %v3758_v24 }
 0xb9e   :  { %v3611_v14 = vpop.f32.mrf.mxu1 }
 0xb9f   :  { %v3612_v36 = vadd.f32 %v8119_v40, %v3611_v14  ;;  %v3816_v20 = vmul.f32 0.5, %v8206_v26  ;;  %4760 = vst.msk [vmem:[%s8691_s24 + $0x18] sm:$0xff] %vm4756_vm12, %v8206_v26 }
 0xba1   :  { %vm3632_vm13 = vcmp.gt.f32.partialorder %v3612_v36, 0.0  ;;  %v3654_v63 = vmul.f32 %v8121_v38, %v3612_v36  ;;  %v5632_v55 = vpop.eup %5631  ;;  %v3835_v3 = vmul.f32 1.442695, %v3816_v20 }
 0xba2   :  { %3881 = vrot.lane.b32.xlu2 %v5632_v55, %s5727_s29 }
 0xba3   :  { %v3670_v52 = vsel %vm3632_vm13, %v3612_v36, %v3654_v63  ;;  %5633 = vpow2.f32 %v3835_v3 }
 0xba4   :  { %5165 = vmatmul.msk.f32.gmra.mxu2 %vm481_vm1, %v3670_v52  ;;  %v3761_v37 = vpop.f32.mrf.mxu2  ;;  %v5302_v52 = vld [vmem:[#allocation7] ss:$0 sm:$0xff] }
 0xba5   :  { %v8219_v13 = vadd.f32 %v8174_v56, %v3761_v37  ;;  %v3797_v37 = vld [vmem:[%s8695_s2] sm:$0xff] }
 0xba6   :  { %v3614_v5 = vpop.f32.mrf.mxu1 }
 0xba7   :  { %v3615_v62 = vadd.f32 %v8119_v40, %v3614_v5  ;;  %v3817_v2 = vmul.f32 0.5, %v8219_v13  ;;  %4761 = vst.msk [vmem:[%s8691_s24 + $0x20] sm:$0xff] %vm4756_vm12, %v8219_v13 }
 0xba9   :  { %vm3633_vm14 = vcmp.gt.f32.partialorder %v3615_v62, 0.0  ;;  %v3655_v4 = vmul.f32 %v8121_v38, %v3615_v62  ;;  %v5634_v12 = vpop.eup %5633  ;;  %v3837_v31 = vmul.f32 1.442695, %v3817_v2 }
 0xbaa   :  { %3883 = vrot.lane.b32.xlu0 %v5634_v12, %s5727_s29 }
 0xbab   :  { %v3671_v30 = vsel %vm3633_vm14, %v3615_v62, %v3655_v4  ;;  %5635 = vpow2.f32 %v3837_v31  ;;  %v3798_v4 = vld [vmem:[%s8695_s2 + $0x8] sm:$0xff] }
 0xbac   :  { %5166 = vmatmul.msk.f32.gmra.mxu2 %vm481_vm1, %v3671_v30  ;;  %v3764_v40 = vpop.f32.mrf.mxu2 }
 0xbad   :  { %v8232_v11 = vadd.f32 %v8174_v56, %v3764_v40  ;;  %v3799_v40 = vld [vmem:[%s8695_s2 + $0x10] sm:$0xff] }
 0xbaf   :  { %v3818_v53 = vmul.f32 0.5, %v8232_v11  ;;  %4762 = vst.msk [vmem:[%s8691_s24 + $0x28] sm:$0xff] %vm4756_vm12, %v8232_v11 }
 0xbb1   :  { %v5636_v38 = vpop.eup %5635  ;;  %v3839_v48 = vmul.f32 1.442695, %v3818_v53 }
 0xbb2   :  { %3885 = vrot.lane.b32.xlu1 %v5636_v38, %s5727_s29 }
 0xbb3   :  { %5637 = vpow2.f32 %v3839_v48  ;;  %v3800_v48 = vld [vmem:[%s8695_s2 + $0x18] sm:$0xff] }
 0xbb4   :  { %v3767_v45 = vpop.f32.mrf.mxu2 }
 0xbb5   :  { %v8242_v49 = vadd.f32 %v8174_v56, %v3767_v45 }
 0xbb7   :  { %v3819_v28 = vmul.f32 0.5, %v8242_v49  ;;  %4763 = vst.msk [vmem:[%s8691_s24 + $0x30] sm:$0xff] %vm4756_vm12, %v8242_v49 }
 0xbb9   :  { %v5638_v39 = vpop.eup %5637  ;;  %v3841_v6 = vmul.f32 1.442695, %v3819_v28 }
 0xbba   :  { %3887 = vrot.lane.b32.xlu2 %v5638_v39, %s5727_s29  ;;  %v36_v39 = vstv %s8696_s20 }
 0xbbb   :  { %5639 = vpow2.f32 %v3841_v6  ;;  %37 = vst [vmem:[#allocation8] sm:$0x1] %v36_v39 }
 0xbbc   :  { %v3770_v27 = vpop.f32.mrf.mxu2 }
 0xbbd   :  { %v8252_v58 = vadd.f32 %v8174_v56, %v3770_v27 }
 0xbbf   :  { %v3820_v10 = vmul.f32 0.5, %v8252_v58  ;;  %4764 = vst.msk [vmem:[%s8691_s24 + $0x38] sm:$0xff] %vm4756_vm12, %v8252_v58 }
 0xbc1   :  { %v5640_v29 = vpop.eup %5639  ;;  %v3843_v15 = vmul.f32 1.442695, %v3820_v10 }
 0xbc2   :  { %3889 = vrot.lane.b32.xlu0 %v5640_v29, %s5727_s29 }
 0xbc3   :  { %5641 = vpow2.f32 %v3843_v15 }
 0xbc4   :  { %v3773_v61 = vpop.f32.mrf.mxu2 }
 0xbc5   :  { %v8262_v51 = vadd.f32 %v8174_v56, %v3773_v61  ;;  %v3802_v61 = vld [vmem:[%s8695_s2 + $0x28] sm:$0xff] }
 0xbc7   :  { %v3821_v17 = vmul.f32 0.5, %v8262_v51  ;;  %4765 = vst.msk [vmem:[%s8691_s24 + $0x40] sm:$0xff] %vm4756_vm12, %v8262_v51 }
 0xbc9   :  { %v5642_v54 = vpop.eup %5641  ;;  %v3845_v57 = vmul.f32 1.442695, %v3821_v17 }
 0xbca   :  { %3891 = vrot.lane.b32.xlu1 %v5642_v54, %s5727_s29 }
 0xbcb   :  { %5643 = vpow2.f32 %v3845_v57 }
 0xbcc   :  { %v3776_v50 = vpop.f32.mrf.mxu2 }
 0xbcd   :  { %v8272_v42 = vadd.f32 %v8174_v56, %v3776_v50 }
 0xbcf   :  { %v3822_v7 = vmul.f32 0.5, %v8272_v42  ;;  %4766 = vst.msk [vmem:[%s8691_s24 + $0x48] sm:$0xff] %vm4756_vm12, %v8272_v42 }
 0xbd1   :  { %v5644_v60 = vpop.eup %5643  ;;  %v3847_v33 = vmul.f32 1.442695, %v3822_v7 }
 0xbd2   :  { %3893 = vrot.lane.b32.xlu2 %v5644_v60, %s5727_s29 }
 0xbd3   :  { %5645 = vpow2.f32 %v3847_v33 }
 0xbd4   :  { %v3779_v9 = vpop.f32.mrf.mxu2 }
 0xbd5   :  { %v8282_v46 = vadd.f32 %v8174_v56, %v3779_v9 }
 0xbd7   :  { %v3823_v1 = vmul.f32 0.5, %v8282_v46  ;;  %4767 = vst.msk [vmem:[%s8691_s24 + $0x50] sm:$0xff] %vm4756_vm12, %v8282_v46 }
 0xbd9   :  { %v5646_v8 = vpop.eup %5645  ;;  %v3849_v25 = vmul.f32 1.442695, %v3823_v1 }
 0xbda   :  { %3895 = vrot.lane.b32.xlu0 %v5646_v8, %s5727_s29  ;;  %v3803_v8 = vld [vmem:[%s8695_s2 + $0x30] sm:$0xff] }
 0xbdb   :  { %5647 = vpow2.f32 %v3849_v25 }
 0xbdc   :  { %v3782_v41 = vpop.f32.mrf.mxu2 }
 0xbdd   :  { %v8292_v32 = vadd.f32 %v8174_v56, %v3782_v41  ;;  %v5303_v41 = vld [vmem:[#allocation8] ss:$0 sm:$0xff] }
 0xbdf   :  { %v3824_v44 = vmul.f32 0.5, %v8292_v32  ;;  %4768 = vst.msk [vmem:[%s8691_s24 + $0x58] sm:$0xff] %vm4756_vm12, %v8292_v32 }
 0xbe1   :  { %v5648_v43 = vpop.eup %5647  ;;  %v3851_v18 = vmul.f32 1.442695, %v3824_v44  ;;  %v4137_v44 = vld [vmem:[%s8697_s18 + $0x30] sm:$0xff] }
 0xbe2   :  { %3897 = vrot.lane.b32.xlu1 %v5648_v43, %s5727_s29  ;;  %v3804_v43 = vld [vmem:[%s8695_s2 + $0x38] sm:$0xff] }
 0xbe3   :  { %5649 = vpow2.f32 %v3851_v18 }
 0xbe4   :  { %v3785_v23 = vpop.f32.mrf.mxu2 }
 0xbe5   :  { %v8305_v19 = vadd.f32 %v8174_v56, %v3785_v23 }
 0xbe7   :  { %v3825_v16 = vmul.f32 0.5, %v8305_v19  ;;  %4769 = vst.msk [vmem:[%s8691_s24 + $0x60] sm:$0xff] %vm4756_vm12, %v8305_v19 }
 0xbe9   :  { %v5650_v21 = vpop.eup %5649  ;;  %v3853_v24 = vmul.f32 1.442695, %v3825_v16 }
 0xbea   :  { %3899 = vrot.lane.b32.xlu2 %v5650_v21, %s5727_s29 }
 0xbeb   :  { %5651 = vpow2.f32 %v3853_v24  ;;  %v4136_v24 = vld [vmem:[%s8697_s18 + $0x28] sm:$0xff] }
 0xbec   :  { %v3788_v14 = vpop.f32.mrf.mxu2 }
 0xbed   :  { %v8321_v36 = vadd.f32 %v8174_v56, %v3788_v14 }
 0xbef   :  { %v3826_v20 = vmul.f32 0.5, %v8321_v36  ;;  %4770 = vst.msk [vmem:[%s8691_s24 + $0x68] sm:$0xff] %vm4756_vm12, %v8321_v36 }
 0xbf1   :  { %v5652_v63 = vpop.eup %5651  ;;  %v3855_v55 = vmul.f32 1.442695, %v3826_v20 }
 0xbf2   :  { %3901 = vrot.lane.b32.xlu0 %v5652_v63, %s5727_s29 }
 0xbf3   :  { %5653 = vpow2.f32 %v3855_v55 }
 0xbf9   :  { %v5654_v3 = vpop.eup %5653 }
 0xbfa   :  { %3903 = vrot.lane.b32.xlu1 %v5654_v3, %s5727_s29  ;;  %v4135_v3 = vld [vmem:[%s8697_s18 + $0x20] sm:$0xff] }
 0xbfc   :  { %v3882_v53 = vpop.permute.xlu2 %3881 }
 0xbfd   :  { %v3927_v38 = vmul.f32 %v3882_v53, %v3799_v40  ;;  %v3810_v40 = vld [vmem:[%s8695_s2 + $0x68] sm:$0xff] }
 0xc02   :  { %4096 = vperm.xlu1 %5294, %v5302_v52   ;;  %v4134_v52 = vld [vmem:[%s8697_s18 + $0x18] sm:$0xff] }
 0xc04   :  { %v3878_v5 = vpop.permute.xlu0 %3877 }
 0xc05   :  { %v3925_v62 = vmul.f32 %v3878_v5, %v3797_v37 }
 0xc07   :  { %v3941_v2 = vadd.f32 %v3925_v62, %v8177_v47  ;;  %v3943_v47 = vadd.f32 %v3927_v38, %v8196_v35  ;;  %v3801_v35 = vld [vmem:[%s8695_s2 + $0x20] sm:$0xff] }
 0xc09   :  { %5167 = vmatmul.msk.f32.vlgmr.msra.gmra.mxu3 %vm114_vm0, %v3941_v2 }
 0xc0c   :  { %v3880_v12 = vpop.permute.xlu1 %3879 }
 0xc0d   :  { %v3926_v31 = vmul.f32 %v3880_v12, %v3798_v4  ;;  %v3809_v12 = vld [vmem:[%s8695_s2 + $0x60] sm:$0xff] }
 0xc0f   :  { %v3942_v30 = vadd.f32 %v3926_v31, %v8186_v22 }
 0xc11   :  { %5168 = vmatmul.msk.f32.gmra.mxu3 %vm114_vm0, %v3942_v30 }
 0xc14   :  { %v3888_v17 = vpop.permute.xlu2 %3887 }
 0xc15   :  { %v3930_v57 = vmul.f32 %v3888_v17, %v3802_v61 }
 0xc17   :  { %v3946_v60 = vadd.f32 %v3930_v57, %v8232_v11 }
 0xc19   :  { %5169 = vmatmul.msk.f32.gmra.mxu3 %vm114_vm0, %v3943_v47  ;;  %v4133_v47 = vld [vmem:[%s8697_s18 + $0x10] sm:$0xff] }
 0xc1c   :  { %v3884_v45 = vpop.permute.xlu0 %3883 }
 0xc1d   :  { %v3928_v28 = vmul.f32 %v3884_v45, %v3800_v48  ;;  %v4132_v48 = vld [vmem:[%s8697_s18 + $0x8] sm:$0xff] }
 0xc1f   :  { %v3944_v22 = vadd.f32 %v3928_v28, %v8206_v26  ;;  %v4138_v26 = vld [vmem:[%s8697_s18 + $0x38] sm:$0xff] }
 0xc20   :  { %4199 = vmatpush.msrb.mxu0 %v4138_v26 }
 0xc21   :  { %5170 = vmatmul.msk.f32.gmra.mxu3 %vm114_vm0, %v3944_v22  ;;  %v3811_v22 = vld [vmem:[%s8695_s2 + $0x70] sm:$0xff] }
 0xc22   :  { %4200 = vmatpush.msrb.mxu0 %v4137_v44 }
 0xc24   :  { %v3886_v6 = vpop.permute.xlu1 %3885  ;;  %4201 = vmatpush.msrb.mxu0 %v4136_v24 }
 0xc25   :  { %v3929_v27 = vmul.f32 %v3886_v6, %v3801_v35 }
 0xc26   :  { %4202 = vmatpush.msrb.mxu0 %v4135_v3 }
 0xc27   :  { %v3791_v10 = vpop.f32.mrf.mxu2  ;;  %v3945_v15 = vadd.f32 %v3929_v27, %v8219_v13 }
 0xc28   :  { %v8358_v29 = vadd.f32 %v8174_v56, %v3791_v10  ;;  %4203 = vmatpush.msrb.mxu0 %v4134_v52 }
 0xc29   :  { %5171 = vmatmul.msk.f32.gmra.mxu3 %vm114_vm0, %v3945_v15 }
 0xc2a   :  { %v3827_v54 = vmul.f32 0.5, %v8358_v29  ;;  %4771 = vst.msk [vmem:[%s8691_s24 + $0x70] sm:$0xff] %vm4756_vm12, %v8358_v29  ;;  %4204 = vmatpush.msrb.mxu0 %v4133_v47 }
 0xc2c   :  { %v3857_v13 = vmul.f32 1.442695, %v3827_v54  ;;  %v3894_v59 = vpop.permute.xlu2 %3893  ;;  %4205 = vmatpush.msrb.mxu0 %v4132_v48 }
 0xc2d   :  { %v3933_v16 = vmul.f32 %v3894_v59, %v3805_v34  ;;  %v4317_v59 = vld [vmem:[%s8699_s21 + $0x30] sm:$0xff] }
 0xc2e   :  { %5655 = vpow2.f32 %v3857_v13 }
 0xc2f   :  { %v3794_v50 = vpop.f32.mrf.mxu2  ;;  %v3949_v21 = vadd.f32 %v3933_v16, %v8262_v51  ;;  %v3807_v51 = vld [vmem:[%s8695_s2 + $0x50] sm:$0xff] }
 0xc30   :  { %v8375_v7 = vadd.f32 %v8174_v56, %v3794_v50 }
 0xc31   :  { %5172 = vmatmul.msk.f32.gmra.mxu3 %vm114_vm0, %v3946_v60 }
 0xc32   :  { %v3828_v33 = vmul.f32 0.5, %v8375_v7  ;;  %4772 = vst.msk [vmem:[%s8691_s24 + $0x78] sm:$0xff] %vm4756_vm12, %v8375_v7 }
 0xc34   :  { %v5656_v9 = vpop.eup %5655  ;;  %v3859_v1 = vmul.f32 1.442695, %v3828_v33  ;;  %v3890_v56 = vpop.permute.xlu0 %3889 }
 0xc35   :  { %3905 = vrot.lane.b32.xlu2 %v5656_v9, %s5727_s29  ;;  %v3931_v11 = vmul.f32 %v3890_v56, %v3803_v8  ;;  %v3812_v56 = vld [vmem:[%s8695_s2 + $0x78] sm:$0xff] }
 0xc36   :  { %5657 = vpow2.f32 %v3859_v1  ;;  %v4318_v1 = vld [vmem:[%s8699_s21 + $0x38] sm:$0xff] }
 0xc37   :  { %v3947_v25 = vadd.f32 %v3931_v11, %v8242_v49  ;;  %4379 = vmatpush.msrb.mxu1 %v4318_v1 }
 0xc39   :  { %5173 = vmatmul.msk.f32.gmra.mxu3 %vm114_vm0, %v3947_v25  ;;  %4380 = vmatpush.msrb.mxu1 %v4317_v59 }
 0xc3c   :  { %v5658_v0 = vpop.eup %5657  ;;  %v3892_v18 = vpop.permute.xlu1 %3891 }
 0xc3d   :  { %3907 = vrot.lane.b32.xlu0 %v5658_v0, %s5727_s29  ;;  %4276 = vperm.xlu2 %5295, %v5303_v41   ;;  %v3932_v23 = vmul.f32 %v3892_v18, %v3804_v43 }
 0xc3f   :  { %v3948_v49 = vadd.f32 %v3932_v23, %v8252_v58  ;;  %v3806_v58 = vld [vmem:[%s8695_s2 + $0x48] sm:$0xff] }
 0xc41   :  { %5174 = vmatmul.msk.f32.gmra.mxu3 %vm114_vm0, %v3948_v49 }
 0xc44   :  { %v3900_v62 = vpop.permute.xlu2 %3899 }
 0xc49   :  { %5175 = vmatmul.msk.f32.gmra.mxu3 %vm114_vm0, %v3949_v21 }
 0xc4c   :  { %v3896_v14 = vpop.permute.xlu0 %3895 }
 0xc4d   :  { %v3934_v20 = vmul.f32 %v3896_v14, %v3806_v58 }
 0xc4f   :  { %v3950_v63 = vadd.f32 %v3934_v20, %v8272_v42  ;;  %v3808_v42 = vld [vmem:[%s8695_s2 + $0x58] sm:$0xff] }
 0xc50   :  { %v3936_v2 = vmul.f32 %v3900_v62, %v3808_v42 }
 0xc51   :  { %5176 = vmatmul.msk.f32.gmra.mxu3 %vm114_vm0, %v3950_v63 }
 0xc52   :  { %v3952_v4 = vadd.f32 %v3936_v2, %v8292_v32 }
 0xc54   :  { %v3898_v55 = vpop.permute.xlu1 %3897 }
 0xc55   :  { %v3935_v37 = vmul.f32 %v3898_v55, %v3807_v51  ;;  %v4316_v51 = vld [vmem:[%s8699_s21 + $0x28] sm:$0xff] }
 0xc56   :  { %4381 = vmatpush.msrb.mxu1 %v4316_v51 }
 0xc57   :  { %v3951_v5 = vadd.f32 %v3935_v37, %v8282_v46 }
 0xc59   :  { %5177 = vmatmul.msk.f32.gmra.mxu3 %vm114_vm0, %v3951_v5 }
 0xc61   :  { %5178 = vmatmul.msk.f32.gmra.mxu3 %vm114_vm0, %v3952_v4  ;;  %v4315_v4 = vld [vmem:[%s8699_s21 + $0x20] sm:$0xff] }
 0xc62   :  { %4382 = vmatpush.msrb.mxu1 %v4315_v4 }
 0xc64   :  { %v3902_v31 = vpop.permute.xlu0 %3901 }
 0xc65   :  { %v3937_v30 = vmul.f32 %v3902_v31, %v3809_v12  ;;  %v4314_v31 = vld [vmem:[%s8699_s21 + $0x18] sm:$0xff] }
 0xc66   :  { %4383 = vmatpush.msrb.mxu1 %v4314_v31 }
 0xc67   :  { %v3953_v46 = vadd.f32 %v3937_v30, %v8305_v19  ;;  %v4131_v19 = vld [vmem:[%s8697_s18] sm:$0xff] }
 0xc68   :  { %4206 = vmatpush.msrb.mxu0 %v4131_v19 }
 0xc69   :  { %5179 = vmatmul.msk.f32.gmra.mxu3 %vm114_vm0, %v3953_v46 }
 0xc6c   :  { %v3904_v53 = vpop.permute.xlu1 %3903 }
 0xc6d   :  { %v3938_v38 = vmul.f32 %v3904_v53, %v3810_v40 }
 0xc6f   :  { %v3954_v32 = vadd.f32 %v3938_v38, %v8321_v36  ;;  %v8451_v36 = vld [vmem:[%s9157_s6] ss:$0 sm:$0xff] }
 0xc71   :  { %5180 = vmatmul.msk.f32.gmra.mxu3 %vm114_vm0, %v3954_v32 }
 0xc74   :  { %v8457_v39 = vpop.permute.xlu1 %4096 }
 0xc8c   :  { %v4028_v45 = vpop.f32.mrf.mxu3 }
 0xc8d   :  { %v4029_v28 = vadd.f32 %v8451_v36, %v4028_v45 }
 0xc8f   :  { %vm4077_vm15 = vcmp.gt.f32.partialorder %v4029_v28, 0.0  ;;  %v4099_v35 = vmul.f32 %v8457_v39, %v4029_v28  ;;  %v3906_v6 = vpop.permute.xlu2 %3905 }
 0xc90   :  { %v3939_v27 = vmul.f32 %v3906_v6, %v3811_v22  ;;  %v4312_v6 = vld [vmem:[%s8699_s21 + $0x8] sm:$0xff] }
 0xc91   :  { %v4115_v10 = vsel %vm4077_vm15, %v4029_v28, %v4099_v35  ;;  %v4313_v35 = vld [vmem:[%s8699_s21 + $0x10] sm:$0xff] }
 0xc92   :  { %v3955_v15 = vadd.f32 %v3939_v27, %v8358_v29  ;;  %5183 = vmatmul.msk.f32.vlgmr.msrb.gmra.mxu0 %vm481_vm1, %v4115_v10  ;;  %4384 = vmatpush.msrb.mxu1 %v4313_v35  ;;  %v4311_v10 = vld [vmem:[%s8699_s21] sm:$0xff] }
 0xc94   :  { %5181 = vmatmul.msk.f32.gmra.mxu3 %vm114_vm0, %v3955_v15  ;;  %v4031_v26 = vpop.f32.mrf.mxu3  ;;  %4385 = vmatpush.msrb.mxu1 %v4312_v6 }
 0xc95   :  { %v4032_v61 = vadd.f32 %v8451_v36, %v4031_v26 }
 0xc96   :  { %4386 = vmatpush.msrb.mxu1 %v4311_v10 }
 0xc97   :  { %vm4078_vm3 = vcmp.gt.f32.partialorder %v4032_v61, 0.0  ;;  %v4100_v17 = vmul.f32 %v8457_v39, %v4032_v61 }
 0xc99   :  { %v4116_v54 = vsel %vm4078_vm3, %v4032_v61, %v4100_v17  ;;  %v8534_v17 = vld [vmem:[%s8698_s19] ss:$0 sm:$0xff] }
 0xc9a   :  { %5184 = vmatmul.msk.f32.gmra.mxu0 %vm481_vm1, %v4116_v54 }
 0xc9c   :  { %v4034_v13 = vpop.f32.mrf.mxu3 }
 0xc9d   :  { %v4035_v57 = vadd.f32 %v8451_v36, %v4034_v13 }
 0xc9f   :  { %vm4079_vm4 = vcmp.gt.f32.partialorder %v4035_v57, 0.0  ;;  %v4101_v50 = vmul.f32 %v8457_v39, %v4035_v57 }
 0xca1   :  { %v4117_v29 = vsel %vm4079_vm4, %v4035_v57, %v4101_v50  ;;  %v8537_v57 = vpop.permute.xlu2 %4276 }
 0xca2   :  { %5185 = vmatmul.msk.f32.gmra.mxu0 %vm481_vm1, %v4117_v29 }
 0xca4   :  { %v4037_v60 = vpop.f32.mrf.mxu3 }
 0xca5   :  { %v4038_v33 = vadd.f32 %v8451_v36, %v4037_v60 }
 0xca7   :  { %vm4080_vm5 = vcmp.gt.f32.partialorder %v4038_v33, 0.0  ;;  %v4102_v9 = vmul.f32 %v8457_v39, %v4038_v33 }
 0xca9   :  { %v4118_v8 = vsel %vm4080_vm5, %v4038_v33, %v4102_v9 }
 0xcaa   :  { %5186 = vmatmul.msk.f32.gmra.mxu0 %vm481_vm1, %v4118_v8 }
 0xcac   :  { %v4040_v11 = vpop.f32.mrf.mxu3 }
 0xcad   :  { %v4041_v25 = vadd.f32 %v8451_v36, %v4040_v11 }
 0xcaf   :  { %v3908_v41 = vpop.permute.xlu0 %3907  ;;  %vm4081_vm6 = vcmp.gt.f32.partialorder %v4041_v25, 0.0  ;;  %v4103_v0 = vmul.f32 %v8457_v39, %v4041_v25 }
 0xcb0   :  { %v3940_v44 = vmul.f32 %v3908_v41, %v3812_v56 }
 0xcb1   :  { %v4119_v18 = vsel %vm4081_vm6, %v4041_v25, %v4103_v0 }
 0xcb2   :  { %v3956_v43 = vadd.f32 %v3940_v44, %v8375_v7  ;;  %5187 = vmatmul.msk.f32.gmra.mxu0 %vm481_vm1, %v4119_v18 }
 0xcb4   :  { %5182 = vmatmul.msk.f32.gmra.mxu3 %vm114_vm0, %v3956_v43  ;;  %v4043_v23 = vpop.f32.mrf.mxu3 }
 0xcb5   :  { %v4044_v49 = vadd.f32 %v8451_v36, %v4043_v23 }
 0xcb7   :  { %vm4082_vm8 = vcmp.gt.f32.partialorder %v4044_v49, 0.0  ;;  %v4104_v34 = vmul.f32 %v8457_v39, %v4044_v49 }
 0xcb9   :  { %v4120_v16 = vsel %vm4082_vm8, %v4044_v49, %v4104_v34 }
 0xcba   :  { %5188 = vmatmul.msk.f32.gmra.mxu0 %vm481_vm1, %v4120_v16 }
 0xcbc   :  { %v4046_v7 = vpop.f32.mrf.mxu3 }
 0xcbd   :  { %v4047_v21 = vadd.f32 %v8451_v36, %v4046_v7 }
 0xcbf   :  { %vm4083_vm7 = vcmp.gt.f32.partialorder %v4047_v21, 0.0  ;;  %v4105_v24 = vmul.f32 %v8457_v39, %v4047_v21 }
 0xcc1   :  { %v4121_v58 = vsel %vm4083_vm7, %v4047_v21, %v4105_v24 }
 0xcc2   :  { %5189 = vmatmul.msk.f32.gmra.mxu0 %vm481_vm1, %v4121_v58 }
 0xcc4   :  { %v4049_v14 = vpop.f32.mrf.mxu3 }
 0xcc5   :  { %v4050_v20 = vadd.f32 %v8451_v36, %v4049_v14 }
 0xcc7   :  { %vm4084_vm2 = vcmp.gt.f32.partialorder %v4050_v20, 0.0  ;;  %v4106_v63 = vmul.f32 %v8457_v39, %v4050_v20 }
 0xcc9   :  { %v4122_v55 = vsel %vm4084_vm2, %v4050_v20, %v4106_v63 }
 0xcca   :  { %5190 = vmatmul.msk.f32.gmra.mxu0 %vm481_vm1, %v4122_v55 }
 0xccc   :  { %v4052_v3 = vpop.f32.mrf.mxu3 }
 0xccd   :  { %v4053_v52 = vadd.f32 %v8451_v36, %v4052_v3 }
 0xccf   :  { %vm4085_vm9 = vcmp.gt.f32.partialorder %v4053_v52, 0.0  ;;  %v4107_v37 = vmul.f32 %v8457_v39, %v4053_v52 }
 0xcd1   :  { %v4123_v5 = vsel %vm4085_vm9, %v4053_v52, %v4107_v37 }
 0xcd2   :  { %5191 = vmatmul.msk.f32.gmra.mxu0 %vm481_vm1, %v4123_v5 }
 0xcd4   :  { %v4055_v42 = vpop.f32.mrf.mxu3 }
 0xcd5   :  { %v4056_v62 = vadd.f32 %v8451_v36, %v4055_v42 }
 0xcd7   :  { %vm4086_vm10 = vcmp.gt.f32.partialorder %v4056_v62, 0.0  ;;  %v4108_v2 = vmul.f32 %v8457_v39, %v4056_v62 }
 0xcd9   :  { %v4124_v12 = vsel %vm4086_vm10, %v4056_v62, %v4108_v2 }
 0xcda   :  { %5192 = vmatmul.msk.f32.gmra.mxu0 %vm481_vm1, %v4124_v12 }
 0xcdc   :  { %v4058_v30 = vpop.f32.mrf.mxu3 }
 0xcdd   :  { %v4059_v46 = vadd.f32 %v8451_v36, %v4058_v30 }
 0xcdf   :  { %vm4087_vm11 = vcmp.gt.f32.partialorder %v4059_v46, 0.0  ;;  %v4109_v40 = vmul.f32 %v8457_v39, %v4059_v46 }
 0xce1   :  { %v4125_v53 = vsel %vm4087_vm11, %v4059_v46, %v4109_v40 }
 0xce2   :  { %5193 = vmatmul.msk.f32.gmra.mxu0 %vm481_vm1, %v4125_v53 }
 0xce4   :  { %v4061_v38 = vpop.f32.mrf.mxu3 }
 0xce5   :  { %v4062_v32 = vadd.f32 %v8451_v36, %v4061_v38 }
 0xce7   :  { %vm4088_vm12 = vcmp.gt.f32.partialorder %v4062_v32, 0.0  ;;  %v4110_v47 = vmul.f32 %v8457_v39, %v4062_v32 }
 0xce9   :  { %v4126_v48 = vsel %vm4088_vm12, %v4062_v32, %v4110_v47 }
 0xcea   :  { %5194 = vmatmul.msk.f32.gmra.mxu0 %vm481_vm1, %v4126_v48 }
 0xcec   :  { %v4064_v19 = vpop.f32.mrf.mxu3 }
 0xced   :  { %v4065_v45 = vadd.f32 %v8451_v36, %v4064_v19 }
 0xcef   :  { %vm4089_vm13 = vcmp.gt.f32.partialorder %v4065_v45, 0.0  ;;  %v4111_v28 = vmul.f32 %v8457_v39, %v4065_v45 }
 0xcf1   :  { %v4127_v22 = vsel %vm4089_vm13, %v4065_v45, %v4111_v28 }
 0xcf2   :  { %5195 = vmatmul.msk.f32.gmra.mxu0 %vm481_vm1, %v4127_v22 }
 0xcf4   :  { %v4067_v27 = vpop.f32.mrf.mxu3 }
 0xcf5   :  { %v4068_v15 = vadd.f32 %v8451_v36, %v4067_v27 }
 0xcf7   :  { %vm4090_vm14 = vcmp.gt.f32.partialorder %v4068_v15, 0.0  ;;  %v4112_v26 = vmul.f32 %v8457_v39, %v4068_v15 }
 0xcf9   :  { %v4128_v61 = vsel %vm4090_vm14, %v4068_v15, %v4112_v26 }
 0xcfa   :  { %5196 = vmatmul.msk.f32.gmra.mxu0 %vm481_vm1, %v4128_v61 }
 0xd0f   :  { %v4208_v54 = vpop.f32.mrf.mxu0 }
 0xd10   :  { %v4209_v13 = vadd.f32 %v8534_v17, %v4208_v54 }
 0xd12   :  { %vm4257_vm15 = vcmp.gt.f32.partialorder %v4209_v13, 0.0  ;;  %v4279_v50 = vmul.f32 %v8537_v57, %v4209_v13 }
 0xd14   :  { %v4295_v29 = vsel %vm4257_vm15, %v4209_v13, %v4279_v50  ;;  %v8589_v50 = vld [vmem:[%s8700_s22] ss:$0 sm:$0xff] }
 0xd15   :  { %5199 = vmatmul.msk.f32.vlgmr.msrb.gmra.mxu1 %vm481_vm1, %v4295_v29 }
 0xd17   :  { %v4070_v60 = vpop.f32.mrf.mxu3  ;;  %v4211_v9 = vpop.f32.mrf.mxu0 }
 0xd18   :  { %v4071_v33 = vadd.f32 %v8451_v36, %v4070_v60  ;;  %v4212_v8 = vadd.f32 %v8534_v17, %v4211_v9 }
 0xd1a   :  { %vm4091_vm3 = vcmp.gt.f32.partialorder %v4071_v33, 0.0  ;;  %v4113_v1 = vmul.f32 %v8457_v39, %v4071_v33  ;;  %vm4258_vm4 = vcmp.gt.f32.partialorder %v4212_v8, 0.0  ;;  %v4280_v56 = vmul.f32 %v8537_v57, %v4212_v8 }
 0xd1c   :  { %v4129_v11 = vsel %vm4091_vm3, %v4071_v33, %v4113_v1  ;;  %v4296_v25 = vsel %vm4258_vm4, %v4212_v8, %v4280_v56 }
 0xd1d   :  { %5197 = vmatmul.msk.f32.gmra.mxu0 %vm481_vm1, %v4129_v11  ;;  %5200 = vmatmul.msk.f32.gmra.mxu1 %vm481_vm1, %v4296_v25 }
 0xd1f   :  { %v4214_v41 = vpop.f32.mrf.mxu0 }
 0xd20   :  { %v4215_v44 = vadd.f32 %v8534_v17, %v4214_v41 }
 0xd22   :  { %vm4259_vm5 = vcmp.gt.f32.partialorder %v4215_v44, 0.0  ;;  %v4281_v0 = vmul.f32 %v8537_v57, %v4215_v44 }
 0xd24   :  { %v4297_v43 = vsel %vm4259_vm5, %v4215_v44, %v4281_v0 }
 0xd25   :  { %5201 = vmatmul.msk.f32.gmra.mxu1 %vm481_vm1, %v4297_v43 }
 0xd27   :  { %v4217_v18 = vpop.f32.mrf.mxu0 }
 0xd28   :  { %v4218_v23 = vadd.f32 %v8534_v17, %v4217_v18 }
 0xd2a   :  { %vm4260_vm6 = vcmp.gt.f32.partialorder %v4218_v23, 0.0  ;;  %v4282_v49 = vmul.f32 %v8537_v57, %v4218_v23 }
 0xd2c   :  { %v4298_v34 = vsel %vm4260_vm6, %v4218_v23, %v4282_v49 }
 0xd2d   :  { %5202 = vmatmul.msk.f32.gmra.mxu1 %vm481_vm1, %v4298_v34 }
 0xd2f   :  { %v4220_v59 = vpop.f32.mrf.mxu0 }
 0xd30   :  { %v4221_v16 = vadd.f32 %v8534_v17, %v4220_v59 }
 0xd32   :  { %vm4261_vm8 = vcmp.gt.f32.partialorder %v4221_v16, 0.0  ;;  %v4283_v7 = vmul.f32 %v8537_v57, %v4221_v16 }
 0xd34   :  { %v4299_v21 = vsel %vm4261_vm8, %v4221_v16, %v4283_v7 }
 0xd35   :  { %5203 = vmatmul.msk.f32.gmra.mxu1 %vm481_vm1, %v4299_v21 }
 0xd37   :  { %v4073_v24 = vpop.f32.mrf.mxu3  ;;  %v4223_v14 = vpop.f32.mrf.mxu0 }
 0xd38   :  { %v4074_v58 = vadd.f32 %v8451_v36, %v4073_v24  ;;  %v4224_v63 = vadd.f32 %v8534_v17, %v4223_v14 }
 0xd3a   :  { %vm4092_vm7 = vcmp.gt.f32.partialorder %v4074_v58, 0.0  ;;  %v4114_v20 = vmul.f32 %v8457_v39, %v4074_v58  ;;  %vm4262_vm2 = vcmp.gt.f32.partialorder %v4224_v63, 0.0  ;;  %v4284_v51 = vmul.f32 %v8537_v57, %v4224_v63 }
 0xd3c   :  { %v4130_v55 = vsel %vm4092_vm7, %v4074_v58, %v4114_v20  ;;  %v4300_v3 = vsel %vm4262_vm2, %v4224_v63, %v4284_v51 }
 0xd3d   :  { %5198 = vmatmul.msk.f32.gmra.mxu0 %vm481_vm1, %v4130_v55  ;;  %5204 = vmatmul.msk.f32.gmra.mxu1 %vm481_vm1, %v4300_v3 }
 0xd3f   :  { %v4226_v52 = vpop.f32.mrf.mxu0 }
 0xd40   :  { %v4227_v37 = vadd.f32 %v8534_v17, %v4226_v52 }
 0xd42   :  { %vm4263_vm9 = vcmp.gt.f32.partialorder %v4227_v37, 0.0  ;;  %v4285_v36 = vmul.f32 %v8537_v57, %v4227_v37 }
 0xd44   :  { %v4301_v5 = vsel %vm4263_vm9, %v4227_v37, %v4285_v36 }
 0xd45   :  { %5205 = vmatmul.msk.f32.gmra.mxu1 %vm481_vm1, %v4301_v5 }
 0xd47   :  { %v4229_v39 = vpop.f32.mrf.mxu0 }
 0xd48   :  { %v4230_v42 = vadd.f32 %v8534_v17, %v4229_v39 }
 0xd4a   :  { %vm4264_vm10 = vcmp.gt.f32.partialorder %v4230_v42, 0.0  ;;  %v4286_v62 = vmul.f32 %v8537_v57, %v4230_v42 }
 0xd4c   :  { %v4302_v2 = vsel %vm4264_vm10, %v4230_v42, %v4286_v62 }
 0xd4d   :  { %5206 = vmatmul.msk.f32.gmra.mxu1 %vm481_vm1, %v4302_v2 }
 0xd4f   :  { %v4232_v4 = vpop.f32.mrf.mxu0 }
 0xd50   :  { %v4233_v12 = vadd.f32 %v8534_v17, %v4232_v4 }
 0xd52   :  { %vm4265_vm11 = vcmp.gt.f32.partialorder %v4233_v12, 0.0  ;;  %v4287_v31 = vmul.f32 %v8537_v57, %v4233_v12 }
 0xd54   :  { %v4303_v30 = vsel %vm4265_vm11, %v4233_v12, %v4287_v31 }
 0xd55   :  { %5207 = vmatmul.msk.f32.gmra.mxu1 %vm481_vm1, %v4303_v30 }
 0xd57   :  { %v4235_v46 = vpop.f32.mrf.mxu0 }
 0xd58   :  { %v4236_v40 = vadd.f32 %v8534_v17, %v4235_v46 }
 0xd5a   :  { %vm4266_vm12 = vcmp.gt.f32.partialorder %v4236_v40, 0.0  ;;  %v4288_v53 = vmul.f32 %v8537_v57, %v4236_v40 }
 0xd5c   :  { %v4304_v38 = vsel %vm4266_vm12, %v4236_v40, %v4288_v53 }
 0xd5d   :  { %5208 = vmatmul.msk.f32.gmra.mxu1 %vm481_vm1, %v4304_v38 }
 0xd5f   :  { %v4238_v32 = vpop.f32.mrf.mxu0 }
 0xd60   :  { %v4239_v47 = vadd.f32 %v8534_v17, %v4238_v32 }
 0xd62   :  { %vm4267_vm13 = vcmp.gt.f32.partialorder %v4239_v47, 0.0  ;;  %v4289_v48 = vmul.f32 %v8537_v57, %v4239_v47 }
 0xd64   :  { %v4305_v19 = vsel %vm4267_vm13, %v4239_v47, %v4289_v48 }
 0xd65   :  { %5209 = vmatmul.msk.f32.gmra.mxu1 %vm481_vm1, %v4305_v19 }
 0xd67   :  { %v4241_v45 = vpop.f32.mrf.mxu0 }
 0xd68   :  { %v4242_v28 = vadd.f32 %v8534_v17, %v4241_v45 }
 0xd6a   :  { %vm4268_vm14 = vcmp.gt.f32.partialorder %v4242_v28, 0.0  ;;  %v4290_v22 = vmul.f32 %v8537_v57, %v4242_v28 }
 0xd6c   :  { %v4306_v35 = vsel %vm4268_vm14, %v4242_v28, %v4290_v22 }
 0xd6d   :  { %5210 = vmatmul.msk.f32.gmra.mxu1 %vm481_vm1, %v4306_v35 }
 0xd6f   :  { %v4244_v6 = vpop.f32.mrf.mxu0 }
 0xd70   :  { %v4245_v27 = vadd.f32 %v8534_v17, %v4244_v6 }
 0xd72   :  { %vm4269_vm15 = vcmp.gt.f32.partialorder %v4245_v27, 0.0  ;;  %v4291_v10 = vmul.f32 %v8537_v57, %v4245_v27 }
 0xd74   :  { %v4307_v15 = vsel %vm4269_vm15, %v4245_v27, %v4291_v10 }
 0xd75   :  { %5211 = vmatmul.msk.f32.gmra.mxu1 %vm481_vm1, %v4307_v15 }
 0xd77   :  { %v4247_v26 = vpop.f32.mrf.mxu0 }
 0xd78   :  { %v4248_v61 = vadd.f32 %v8534_v17, %v4247_v26 }
 0xd7a   :  { %vm4270_vm3 = vcmp.gt.f32.partialorder %v4248_v61, 0.0  ;;  %v4292_v54 = vmul.f32 %v8537_v57, %v4248_v61 }
 0xd7c   :  { %v4308_v13 = vsel %vm4270_vm3, %v4248_v61, %v4292_v54 }
 0xd7d   :  { %5212 = vmatmul.msk.f32.gmra.mxu1 %vm481_vm1, %v4308_v13 }
 0xd92   :  { %v4388_v29 = vpop.f32.mrf.mxu1 }
 0xd93   :  { %v4389_v60 = vadd.f32 %v8589_v50, %v4388_v29 }
 0xd95   :  { %v5215_v33 = vmul.f32 -1.442695, %v4389_v60 }
 0xd97   :  { %5659 = vpow2.f32 %v5215_v33 }
 0xd9a   :  { %v4250_v9 = vpop.f32.mrf.mxu0  ;;  %v4391_v8 = vpop.f32.mrf.mxu1 }
 0xd9b   :  { %v4251_v1 = vadd.f32 %v8534_v17, %v4250_v9  ;;  %v4392_v25 = vadd.f32 %v8589_v50, %v4391_v8 }
 0xd9d   :  { %v5660_v56 = vpop.eup %5659  ;;  %vm4271_vm4 = vcmp.gt.f32.partialorder %v4251_v1, 0.0  ;;  %v4293_v11 = vmul.f32 %v8537_v57, %v4251_v1  ;;  %v5216_v44 = vmul.f32 -1.442695, %v4392_v25 }
 0xd9e   :  { %v4484_v41 = vadd.f32 1.0, %v5660_v56 }
 0xd9f   :  { %v4309_v0 = vsel %vm4271_vm4, %v4251_v1, %v4293_v11 }
 0xda0   :  { %5661 = vrcp.f32 %v4484_v41  ;;  %5213 = vmatmul.msk.f32.gmra.mxu1 %vm481_vm1, %v4309_v0  ;;  %v4511_v21 = vand.u32 2147483648, %v4484_v41  ;;  %v4509_v58 = vand.u32 2147483647, %v4484_v41  ;;  %vm4505_vm6 = vweird.f32 %v4484_v41 }
 0xda1   :  { %5663 = vpow2.f32 %v5216_v44 }
 0xda2   :  { %v4394_v43 = vpop.f32.mrf.mxu1  ;;  %v4512_v51 = vor.u32 1.1754944e-38, %v4511_v21  ;;  %vm4510_vm7 = vcmp.eq.f32.partialorder %v4509_v58, 8.507059e+37 }
 0xda3   :  { %v4395_v18 = vadd.f32 %v8589_v50, %v4394_v43 }
 0xda5   :  { %v5217_v59 = vmul.f32 -1.442695, %v4395_v18 }
 0xda6   :  { %v5662_v23 = vpop.eup %5661 }
 0xda7   :  { %v5664_v49 = vpop.eup %5663  ;;  %v4501_v34 = vmul.f32 %v5662_v23, %v4484_v41  ;;  %5665 = vpow2.f32 %v5217_v59  ;;  %vm4506_vm5 = vweird.f32 %v5662_v23 }
 0xda8   :  { %v4485_v16 = vadd.f32 1.0, %v5664_v49  ;;  %vm4507_vm8 = vmor %vm4505_vm6, %vm4506_vm5 }
 0xda9   :  { %v4502_v7 = vsub.f32 1.0, %v4501_v34 }
 0xdaa   :  { %5667 = vrcp.f32 %v4485_v16  ;;  %v4397_v14 = vpop.f32.mrf.mxu1  ;;  %v4526_v62 = vand.u32 2147483648, %v4485_v16  ;;  %v4524_v12 = vand.u32 2147483647, %v4485_v16  ;;  %vm4520_vm9 = vweird.f32 %v4485_v16 }
 0xdab   :  { %v4503_v24 = vmul.f32 %v5662_v23, %v4502_v7  ;;  %v4398_v63 = vadd.f32 %v8589_v50, %v4397_v14 }
 0xdac   :  { %v4527_v38 = vor.u32 1.1754944e-38, %v4526_v62  ;;  %vm4525_vm11 = vcmp.eq.f32.partialorder %v4524_v12, 8.507059e+37 }
 0xdad   :  { %v4504_v20 = vadd.f32 %v5662_v23, %v4503_v24  ;;  %v5666_v55 = vpop.eup %5665  ;;  %v5218_v52 = vmul.f32 -1.442695, %v4398_v63 }
 0xdae   :  { %v4486_v5 = vadd.f32 1.0, %v5666_v55 }
 0xdaf   :  { %v4508_v3 = vsel %vm4507_vm8, %v5662_v23, %v4504_v20  ;;  %5669 = vpow2.f32 %v5218_v52 }
 0xdb0   :  { %v5668_v37 = vpop.eup %5667  ;;  %v4513_v36 = vsel %vm4510_vm7, %v4512_v51, %v4508_v3  ;;  %5671 = vrcp.f32 %v4486_v5  ;;  %v4539_v35 = vand.u32 2147483647, %v4486_v5  ;;  %v4541_v6 = vand.u32 2147483648, %v4486_v5 }
 0xdb1   :  { %4740 = vst.msk [vmem:[%s8701_s23] sm:$0xff] %vm114_vm0, %v4513_v36  ;;  %v4516_v39 = vmul.f32 %v5668_v37, %v4485_v16  ;;  %vm4521_vm2 = vweird.f32 %v5668_v37  ;;  %vm4535_vm14 = vweird.f32 %v4486_v5 }
 0xdb2   :  { %v4400_v2 = vpop.f32.mrf.mxu1  ;;  %vm4522_vm10 = vmor %vm4520_vm9, %vm4521_vm2  ;;  %v4542_v60 = vor.u32 1.1754944e-38, %v4541_v6  ;;  %vm4540_vm3 = vcmp.eq.f32.partialorder %v4539_v35, 8.507059e+37 }
 0xdb3   :  { %v4517_v42 = vsub.f32 1.0, %v4516_v39  ;;  %v4401_v31 = vadd.f32 %v8589_v50, %v4400_v2 }
 0xdb5   :  { %v4518_v4 = vmul.f32 %v5668_v37, %v4517_v42  ;;  %v5670_v30 = vpop.eup %5669  ;;  %v5219_v40 = vmul.f32 -1.442695, %v4401_v31 }
 0xdb6   :  { %v5672_v53 = vpop.eup %5671  ;;  %v4487_v32 = vadd.f32 1.0, %v5670_v30 }
 0xdb7   :  { %v4519_v46 = vadd.f32 %v5668_v37, %v4518_v4  ;;  %v4531_v48 = vmul.f32 %v5672_v53, %v4486_v5  ;;  %5673 = vpow2.f32 %v5219_v40  ;;  %vm4536_vm12 = vweird.f32 %v5672_v53 }
 0xdb8   :  { %5675 = vrcp.f32 %v4487_v32  ;;  %vm4537_vm15 = vmor %vm4535_vm14, %vm4536_vm12  ;;  %v4556_v56 = vand.u32 2147483648, %v4487_v32  ;;  %v4554_v41 = vand.u32 2147483647, %v4487_v32 }
 0xdb9   :  { %v4523_v47 = vsel %vm4522_vm10, %v5668_v37, %v4519_v46  ;;  %v4532_v28 = vsub.f32 1.0, %v4531_v48 }
 0xdba   :  { %v4528_v19 = vsel %vm4525_vm11, %v4527_v38, %v4523_v47  ;;  %v4253_v45 = vpop.f32.mrf.mxu0  ;;  %v4403_v27 = vpop.f32.mrf.mxu1  ;;  %v4557_v23 = vor.u32 1.1754944e-38, %v4556_v56  ;;  %vm4555_vm6 = vcmp.eq.f32.partialorder %v4554_v41, 8.507059e+37 }
 0xdbb   :  { %4741 = vst.msk [vmem:[%s8701_s23 + $0x8] sm:$0xff] %vm114_vm0, %v4528_v19  ;;  %v4254_v22 = vadd.f32 %v8534_v17, %v4253_v45  ;;  %v4533_v10 = vmul.f32 %v5672_v53, %v4532_v28  ;;  %v4404_v26 = vadd.f32 %v8589_v50, %v4403_v27 }
 0xdbd   :  { %vm4272_vm13 = vcmp.gt.f32.partialorder %v4254_v22, 0.0  ;;  %v4294_v15 = vmul.f32 %v8537_v57, %v4254_v22  ;;  %v5674_v61 = vpop.eup %5673  ;;  %v4534_v54 = vadd.f32 %v5672_v53, %v4533_v10  ;;  %v5220_v9 = vmul.f32 -1.442695, %v4404_v26 }
 0xdbe   :  { %v5676_v29 = vpop.eup %5675  ;;  %v4488_v33 = vadd.f32 1.0, %v5674_v61 }
 0xdbf   :  { %v4310_v13 = vsel %vm4272_vm13, %v4254_v22, %v4294_v15  ;;  %v4538_v17 = vsel %vm4537_vm15, %v5672_v53, %v4534_v54  ;;  %v4546_v1 = vmul.f32 %v5676_v29, %v4487_v32  ;;  %vm4551_vm4 = vweird.f32 %v5676_v29 }
 0xdc0   :  { %5214 = vmatmul.msk.f32.gmra.mxu1 %vm481_vm1, %v4310_v13  ;;  %v4543_v8 = vsel %vm4540_vm3, %v4542_v60, %v4538_v17  ;;  %5677 = vrcp.f32 %v4488_v33  ;;  %vm4550_vm1 = vweird.f32 %v4487_v32  ;;  %v4571_v24 = vand.u32 2147483648, %v4488_v33 }
 0xdc1   :  { %4742 = vst.msk [vmem:[%s8701_s23 + $0x10] sm:$0xff] %vm114_vm0, %v4543_v8  ;;  %v4547_v57 = vsub.f32 1.0, %v4546_v1  ;;  %5679 = vpow2.f32 %v5220_v9  ;;  %vm4552_vm5 = vmor %vm4550_vm1, %vm4551_vm4  ;;  %v4569_v20 = vand.u32 2147483647, %v4488_v33  ;;  %vm4565_vm7 = vweird.f32 %v4488_v33 }
 0xdc2   :  { %v4406_v11 = vpop.f32.mrf.mxu1  ;;  %v4572_v52 = vor.u32 1.1754944e-38, %v4571_v24 }
 0xdc3   :  { %v4548_v25 = vmul.f32 %v5676_v29, %v4547_v57  ;;  %v4407_v44 = vadd.f32 %v8589_v50, %v4406_v11  ;;  %vm4570_vm9 = vcmp.eq.f32.partialorder %v4569_v20, 8.507059e+37 }
 0xdc5   :  { %v4549_v0 = vadd.f32 %v5676_v29, %v4548_v25  ;;  %v5221_v43 = vmul.f32 -1.442695, %v4407_v44 }
 0xdc6   :  { %v5678_v18 = vpop.eup %5677 }
 0xdc7   :  { %v5680_v49 = vpop.eup %5679  ;;  %v4553_v34 = vsel %vm4552_vm5, %v5676_v29, %v4549_v0  ;;  %v4561_v59 = vmul.f32 %v5678_v18, %v4488_v33  ;;  %5681 = vpow2.f32 %v5221_v43  ;;  %vm4566_vm8 = vweird.f32 %v5678_v18 }
 0xdc8   :  { %v4558_v16 = vsel %vm4555_vm6, %v4557_v23, %v4553_v34  ;;  %v4489_v7 = vadd.f32 1.0, %v5680_v49  ;;  %vm4567_vm2 = vmor %vm4565_vm7, %vm4566_vm8 }
 0xdc9   :  { %4743 = vst.msk [vmem:[%s8701_s23 + $0x18] sm:$0xff] %vm114_vm0, %v4558_v16  ;;  %v4562_v21 = vsub.f32 1.0, %v4561_v59 }
 0xdca   :  { %5683 = vrcp.f32 %v4489_v7  ;;  %v4409_v58 = vpop.f32.mrf.mxu1  ;;  %v4586_v12 = vand.u32 2147483648, %v4489_v7  ;;  %v4584_v46 = vand.u32 2147483647, %v4489_v7  ;;  %vm4580_vm11 = vweird.f32 %v4489_v7 }
 0xdcb   :  { %v4563_v14 = vmul.f32 %v5678_v18, %v4562_v21  ;;  %v4410_v63 = vadd.f32 %v8589_v50, %v4409_v58 }
 0xdcc   :  { %v4587_v48 = vor.u32 1.1754944e-38, %v4586_v12  ;;  %vm4585_vm13 = vcmp.eq.f32.partialorder %v4584_v46, 8.507059e+37 }
 0xdcd   :  { %v5682_v51 = vpop.eup %5681  ;;  %v4564_v55 = vadd.f32 %v5678_v18, %v4563_v14  ;;  %v5222_v3 = vmul.f32 -1.442695, %v4410_v63 }
 0xdce   :  { %v4490_v37 = vadd.f32 1.0, %v5682_v51 }
 0xdcf   :  { %v4568_v36 = vsel %vm4567_vm2, %v5678_v18, %v4564_v55  ;;  %5685 = vpow2.f32 %v5222_v3 }
 0xdd0   :  { %v5684_v5 = vpop.eup %5683  ;;  %v4573_v39 = vsel %vm4570_vm9, %v4572_v52, %v4568_v36  ;;  %5687 = vrcp.f32 %v4490_v37  ;;  %v4601_v22 = vand.u32 2147483648, %v4490_v37  ;;  %v4599_v27 = vand.u32 2147483647, %v4490_v37 }
 0xdd1   :  { %4744 = vst.msk [vmem:[%s8701_s23 + $0x20] sm:$0xff] %vm114_vm0, %v4573_v39  ;;  %v4576_v42 = vmul.f32 %v5684_v5, %v4489_v7  ;;  %vm4581_vm10 = vweird.f32 %v5684_v5  ;;  %vm4595_vm15 = vweird.f32 %v4490_v37 }
 0xdd2   :  { %v4412_v62 = vpop.f32.mrf.mxu1  ;;  %vm4582_vm12 = vmor %vm4580_vm11, %vm4581_vm10  ;;  %v4602_v13 = vor.u32 1.1754944e-38, %v4601_v22  ;;  %vm4600_vm4 = vcmp.eq.f32.partialorder %v4599_v27, 8.507059e+37 }
 0xdd3   :  { %v4577_v2 = vsub.f32 1.0, %v4576_v42  ;;  %v4413_v4 = vadd.f32 %v8589_v50, %v4412_v62 }
 0xdd5   :  { %v5686_v31 = vpop.eup %5685  ;;  %v4578_v30 = vmul.f32 %v5684_v5, %v4577_v2  ;;  %v5223_v40 = vmul.f32 -1.442695, %v4413_v4 }
 0xdd6   :  { %v5688_v53 = vpop.eup %5687  ;;  %v4491_v38 = vadd.f32 1.0, %v5686_v31 }
 0xdd7   :  { %v4579_v32 = vadd.f32 %v5684_v5, %v4578_v30  ;;  %v4591_v47 = vmul.f32 %v5688_v53, %v4490_v37  ;;  %5689 = vpow2.f32 %v5223_v40  ;;  %vm4596_vm14 = vweird.f32 %v5688_v53 }
 0xdd8   :  { %5691 = vrcp.f32 %v4491_v38  ;;  %vm4597_vm3 = vmor %vm4595_vm15, %vm4596_vm14  ;;  %v4616_v1 = vand.u32 2147483648, %v4491_v38  ;;  %v4614_v56 = vand.u32 2147483647, %v4491_v38  ;;  %vm4610_vm5 = vweird.f32 %v4491_v38 }
 0xdd9   :  { %v4583_v19 = vsel %vm4582_vm12, %v5684_v5, %v4579_v32  ;;  %v4592_v45 = vsub.f32 1.0, %v4591_v47 }
 0xdda   :  { %v4588_v28 = vsel %vm4585_vm13, %v4587_v48, %v4583_v19  ;;  %v4415_v35 = vpop.f32.mrf.mxu1  ;;  %v4617_v43 = vor.u32 1.1754944e-38, %v4616_v1  ;;  %vm4615_vm8 = vcmp.eq.f32.partialorder %v4614_v56, 8.507059e+37 }
 0xddb   :  { %4745 = vst.msk [vmem:[%s8701_s23 + $0x28] sm:$0xff] %vm114_vm0, %v4588_v28  ;;  %v4593_v6 = vmul.f32 %v5688_v53, %v4592_v45  ;;  %v4416_v10 = vadd.f32 %v8589_v50, %v4415_v35 }
 0xddd   :  { %v5690_v15 = vpop.eup %5689  ;;  %v4594_v26 = vadd.f32 %v5688_v53, %v4593_v6  ;;  %v5224_v61 = vmul.f32 -1.442695, %v4416_v10 }
 0xdde   :  { %v5692_v54 = vpop.eup %5691  ;;  %v4492_v29 = vadd.f32 1.0, %v5690_v15 }
 0xddf   :  { %v4598_v60 = vsel %vm4597_vm3, %v5688_v53, %v4594_v26  ;;  %v4606_v33 = vmul.f32 %v5692_v54, %v4491_v38  ;;  %5693 = vpow2.f32 %v5224_v61  ;;  %vm4611_vm1 = vweird.f32 %v5692_v54 }
 0xde0   :  { %v4603_v9 = vsel %vm4600_vm4, %v4602_v13, %v4598_v60  ;;  %5695 = vrcp.f32 %v4492_v29  ;;  %vm4612_vm6 = vmor %vm4610_vm5, %vm4611_vm1  ;;  %v4631_v16 = vand.u32 2147483648, %v4492_v29  ;;  %v4629_v24 = vand.u32 2147483647, %v4492_v29 }
 0xde1   :  { %4746 = vst.msk [vmem:[%s8701_s23 + $0x30] sm:$0xff] %vm114_vm0, %v4603_v9  ;;  %v4607_v17 = vsub.f32 1.0, %v4606_v33  ;;  %vm4625_vm2 = vweird.f32 %v4492_v29 }
 0xde2   :  { %v4418_v8 = vpop.f32.mrf.mxu1  ;;  %v4632_v55 = vor.u32 1.1754944e-38, %v4631_v16  ;;  %vm4630_vm10 = vcmp.eq.f32.partialorder %v4629_v24, 8.507059e+37 }
 0xde3   :  { %v4608_v57 = vmul.f32 %v5692_v54, %v4607_v17  ;;  %v4419_v11 = vadd.f32 %v8589_v50, %v4418_v8 }
 0xde5   :  { %v5694_v25 = vpop.eup %5693  ;;  %v4609_v41 = vadd.f32 %v5692_v54, %v4608_v57  ;;  %v5225_v44 = vmul.f32 -1.442695, %v4419_v11 }
 0xde6   :  { %v5696_v0 = vpop.eup %5695  ;;  %v4493_v18 = vadd.f32 1.0, %v5694_v25 }
 0xde7   :  { %v4613_v23 = vsel %vm4612_vm6, %v5692_v54, %v4609_v41  ;;  %v4621_v49 = vmul.f32 %v5696_v0, %v4492_v29  ;;  %5697 = vpow2.f32 %v5225_v44  ;;  %vm4626_vm7 = vweird.f32 %v5696_v0 }
 0xde8   :  { %v4618_v34 = vsel %vm4615_vm8, %v4617_v43, %v4613_v23  ;;  %5699 = vrcp.f32 %v4493_v18  ;;  %vm4627_vm9 = vmor %vm4625_vm2, %vm4626_vm7  ;;  %v4646_v39 = vand.u32 2147483648, %v4493_v18  ;;  %v4644_v2 = vand.u32 2147483647, %v4493_v18 }
 0xde9   :  { %4747 = vst.msk [vmem:[%s8701_s23 + $0x38] sm:$0xff] %vm114_vm0, %v4618_v34  ;;  %v4622_v59 = vsub.f32 1.0, %v4621_v49  ;;  %vm4640_vm12 = vweird.f32 %v4493_v18 }
 0xdea   :  { %v4421_v7 = vpop.f32.mrf.mxu1  ;;  %v4647_v40 = vor.u32 1.1754944e-38, %v4646_v39  ;;  %vm4645_vm14 = vcmp.eq.f32.partialorder %v4644_v2, 8.507059e+37 }
 0xdeb   :  { %v4623_v21 = vmul.f32 %v5696_v0, %v4622_v59  ;;  %v4422_v58 = vadd.f32 %v8589_v50, %v4421_v7 }
 0xded   :  { %v5698_v14 = vpop.eup %5697  ;;  %v4624_v20 = vadd.f32 %v5696_v0, %v4623_v21  ;;  %v5226_v63 = vmul.f32 -1.442695, %v4422_v58 }
 0xdee   :  { %v5700_v51 = vpop.eup %5699  ;;  %v4494_v3 = vadd.f32 1.0, %v5698_v14 }
 0xdef   :  { %v4628_v52 = vsel %vm4627_vm9, %v5696_v0, %v4624_v20  ;;  %v4636_v37 = vmul.f32 %v5700_v51, %v4493_v18  ;;  %5701 = vpow2.f32 %v5226_v63  ;;  %vm4641_vm11 = vweird.f32 %v5700_v51 }
 0xdf0   :  { %v4633_v36 = vsel %vm4630_vm10, %v4632_v55, %v4628_v52  ;;  %5703 = vrcp.f32 %v4494_v3  ;;  %vm4642_vm13 = vmor %vm4640_vm12, %vm4641_vm11  ;;  %v4661_v19 = vand.u32 2147483648, %v4494_v3  ;;  %v4659_v22 = vand.u32 2147483647, %v4494_v3 }
 0xdf1   :  { %4748 = vst.msk [vmem:[%s8701_s23 + $0x40] sm:$0xff] %vm114_vm0, %v4633_v36  ;;  %v4637_v5 = vsub.f32 1.0, %v4636_v37  ;;  %vm4655_vm3 = vweird.f32 %v4494_v3 }
 0xdf2   :  { %v4424_v42 = vpop.f32.mrf.mxu1  ;;  %v4662_v26 = vor.u32 1.1754944e-38, %v4661_v19  ;;  %vm4660_vm1 = vcmp.eq.f32.partialorder %v4659_v22, 8.507059e+37 }
 0xdf3   :  { %v4638_v62 = vmul.f32 %v5700_v51, %v4637_v5  ;;  %v4425_v4 = vadd.f32 %v8589_v50, %v4424_v42 }
 0xdf5   :  { %v5702_v12 = vpop.eup %5701  ;;  %v4639_v31 = vadd.f32 %v5700_v51, %v4638_v62  ;;  %v5227_v30 = vmul.f32 -1.442695, %v4425_v4 }
 0xdf6   :  { %v5704_v46 = vpop.eup %5703  ;;  %v4495_v53 = vadd.f32 1.0, %v5702_v12 }
 0xdf7   :  { %v4643_v38 = vsel %vm4642_vm13, %v5700_v51, %v4639_v31  ;;  %v4651_v32 = vmul.f32 %v5704_v46, %v4494_v3  ;;  %5705 = vpow2.f32 %v5227_v30  ;;  %vm4656_vm15 = vweird.f32 %v5704_v46 }
 0xdf8   :  { %v4648_v47 = vsel %vm4645_vm14, %v4647_v40, %v4643_v38  ;;  %5707 = vrcp.f32 %v4495_v53  ;;  %vm4657_vm4 = vmor %vm4655_vm3, %vm4656_vm15  ;;  %v4676_v33 = vand.u32 2147483648, %v4495_v53  ;;  %v4674_v17 = vand.u32 2147483647, %v4495_v53 }
 0xdf9   :  { %4749 = vst.msk [vmem:[%s8701_s23 + $0x48] sm:$0xff] %vm114_vm0, %v4648_v47  ;;  %v4652_v48 = vsub.f32 1.0, %v4651_v32  ;;  %vm4670_vm6 = vweird.f32 %v4495_v53 }
 0xdfa   :  { %v4427_v45 = vpop.f32.mrf.mxu1  ;;  %v4677_v56 = vor.u32 1.1754944e-38, %v4676_v33  ;;  %vm4675_vm7 = vcmp.eq.f32.partialorder %v4674_v17, 8.507059e+37 }
 0xdfb   :  { %v4653_v28 = vmul.f32 %v5704_v46, %v4652_v48  ;;  %v4428_v35 = vadd.f32 %v8589_v50, %v4427_v45 }
 0xdfd   :  { %v5706_v6 = vpop.eup %5705  ;;  %v4654_v27 = vadd.f32 %v5704_v46, %v4653_v28  ;;  %v5228_v10 = vmul.f32 -1.442695, %v4428_v35 }
 0xdfe   :  { %v5708_v15 = vpop.eup %5707  ;;  %v4496_v61 = vadd.f32 1.0, %v5706_v6 }
 0xdff   :  { %v4658_v54 = vsel %vm4657_vm4, %v5704_v46, %v4654_v27  ;;  %v4666_v13 = vmul.f32 %v5708_v15, %v4495_v53  ;;  %5709 = vpow2.f32 %v5228_v10  ;;  %vm4671_vm5 = vweird.f32 %v5708_v15 }
 0xe00   :  { %v4663_v29 = vsel %vm4660_vm1, %v4662_v26, %v4658_v54  ;;  %5711 = vrcp.f32 %v4496_v61  ;;  %vm4672_vm8 = vmor %vm4670_vm6, %vm4671_vm5  ;;  %v4691_v43 = vand.u32 2147483648, %v4496_v61  ;;  %v4689_v23 = vand.u32 2147483647, %v4496_v61 }
 0xe01   :  { %4750 = vst.msk [vmem:[%s8701_s23 + $0x50] sm:$0xff] %vm114_vm0, %v4663_v29  ;;  %v4667_v60 = vsub.f32 1.0, %v4666_v13  ;;  %vm4685_vm9 = vweird.f32 %v4496_v61 }
 0xe02   :  { %v4692_v59 = vor.u32 1.1754944e-38, %v4691_v43  ;;  %vm4690_vm11 = vcmp.eq.f32.partialorder %v4689_v23, 8.507059e+37 }
 0xe03   :  { %v4668_v9 = vmul.f32 %v5708_v15, %v4667_v60 }
 0xe05   :  { %v5710_v1 = vpop.eup %5709  ;;  %v4669_v8 = vadd.f32 %v5708_v15, %v4668_v9 }
 0xe06   :  { %v5712_v57 = vpop.eup %5711  ;;  %v4497_v11 = vadd.f32 1.0, %v5710_v1 }
 0xe07   :  { %v4673_v25 = vsel %vm4672_vm8, %v5708_v15, %v4669_v8  ;;  %v4681_v41 = vmul.f32 %v5712_v57, %v4496_v61  ;;  %vm4686_vm2 = vweird.f32 %v5712_v57 }
 0xe08   :  { %v4678_v44 = vsel %vm4675_vm7, %v4677_v56, %v4673_v25  ;;  %5713 = vrcp.f32 %v4497_v11  ;;  %vm4687_vm10 = vmor %vm4685_vm9, %vm4686_vm2  ;;  %v4706_v58 = vand.u32 2147483648, %v4497_v11  ;;  %v4704_v20 = vand.u32 2147483647, %v4497_v11 }
 0xe09   :  { %4751 = vst.msk [vmem:[%s8701_s23 + $0x58] sm:$0xff] %vm114_vm0, %v4678_v44  ;;  %v4682_v0 = vsub.f32 1.0, %v4681_v41  ;;  %vm4700_vm13 = vweird.f32 %v4497_v11 }
 0xe0a   :  { %v4707_v51 = vor.u32 1.1754944e-38, %v4706_v58  ;;  %vm4705_vm15 = vcmp.eq.f32.partialorder %v4704_v20, 8.507059e+37 }
 0xe0b   :  { %v4683_v18 = vmul.f32 %v5712_v57, %v4682_v0 }
 0xe0d   :  { %v4684_v49 = vadd.f32 %v5712_v57, %v4683_v18 }
 0xe0e   :  { %v5714_v34 = vpop.eup %5713 }
 0xe0f   :  { %v4688_v16 = vsel %vm4687_vm10, %v5712_v57, %v4684_v49  ;;  %v4696_v7 = vmul.f32 %v5714_v34, %v4497_v11  ;;  %vm4701_vm12 = vweird.f32 %v5714_v34 }
 0xe10   :  { %v4693_v21 = vsel %vm4690_vm11, %v4692_v59, %v4688_v16  ;;  %vm4702_vm14 = vmor %vm4700_vm13, %vm4701_vm12 }
 0xe11   :  { %4752 = vst.msk [vmem:[%s8701_s23 + $0x60] sm:$0xff] %vm114_vm0, %v4693_v21  ;;  %v4697_v24 = vsub.f32 1.0, %v4696_v7 }
 0xe13   :  { %v4698_v14 = vmul.f32 %v5714_v34, %v4697_v24 }
 0xe15   :  { %v4699_v63 = vadd.f32 %v5714_v34, %v4698_v14 }
 0xe17   :  { %v4703_v55 = vsel %vm4702_vm14, %v5714_v34, %v4699_v63 }
 0xe18   :  { %v4708_v3 = vsel %vm4705_vm15, %v4707_v51, %v4703_v55 }
 0xe19   :  { %4753 = vst.msk [vmem:[%s8701_s23 + $0x68] sm:$0xff] %vm114_vm0, %v4708_v3 }
 0xe1d   :  { %v4430_v52 = vpop.f32.mrf.mxu1 }
 0xe1e   :  { %v4431_v37 = vadd.f32 %v8589_v50, %v4430_v52 }
 0xe20   :  { %v5229_v36 = vmul.f32 -1.442695, %v4431_v37 }
 0xe22   :  { %5715 = vpow2.f32 %v5229_v36 }
 0xe28   :  { %v5716_v5 = vpop.eup %5715 }
 0xe29   :  { %v4498_v39 = vadd.f32 1.0, %v5716_v5 }
 0xe2b   :  { %5717 = vrcp.f32 %v4498_v39  ;;  %v4721_v4 = vand.u32 2147483648, %v4498_v39  ;;  %v4719_v31 = vand.u32 2147483647, %v4498_v39  ;;  %vm4715_vm4 = vweird.f32 %v4498_v39 }
 0xe2d   :  { %v4722_v46 = vor.u32 1.1754944e-38, %v4721_v4  ;;  %vm4720_vm5 = vcmp.eq.f32.partialorder %v4719_v31, 8.507059e+37 }
 0xe31   :  { %v5718_v42 = vpop.eup %5717 }
 0xe32   :  { %v4711_v62 = vmul.f32 %v5718_v42, %v4498_v39  ;;  %vm4716_vm3 = vweird.f32 %v5718_v42 }
 0xe33   :  { %vm4717_vm1 = vmor %vm4715_vm4, %vm4716_vm3 }
 0xe34   :  { %v4712_v2 = vsub.f32 1.0, %v4711_v62 }
 0xe36   :  { %v4713_v12 = vmul.f32 %v5718_v42, %v4712_v2 }
 0xe38   :  { %v4714_v30 = vadd.f32 %v5718_v42, %v4713_v12 }
 0xe3a   :  { %v4718_v40 = vsel %vm4717_vm1, %v5718_v42, %v4714_v30 }
 0xe3b   :  { %v4723_v53 = vsel %vm4720_vm5, %v4722_v46, %v4718_v40 }
 0xe3c   :  { %4754 = vst.msk [vmem:[%s8701_s23 + $0x70] sm:$0xff] %vm114_vm0, %v4723_v53 }
 0xe3d   :  { %v4433_v38 = vpop.f32.mrf.mxu1 }
 0xe3e   :  { %v4434_v32 = vadd.f32 %v8589_v50, %v4433_v38 }
 0xe40   :  { %v5230_v47 = vmul.f32 -1.442695, %v4434_v32 }
 0xe42   :  { %5719 = vpow2.f32 %v5230_v47 }
 0xe48   :  { %v5720_v48 = vpop.eup %5719 }
 0xe49   :  { %v4499_v19 = vadd.f32 1.0, %v5720_v48 }
 0xe4b   :  { %5721 = vrcp.f32 %v4499_v19  ;;  %v4736_v35 = vand.u32 2147483648, %v4499_v19  ;;  %v4734_v27 = vand.u32 2147483647, %v4499_v19  ;;  %vm4730_vm8 = vweird.f32 %v4499_v19 }
 0xe4d   :  { %v4737_v15 = vor.u32 1.1754944e-38, %v4736_v35  ;;  %vm4735_vm2 = vcmp.eq.f32.partialorder %v4734_v27, 8.507059e+37 }
 0xe51   :  { %v5722_v45 = vpop.eup %5721 }
 0xe52   :  { %v4726_v28 = vmul.f32 %v5722_v45, %v4499_v19  ;;  %vm4731_vm6 = vweird.f32 %v5722_v45 }
 0xe53   :  { %vm4732_vm7 = vmor %vm4730_vm8, %vm4731_vm6 }
 0xe54   :  { %v4727_v22 = vsub.f32 1.0, %v4726_v28 }
 0xe56   :  { %v4728_v6 = vmul.f32 %v5722_v45, %v4727_v22 }
 0xe58   :  { %v4729_v10 = vadd.f32 %v5722_v45, %v4728_v6 }
 0xe5a   :  { %v4733_v26 = vsel %vm4732_vm7, %v5722_v45, %v4729_v10 }
 0xe5b   :  { %v4738_v61 = vsel %vm4735_vm2, %v4737_v15, %v4733_v26 }
 0xe5c   :  { %4755 = vst.msk [vmem:[%s8701_s23 + $0x78] sm:$0xff] %vm114_vm0, %v4738_v61 }

</bundles_post_ra>
